<compile_context>
chip_gen: v6e
topology: v6e:2x2x1
jax: 0.10.0
libtpu: 0.0.40
codegen_flags: <defaults>
</compile_context>

<pallas_src>
import functools

import jax
import jax.numpy as jnp
from jax.experimental import pallas as pl
from jax.experimental.pallas import tpu as pltpu


# ----------------------------------------------------------------------------
# Chip detection / VMEM budgets
# ----------------------------------------------------------------------------
def _round_up(x, m):
    return ((x + m - 1) // m) * m


@functools.lru_cache(maxsize=1)
def _chip_info():
    """Returns (is_v7x, tile VMEM budget bytes, vmem_limit_bytes for CompilerParams)."""
    kind = ""
    try:
        kind = jax.devices()[0].device_kind.lower()
    except Exception:
        pass
    is_v7 = ("v7" in kind) or ("tpu7" in kind)
    if is_v7:                                   # 64 MiB physical VMEM, 2 TensorCores
        return True, 36 << 20, 48 << 20
    return False, 48 << 20, 64 << 20            # v5e / v6e: 128 MiB physical, 1 TC


# ----------------------------------------------------------------------------
# Pallas kernel 1: fused matmul (patches/pixels @ weight) + bias + LeakyReLU
#   single-K-step variant (no scratch) and multi-K-step variant (f32 accumulator).
# ----------------------------------------------------------------------------
def _matmul_kernel_single(p_ref, w_ref, b_ref, o_ref, *, leaky):
    y = jnp.dot(p_ref[...], w_ref[...], preferred_element_type=jnp.float32) + b_ref[...]
    if leaky:
        y = jnp.where(y > 0, y, 0.1 * y)
    o_ref[...] = y.astype(o_ref.dtype)


def _matmul_kernel_multi(p_ref, w_ref, b_ref, o_ref, acc_ref, *, leaky):
    @pl.when(pl.program_id(2) == 0)
    def _init():                                 # accumulator starts at the bias
        acc_ref[...] = jnp.broadcast_to(b_ref[...], acc_ref.shape)

    acc_ref[...] += jnp.dot(p_ref[...], w_ref[...], preferred_element_type=jnp.float32)

    @pl.when(pl.program_id(2) == pl.num_programs(2) - 1)
    def _fin():
        y = acc_ref[...]
        if leaky:
            y = jnp.where(y > 0, y, 0.1 * y)
        o_ref[...] = y.astype(o_ref.dtype)


def _matmul_tiles(M, Kp, Np, out_bytes):
    """Pick (TM, TN, TK). Kp/Np are always multiples of 128 by construction."""
    is_v7, budget, _ = _chip_info()
    w_bytes = Kp * Np * 2
    if 2 * w_bytes <= budget // 2:
        TK, TN = Kp, Np                          # weight-stationary: wm DMA'd once
        w_foot = 2 * w_bytes
    else:
        TN = 512 if Np % 512 == 0 else (256 if Np % 256 == 0 else 128)
        TK = next(c for c in (1024, 512, 384, 256, 128) if Kp % c == 0)
        w_foot = 2 * TK * TN * 2
    # per-M-row VMEM: pm double-buffer + f32 acc + out double-buffer
    per_row = 2 * TK * 2 + TN * 4 + 2 * TN * out_bytes
    max_tm = max(8, min(512, ((budget - w_foot) // per_row) // 8 * 8))
    TM = min(max_tm, _round_up(M, 8))
    # v7x only: make sure at least one "parallel" axis has >=2 iterations (2 TCs).
    if is_v7 and TM >= 16 and Np // TN < 2 and _round_up(M, TM) // TM < 2:
        TM = _round_up(TM // 2, 8)
    return TM, TN, TK


def fused_matmul(pm, wm, bm, leaky, out_dtype):
    """pm (M,Kp) bf16 @ wm (Kp,Np) bf16 + bm (1,Np) f32; optional LeakyReLU."""
    M, Kp = pm.shape
    Np = wm.shape[1]
    out_bytes = jnp.dtype(out_dtype).itemsize
    TM, TN, TK = _matmul_tiles(M, Kp, Np, out_bytes)
    Mp = _round_up(M, TM)
    if Mp != M:
        pm = jnp.pad(pm, ((0, Mp - M), (0, 0)))
    _, _, vmem_limit = _chip_info()

    flops = 2 * Mp * Kp * Np
    bytes_accessed = Mp * Kp * 2 + Kp * Np * 2 + Mp * Np * out_bytes + Np * 4
    cost = pl.CostEstimate(flops=flops, transcendentals=0,
                           bytes_accessed=bytes_accessed)

    if Kp // TK == 1:
        # Single reduction step: no scratch, bias + activation fused on the dot.
        return pl.pallas_call(
            functools.partial(_matmul_kernel_single, leaky=leaky),
            out_shape=jax.ShapeDtypeStruct((Mp, Np), out_dtype),
            grid=(Mp // TM, Np // TN),
            in_specs=[
                pl.BlockSpec((TM, TK), lambda i, j: (i, 0)),
                pl.BlockSpec((TK, TN), lambda i, j: (0, j)),
                pl.BlockSpec((1, TN), lambda i, j: (0, j)),
            ],
            out_specs=pl.BlockSpec((TM, TN), lambda i, j: (i, j)),
            compiler_params=pltpu.CompilerParams(
                dimension_semantics=("parallel", "parallel"),
                vmem_limit_bytes=vmem_limit),
            cost_estimate=cost,
        )(pm, wm, bm)

    return pl.pallas_call(
        functools.partial(_matmul_kernel_multi, leaky=leaky),
        out_shape=jax.ShapeDtypeStruct((Mp, Np), out_dtype),
        grid=(Mp // TM, Np // TN, Kp // TK),
        in_specs=[
            pl.BlockSpec((TM, TK), lambda i, j, k: (i, k)),
            pl.BlockSpec((TK, TN), lambda i, j, k: (k, j)),
            pl.BlockSpec((1, TN), lambda i, j, k: (0, j)),
        ],
        out_specs=pl.BlockSpec((TM, TN), lambda i, j, k: (i, j)),
        scratch_shapes=[pltpu.VMEM((TM, TN), jnp.float32)],
        compiler_params=pltpu.CompilerParams(
            dimension_semantics=("parallel", "parallel", "arbitrary"),
            vmem_limit_bytes=vmem_limit),
        cost_estimate=cost,
    )(pm, wm, bm)


# ----------------------------------------------------------------------------
# Pallas kernel 2: direct k x k stride-1 conv (no im2col in HBM).
#   grid = (N, Cout tiles, Cin tiles); taps applied to shifted VMEM windows.
# ----------------------------------------------------------------------------
def _direct_conv_kernel(x_ref, w_ref, b_ref, o_ref, *scratch, ksz, Ho, Wo, leaky):
    tci = x_ref.shape[-1]
    tco = o_ref.shape[-1]
    partial = jnp.zeros((Ho * Wo, tco), jnp.float32)
    for di in range(ksz):                 # k*k taps fully unrolled: each tap is a
        for dj in range(ksz):             # shifted window of the VMEM-resident tile
            win = x_ref[0, di:di + Ho, dj:dj + Wo, :].reshape(Ho * Wo, tci)
            partial += jnp.dot(win, w_ref[di * ksz + dj],
                               preferred_element_type=jnp.float32)

    if scratch:                           # >1 Cin tile: accumulate across grid axis 2
        acc_ref = scratch[0]

        @pl.when(pl.program_id(2) == 0)
        def _init():
            acc_ref[...] = jnp.broadcast_to(b_ref[...], acc_ref.shape)

        acc_ref[...] += partial

        @pl.when(pl.program_id(2) == pl.num_programs(2) - 1)
        def _fin():
            y = acc_ref[...]
            if leaky:
                y = jnp.where(y > 0, y, 0.1 * y)
            o_ref[...] = y.reshape(o_ref.shape).astype(o_ref.dtype)
    else:                                 # single Cin tile: bias + act fused, no scratch
        y = partial + b_ref[...]
        if leaky:
            y = jnp.where(y > 0, y, 0.1 * y)
        o_ref[...] = y.reshape(o_ref.shape).astype(o_ref.dtype)


def direct_conv(xp, wm, bm, cfg, out_dtype):
    """xp: (N,Hp,Wp,Cin_pad) bf16 spatially+channel padded; wm: (k*k,Cin_pad,Cout_pad)
    bf16; bm: (1,Cout_pad) f32.  Stride-1 conv, returns (N,Ho,Wo,Cout_pad)."""
    N, Hp, Wp, Cp_in = xp.shape
    ksz = cfg["size"]
    Ho, Wo = Hp - ksz + 1, Wp - ksz + 1
    kk, _, Cp_out = wm.shape
    out_bytes = jnp.dtype(out_dtype).itemsize
    _, budget, vmem_limit = _chip_info()

    TCI, TCO = 128, 128
    if Cp_in % 256 == 0 and 2 * Hp * Wp * 256 * 2 <= budget // 3:
        TCI = 256
    if Cp_out % 256 == 0 and Ho * Wo * 256 * (4 + 2 * out_bytes) <= budget // 3:
        TCO = 256
    n_ci, n_co = Cp_in // TCI, Cp_out // TCO

    flops = 2 * N * Ho * Wo * kk * Cp_in * Cp_out
    bytes_accessed = (N * Hp * Wp * Cp_in * 2 * n_co + kk * Cp_in * Cp_out * 2
                      + N * Ho * Wo * Cp_out * out_bytes)
    cost = pl.CostEstimate(flops=flops, transcendentals=0,
                           bytes_accessed=bytes_accessed)

    scratch = [pltpu.VMEM((Ho * Wo, TCO), jnp.float32)] if n_ci > 1 else []
    return pl.pallas_call(
        functools.partial(_direct_conv_kernel, ksz=ksz, Ho=Ho, Wo=Wo,
                          leaky=cfg["leaky"]),
        out_shape=jax.ShapeDtypeStruct((N, Ho, Wo, Cp_out), out_dtype),
        grid=(N, n_co, n_ci),
        in_specs=[
            pl.BlockSpec((1, Hp, Wp, TCI), lambda n, co, ci: (n, 0, 0, ci)),
            pl.BlockSpec((kk, TCI, TCO), lambda n, co, ci: (0, ci, co)),
            pl.BlockSpec((1, TCO), lambda n, co, ci: (0, co)),
        ],
        out_specs=pl.BlockSpec((1, Ho, Wo, TCO), lambda n, co, ci: (n, 0, 0, co)),
        scratch_shapes=scratch,
        compiler_params=pltpu.CompilerParams(
            dimension_semantics=("parallel", "parallel", "arbitrary"),
            vmem_limit_bytes=vmem_limit),
        cost_estimate=cost,
    )(xp, wm, bm)


# ----------------------------------------------------------------------------
# Conv dispatch (all paths end in a Pallas kernel)
# ----------------------------------------------------------------------------
def conv2d_nhwc(x, wm, bm, cfg):
    """x: (N,H,W,Cin_pad) channel-padded NHWC.  Returns channel-padded output in
    cfg['out_dtype'] (bf16 between convs, f32 for yolo-head convs)."""
    ksz, stride, pad = cfg["size"], cfg["stride"], cfg["pad"]
    out_dtype = cfg["out_dtype"]
    Cp_out = cfg["Cout_pad"]
    x = x.astype(jnp.bfloat16)
    N = x.shape[0]

    if ksz == 1:
        if stride > 1:
            x = x[:, ::stride, ::stride, :]
        _, H, W, Cp = x.shape
        pm = x.reshape(N * H * W, Cp)            # no im2col for 1x1
        out = fused_matmul(pm, wm.reshape(Cp, Cp_out), bm, cfg["leaky"], out_dtype)
        return out[:N * H * W].reshape(N, H, W, Cp_out)

    xp = jnp.pad(x, ((0, 0), (pad, pad), (pad, pad), (0, 0))) if pad else x
    _, Hp, Wp, Cp = xp.shape
    Ho = (Hp - ksz) // stride + 1
    Wo = (Wp - ksz) // stride + 1

    if stride == 1:
        return direct_conv(xp, wm, bm, cfg, out_dtype)

    # TODO(synk): strided k>1 convs still materialize an im2col patch matrix in HBM.
    cols = []
    for i in range(ksz):
        for j in range(ksz):
            cols.append(xp[:, i: i + stride * (Ho - 1) + 1: stride,
                              j: j + stride * (Wo - 1) + 1: stride, :])
    pm = jnp.concatenate(cols, axis=-1).reshape(N * Ho * Wo, ksz * ksz * Cp)
    out = fused_matmul(pm, wm.reshape(ksz * ksz * Cp, Cp_out), bm,
                       cfg["leaky"], out_dtype)
    return out[:N * Ho * Wo].reshape(N, Ho, Wo, Cp_out)


# ----------------------------------------------------------------------------
# Glue ops (plain JAX, fused under jit)
# ----------------------------------------------------------------------------
def upsample_bilinear_align_corners(x, scale):
    """NHWC bilinear upsample, align_corners=True (matches nn.Upsample in the cfg)."""
    N, H, W, C = x.shape
    Ho, Wo = H * scale, W * scale

    def src(out_size, in_size):
        if out_size == 1:
            return jnp.zeros((1,), jnp.float32)
        return jnp.arange(out_size, dtype=jnp.float32) * ((in_size - 1) / (out_size - 1))

    ys, xs = src(Ho, H), src(Wo, W)
    y0 = jnp.floor(ys).astype(jnp.int32)
    x0 = jnp.floor(xs).astype(jnp.int32)
    y1 = jnp.clip(y0 + 1, 0, H - 1)
    x1 = jnp.clip(x0 + 1, 0, W - 1)
    wy = (ys - y0.astype(jnp.float32))[None, :, None, None]
    wx = (xs - x0.astype(jnp.float32))[None, None, :, None]

    r0 = x[:, y0]
    r1 = x[:, y1]
    top = r0[:, :, x0] * (1 - wx) + r0[:, :, x1] * wx
    bot = r1[:, :, x0] * (1 - wx) + r1[:, :, x1] * wx
    return top * (1 - wy) + bot * wy


def predict_transform(pred_nchw, inp_dim, anchors, num_classes):
    """Canonical YOLOv3 detection decode (operates on NCHW prediction)."""
    B, C, G, _ = pred_nchw.shape
    stride = inp_dim // G
    na = len(anchors)
    bbox = 5 + num_classes

    p = pred_nchw.reshape(B, bbox * na, G * G)
    p = jnp.transpose(p, (0, 2, 1)).reshape(B, G * G * na, bbox)

    anchors_s = jnp.array([(a[0] / stride, a[1] / stride) for a in anchors], jnp.float32)

    xy = jax.nn.sigmoid(p[:, :, 0:2])
    obj = jax.nn.sigmoid(p[:, :, 4:5])
    cls = jax.nn.sigmoid(p[:, :, 5:])

    gr = jnp.arange(G, dtype=jnp.float32)
    a_off, b_off = jnp.meshgrid(gr, gr)                       # 'xy' indexing, as torch
    xy_off = jnp.concatenate([a_off.reshape(-1, 1), b_off.reshape(-1, 1)], axis=1)
    xy_off = jnp.tile(xy_off, (1, na)).reshape(-1, 2)[None]   # (1, G*G*na, 2)
    xy = xy + xy_off

    anc = jnp.tile(anchors_s, (G * G, 1))[None]               # (1, G*G*na, 2)
    wh = jnp.exp(p[:, :, 2:4]) * anc

    box = jnp.concatenate([xy, wh], axis=-1) * float(stride)
    return jnp.concatenate([box, obj, cls], axis=-1)


# ----------------------------------------------------------------------------
# Synthetic Darknet cfg (same dict format parse_cfg would emit)
# ----------------------------------------------------------------------------
def make_blocks():
    return [
        {"type": "net", "height": "16", "width": "16", "channels": "3"},
        {"type": "convolutional", "batch_normalize": "1", "filters": "8",
         "size": "3", "stride": "1", "pad": "1", "activation": "leaky"},
        {"type": "convolutional", "batch_normalize": "1", "filters": "16",
         "size": "3", "stride": "2", "pad": "1", "activation": "leaky"},
        {"type": "convolutional", "batch_normalize": "1", "filters": "16",
         "size": "1", "stride": "1", "pad": "1", "activation": "leaky"},
        {"type": "shortcut", "from": "-2", "activation": "linear"},
        {"type": "convolutional", "batch_normalize": "1", "filters": "32",
         "size": "3", "stride": "2", "pad": "1", "activation": "leaky"},
        {"type": "convolutional", "filters": "27",
         "size": "1", "stride": "1", "pad": "1", "activation": "linear"},
        {"type": "yolo", "mask": "3,4,5",
         "anchors": "10,13,16,30,33,23,30,61,62,45,59,119", "classes": "4"},
        {"type": "route", "layers": "-3"},
        {"type": "convolutional", "batch_normalize": "1", "filters": "16",
         "size": "1", "stride": "1", "pad": "1", "activation": "leaky"},
        {"type": "upsample", "stride": "2"},
        {"type": "route", "layers": "-1,-7"},
        {"type": "convolutional", "filters": "27",
         "size": "1", "stride": "1", "pad": "1", "activation": "linear"},
        {"type": "yolo", "mask": "0,1,2",
         "anchors": "10,13,16,30,33,23,30,61,62,45,59,119", "classes": "4"},
    ]


class DarknetPallas:
    def __init__(self, blocks, key):
        self.blocks = blocks
        self.net_info = blocks[0]
        self.layer_cfgs = []      # static per-layer config (python values only)
        self.params = []          # pytree of arrays passed to the jitted forward
        prev_filters = int(self.net_info["channels"])
        output_filters = []
        body = blocks[1:]

        for index, x in enumerate(body):
            t = x["type"]
            cfg = {"type": t}
            param = {}
            filters = prev_filters
            if t == "convolutional":
                bn = int(x.get("batch_normalize", 0))
                filters = int(x["filters"])
                ksz = int(x["size"])
                padding = int(x["pad"])
                stride = int(x["stride"])
                pad = (ksz - 1) // 2 if padding else 0

                key, kw_, kb_, kg_, kbe_, km_, kv_ = jax.random.split(key, 7)
                w = 0.1 * jax.random.normal(kw_, (filters, prev_filters, ksz, ksz),
                                            jnp.float32)
                if bn:
                    # Fold BatchNorm (inference) into the conv weights/bias.
                    gamma = 1.0 + 0.1 * jax.random.normal(kg_, (filters,), jnp.float32)
                    beta = 0.1 * jax.random.normal(kbe_, (filters,), jnp.float32)
                    mean = 0.1 * jax.random.normal(km_, (filters,), jnp.float32)
                    var = 0.5 + 0.1 * jnp.abs(jax.random.normal(kv_, (filters,), jnp.float32))
                    scale = gamma / jnp.sqrt(var + 1e-5)
                    w = w * scale[:, None, None, None]
                    b = beta - mean * scale
                else:
                    b = 0.1 * jax.random.normal(kb_, (filters,), jnp.float32)

                # Hoisted weight transform (done once): (Cout,Cin,kh,kw) ->
                # (kh*kw, Cin_pad, Cout_pad) bf16 — shared by the direct-conv tap
                # indexing and the im2col matmul after a flat reshape.
                Cin_pad = _round_up(prev_filters, 128)
                Cout_pad = _round_up(filters, 128)
                wm = jnp.transpose(w, (2, 3, 1, 0)).reshape(ksz * ksz, prev_filters, filters)
                wm = jnp.pad(wm, ((0, 0), (0, Cin_pad - prev_filters),
                                  (0, Cout_pad - filters))).astype(jnp.bfloat16)
                bm = jnp.pad(b, (0, Cout_pad - filters)).reshape(1, Cout_pad).astype(jnp.float32)

                # bf16 activations between convs; f32 only when the consumer is a yolo head.
                next_is_yolo = index + 1 < len(body) and body[index + 1]["type"] == "yolo"
                cfg.update(size=ksz, stride=stride, pad=pad, filters=filters,
                           Cin_pad=Cin_pad, Cout_pad=Cout_pad,
                           leaky=(x["activation"] == "leaky"),
                           out_dtype=jnp.float32 if next_is_yolo else jnp.bfloat16)
                param = {"wm": wm, "bm": bm}
            elif t == "upsample":
                cfg["stride"] = int(x["stride"])
            elif t == "route":
                ls = [int(i) for i in x["layers"].split(",")]
                ls = [l if l > 0 else l + index for l in ls]
                cfg["layers"] = ls
                filters = sum(output_filters[l] for l in ls)
            elif t == "shortcut":
                f = int(x["from"])
                cfg["from"] = f if f > 0 else f + index
            elif t == "yolo":
                mask = [int(i) for i in x["mask"].split(",")]
                anc = [int(i) for i in x["anchors"].split(",")]
                anc = [(anc[i], anc[i + 1]) for i in range(0, len(anc), 2)]
                cfg["anchors"] = [anc[m] for m in mask]
                cfg["classes"] = int(x["classes"])

            cfg["out_ch"] = filters        # real (unpadded) channel count of outputs[index]
            self.layer_cfgs.append(cfg)
            self.params.append(param)
            prev_filters = filters
            output_filters.append(filters)

        # Trace/compile the whole forward once; weights are a pytree argument.
        self._forward_jit = jax.jit(self._forward)

    def _forward(self, params, x_nchw):
        # NCHW at the boundary; channel-padded (to 128) bf16 NHWC internally.
        x = jnp.transpose(x_nchw, (0, 2, 3, 1)).astype(jnp.bfloat16)
        cin0 = int(self.net_info["channels"])
        cp0 = _round_up(cin0, 128)
        if cp0 != cin0:
            x = jnp.pad(x, ((0, 0), (0, 0), (0, 0), (0, cp0 - cin0)))

        outputs = {}
        detections = None
        for index, (cfg, p) in enumerate(zip(self.layer_cfgs, params)):
            t = cfg["type"]
            if t == "convolutional":
                x = conv2d_nhwc(x, p["wm"], p["bm"], cfg)
            elif t == "upsample":
                x = upsample_bilinear_align_corners(x, cfg["stride"])
            elif t == "route":
                ls = cfg["layers"]
                if len(ls) == 1:
                    x = outputs[ls[0]]
                else:
                    # concat real channels only, then re-pad to a 128 lane multiple
                    c1 = self.layer_cfgs[ls[0]]["out_ch"]
                    c2 = self.layer_cfgs[ls[1]]["out_ch"]
                    m1 = outputs[ls[0]][..., :c1].astype(jnp.bfloat16)
                    m2 = outputs[ls[1]][..., :c2].astype(jnp.bfloat16)
                    x = jnp.concatenate([m1, m2], axis=-1)
                    cp = _round_up(c1 + c2, 128)
                    if cp != c1 + c2:
                        x = jnp.pad(x, ((0, 0), (0, 0), (0, 0), (0, cp - (c1 + c2))))
            elif t == "shortcut":
                x = outputs[index - 1] + outputs[cfg["from"]]
            elif t == "yolo":
                inp_dim = int(self.net_info["height"])
                nreal = len(cfg["anchors"]) * (5 + cfg["classes"])
                pred = jnp.transpose(x[..., :nreal].astype(jnp.float32), (0, 3, 1, 2))
                d = predict_transform(pred, inp_dim, cfg["anchors"], cfg["classes"])
                detections = d if detections is None else jnp.concatenate(
                    [detections, d], axis=1)
                x = d
            outputs[index] = x
        return detections

    def forward(self, x_nchw):
        return self._forward_jit(self.params, x_nchw)


if __name__ == "__main__":
    key = jax.random.PRNGKey(0)
    key, k_in = jax.random.split(key)

    model = DarknetPallas(make_blocks(), key)
    x = jax.random.normal(k_in, (2, 3, 16, 16), jnp.float32)  # NCHW, matches net cfg

    det = model.forward(x)
    det = jax.block_until_ready(det)

    # expected: 2 yolo heads -> (2, 4*4*3 + 8*8*3, 5 + 4) = (2, 240, 9)
    assert det.shape == (2, 240, 9), det.shape
    assert bool(jnp.all(jnp.isfinite(det)))
    print("KERNEL_OK")
</pallas_src>

<mosaic_0001>
module attributes {stable_mosaic.version = 11 : i64} {
  func.func @_direct_conv_kernel(%arg0: i32, %arg1: i32, %arg2: i32, %arg3: memref<1x18x18x128xbf16, #tpu.memory_space<vmem>>, %arg4: memref<9x128x128xbf16, #tpu.memory_space<vmem>>, %arg5: memref<1x128xf32, #tpu.memory_space<vmem>>, %arg6: memref<1x16x16x128xbf16, #tpu.memory_space<vmem>>) attributes {dimension_semantics = [#tpu.dimension_semantics<parallel>, #tpu.dimension_semantics<parallel>, #tpu.dimension_semantics<arbitrary>], iteration_bounds = array<i64: 2, 1, 1>, scalar_prefetch = 0 : i64, scratch_operands = 0 : i64, tpu.core_type = #tpu.core_type<tc>, window_params = [{transform_indices = @transform_0, window_bounds = array<i64: 1, 18, 18, 128>}, {transform_indices = @transform_1, window_bounds = array<i64: 9, 128, 128>}, {transform_indices = @transform_2, window_bounds = array<i64: 1, 128>}, {transform_indices = @transform_3, window_bounds = array<i64: 1, 16, 16, 128>}]} {
    %cst = arith.constant 0.000000e+00 : f32
    %0 = vector.broadcast %cst : f32 to vector<256x128xf32>
    %c0 = arith.constant 0 : index
    %c0_0 = arith.constant 0 : index
    %c0_1 = arith.constant 0 : index
    %c0_2 = arith.constant 0 : index
    %1 = vector.load %arg3[%c0, %c0_0, %c0_1, %c0_2] : memref<1x18x18x128xbf16, #tpu.memory_space<vmem>>, vector<1x16x16x128xbf16>
    %2 = vector.shape_cast %1 : vector<1x16x16x128xbf16> to vector<16x16x128xbf16>
    %3 = vector.shape_cast %2 : vector<16x16x128xbf16> to vector<256x128xbf16>
    %c0_3 = arith.constant 0 : index
    %c0_4 = arith.constant 0 : index
    %c0_5 = arith.constant 0 : index
    %4 = vector.load %arg4[%c0_3, %c0_4, %c0_5] : memref<9x128x128xbf16, #tpu.memory_space<vmem>>, vector<1x128x128xbf16>
    %5 = vector.shape_cast %4 : vector<1x128x128xbf16> to vector<128x128xbf16>
    %cst_6 = arith.constant dense<0.000000e+00> : vector<256x128xf32>
    %6 = tpu.matmul %3, %5, %cst_6 {dimension_numbers = #tpu.dot_dimension_numbers<[1], [0], [0], [1], [0, 0, 1, 1], [], []>} : vector<256x128xbf16>, vector<128x128xbf16>, vector<256x128xf32> -> vector<256x128xf32>
    %7 = arith.addf %0, %6 : vector<256x128xf32>
    %c0_7 = arith.constant 0 : index
    %c0_8 = arith.constant 0 : index
    %c1 = arith.constant 1 : index
    %c0_9 = arith.constant 0 : index
    %8 = vector.load %arg3[%c0_7, %c0_8, %c1, %c0_9] : memref<1x18x18x128xbf16, #tpu.memory_space<vmem>>, vector<1x16x16x128xbf16>
    %9 = vector.shape_cast %8 : vector<1x16x16x128xbf16> to vector<16x16x128xbf16>
    %10 = vector.shape_cast %9 : vector<16x16x128xbf16> to vector<256x128xbf16>
    %c1_10 = arith.constant 1 : index
    %c0_11 = arith.constant 0 : index
    %c0_12 = arith.constant 0 : index
    %11 = vector.load %arg4[%c1_10, %c0_11, %c0_12] : memref<9x128x128xbf16, #tpu.memory_space<vmem>>, vector<1x128x128xbf16>
    %12 = vector.shape_cast %11 : vector<1x128x128xbf16> to vector<128x128xbf16>
    %cst_13 = arith.constant dense<0.000000e+00> : vector<256x128xf32>
    %13 = tpu.matmul %10, %12, %cst_13 {dimension_numbers = #tpu.dot_dimension_numbers<[1], [0], [0], [1], [0, 0, 1, 1], [], []>} : vector<256x128xbf16>, vector<128x128xbf16>, vector<256x128xf32> -> vector<256x128xf32>
    %14 = arith.addf %7, %13 : vector<256x128xf32>
    %c0_14 = arith.constant 0 : index
    %c0_15 = arith.constant 0 : index
    %c2 = arith.constant 2 : index
    %c0_16 = arith.constant 0 : index
    %15 = vector.load %arg3[%c0_14, %c0_15, %c2, %c0_16] : memref<1x18x18x128xbf16, #tpu.memory_space<vmem>>, vector<1x16x16x128xbf16>
    %16 = vector.shape_cast %15 : vector<1x16x16x128xbf16> to vector<16x16x128xbf16>
    %17 = vector.shape_cast %16 : vector<16x16x128xbf16> to vector<256x128xbf16>
    %c2_17 = arith.constant 2 : index
    %c0_18 = arith.constant 0 : index
    %c0_19 = arith.constant 0 : index
    %18 = vector.load %arg4[%c2_17, %c0_18, %c0_19] : memref<9x128x128xbf16, #tpu.memory_space<vmem>>, vector<1x128x128xbf16>
    %19 = vector.shape_cast %18 : vector<1x128x128xbf16> to vector<128x128xbf16>
    %cst_20 = arith.constant dense<0.000000e+00> : vector<256x128xf32>
    %20 = tpu.matmul %17, %19, %cst_20 {dimension_numbers = #tpu.dot_dimension_numbers<[1], [0], [0], [1], [0, 0, 1, 1], [], []>} : vector<256x128xbf16>, vector<128x128xbf16>, vector<256x128xf32> -> vector<256x128xf32>
    %21 = arith.addf %14, %20 : vector<256x128xf32>
    %c0_21 = arith.constant 0 : index
    %c1_22 = arith.constant 1 : index
    %c0_23 = arith.constant 0 : index
    %c0_24 = arith.constant 0 : index
    %22 = vector.load %arg3[%c0_21, %c1_22, %c0_23, %c0_24] : memref<1x18x18x128xbf16, #tpu.memory_space<vmem>>, vector<1x16x16x128xbf16>
    %23 = vector.shape_cast %22 : vector<1x16x16x128xbf16> to vector<16x16x128xbf16>
    %24 = vector.shape_cast %23 : vector<16x16x128xbf16> to vector<256x128xbf16>
    %c3 = arith.constant 3 : index
    %c0_25 = arith.constant 0 : index
    %c0_26 = arith.constant 0 : index
    %25 = vector.load %arg4[%c3, %c0_25, %c0_26] : memref<9x128x128xbf16, #tpu.memory_space<vmem>>, vector<1x128x128xbf16>
    %26 = vector.shape_cast %25 : vector<1x128x128xbf16> to vector<128x128xbf16>
    %cst_27 = arith.constant dense<0.000000e+00> : vector<256x128xf32>
    %27 = tpu.matmul %24, %26, %cst_27 {dimension_numbers = #tpu.dot_dimension_numbers<[1], [0], [0], [1], [0, 0, 1, 1], [], []>} : vector<256x128xbf16>, vector<128x128xbf16>, vector<256x128xf32> -> vector<256x128xf32>
    %28 = arith.addf %21, %27 : vector<256x128xf32>
    %c0_28 = arith.constant 0 : index
    %c1_29 = arith.constant 1 : index
    %c1_30 = arith.constant 1 : index
    %c0_31 = arith.constant 0 : index
    %29 = vector.load %arg3[%c0_28, %c1_29, %c1_30, %c0_31] : memref<1x18x18x128xbf16, #tpu.memory_space<vmem>>, vector<1x16x16x128xbf16>
    %30 = vector.shape_cast %29 : vector<1x16x16x128xbf16> to vector<16x16x128xbf16>
    %31 = vector.shape_cast %30 : vector<16x16x128xbf16> to vector<256x128xbf16>
    %c4 = arith.constant 4 : index
    %c0_32 = arith.constant 0 : index
    %c0_33 = arith.constant 0 : index
    %32 = vector.load %arg4[%c4, %c0_32, %c0_33] : memref<9x128x128xbf16, #tpu.memory_space<vmem>>, vector<1x128x128xbf16>
    %33 = vector.shape_cast %32 : vector<1x128x128xbf16> to vector<128x128xbf16>
    %cst_34 = arith.constant dense<0.000000e+00> : vector<256x128xf32>
    %34 = tpu.matmul %31, %33, %cst_34 {dimension_numbers = #tpu.dot_dimension_numbers<[1], [0], [0], [1], [0, 0, 1, 1], [], []>} : vector<256x128xbf16>, vector<128x128xbf16>, vector<256x128xf32> -> vector<256x128xf32>
    %35 = arith.addf %28, %34 : vector<256x128xf32>
    %c0_35 = arith.constant 0 : index
    %c1_36 = arith.constant 1 : index
    %c2_37 = arith.constant 2 : index
    %c0_38 = arith.constant 0 : index
    %36 = vector.load %arg3[%c0_35, %c1_36, %c2_37, %c0_38] : memref<1x18x18x128xbf16, #tpu.memory_space<vmem>>, vector<1x16x16x128xbf16>
    %37 = vector.shape_cast %36 : vector<1x16x16x128xbf16> to vector<16x16x128xbf16>
    %38 = vector.shape_cast %37 : vector<16x16x128xbf16> to vector<256x128xbf16>
    %c5 = arith.constant 5 : index
    %c0_39 = arith.constant 0 : index
    %c0_40 = arith.constant 0 : index
    %39 = vector.load %arg4[%c5, %c0_39, %c0_40] : memref<9x128x128xbf16, #tpu.memory_space<vmem>>, vector<1x128x128xbf16>
    %40 = vector.shape_cast %39 : vector<1x128x128xbf16> to vector<128x128xbf16>
    %cst_41 = arith.constant dense<0.000000e+00> : vector<256x128xf32>
    %41 = tpu.matmul %38, %40, %cst_41 {dimension_numbers = #tpu.dot_dimension_numbers<[1], [0], [0], [1], [0, 0, 1, 1], [], []>} : vector<256x128xbf16>, vector<128x128xbf16>, vector<256x128xf32> -> vector<256x128xf32>
    %42 = arith.addf %35, %41 : vector<256x128xf32>
    %c0_42 = arith.constant 0 : index
    %c2_43 = arith.constant 2 : index
    %c0_44 = arith.constant 0 : index
    %c0_45 = arith.constant 0 : index
    %43 = vector.load %arg3[%c0_42, %c2_43, %c0_44, %c0_45] : memref<1x18x18x128xbf16, #tpu.memory_space<vmem>>, vector<1x16x16x128xbf16>
    %44 = vector.shape_cast %43 : vector<1x16x16x128xbf16> to vector<16x16x128xbf16>
    %45 = vector.shape_cast %44 : vector<16x16x128xbf16> to vector<256x128xbf16>
    %c6 = arith.constant 6 : index
    %c0_46 = arith.constant 0 : index
    %c0_47 = arith.constant 0 : index
    %46 = vector.load %arg4[%c6, %c0_46, %c0_47] : memref<9x128x128xbf16, #tpu.memory_space<vmem>>, vector<1x128x128xbf16>
    %47 = vector.shape_cast %46 : vector<1x128x128xbf16> to vector<128x128xbf16>
    %cst_48 = arith.constant dense<0.000000e+00> : vector<256x128xf32>
    %48 = tpu.matmul %45, %47, %cst_48 {dimension_numbers = #tpu.dot_dimension_numbers<[1], [0], [0], [1], [0, 0, 1, 1], [], []>} : vector<256x128xbf16>, vector<128x128xbf16>, vector<256x128xf32> -> vector<256x128xf32>
    %49 = arith.addf %42, %48 : vector<256x128xf32>
    %c0_49 = arith.constant 0 : index
    %c2_50 = arith.constant 2 : index
    %c1_51 = arith.constant 1 : index
    %c0_52 = arith.constant 0 : index
    %50 = vector.load %arg3[%c0_49, %c2_50, %c1_51, %c0_52] : memref<1x18x18x128xbf16, #tpu.memory_space<vmem>>, vector<1x16x16x128xbf16>
    %51 = vector.shape_cast %50 : vector<1x16x16x128xbf16> to vector<16x16x128xbf16>
    %52 = vector.shape_cast %51 : vector<16x16x128xbf16> to vector<256x128xbf16>
    %c7 = arith.constant 7 : index
    %c0_53 = arith.constant 0 : index
    %c0_54 = arith.constant 0 : index
    %53 = vector.load %arg4[%c7, %c0_53, %c0_54] : memref<9x128x128xbf16, #tpu.memory_space<vmem>>, vector<1x128x128xbf16>
    %54 = vector.shape_cast %53 : vector<1x128x128xbf16> to vector<128x128xbf16>
    %cst_55 = arith.constant dense<0.000000e+00> : vector<256x128xf32>
    %55 = tpu.matmul %52, %54, %cst_55 {dimension_numbers = #tpu.dot_dimension_numbers<[1], [0], [0], [1], [0, 0, 1, 1], [], []>} : vector<256x128xbf16>, vector<128x128xbf16>, vector<256x128xf32> -> vector<256x128xf32>
    %56 = arith.addf %49, %55 : vector<256x128xf32>
    %c0_56 = arith.constant 0 : index
    %c2_57 = arith.constant 2 : index
    %c2_58 = arith.constant 2 : index
    %c0_59 = arith.constant 0 : index
    %57 = vector.load %arg3[%c0_56, %c2_57, %c2_58, %c0_59] : memref<1x18x18x128xbf16, #tpu.memory_space<vmem>>, vector<1x16x16x128xbf16>
    %58 = vector.shape_cast %57 : vector<1x16x16x128xbf16> to vector<16x16x128xbf16>
    %59 = vector.shape_cast %58 : vector<16x16x128xbf16> to vector<256x128xbf16>
    %c8 = arith.constant 8 : index
    %c0_60 = arith.constant 0 : index
    %c0_61 = arith.constant 0 : index
    %60 = vector.load %arg4[%c8, %c0_60, %c0_61] : memref<9x128x128xbf16, #tpu.memory_space<vmem>>, vector<1x128x128xbf16>
    %61 = vector.shape_cast %60 : vector<1x128x128xbf16> to vector<128x128xbf16>
    %cst_62 = arith.constant dense<0.000000e+00> : vector<256x128xf32>
    %62 = tpu.matmul %59, %61, %cst_62 {dimension_numbers = #tpu.dot_dimension_numbers<[1], [0], [0], [1], [0, 0, 1, 1], [], []>} : vector<256x128xbf16>, vector<128x128xbf16>, vector<256x128xf32> -> vector<256x128xf32>
    %63 = arith.addf %56, %62 : vector<256x128xf32>
    %c0_63 = arith.constant 0 : index
    %c0_64 = arith.constant 0 : index
    %64 = vector.load %arg5[%c0_63, %c0_64] : memref<1x128xf32, #tpu.memory_space<vmem>>, vector<1x128xf32>
    %65 = vector.broadcast %64 : vector<1x128xf32> to vector<256x128xf32>
    %66 = arith.addf %63, %65 : vector<256x128xf32>
    %cst_65 = arith.constant 0.000000e+00 : f32
    %67 = vector.broadcast %cst_65 : f32 to vector<256x128xf32>
    %68 = arith.cmpf ogt, %66, %67 : vector<256x128xf32>
    %cst_66 = arith.constant 1.000000e-01 : f32
    %69 = vector.broadcast %cst_66 : f32 to vector<256x128xf32>
    %70 = arith.mulf %69, %66 : vector<256x128xf32>
    %71 = arith.select %68, %66, %70 : vector<256x128xi1>, vector<256x128xf32>
    %72 = vector.shape_cast %71 : vector<256x128xf32> to vector<1x16x16x128xf32>
    %73 = arith.truncf %72 : vector<1x16x16x128xf32> to vector<1x16x16x128xbf16>
    %c0_67 = arith.constant 0 : index
    %c0_68 = arith.constant 0 : index
    %c0_69 = arith.constant 0 : index
    %c0_70 = arith.constant 0 : index
    %74 = vector.load %arg6[%c0_67, %c0_68, %c0_69, %c0_70] : memref<1x16x16x128xbf16, #tpu.memory_space<vmem>>, vector<1x16x16x128xbf16>
    tpu.vector_store %arg6[%c0_67, %c0_68, %c0_69, %c0_70], %73 {strides = array<i32>} : memref<1x16x16x128xbf16, #tpu.memory_space<vmem>>, vector<1x16x16x128xbf16>,
    return
  }
  func.func @transform_0(%arg0: i32, %arg1: i32, %arg2: i32) -> (i32, i32, i32, i32) {
    %c0_i32 = arith.constant 0 : i32
    %c0_i32_0 = arith.constant 0 : i32
    %c0_i32_1 = arith.constant 0 : i32
    return %arg0, %c0_i32, %c0_i32_0, %arg2 : i32, i32, i32, i32
  }
  func.func @transform_1(%arg0: i32, %arg1: i32, %arg2: i32) -> (i32, i32, i32) {
    %c0_i32 = arith.constant 0 : i32
    %c0_i32_0 = arith.constant 0 : i32
    return %c0_i32, %arg2, %arg1 : i32, i32, i32
  }
  func.func @transform_2(%arg0: i32, %arg1: i32, %arg2: i32) -> (i32, i32) {
    %c0_i32 = arith.constant 0 : i32
    %c0_i32_0 = arith.constant 0 : i32
    return %c0_i32, %arg1 : i32, i32
  }
  func.func @transform_3(%arg0: i32, %arg1: i32, %arg2: i32) -> (i32, i32, i32, i32) {
    %c0_i32 = arith.constant 0 : i32
    %c0_i32_0 = arith.constant 0 : i32
    %c0_i32_1 = arith.constant 0 : i32
    return %arg0, %c0_i32, %c0_i32_0, %arg1 : i32, i32, i32, i32
  }
}

module attributes {stable_mosaic.version = 11 : i64} {
  func.func @_matmul_kernel_single(%arg0: i32, %arg1: i32, %arg2: memref<128x1152xbf16, #tpu.memory_space<vmem>>, %arg3: memref<1152x128xbf16, #tpu.memory_space<vmem>>, %arg4: memref<1x128xf32, #tpu.memory_space<vmem>>, %arg5: memref<128x128xbf16, #tpu.memory_space<vmem>>) attributes {dimension_semantics = [#tpu.dimension_semantics<parallel>, #tpu.dimension_semantics<parallel>], iteration_bounds = array<i64: 1, 1>, scalar_prefetch = 0 : i64, scratch_operands = 0 : i64, tpu.core_type = #tpu.core_type<tc>, window_params = [{transform_indices = @transform_0, window_bounds = array<i64: 128, 1152>}, {transform_indices = @transform_1, window_bounds = array<i64: 1152, 128>}, {transform_indices = @transform_2, window_bounds = array<i64: 1, 128>}, {transform_indices = @transform_3, window_bounds = array<i64: 128, 128>}]} {
    %c0 = arith.constant 0 : index
    %c0_0 = arith.constant 0 : index
    %0 = vector.load %arg2[%c0, %c0_0] : memref<128x1152xbf16, #tpu.memory_space<vmem>>, vector<128x1152xbf16>
    %c0_1 = arith.constant 0 : index
    %c0_2 = arith.constant 0 : index
    %1 = vector.load %arg3[%c0_1, %c0_2] : memref<1152x128xbf16, #tpu.memory_space<vmem>>, vector<1152x128xbf16>
    %cst = arith.constant dense<0.000000e+00> : vector<128x128xf32>
    %2 = tpu.matmul %0, %1, %cst {dimension_numbers = #tpu.dot_dimension_numbers<[1], [0], [0], [1], [0, 0, 1, 1], [], []>} : vector<128x1152xbf16>, vector<1152x128xbf16>, vector<128x128xf32> -> vector<128x128xf32>
    %c0_3 = arith.constant 0 : index
    %c0_4 = arith.constant 0 : index
    %3 = vector.load %arg4[%c0_3, %c0_4] : memref<1x128xf32, #tpu.memory_space<vmem>>, vector<1x128xf32>
    %4 = vector.broadcast %3 : vector<1x128xf32> to vector<128x128xf32>
    %5 = arith.addf %2, %4 : vector<128x128xf32>
    %cst_5 = arith.constant 0.000000e+00 : f32
    %6 = vector.broadcast %cst_5 : f32 to vector<128x128xf32>
    %7 = arith.cmpf ogt, %5, %6 : vector<128x128xf32>
    %cst_6 = arith.constant 1.000000e-01 : f32
    %8 = vector.broadcast %cst_6 : f32 to vector<128x128xf32>
    %9 = arith.mulf %8, %5 : vector<128x128xf32>
    %10 = arith.select %7, %5, %9 : vector<128x128xi1>, vector<128x128xf32>
    %11 = arith.truncf %10 : vector<128x128xf32> to vector<128x128xbf16>
    %c0_7 = arith.constant 0 : index
    %c0_8 = arith.constant 0 : index
    %12 = vector.load %arg5[%c0_7, %c0_8] : memref<128x128xbf16, #tpu.memory_space<vmem>>, vector<128x128xbf16>
    tpu.vector_store %arg5[%c0_7, %c0_8], %11 {strides = array<i32>} : memref<128x128xbf16, #tpu.memory_space<vmem>>, vector<128x128xbf16>,
    return
  }
  func.func @transform_0(%arg0: i32, %arg1: i32) -> (i32, i32) {
    %c0_i32 = arith.constant 0 : i32
    %c0_i32_0 = arith.constant 0 : i32
    return %arg0, %c0_i32 : i32, i32
  }
  func.func @transform_1(%arg0: i32, %arg1: i32) -> (i32, i32) {
    %c0_i32 = arith.constant 0 : i32
    %c0_i32_0 = arith.constant 0 : i32
    return %c0_i32, %arg1 : i32, i32
  }
  func.func @transform_2(%arg0: i32, %arg1: i32) -> (i32, i32) {
    %c0_i32 = arith.constant 0 : i32
    %c0_i32_0 = arith.constant 0 : i32
    return %c0_i32, %arg1 : i32, i32
  }
  func.func @transform_3(%arg0: i32, %arg1: i32) -> (i32, i32) {
    %c0_i32 = arith.constant 0 : i32
    return %arg0, %arg1 : i32, i32
  }
}

module attributes {stable_mosaic.version = 11 : i64} {
  func.func @_matmul_kernel_single(%arg0: i32, %arg1: i32, %arg2: memref<128x128xbf16, #tpu.memory_space<vmem>>, %arg3: memref<128x128xbf16, #tpu.memory_space<vmem>>, %arg4: memref<1x128xf32, #tpu.memory_space<vmem>>, %arg5: memref<128x128xbf16, #tpu.memory_space<vmem>>) attributes {dimension_semantics = [#tpu.dimension_semantics<parallel>, #tpu.dimension_semantics<parallel>], iteration_bounds = array<i64: 1, 1>, scalar_prefetch = 0 : i64, scratch_operands = 0 : i64, tpu.core_type = #tpu.core_type<tc>, window_params = [{transform_indices = @transform_0, window_bounds = array<i64: 128, 128>}, {transform_indices = @transform_1, window_bounds = array<i64: 128, 128>}, {transform_indices = @transform_2, window_bounds = array<i64: 1, 128>}, {transform_indices = @transform_3, window_bounds = array<i64: 128, 128>}]} {
    %c0 = arith.constant 0 : index
    %c0_0 = arith.constant 0 : index
    %0 = vector.load %arg2[%c0, %c0_0] : memref<128x128xbf16, #tpu.memory_space<vmem>>, vector<128x128xbf16>
    %c0_1 = arith.constant 0 : index
    %c0_2 = arith.constant 0 : index
    %1 = vector.load %arg3[%c0_1, %c0_2] : memref<128x128xbf16, #tpu.memory_space<vmem>>, vector<128x128xbf16>
    %cst = arith.constant dense<0.000000e+00> : vector<128x128xf32>
    %2 = tpu.matmul %0, %1, %cst {dimension_numbers = #tpu.dot_dimension_numbers<[1], [0], [0], [1], [0, 0, 1, 1], [], []>} : vector<128x128xbf16>, vector<128x128xbf16>, vector<128x128xf32> -> vector<128x128xf32>
    %c0_3 = arith.constant 0 : index
    %c0_4 = arith.constant 0 : index
    %3 = vector.load %arg4[%c0_3, %c0_4] : memref<1x128xf32, #tpu.memory_space<vmem>>, vector<1x128xf32>
    %4 = vector.broadcast %3 : vector<1x128xf32> to vector<128x128xf32>
    %5 = arith.addf %2, %4 : vector<128x128xf32>
    %cst_5 = arith.constant 0.000000e+00 : f32
    %6 = vector.broadcast %cst_5 : f32 to vector<128x128xf32>
    %7 = arith.cmpf ogt, %5, %6 : vector<128x128xf32>
    %cst_6 = arith.constant 1.000000e-01 : f32
    %8 = vector.broadcast %cst_6 : f32 to vector<128x128xf32>
    %9 = arith.mulf %8, %5 : vector<128x128xf32>
    %10 = arith.select %7, %5, %9 : vector<128x128xi1>, vector<128x128xf32>
    %11 = arith.truncf %10 : vector<128x128xf32> to vector<128x128xbf16>
    %c0_7 = arith.constant 0 : index
    %c0_8 = arith.constant 0 : index
    %12 = vector.load %arg5[%c0_7, %c0_8] : memref<128x128xbf16, #tpu.memory_space<vmem>>, vector<128x128xbf16>
    tpu.vector_store %arg5[%c0_7, %c0_8], %11 {strides = array<i32>} : memref<128x128xbf16, #tpu.memory_space<vmem>>, vector<128x128xbf16>,
    return
  }
  func.func @transform_0(%arg0: i32, %arg1: i32) -> (i32, i32) {
    %c0_i32 = arith.constant 0 : i32
    %c0_i32_0 = arith.constant 0 : i32
    return %arg0, %c0_i32 : i32, i32
  }
  func.func @transform_1(%arg0: i32, %arg1: i32) -> (i32, i32) {
    %c0_i32 = arith.constant 0 : i32
    %c0_i32_0 = arith.constant 0 : i32
    return %c0_i32, %arg1 : i32, i32
  }
  func.func @transform_2(%arg0: i32, %arg1: i32) -> (i32, i32) {
    %c0_i32 = arith.constant 0 : i32
    %c0_i32_0 = arith.constant 0 : i32
    return %c0_i32, %arg1 : i32, i32
  }
  func.func @transform_3(%arg0: i32, %arg1: i32) -> (i32, i32) {
    %c0_i32 = arith.constant 0 : i32
    return %arg0, %arg1 : i32, i32
  }
}

module attributes {stable_mosaic.version = 11 : i64} {
  func.func @_matmul_kernel_single(%arg0: i32, %arg1: i32, %arg2: memref<32x128xbf16, #tpu.memory_space<vmem>>, %arg3: memref<128x128xbf16, #tpu.memory_space<vmem>>, %arg4: memref<1x128xf32, #tpu.memory_space<vmem>>, %arg5: memref<32x128xf32, #tpu.memory_space<vmem>>) attributes {dimension_semantics = [#tpu.dimension_semantics<parallel>, #tpu.dimension_semantics<parallel>], iteration_bounds = array<i64: 1, 1>, scalar_prefetch = 0 : i64, scratch_operands = 0 : i64, tpu.core_type = #tpu.core_type<tc>, window_params = [{transform_indices = @transform_0, window_bounds = array<i64: 32, 128>}, {transform_indices = @transform_1, window_bounds = array<i64: 128, 128>}, {transform_indices = @transform_2, window_bounds = array<i64: 1, 128>}, {transform_indices = @transform_3, window_bounds = array<i64: 32, 128>}]} {
    %c0 = arith.constant 0 : index
    %c0_0 = arith.constant 0 : index
    %0 = vector.load %arg2[%c0, %c0_0] : memref<32x128xbf16, #tpu.memory_space<vmem>>, vector<32x128xbf16>
    %c0_1 = arith.constant 0 : index
    %c0_2 = arith.constant 0 : index
    %1 = vector.load %arg3[%c0_1, %c0_2] : memref<128x128xbf16, #tpu.memory_space<vmem>>, vector<128x128xbf16>
    %cst = arith.constant dense<0.000000e+00> : vector<32x128xf32>
    %2 = tpu.matmul %0, %1, %cst {dimension_numbers = #tpu.dot_dimension_numbers<[1], [0], [0], [1], [0, 0, 1, 1], [], []>} : vector<32x128xbf16>, vector<128x128xbf16>, vector<32x128xf32> -> vector<32x128xf32>
    %c0_3 = arith.constant 0 : index
    %c0_4 = arith.constant 0 : index
    %3 = vector.load %arg4[%c0_3, %c0_4] : memref<1x128xf32, #tpu.memory_space<vmem>>, vector<1x128xf32>
    %4 = vector.broadcast %3 : vector<1x128xf32> to vector<32x128xf32>
    %5 = arith.addf %2, %4 : vector<32x128xf32>
    %c0_5 = arith.constant 0 : index
    %c0_6 = arith.constant 0 : index
    %6 = vector.load %arg5[%c0_5, %c0_6] : memref<32x128xf32, #tpu.memory_space<vmem>>, vector<32x128xf32>
    tpu.vector_store %arg5[%c0_5, %c0_6], %5 {strides = array<i32>} : memref<32x128xf32, #tpu.memory_space<vmem>>, vector<32x128xf32>,
    return
  }
  func.func @transform_0(%arg0: i32, %arg1: i32) -> (i32, i32) {
    %c0_i32 = arith.constant 0 : i32
    %c0_i32_0 = arith.constant 0 : i32
    return %arg0, %c0_i32 : i32, i32
  }
  func.func @transform_1(%arg0: i32, %arg1: i32) -> (i32, i32) {
    %c0_i32 = arith.constant 0 : i32
    %c0_i32_0 = arith.constant 0 : i32
    return %c0_i32, %arg1 : i32, i32
  }
  func.func @transform_2(%arg0: i32, %arg1: i32) -> (i32, i32) {
    %c0_i32 = arith.constant 0 : i32
    %c0_i32_0 = arith.constant 0 : i32
    return %c0_i32, %arg1 : i32, i32
  }
  func.func @transform_3(%arg0: i32, %arg1: i32) -> (i32, i32) {
    %c0_i32 = arith.constant 0 : i32
    return %arg0, %arg1 : i32, i32
  }
}

module attributes {stable_mosaic.version = 11 : i64} {
  func.func @_matmul_kernel_single(%arg0: i32, %arg1: i32, %arg2: memref<32x1152xbf16, #tpu.memory_space<vmem>>, %arg3: memref<1152x128xbf16, #tpu.memory_space<vmem>>, %arg4: memref<1x128xf32, #tpu.memory_space<vmem>>, %arg5: memref<32x128xbf16, #tpu.memory_space<vmem>>) attributes {dimension_semantics = [#tpu.dimension_semantics<parallel>, #tpu.dimension_semantics<parallel>], iteration_bounds = array<i64: 1, 1>, scalar_prefetch = 0 : i64, scratch_operands = 0 : i64, tpu.core_type = #tpu.core_type<tc>, window_params = [{transform_indices = @transform_0, window_bounds = array<i64: 32, 1152>}, {transform_indices = @transform_1, window_bounds = array<i64: 1152, 128>}, {transform_indices = @transform_2, window_bounds = array<i64: 1, 128>}, {transform_indices = @transform_3, window_bounds = array<i64: 32, 128>}]} {
    %c0 = arith.constant 0 : index
    %c0_0 = arith.constant 0 : index
    %0 = vector.load %arg2[%c0, %c0_0] : memref<32x1152xbf16, #tpu.memory_space<vmem>>, vector<32x1152xbf16>
    %c0_1 = arith.constant 0 : index
    %c0_2 = arith.constant 0 : index
    %1 = vector.load %arg3[%c0_1, %c0_2] : memref<1152x128xbf16, #tpu.memory_space<vmem>>, vector<1152x128xbf16>
    %cst = arith.constant dense<0.000000e+00> : vector<32x128xf32>
    %2 = tpu.matmul %0, %1, %cst {dimension_numbers = #tpu.dot_dimension_numbers<[1], [0], [0], [1], [0, 0, 1, 1], [], []>} : vector<32x1152xbf16>, vector<1152x128xbf16>, vector<32x128xf32> -> vector<32x128xf32>
    %c0_3 = arith.constant 0 : index
    %c0_4 = arith.constant 0 : index
    %3 = vector.load %arg4[%c0_3, %c0_4] : memref<1x128xf32, #tpu.memory_space<vmem>>, vector<1x128xf32>
    %4 = vector.broadcast %3 : vector<1x128xf32> to vector<32x128xf32>
    %5 = arith.addf %2, %4 : vector<32x128xf32>
    %cst_5 = arith.constant 0.000000e+00 : f32
    %6 = vector.broadcast %cst_5 : f32 to vector<32x128xf32>
    %7 = arith.cmpf ogt, %5, %6 : vector<32x128xf32>
    %cst_6 = arith.constant 1.000000e-01 : f32
    %8 = vector.broadcast %cst_6 : f32 to vector<32x128xf32>
    %9 = arith.mulf %8, %5 : vector<32x128xf32>
    %10 = arith.select %7, %5, %9 : vector<32x128xi1>, vector<32x128xf32>
    %11 = arith.truncf %10 : vector<32x128xf32> to vector<32x128xbf16>
    %c0_7 = arith.constant 0 : index
    %c0_8 = arith.constant 0 : index
    %12 = vector.load %arg5[%c0_7, %c0_8] : memref<32x128xbf16, #tpu.memory_space<vmem>>, vector<32x128xbf16>
    tpu.vector_store %arg5[%c0_7, %c0_8], %11 {strides = array<i32>} : memref<32x128xbf16, #tpu.memory_space<vmem>>, vector<32x128xbf16>,
    return
  }
  func.func @transform_0(%arg0: i32, %arg1: i32) -> (i32, i32) {
    %c0_i32 = arith.constant 0 : i32
    %c0_i32_0 = arith.constant 0 : i32
    return %arg0, %c0_i32 : i32, i32
  }
  func.func @transform_1(%arg0: i32, %arg1: i32) -> (i32, i32) {
    %c0_i32 = arith.constant 0 : i32
    %c0_i32_0 = arith.constant 0 : i32
    return %c0_i32, %arg1 : i32, i32
  }
  func.func @transform_2(%arg0: i32, %arg1: i32) -> (i32, i32) {
    %c0_i32 = arith.constant 0 : i32
    %c0_i32_0 = arith.constant 0 : i32
    return %c0_i32, %arg1 : i32, i32
  }
  func.func @transform_3(%arg0: i32, %arg1: i32) -> (i32, i32) {
    %c0_i32 = arith.constant 0 : i32
    return %arg0, %arg1 : i32, i32
  }
}

module attributes {stable_mosaic.version = 11 : i64} {
  func.func @_matmul_kernel_single(%arg0: i32, %arg1: i32, %arg2: memref<32x128xbf16, #tpu.memory_space<vmem>>, %arg3: memref<128x128xbf16, #tpu.memory_space<vmem>>, %arg4: memref<1x128xf32, #tpu.memory_space<vmem>>, %arg5: memref<32x128xbf16, #tpu.memory_space<vmem>>) attributes {dimension_semantics = [#tpu.dimension_semantics<parallel>, #tpu.dimension_semantics<parallel>], iteration_bounds = array<i64: 1, 1>, scalar_prefetch = 0 : i64, scratch_operands = 0 : i64, tpu.core_type = #tpu.core_type<tc>, window_params = [{transform_indices = @transform_0, window_bounds = array<i64: 32, 128>}, {transform_indices = @transform_1, window_bounds = array<i64: 128, 128>}, {transform_indices = @transform_2, window_bounds = array<i64: 1, 128>}, {transform_indices = @transform_3, window_bounds = array<i64: 32, 128>}]} {
    %c0 = arith.constant 0 : index
    %c0_0 = arith.constant 0 : index
    %0 = vector.load %arg2[%c0, %c0_0] : memref<32x128xbf16, #tpu.memory_space<vmem>>, vector<32x128xbf16>
    %c0_1 = arith.constant 0 : index
    %c0_2 = arith.constant 0 : index
    %1 = vector.load %arg3[%c0_1, %c0_2] : memref<128x128xbf16, #tpu.memory_space<vmem>>, vector<128x128xbf16>
    %cst = arith.constant dense<0.000000e+00> : vector<32x128xf32>
    %2 = tpu.matmul %0, %1, %cst {dimension_numbers = #tpu.dot_dimension_numbers<[1], [0], [0], [1], [0, 0, 1, 1], [], []>} : vector<32x128xbf16>, vector<128x128xbf16>, vector<32x128xf32> -> vector<32x128xf32>
    %c0_3 = arith.constant 0 : index
    %c0_4 = arith.constant 0 : index
    %3 = vector.load %arg4[%c0_3, %c0_4] : memref<1x128xf32, #tpu.memory_space<vmem>>, vector<1x128xf32>
    %4 = vector.broadcast %3 : vector<1x128xf32> to vector<32x128xf32>
    %5 = arith.addf %2, %4 : vector<32x128xf32>
    %cst_5 = arith.constant 0.000000e+00 : f32
    %6 = vector.broadcast %cst_5 : f32 to vector<32x128xf32>
    %7 = arith.cmpf ogt, %5, %6 : vector<32x128xf32>
    %cst_6 = arith.constant 1.000000e-01 : f32
    %8 = vector.broadcast %cst_6 : f32 to vector<32x128xf32>
    %9 = arith.mulf %8, %5 : vector<32x128xf32>
    %10 = arith.select %7, %5, %9 : vector<32x128xi1>, vector<32x128xf32>
    %11 = arith.truncf %10 : vector<32x128xf32> to vector<32x128xbf16>
    %c0_7 = arith.constant 0 : index
    %c0_8 = arith.constant 0 : index
    %12 = vector.load %arg5[%c0_7, %c0_8] : memref<32x128xbf16, #tpu.memory_space<vmem>>, vector<32x128xbf16>
    tpu.vector_store %arg5[%c0_7, %c0_8], %11 {strides = array<i32>} : memref<32x128xbf16, #tpu.memory_space<vmem>>, vector<32x128xbf16>,
    return
  }
  func.func @transform_0(%arg0: i32, %arg1: i32) -> (i32, i32) {
    %c0_i32 = arith.constant 0 : i32
    %c0_i32_0 = arith.constant 0 : i32
    return %arg0, %c0_i32 : i32, i32
  }
  func.func @transform_1(%arg0: i32, %arg1: i32) -> (i32, i32) {
    %c0_i32 = arith.constant 0 : i32
    %c0_i32_0 = arith.constant 0 : i32
    return %c0_i32, %arg1 : i32, i32
  }
  func.func @transform_2(%arg0: i32, %arg1: i32) -> (i32, i32) {
    %c0_i32 = arith.constant 0 : i32
    %c0_i32_0 = arith.constant 0 : i32
    return %c0_i32, %arg1 : i32, i32
  }
  func.func @transform_3(%arg0: i32, %arg1: i32) -> (i32, i32) {
    %c0_i32 = arith.constant 0 : i32
    return %arg0, %arg1 : i32, i32
  }
}

module attributes {stable_mosaic.version = 11 : i64} {
  func.func @_matmul_kernel_single(%arg0: i32, %arg1: i32, %arg2: memref<128x128xbf16, #tpu.memory_space<vmem>>, %arg3: memref<128x128xbf16, #tpu.memory_space<vmem>>, %arg4: memref<1x128xf32, #tpu.memory_space<vmem>>, %arg5: memref<128x128xf32, #tpu.memory_space<vmem>>) attributes {dimension_semantics = [#tpu.dimension_semantics<parallel>, #tpu.dimension_semantics<parallel>], iteration_bounds = array<i64: 1, 1>, scalar_prefetch = 0 : i64, scratch_operands = 0 : i64, tpu.core_type = #tpu.core_type<tc>, window_params = [{transform_indices = @transform_0, window_bounds = array<i64: 128, 128>}, {transform_indices = @transform_1, window_bounds = array<i64: 128, 128>}, {transform_indices = @transform_2, window_bounds = array<i64: 1, 128>}, {transform_indices = @transform_3, window_bounds = array<i64: 128, 128>}]} {
    %c0 = arith.constant 0 : index
    %c0_0 = arith.constant 0 : index
    %0 = vector.load %arg2[%c0, %c0_0] : memref<128x128xbf16, #tpu.memory_space<vmem>>, vector<128x128xbf16>
    %c0_1 = arith.constant 0 : index
    %c0_2 = arith.constant 0 : index
    %1 = vector.load %arg3[%c0_1, %c0_2] : memref<128x128xbf16, #tpu.memory_space<vmem>>, vector<128x128xbf16>
    %cst = arith.constant dense<0.000000e+00> : vector<128x128xf32>
    %2 = tpu.matmul %0, %1, %cst {dimension_numbers = #tpu.dot_dimension_numbers<[1], [0], [0], [1], [0, 0, 1, 1], [], []>} : vector<128x128xbf16>, vector<128x128xbf16>, vector<128x128xf32> -> vector<128x128xf32>
    %c0_3 = arith.constant 0 : index
    %c0_4 = arith.constant 0 : index
    %3 = vector.load %arg4[%c0_3, %c0_4] : memref<1x128xf32, #tpu.memory_space<vmem>>, vector<1x128xf32>
    %4 = vector.broadcast %3 : vector<1x128xf32> to vector<128x128xf32>
    %5 = arith.addf %2, %4 : vector<128x128xf32>
    %c0_5 = arith.constant 0 : index
    %c0_6 = arith.constant 0 : index
    %6 = vector.load %arg5[%c0_5, %c0_6] : memref<128x128xf32, #tpu.memory_space<vmem>>, vector<128x128xf32>
    tpu.vector_store %arg5[%c0_5, %c0_6], %5 {strides = array<i32>} : memref<128x128xf32, #tpu.memory_space<vmem>>, vector<128x128xf32>,
    return
  }
  func.func @transform_0(%arg0: i32, %arg1: i32) -> (i32, i32) {
    %c0_i32 = arith.constant 0 : i32
    %c0_i32_0 = arith.constant 0 : i32
    return %arg0, %c0_i32 : i32, i32
  }
  func.func @transform_1(%arg0: i32, %arg1: i32) -> (i32, i32) {
    %c0_i32 = arith.constant 0 : i32
    %c0_i32_0 = arith.constant 0 : i32
    return %c0_i32, %arg1 : i32, i32
  }
  func.func @transform_2(%arg0: i32, %arg1: i32) -> (i32, i32) {
    %c0_i32 = arith.constant 0 : i32
    %c0_i32_0 = arith.constant 0 : i32
    return %c0_i32, %arg1 : i32, i32
  }
  func.func @transform_3(%arg0: i32, %arg1: i32) -> (i32, i32) {
    %c0_i32 = arith.constant 0 : i32
    return %arg0, %arg1 : i32, i32
  }
}

</mosaic_0001>

<bundles_post_ra>
// kernel: _forward.9
= control target key start
LH: loop header
LB: loop body
LE: loop exit
PB: predicated region body
PF: predicated region fallthrough
CT: control target
= control target key end

     0   :  { %s674_s1 = inlined_call_operand.vmem [shape: bf16[128,128], index: 1, kind: input, shape index: {}]   ;;  %s675_s0 = inlined_call_operand.vmem [shape: bf16[128,128], index: 0, kind: input, shape index: {}]   ;;  %s676_s2 = inlined_call_operand.vmem [shape: f32[1,128], index: 2, kind: input, shape index: {}]   ;;  %s677_s3 = inlined_call_operand.vmem [shape: bf16[128,128], index: 3, kind: output, shape index: {}]  }
   0x1   :  { %v539_v0 = vld [vmem:[%s674_s1 + $0x38] sm:$0xff]   ;;  %v540_v1 = vld [vmem:[%s674_s1 + $0x30] sm:$0xff]   ;;  %v541_v2 = vld [vmem:[%s674_s1 + $0x28] sm:$0xff]  }
   0x2   :  { %491 = vmatprep.subr.bf16.mxu0 %v539_v0  ;;  %523 = vmatprep.subr.bf16.mxu1 %v539_v0  ;;  %v542_v3 = vld [vmem:[%s674_s1 + $0x20] sm:$0xff]   ;;  %v543_v6 = vld [vmem:[%s674_s1 + $0x18] sm:$0xff]   ;;  %v544_v7 = vld [vmem:[%s674_s1 + $0x10] sm:$0xff]  }
   0x3   :  { %492 = vmatpush3.bf16.msra.mxu0 %v539_v0  ;;  %531 = vmatpush3.bf16.msra.mxu1 %v539_v0  ;;  %v547_v4 = vld [vmem:[%s675_s0] sm:$0xff]   ;;  %v545_v8 = vld [vmem:[%s674_s1 + $0x8] sm:$0xff]   ;;  %v551_v12 = vld [vmem:[%s675_s0 + $0x10] sm:$0xff]  }
   0x4   :  { %493 = vmatprep.subr.bf16.mxu0 %v540_v1  ;;  %524 = vmatprep.subr.bf16.mxu1 %v540_v1  ;;  %v548_v5 = vld [vmem:[%s675_s0 + $0x20] sm:$0xff]   ;;  %v549_v10 = vld [vmem:[%s675_s0 + $0x8] sm:$0xff]   ;;  %v552_v13 = vld [vmem:[%s675_s0 + $0x30] sm:$0xff]  }
   0x5   :  { %507 = vmatprep.mubr.bf16.mxu0 %v547_v4  ;;  %515 = vmatprep.mubr.bf16.mxu1 %v548_v5  ;;  %v546_v9 = vld [vmem:[%s674_s1] sm:$0xff]   ;;  %v550_v11 = vld [vmem:[%s675_s0 + $0x28] sm:$0xff]   ;;  %v553_v14 = vld [vmem:[%s675_s0 + $0x18] sm:$0xff]  }
   0x6   :  { %v554_v15 = vld [vmem:[%s675_s0 + $0x38] sm:$0xff]   ;;  %v626_v16 = vld [vmem:[%s676_s2] ss:$0 sm:$0xff] }
   0x7   :  { %494 = vmatpush3.bf16.msra.mxu0 %v540_v1  ;;  %532 = vmatpush3.bf16.msra.mxu1 %v540_v1 }
   0x8   :  { %495 = vmatprep.subr.bf16.mxu0 %v541_v2  ;;  %525 = vmatprep.subr.bf16.mxu1 %v541_v2 }
   0xb   :  { %496 = vmatpush3.bf16.msra.mxu0 %v541_v2  ;;  %533 = vmatpush3.bf16.msra.mxu1 %v541_v2 }
   0xc   :  { %497 = vmatprep.subr.bf16.mxu0 %v542_v3  ;;  %526 = vmatprep.subr.bf16.mxu1 %v542_v3 }
   0xf   :  { %498 = vmatpush3.bf16.msra.mxu0 %v542_v3  ;;  %534 = vmatpush3.bf16.msra.mxu1 %v542_v3 }
  0x10   :  { %499 = vmatprep.subr.bf16.mxu0 %v543_v6  ;;  %527 = vmatprep.subr.bf16.mxu1 %v543_v6 }
  0x13   :  { %500 = vmatpush3.bf16.msra.mxu0 %v543_v6  ;;  %535 = vmatpush3.bf16.msra.mxu1 %v543_v6 }
  0x14   :  { %501 = vmatprep.subr.bf16.mxu0 %v544_v7  ;;  %528 = vmatprep.subr.bf16.mxu1 %v544_v7 }
  0x17   :  { %502 = vmatpush3.bf16.msra.mxu0 %v544_v7  ;;  %536 = vmatpush3.bf16.msra.mxu1 %v544_v7 }
  0x18   :  { %503 = vmatprep.subr.bf16.mxu0 %v545_v8  ;;  %529 = vmatprep.subr.bf16.mxu1 %v545_v8 }
  0x1b   :  { %504 = vmatpush3.bf16.msra.mxu0 %v545_v8  ;;  %537 = vmatpush3.bf16.msra.mxu1 %v545_v8 }
  0x1c   :  { %505 = vmatprep.subr.bf16.mxu0 %v546_v9  ;;  %530 = vmatprep.subr.bf16.mxu1 %v546_v9 }
  0x1f   :  { %506 = vmatpush3.bf16.msra.mxu0 %v546_v9  ;;  %538 = vmatpush3.bf16.msra.mxu1 %v546_v9 }
  0x22   :  { %508 = vmatmul.mubr.bf16.vlgmr.msra.gmra.mxu0 %v549_v10  ;;  %516 = vmatmul.mubr.bf16.vlgmr.msra.gmra.mxu1 %v550_v11 }
  0x23   :  { %511 = vmatprep.mubr.bf16.mxu0 %v551_v12  ;;  %519 = vmatprep.mubr.bf16.mxu1 %v552_v13 }
  0x2a   :  { %512 = vmatmul.mubr.bf16.gmra.mxu0 %v553_v14  ;;  %520 = vmatmul.mubr.bf16.gmra.mxu1 %v554_v15 }
  0xe2   :  { %v509_v17 = vpop.f32.mrf.mxu0  ;;  %v517_v18 = vpop.f32.mrf.mxu1 }
  0xe3   :  { %v193_v19 = vadd.f32 %v509_v17, %v626_v16  ;;  %v225_v20 = vadd.f32 %v517_v18, %v626_v16 }
  0xe4   :  { %v184_v21 = vpop.f32.mrf.mxu0  ;;  %v216_v22 = vpop.f32.mrf.mxu1 }
  0xe5   :  { %vm249_vm0 = vcmp.gt.f32.partialorder %v193_v19, 0.0  ;;  %v265_v23 = vmul.f32 0.1, %v193_v19  ;;  %vm257_vm1 = vcmp.gt.f32.partialorder %v225_v20, 0.0  ;;  %v273_v24 = vmul.f32 0.1, %v225_v20 }
  0xe6   :  { %v185_v25 = vadd.f32 %v626_v16, %v184_v21  ;;  %v217_v26 = vadd.f32 %v626_v16, %v216_v22  ;;  %v510_v27 = vpop.f32.mrf.mxu0  ;;  %v518_v28 = vpop.f32.mrf.mxu1 }
  0xe7   :  { %v196_v29 = vadd.f32 %v510_v27, %v626_v16  ;;  %v228_v30 = vadd.f32 %v518_v28, %v626_v16  ;;  %v281_v31 = vsel %vm249_vm0, %v193_v19, %v265_v23  ;;  %v289_v32 = vsel %vm257_vm1, %v225_v20, %v273_v24 }
  0xe8   :  { %vm247_vm2 = vcmp.gt.f32.partialorder %v185_v25, 0.0  ;;  %v263_v33 = vmul.f32 0.1, %v185_v25  ;;  %v187_v34 = vpop.f32.mrf.mxu0  ;;  %v219_v35 = vpop.f32.mrf.mxu1  ;;  %vm255_vm5 = vcmp.gt.f32.partialorder %v217_v26, 0.0  ;;  %v271_v38 = vmul.f32 0.1, %v217_v26 }
  0xe9   :  { %vm250_vm3 = vcmp.gt.f32.partialorder %v196_v29, 0.0  ;;  %v266_v36 = vmul.f32 0.1, %v196_v29  ;;  %vm258_vm4 = vcmp.gt.f32.partialorder %v228_v30, 0.0  ;;  %v274_v37 = vmul.f32 0.1, %v228_v30 }
  0xea   :  { %v188_v39 = vadd.f32 %v626_v16, %v187_v34  ;;  %v220_v40 = vadd.f32 %v626_v16, %v219_v35  ;;  %v513_v41 = vpop.f32.mrf.mxu0  ;;  %v521_v42 = vpop.f32.mrf.mxu1  ;;  %v279_v53 = vsel %vm247_vm2, %v185_v25, %v263_v33  ;;  %v287_v58 = vsel %vm255_vm5, %v217_v26, %v271_v38 }
  0xeb   :  { %v282_v43 = vsel %vm250_vm3, %v196_v29, %v266_v36  ;;  %v290_v44 = vsel %vm258_vm4, %v228_v30, %v274_v37  ;;  %v209_v45 = vadd.f32 %v513_v41, %v626_v16  ;;  %v241_v46 = vadd.f32 %v521_v42, %v626_v16 }
  0xec   :  { %v436_v47 = vpack.c.bf16 %v282_v43, %v281_v31  ;;  %v456_v48 = vpack.c.bf16 %v290_v44, %v289_v32  ;;  %vm248_vm6 = vcmp.gt.f32.partialorder %v188_v39, 0.0  ;;  %v264_v49 = vmul.f32 0.1, %v188_v39  ;;  %v200_v50 = vpop.f32.mrf.mxu0  ;;  %v232_v51 = vpop.f32.mrf.mxu1 }
  0xed   :  { %vm256_vm7 = vcmp.gt.f32.partialorder %v220_v40, 0.0  ;;  %v272_v52 = vmul.f32 0.1, %v220_v40  ;;  %v201_v55 = vadd.f32 %v626_v16, %v200_v50  ;;  %v233_v61 = vadd.f32 %v626_v16, %v232_v51 }
  0xee   :  { %468 = vst [vmem:[%s677_s3 + $0x8] sm:$0xff] %v436_v47   ;;  %472 = vst [vmem:[%s677_s3 + $0x28] sm:$0xff] %v456_v48   ;;  %v280_v54 = vsel %vm248_vm6, %v188_v39, %v264_v49  ;;  %v514_v56 = vpop.f32.mrf.mxu0  ;;  %v522_v57 = vpop.f32.mrf.mxu1  ;;  %vm253_vm8 = vcmp.gt.f32.partialorder %v209_v45, 0.0  ;;  %v269_v63 = vmul.f32 0.1, %v209_v45  ;;  %vm261_vm9 = vcmp.gt.f32.partialorder %v241_v46, 0.0 }
  0xef   :  { %v431_v59 = vpack.c.bf16 %v280_v54, %v279_v53  ;;  %v288_v60 = vsel %vm256_vm7, %v220_v40, %v272_v52  ;;  %v277_v2 = vmul.f32 0.1, %v241_v46  ;;  %vm251_vm10 = vcmp.gt.f32.partialorder %v201_v55, 0.0 }
  0xf0   :  { %v451_v62 = vpack.c.bf16 %v288_v60, %v287_v58  ;;  %v203_v0 = vpop.f32.mrf.mxu0  ;;  %v235_v1 = vpop.f32.mrf.mxu1  ;;  %v212_v3 = vadd.f32 %v514_v56, %v626_v16  ;;  %v244_v4 = vadd.f32 %v522_v57, %v626_v16  ;;  %v267_v5 = vmul.f32 0.1, %v201_v55 }
  0xf1   :  { %432 = vst [vmem:[%s677_s3] sm:$0xff] %v431_v59   ;;  %vm259_vm11 = vcmp.gt.f32.partialorder %v233_v61, 0.0  ;;  %v204_v6 = vadd.f32 %v626_v16, %v203_v0  ;;  %v236_v7 = vadd.f32 %v626_v16, %v235_v1  ;;  %v275_v8 = vmul.f32 0.1, %v233_v61 }
  0xf2   :  { %471 = vst [vmem:[%s677_s3 + $0x20] sm:$0xff] %v451_v62   ;;  %vm254_vm12 = vcmp.gt.f32.partialorder %v212_v3, 0.0  ;;  %v270_v9 = vmul.f32 0.1, %v212_v3  ;;  %vm262_vm13 = vcmp.gt.f32.partialorder %v244_v4, 0.0  ;;  %v285_v12 = vsel %vm253_vm8, %v209_v45, %v269_v63 }
  0xf3   :  { %v278_v10 = vmul.f32 0.1, %v244_v4  ;;  %vm252_vm14 = vcmp.gt.f32.partialorder %v204_v6, 0.0  ;;  %v268_v11 = vmul.f32 0.1, %v204_v6  ;;  %vm260_vm15 = vcmp.gt.f32.partialorder %v236_v7, 0.0 }
  0xf4   :  { %v293_v13 = vsel %vm261_vm9, %v241_v46, %v277_v2  ;;  %v286_v14 = vsel %vm254_vm12, %v212_v3, %v270_v9  ;;  %v276_v15 = vmul.f32 0.1, %v236_v7  ;;  %v283_v17 = vsel %vm251_vm10, %v201_v55, %v267_v5 }
  0xf5   :  { %v446_v18 = vpack.c.bf16 %v286_v14, %v285_v12  ;;  %v294_v19 = vsel %vm262_vm13, %v244_v4, %v278_v10  ;;  %v284_v20 = vsel %vm252_vm14, %v204_v6, %v268_v11  ;;  %v291_v16 = vsel %vm259_vm11, %v233_v61, %v275_v8 }
  0xf6   :  { %v466_v21 = vpack.c.bf16 %v294_v19, %v293_v13  ;;  %v441_v22 = vpack.c.bf16 %v284_v20, %v283_v17  ;;  %v292_v23 = vsel %vm260_vm15, %v236_v7, %v276_v15 }
  0xf7   :  { %470 = vst [vmem:[%s677_s3 + $0x18] sm:$0xff] %v446_v18   ;;  %v461_v24 = vpack.c.bf16 %v292_v23, %v291_v16 }
  0xf8   :  { %474 = vst [vmem:[%s677_s3 + $0x38] sm:$0xff] %v466_v21   ;;  %469 = vst [vmem:[%s677_s3 + $0x10] sm:$0xff] %v441_v22  }
  0xf9   :  { %473 = vst [vmem:[%s677_s3 + $0x30] sm:$0xff] %v461_v24  }

// kernel: _forward.8
= control target key start
LH: loop header
LB: loop body
LE: loop exit
PB: predicated region body
PF: predicated region fallthrough
CT: control target
= control target key end

     0   :  { %s2978_s1 = inlined_call_operand.vmem [shape: bf16[1152,128], index: 1, kind: input, shape index: {}]   ;;  %s2979_s0 = inlined_call_operand.vmem [shape: bf16[128,1152], index: 0, kind: input, shape index: {}]   ;;  %s2980_s2 = inlined_call_operand.vmem [shape: f32[1,128], index: 2, kind: input, shape index: {}]   ;;  %s2981_s3 = inlined_call_operand.vmem [shape: bf16[128,128], index: 3, kind: output, shape index: {}]  }
   0x1   :  { %v2207_v0 = vld [vmem:[%s2978_s1 + $0x78] sm:$0xff]   ;;  %v2211_v4 = vld [vmem:[%s2978_s1 + $0x70] sm:$0xff]   ;;  %v2215_v8 = vld [vmem:[%s2978_s1 + $0x68] sm:$0xff]  }
   0x2   :  { %v2208_v1 = vld [vmem:[%s2978_s1 + $0xf8] sm:$0xff]   ;;  %1887 = vmatprep.subr.bf16.mxu0 %v2207_v0  ;;  %v2212_v5 = vld [vmem:[%s2978_s1 + $0xf0] sm:$0xff]   ;;  %v2216_v9 = vld [vmem:[%s2978_s1 + $0xe8] sm:$0xff]  }
   0x3   :  { %v2209_v2 = vld [vmem:[%s2978_s1 + $0x38] sm:$0xff]   ;;  %1951 = vmatprep.subr.bf16.mxu1 %v2208_v1  ;;  %v2213_v6 = vld [vmem:[%s2978_s1 + $0x30] sm:$0xff]   ;;  %v2217_v10 = vld [vmem:[%s2978_s1 + $0x28] sm:$0xff]  }
   0x4   :  { %v2210_v3 = vld [vmem:[%s2978_s1 + $0xb8] sm:$0xff]   ;;  %1888 = vmatpush3.bf16.msra.mxu0 %v2209_v2  ;;  %v2214_v7 = vld [vmem:[%s2978_s1 + $0xb0] sm:$0xff]   ;;  %v2218_v11 = vld [vmem:[%s2978_s1 + $0xa8] sm:$0xff]  }
   0x5   :  { %1952 = vmatpush3.bf16.msra.mxu1 %v2210_v3  ;;  %1889 = vmatprep.subr.bf16.mxu0 %v2211_v4  ;;  %v2219_v12 = vld [vmem:[%s2978_s1 + $0x60] sm:$0xff]   ;;  %v2223_v16 = vld [vmem:[%s2978_s1 + $0x58] sm:$0xff]   ;;  %v2227_v20 = vld [vmem:[%s2978_s1 + $0x50] sm:$0xff]  }
   0x6   :  { %1953 = vmatprep.subr.bf16.mxu1 %v2212_v5  ;;  %v2220_v13 = vld [vmem:[%s2978_s1 + $0xe0] sm:$0xff]   ;;  %v2224_v17 = vld [vmem:[%s2978_s1 + $0xd8] sm:$0xff]   ;;  %v2228_v21 = vld [vmem:[%s2978_s1 + $0xd0] sm:$0xff]  }
   0x7   :  { %v2221_v14 = vld [vmem:[%s2978_s1 + $0x20] sm:$0xff]   ;;  %v2225_v18 = vld [vmem:[%s2978_s1 + $0x18] sm:$0xff]   ;;  %v2229_v22 = vld [vmem:[%s2978_s1 + $0x10] sm:$0xff]  }
   0x8   :  { %1890 = vmatpush3.bf16.msra.mxu0 %v2213_v6  ;;  %v2222_v15 = vld [vmem:[%s2978_s1 + $0xa0] sm:$0xff]   ;;  %v2226_v19 = vld [vmem:[%s2978_s1 + $0x98] sm:$0xff]   ;;  %v2230_v23 = vld [vmem:[%s2978_s1 + $0x90] sm:$0xff]  }
   0x9   :  { %1954 = vmatpush3.bf16.msra.mxu1 %v2214_v7  ;;  %1891 = vmatprep.subr.bf16.mxu0 %v2215_v8  ;;  %v2231_v24 = vld [vmem:[%s2978_s1 + $0x48] sm:$0xff]   ;;  %v2235_v28 = vld [vmem:[%s2978_s1 + $0x40] sm:$0xff]   ;;  %v2245_v36 = vld [vmem:[%s2978_s1 + $0x178] sm:$0xff]  }
   0xa   :  { %1955 = vmatprep.subr.bf16.mxu1 %v2216_v9  ;;  %v2232_v25 = vld [vmem:[%s2978_s1 + $0xc8] sm:$0xff]   ;;  %v2236_v29 = vld [vmem:[%s2978_s1 + $0xc0] sm:$0xff]   ;;  %v2246_v37 = vld [vmem:[%s2978_s1 + $0x1f8] sm:$0xff]  }
   0xb   :  { %v2233_v26 = vld [vmem:[%s2978_s1 + $0x8] sm:$0xff]   ;;  %v2237_v30 = vld [vmem:[%s2978_s1] sm:$0xff]   ;;  %v2247_v38 = vld [vmem:[%s2978_s1 + $0x138] sm:$0xff]  }
   0xc   :  { %1892 = vmatpush3.bf16.msra.mxu0 %v2217_v10  ;;  %v2234_v27 = vld [vmem:[%s2978_s1 + $0x88] sm:$0xff]   ;;  %v2238_v31 = vld [vmem:[%s2978_s1 + $0x80] sm:$0xff]   ;;  %v2248_v39 = vld [vmem:[%s2978_s1 + $0x1b8] sm:$0xff]  }
   0xd   :  { %1956 = vmatpush3.bf16.msra.mxu1 %v2218_v11  ;;  %1893 = vmatprep.subr.bf16.mxu0 %v2219_v12  ;;  %v2239_v32 = vld [vmem:[%s2979_s0] ss:$36 sps:$4 sm:$0xff]   ;;  %v2242_v34 = vld [vmem:[%s2979_s0 + $0x8] ss:$36 sps:$4 sm:$0xff]   ;;  %v2251_v41 = vld [vmem:[%s2979_s0 + $0x54] ss:$36 sps:$4 sm:$0xff]  }
   0xe   :  { %1957 = vmatprep.subr.bf16.mxu1 %v2220_v13  ;;  %v2241_v33 = vld [vmem:[%s2979_s0 + $0x4] ss:$36 sps:$4 sm:$0xff]   ;;  %v2244_v35 = vld [vmem:[%s2979_s0 + $0xc] ss:$36 sps:$4 sm:$0xff]   ;;  %v2259_v48 = vld [vmem:[%s2979_s0 + $0x94] ss:$36 sps:$4 sm:$0xff]  }
   0xf   :  { %1078 = vmatprep.mubr.bf16.mxu0 %v2241_v33  ;;  %1175 = vmatprep.mubr.bf16.mxu1 %v2244_v35  ;;  %v2249_v40 = vld [vmem:[%s2979_s0 + $0x4c] ss:$36 sps:$4 sm:$0xff]   ;;  %v2261_v49 = vld [vmem:[%s2979_s0 + $0x9c] ss:$36 sps:$4 sm:$0xff]   ;;  %v2271_v57 = vld [vmem:[%s2979_s0 + $0xe4] ss:$36 sps:$4 sm:$0xff]  }
  0x10   :  { %1894 = vmatpush3.bf16.msra.mxu0 %v2221_v14  ;;  %v2253_v42 = vld [vmem:[%s2979_s0 + $0x48] ss:$36 sps:$4 sm:$0xff]   ;;  %v2254_v43 = vld [vmem:[%s2979_s0 + $0x50] ss:$36 sps:$4 sm:$0xff]   ;;  %v2264_v51 = vld [vmem:[%s2979_s0 + $0x98] ss:$36 sps:$4 sm:$0xff]  }
  0x11   :  { %1958 = vmatpush3.bf16.msra.mxu1 %v2222_v15  ;;  %1895 = vmatprep.subr.bf16.mxu0 %v2223_v16  ;;  %v2255_v44 = vld [vmem:[%s2978_s1 + $0x170] sm:$0xff]   ;;  %v2265_v52 = vld [vmem:[%s2978_s1 + $0x168] sm:$0xff]   ;;  %v2269_v56 = vld [vmem:[%s2979_s0 + $0xdc] ss:$36 sps:$4 sm:$0xff]  }
  0x12   :  { %1959 = vmatprep.subr.bf16.mxu1 %v2224_v17  ;;  %v2256_v45 = vld [vmem:[%s2978_s1 + $0x1f0] sm:$0xff]   ;;  %v2266_v53 = vld [vmem:[%s2978_s1 + $0x1e8] sm:$0xff]   ;;  %v2273_v58 = vld [vmem:[%s2979_s0 + $0xd8] ss:$36 sps:$4 sm:$0xff]  }
  0x13   :  { %v2257_v46 = vld [vmem:[%s2978_s1 + $0x130] sm:$0xff]   ;;  %v2267_v54 = vld [vmem:[%s2978_s1 + $0x128] sm:$0xff]   ;;  %v2274_v59 = vld [vmem:[%s2979_s0 + $0xe0] ss:$36 sps:$4 sm:$0xff]  }
  0x14   :  { %1896 = vmatpush3.bf16.msra.mxu0 %v2225_v18  ;;  %v2258_v47 = vld [vmem:[%s2978_s1 + $0x1b0] sm:$0xff]   ;;  %v2268_v55 = vld [vmem:[%s2978_s1 + $0x1a8] sm:$0xff]   ;;  %v2275_v60 = vld [vmem:[%s2978_s1 + $0x160] sm:$0xff]  }
  0x15   :  { %1960 = vmatpush3.bf16.msra.mxu1 %v2226_v19  ;;  %1897 = vmatprep.subr.bf16.mxu0 %v2227_v20  ;;  %v2263_v50 = vld [vmem:[%s2979_s0 + $0x90] ss:$36 sps:$4 sm:$0xff]   ;;  %v2276_v61 = vld [vmem:[%s2978_s1 + $0x1e0] sm:$0xff]   ;;  %v2285_v3 = vld [vmem:[%s2978_s1 + $0x158] sm:$0xff]  }
  0x16   :  { %1961 = vmatprep.subr.bf16.mxu1 %v2228_v21  ;;  %v2277_v62 = vld [vmem:[%s2978_s1 + $0x120] sm:$0xff]   ;;  %v2281_v1 = vld [vmem:[%s2979_s0 + $0x12c] ss:$36 sps:$4 sm:$0xff]   ;;  %v2286_v5 = vld [vmem:[%s2978_s1 + $0x1d8] sm:$0xff]  }
  0x17   :  { %v2278_v63 = vld [vmem:[%s2978_s1 + $0x1a0] sm:$0xff]   ;;  %v2284_v4 = vld [vmem:[%s2979_s0 + $0x128] ss:$36 sps:$4 sm:$0xff]   ;;  %v2287_v6 = vld [vmem:[%s2978_s1 + $0x118] sm:$0xff]  }
  0x18   :  { %1898 = vmatpush3.bf16.msra.mxu0 %v2229_v22  ;;  %v2279_v0 = vld [vmem:[%s2979_s0 + $0x124] ss:$36 sps:$4 sm:$0xff]   ;;  %v2288_v7 = vld [vmem:[%s2978_s1 + $0x198] sm:$0xff]   ;;  %v2289_v8 = vld [vmem:[%s2979_s0 + $0x16c] ss:$36 sps:$4 sm:$0xff]  }
  0x19   :  { %1962 = vmatpush3.bf16.msra.mxu1 %v2230_v23  ;;  %1899 = vmatprep.subr.bf16.mxu0 %v2231_v24  ;;  %v2283_v2 = vld [vmem:[%s2979_s0 + $0x120] ss:$36 sps:$4 sm:$0xff]   ;;  %v2291_v9 = vld [vmem:[%s2979_s0 + $0x174] ss:$36 sps:$4 sm:$0xff]   ;;  %v2293_v12 = vld [vmem:[%s2979_s0 + $0x168] ss:$36 sps:$4 sm:$0xff]  }
  0x1a   :  { %1963 = vmatprep.subr.bf16.mxu1 %v2232_v25  ;;  %v2295_v10 = vld [vmem:[%s2978_s1 + $0x150] sm:$0xff]   ;;  %v2301_v17 = vld [vmem:[%s2979_s0 + $0x1bc] ss:$36 sps:$4 sm:$0xff]   ;;  %v2305_v18 = vld [vmem:[%s2978_s1 + $0x148] sm:$0xff]  }
  0x1b   :  { %v2296_v11 = vld [vmem:[%s2978_s1 + $0x1d0] sm:$0xff]   ;;  %v2306_v19 = vld [vmem:[%s2978_s1 + $0x1c8] sm:$0xff]   ;;  %v2304_v23 = vld [vmem:[%s2979_s0 + $0x1b8] ss:$36 sps:$4 sm:$0xff]  }
  0x1c   :  { %1900 = vmatpush3.bf16.msra.mxu0 %v2233_v26  ;;  %v2297_v13 = vld [vmem:[%s2978_s1 + $0x110] sm:$0xff]   ;;  %v2307_v20 = vld [vmem:[%s2978_s1 + $0x108] sm:$0xff]   ;;  %v2309_v24 = vld [vmem:[%s2979_s0 + $0x1fc] ss:$36 sps:$4 sm:$0xff]  }
  0x1d   :  { %1964 = vmatpush3.bf16.msra.mxu1 %v2234_v27  ;;  %1901 = vmatprep.subr.bf16.mxu0 %v2235_v28  ;;  %v2298_v14 = vld [vmem:[%s2978_s1 + $0x190] sm:$0xff]   ;;  %v2308_v21 = vld [vmem:[%s2978_s1 + $0x188] sm:$0xff]   ;;  %v2315_v26 = vld [vmem:[%s2978_s1 + $0x140] sm:$0xff]  }
  0x1e   :  { %1965 = vmatprep.subr.bf16.mxu1 %v2236_v29  ;;  %v2294_v15 = vld [vmem:[%s2979_s0 + $0x170] ss:$36 sps:$4 sm:$0xff]   ;;  %v2311_v25 = vld [vmem:[%s2979_s0 + $0x204] ss:$36 sps:$4 sm:$0xff]  }
  0x1f   :  { %v2299_v16 = vld [vmem:[%s2979_s0 + $0x1b4] ss:$36 sps:$4 sm:$0xff]   ;;  %v2316_v27 = vld [vmem:[%s2978_s1 + $0x1c0] sm:$0xff]  }
  0x20   :  { %1902 = vmatpush3.bf16.msra.mxu0 %v2237_v30  ;;  %v2303_v22 = vld [vmem:[%s2979_s0 + $0x1b0] ss:$36 sps:$4 sm:$0xff]   ;;  %v2317_v28 = vld [vmem:[%s2978_s1 + $0x100] sm:$0xff]   ;;  %v2313_v30 = vld [vmem:[%s2979_s0 + $0x1f8] ss:$36 sps:$4 sm:$0xff]  }
  0x21   :  { %1966 = vmatpush3.bf16.msra.mxu1 %v2238_v31  ;;  %2015 = vmatprep.subr.bf16.mxu0 %v2245_v36  ;;  %v2318_v29 = vld [vmem:[%s2978_s1 + $0x180] sm:$0xff]   ;;  %v2321_v33 = vld [vmem:[%s2979_s0 + $0x14] ss:$36 sps:$4 sm:$0xff]  }
  0x22   :  { %2079 = vmatprep.subr.bf16.mxu1 %v2246_v37  ;;  %v2314_v31 = vld [vmem:[%s2979_s0 + $0x200] ss:$36 sps:$4 sm:$0xff]   ;;  %v2319_v35 = vld [vmem:[%s2979_s0 + $0x10] ss:$36 sps:$4 sm:$0xff]   ;;  %v2322_v36 = vld [vmem:[%s2979_s0 + $0x18] ss:$36 sps:$4 sm:$0xff]  }
  0x23   :  { %1079 = vmatmul.mubr.bf16.vlgmr.msra.gmra.mxu0 %v2239_v32  ;;  %v2325_v32 = vld [vmem:[%s2978_s1 + $0x238] sm:$0xff]  }
  0x24   :  { %1176 = vmatmul.mubr.bf16.vlgmr.msra.gmra.mxu1 %v2242_v34  ;;  %2016 = vmatpush3.bf16.msra.mxu0 %v2247_v38  ;;  %v2324_v34 = vld [vmem:[%s2979_s0 + $0x1c] ss:$36 sps:$4 sm:$0xff]   ;;  %v2328_v38 = vld [vmem:[%s2979_s0 + $0x64] ss:$36 sps:$4 sm:$0xff]  }
  0x25   :  { %2080 = vmatpush3.bf16.msra.mxu1 %v2248_v39  ;;  %1086 = vmatprep.mubr.bf16.mxu0 %v2249_v40  ;;  %v2326_v37 = vld [vmem:[%s2979_s0 + $0x5c] ss:$36 sps:$4 sm:$0xff]   ;;  %v2332_v39 = vld [vmem:[%s2978_s1 + $0x230] sm:$0xff]   ;;  %v2339_v40 = vld [vmem:[%s2978_s1 + $0x228] sm:$0xff]  }
  0x26   :  { %1183 = vmatprep.mubr.bf16.mxu1 %v2251_v41  ;;  %2017 = vmatprep.subr.bf16.mxu0 %v2255_v44  ;;  %v2330_v41 = vld [vmem:[%s2979_s0 + $0x58] ss:$36 sps:$4 sm:$0xff]   ;;  %v2335_v44 = vld [vmem:[%s2979_s0 + $0xac] ss:$36 sps:$4 sm:$0xff]  }
  0x27   :  { %2081 = vmatprep.subr.bf16.mxu1 %v2256_v45  ;;  %v2346_v45 = vld [vmem:[%s2978_s1 + $0x220] sm:$0xff]  }
  0x28   :  { %2018 = vmatpush3.bf16.msra.mxu0 %v2257_v46  ;;  %v2353_v46 = vld [vmem:[%s2978_s1 + $0x218] sm:$0xff]  }
  0x29   :  { %2082 = vmatpush3.bf16.msra.mxu1 %v2258_v47  ;;  %2019 = vmatprep.subr.bf16.mxu0 %v2265_v52  ;;  %v2337_v47 = vld [vmem:[%s2979_s0 + $0xa0] ss:$36 sps:$4 sm:$0xff]   ;;  %v2344_v52 = vld [vmem:[%s2979_s0 + $0xe8] ss:$36 sps:$4 sm:$0xff]  }
  0x2a   :  { %2083 = vmatprep.subr.bf16.mxu1 %v2266_v53  ;;  %v2367_v53 = vld [vmem:[%s2978_s1 + $0x208] sm:$0xff]  }
  0x2b   :  { %1087 = vmatmul.mubr.bf16.gmra.mxu0 %v2253_v42  ;;  %v2331_v42 = vld [vmem:[%s2979_s0 + $0x60] ss:$36 sps:$4 sm:$0xff]  }
  0x2c   :  { %1184 = vmatmul.mubr.bf16.gmra.mxu1 %v2254_v43  ;;  %1094 = vmatprep.mubr.bf16.mxu0 %v2259_v48  ;;  %v2333_v43 = vld [vmem:[%s2979_s0 + $0xa4] ss:$36 sps:$4 sm:$0xff]  }
  0x2d   :  { %1191 = vmatprep.mubr.bf16.mxu1 %v2261_v49  ;;  %2020 = vmatpush3.bf16.msra.mxu0 %v2267_v54  ;;  %v2338_v48 = vld [vmem:[%s2979_s0 + $0xa8] ss:$36 sps:$4 sm:$0xff]   ;;  %v2345_v54 = vld [vmem:[%s2979_s0 + $0xf0] ss:$36 sps:$4 sm:$0xff]  }
  0x2e   :  { %2084 = vmatpush3.bf16.msra.mxu1 %v2268_v55  ;;  %2021 = vmatprep.subr.bf16.mxu0 %v2275_v60  ;;  %v2340_v49 = vld [vmem:[%s2979_s0 + $0xec] ss:$36 sps:$4 sm:$0xff]   ;;  %v2347_v55 = vld [vmem:[%s2979_s0 + $0x134] ss:$36 sps:$4 sm:$0xff]   ;;  %v2354_v60 = vld [vmem:[%s2979_s0 + $0x17c] ss:$36 sps:$4 sm:$0xff]  }
  0x2f   :  { %2085 = vmatprep.subr.bf16.mxu1 %v2276_v61  ;;  %v2356_v61 = vld [vmem:[%s2979_s0 + $0x184] ss:$36 sps:$4 sm:$0xff]  }
  0x31   :  { %2022 = vmatpush3.bf16.msra.mxu0 %v2277_v62  ;;  %v2358_v62 = vld [vmem:[%s2979_s0 + $0x178] ss:$36 sps:$4 sm:$0xff]  }
  0x32   :  { %2086 = vmatpush3.bf16.msra.mxu1 %v2278_v63  ;;  %2023 = vmatprep.subr.bf16.mxu0 %v2285_v3  ;;  %v2359_v63 = vld [vmem:[%s2979_s0 + $0x180] ss:$36 sps:$4 sm:$0xff]   ;;  %v2366_v3 = vld [vmem:[%s2979_s0 + $0x1c8] ss:$36 sps:$4 sm:$0xff]  }
  0x33   :  { %1095 = vmatmul.mubr.bf16.gmra.mxu0 %v2263_v50  ;;  %2087 = vmatprep.subr.bf16.mxu1 %v2286_v5  ;;  %v2342_v50 = vld [vmem:[%s2979_s0 + $0xf4] ss:$36 sps:$4 sm:$0xff]  }
  0x34   :  { %1192 = vmatmul.mubr.bf16.gmra.mxu1 %v2264_v51  ;;  %1102 = vmatprep.mubr.bf16.mxu0 %v2269_v56  ;;  %v2360_v51 = vld [vmem:[%s2978_s1 + $0x210] sm:$0xff]   ;;  %v2349_v56 = vld [vmem:[%s2979_s0 + $0x13c] ss:$36 sps:$4 sm:$0xff]  }
  0x35   :  { %1199 = vmatprep.mubr.bf16.mxu1 %v2271_v57  ;;  %2024 = vmatpush3.bf16.msra.mxu0 %v2287_v6  ;;  %v2374_v57 = vld [vmem:[%s2978_s1 + $0x200] sm:$0xff]   ;;  %v2370_v5 = vld [vmem:[%s2979_s0 + $0x214] ss:$36 sps:$4 sm:$0xff]   ;;  %v2372_v6 = vld [vmem:[%s2979_s0 + $0x208] ss:$36 sps:$4 sm:$0xff]  }
  0x36   :  { %2088 = vmatpush3.bf16.msra.mxu1 %v2288_v7  ;;  %2025 = vmatprep.subr.bf16.mxu0 %v2295_v10  ;;  %v2373_v7 = vld [vmem:[%s2979_s0 + $0x210] ss:$36 sps:$4 sm:$0xff]   ;;  %v2377_v10 = vld [vmem:[%s2979_s0 + $0x68] ss:$36 sps:$4 sm:$0xff]  }
  0x37   :  { %2089 = vmatprep.subr.bf16.mxu1 %v2296_v11  ;;  %v2378_v11 = vld [vmem:[%s2979_s0 + $0x188] ss:$36 sps:$4 sm:$0xff]  }
  0x39   :  { %2026 = vmatpush3.bf16.msra.mxu0 %v2297_v13  ;;  %v2380_v13 = vld [vmem:[%s2979_s0 + $0x1d0] ss:$36 sps:$4 sm:$0xff]  }
  0x3a   :  { %2090 = vmatpush3.bf16.msra.mxu1 %v2298_v14  ;;  %2027 = vmatprep.subr.bf16.mxu0 %v2305_v18  ;;  %v2381_v14 = vld [vmem:[%s2979_s0 + $0xf8] ss:$36 sps:$4 sm:$0xff]   ;;  %v2838_v18 = vld [vmem:[%s2980_s2] ss:$0 sm:$0xff] }
  0x3b   :  { %1103 = vmatmul.mubr.bf16.gmra.mxu0 %v2273_v58  ;;  %2091 = vmatprep.subr.bf16.mxu1 %v2306_v19  ;;  %v2351_v58 = vld [vmem:[%s2979_s0 + $0x130] ss:$36 sps:$4 sm:$0xff]  }
  0x3c   :  { %1200 = vmatmul.mubr.bf16.gmra.mxu1 %v2274_v59  ;;  %1110 = vmatprep.mubr.bf16.mxu0 %v2279_v0  ;;  %v2352_v59 = vld [vmem:[%s2979_s0 + $0x138] ss:$36 sps:$4 sm:$0xff]   ;;  %v2361_v0 = vld [vmem:[%s2979_s0 + $0x1c4] ss:$36 sps:$4 sm:$0xff]  }
  0x3d   :  { %1207 = vmatprep.mubr.bf16.mxu1 %v2281_v1  ;;  %2028 = vmatpush3.bf16.msra.mxu0 %v2307_v20  ;;  %v2363_v1 = vld [vmem:[%s2979_s0 + $0x1cc] ss:$36 sps:$4 sm:$0xff]  }
  0x3e   :  { %2092 = vmatpush3.bf16.msra.mxu1 %v2308_v21  ;;  %2029 = vmatprep.subr.bf16.mxu0 %v2315_v26 }
  0x3f   :  { %2093 = vmatprep.subr.bf16.mxu1 %v2316_v27 }
  0x41   :  { %2030 = vmatpush3.bf16.msra.mxu0 %v2317_v28 }
  0x42   :  { %2094 = vmatpush3.bf16.msra.mxu1 %v2318_v29  ;;  %2159 = vmatprep.subr.bf16.mxu0 %v2325_v32 }
  0x43   :  { %1111 = vmatmul.mubr.bf16.gmra.mxu0 %v2283_v2  ;;  %2191 = vmatprep.subr.bf16.mxu1 %v2325_v32  ;;  %v2365_v2 = vld [vmem:[%s2979_s0 + $0x1c0] ss:$36 sps:$4 sm:$0xff]  }
  0x44   :  { %1208 = vmatmul.mubr.bf16.gmra.mxu1 %v2284_v4  ;;  %1118 = vmatprep.mubr.bf16.mxu0 %v2289_v8  ;;  %v2368_v4 = vld [vmem:[%s2979_s0 + $0x20c] ss:$36 sps:$4 sm:$0xff]   ;;  %v2375_v8 = vld [vmem:[%s2979_s0 + $0x20] ss:$36 sps:$4 sm:$0xff]  }
  0x45   :  { %1215 = vmatprep.mubr.bf16.mxu1 %v2291_v9  ;;  %v2376_v9 = vld [vmem:[%s2979_s0 + $0x140] ss:$36 sps:$4 sm:$0xff]  }
  0x4b   :  { %1119 = vmatmul.mubr.bf16.gmra.mxu0 %v2293_v12  ;;  %v2379_v12 = vld [vmem:[%s2979_s0 + $0xb0] ss:$36 sps:$4 sm:$0xff]  }
  0x4c   :  { %1216 = vmatmul.mubr.bf16.gmra.mxu1 %v2294_v15  ;;  %1126 = vmatprep.mubr.bf16.mxu0 %v2299_v16  ;;  %v2382_v15 = vld [vmem:[%s2979_s0 + $0x218] ss:$36 sps:$4 sm:$0xff]  }
  0x4d   :  { %1223 = vmatprep.mubr.bf16.mxu1 %v2301_v17 }
  0x53   :  { %1127 = vmatmul.mubr.bf16.gmra.mxu0 %v2303_v22 }
  0x54   :  { %1224 = vmatmul.mubr.bf16.gmra.mxu1 %v2304_v23  ;;  %1134 = vmatprep.mubr.bf16.mxu0 %v2309_v24 }
  0x55   :  { %1231 = vmatprep.mubr.bf16.mxu1 %v2311_v25 }
  0x5b   :  { %1135 = vmatmul.mubr.bf16.gmra.mxu0 %v2313_v30 }
  0x5c   :  { %1232 = vmatmul.mubr.bf16.gmra.mxu1 %v2314_v31  ;;  %1272 = vmatprep.mubr.bf16.mxu0 %v2321_v33 }
  0x5d   :  { %1369 = vmatprep.mubr.bf16.mxu1 %v2324_v34 }
  0x63   :  { %1273 = vmatmul.mubr.bf16.vlgmr.msra.gmra.mxu0 %v2319_v35 }
  0x64   :  { %1370 = vmatmul.mubr.bf16.vlgmr.msra.gmra.mxu1 %v2322_v36  ;;  %2160 = vmatpush3.bf16.msra.mxu0 %v2325_v32 }
  0x65   :  { %2199 = vmatpush3.bf16.msra.mxu1 %v2325_v32  ;;  %1280 = vmatprep.mubr.bf16.mxu0 %v2326_v37 }
  0x66   :  { %1377 = vmatprep.mubr.bf16.mxu1 %v2328_v38  ;;  %2161 = vmatprep.subr.bf16.mxu0 %v2332_v39 }
  0x67   :  { %2192 = vmatprep.subr.bf16.mxu1 %v2332_v39 }
  0x68   :  { %2162 = vmatpush3.bf16.msra.mxu0 %v2332_v39 }
  0x69   :  { %2200 = vmatpush3.bf16.msra.mxu1 %v2332_v39  ;;  %2163 = vmatprep.subr.bf16.mxu0 %v2339_v40 }
  0x6a   :  { %2193 = vmatprep.subr.bf16.mxu1 %v2339_v40 }
  0x6b   :  { %1281 = vmatmul.mubr.bf16.gmra.mxu0 %v2330_v41 }
  0x6c   :  { %1378 = vmatmul.mubr.bf16.gmra.mxu1 %v2331_v42  ;;  %1288 = vmatprep.mubr.bf16.mxu0 %v2333_v43 }
  0x6d   :  { %1385 = vmatprep.mubr.bf16.mxu1 %v2335_v44  ;;  %2164 = vmatpush3.bf16.msra.mxu0 %v2339_v40 }
  0x6e   :  { %2201 = vmatpush3.bf16.msra.mxu1 %v2339_v40  ;;  %2165 = vmatprep.subr.bf16.mxu0 %v2346_v45 }
  0x6f   :  { %2194 = vmatprep.subr.bf16.mxu1 %v2346_v45 }
  0x71   :  { %2166 = vmatpush3.bf16.msra.mxu0 %v2346_v45 }
  0x72   :  { %2202 = vmatpush3.bf16.msra.mxu1 %v2346_v45  ;;  %2167 = vmatprep.subr.bf16.mxu0 %v2353_v46 }
  0x73   :  { %1289 = vmatmul.mubr.bf16.gmra.mxu0 %v2337_v47  ;;  %2195 = vmatprep.subr.bf16.mxu1 %v2353_v46 }
  0x74   :  { %1386 = vmatmul.mubr.bf16.gmra.mxu1 %v2338_v48  ;;  %1296 = vmatprep.mubr.bf16.mxu0 %v2340_v49 }
  0x75   :  { %1393 = vmatprep.mubr.bf16.mxu1 %v2342_v50  ;;  %2168 = vmatpush3.bf16.msra.mxu0 %v2353_v46 }
  0x76   :  { %2203 = vmatpush3.bf16.msra.mxu1 %v2353_v46  ;;  %2169 = vmatprep.subr.bf16.mxu0 %v2360_v51 }
  0x77   :  { %2196 = vmatprep.subr.bf16.mxu1 %v2360_v51 }
  0x79   :  { %2170 = vmatpush3.bf16.msra.mxu0 %v2360_v51 }
  0x7a   :  { %2204 = vmatpush3.bf16.msra.mxu1 %v2360_v51  ;;  %2171 = vmatprep.subr.bf16.mxu0 %v2367_v53 }
  0x7b   :  { %1297 = vmatmul.mubr.bf16.gmra.mxu0 %v2344_v52  ;;  %2197 = vmatprep.subr.bf16.mxu1 %v2367_v53 }
  0x7c   :  { %1394 = vmatmul.mubr.bf16.gmra.mxu1 %v2345_v54  ;;  %1304 = vmatprep.mubr.bf16.mxu0 %v2347_v55 }
  0x7d   :  { %1401 = vmatprep.mubr.bf16.mxu1 %v2349_v56  ;;  %2172 = vmatpush3.bf16.msra.mxu0 %v2367_v53 }
  0x7e   :  { %2205 = vmatpush3.bf16.msra.mxu1 %v2367_v53  ;;  %2173 = vmatprep.subr.bf16.mxu0 %v2374_v57 }
  0x7f   :  { %2198 = vmatprep.subr.bf16.mxu1 %v2374_v57 }
  0x81   :  { %2174 = vmatpush3.bf16.msra.mxu0 %v2374_v57 }
  0x82   :  { %2206 = vmatpush3.bf16.msra.mxu1 %v2374_v57 }
  0x83   :  { %1305 = vmatmul.mubr.bf16.gmra.mxu0 %v2351_v58 }
  0x84   :  { %1402 = vmatmul.mubr.bf16.gmra.mxu1 %v2352_v59  ;;  %1312 = vmatprep.mubr.bf16.mxu0 %v2354_v60 }
  0x85   :  { %1409 = vmatprep.mubr.bf16.mxu1 %v2356_v61 }
  0x8b   :  { %1313 = vmatmul.mubr.bf16.gmra.mxu0 %v2358_v62 }
  0x8c   :  { %1410 = vmatmul.mubr.bf16.gmra.mxu1 %v2359_v63  ;;  %1320 = vmatprep.mubr.bf16.mxu0 %v2361_v0 }
  0x8d   :  { %1417 = vmatprep.mubr.bf16.mxu1 %v2363_v1 }
  0x93   :  { %1321 = vmatmul.mubr.bf16.gmra.mxu0 %v2365_v2 }
  0x94   :  { %1418 = vmatmul.mubr.bf16.gmra.mxu1 %v2366_v3  ;;  %1328 = vmatprep.mubr.bf16.mxu0 %v2368_v4 }
  0x95   :  { %1425 = vmatprep.mubr.bf16.mxu1 %v2370_v5 }
  0x9b   :  { %1329 = vmatmul.mubr.bf16.gmra.mxu0 %v2372_v6 }
  0x9c   :  { %1426 = vmatmul.mubr.bf16.gmra.mxu1 %v2373_v7  ;;  %2175 = vmatprep.mubr.bf16.mxu0 %v2375_v8 }
  0x9d   :  { %2183 = vmatprep.mubr.bf16.mxu1 %v2376_v9 }
  0xa3   :  { %2176 = vmatmul.mubr.bf16.vlgmr.msra.gmra.mxu0 %v2377_v10 }
  0xa4   :  { %2184 = vmatmul.mubr.bf16.vlgmr.msra.gmra.mxu1 %v2378_v11  ;;  %2179 = vmatprep.mubr.bf16.mxu0 %v2379_v12 }
  0xa5   :  { %2187 = vmatprep.mubr.bf16.mxu1 %v2380_v13 }
  0xab   :  { %2180 = vmatmul.mubr.bf16.gmra.mxu0 %v2381_v14 }
  0xac   :  { %2188 = vmatmul.mubr.bf16.gmra.mxu1 %v2382_v15 }
  0xe3   :  { %v1903_v16 = vpop.f32.mrf.mxu0 }
  0xe4   :  { %v1967_v17 = vpop.f32.mrf.mxu1 }
  0xe5   :  { %v1904_v19 = vpop.f32.mrf.mxu0 }
  0xe6   :  { %v1905_v20 = vadd.f32 %v1904_v19, %v1903_v16  ;;  %v1968_v21 = vpop.f32.mrf.mxu1 }
  0xe7   :  { %v1969_v22 = vadd.f32 %v1968_v21, %v1967_v17  ;;  %v1906_v23 = vpop.f32.mrf.mxu0 }
  0xe8   :  { %v1081_v24 = vadd.f32 %v1905_v20, %v2838_v18  ;;  %v1970_v25 = vpop.f32.mrf.mxu1 }
  0xe9   :  { %v1907_v26 = vpop.f32.mrf.mxu0 }
  0xea   :  { %v2841_v27 = vadd.f32 %v1969_v22, %v1081_v24  ;;  %v1908_v28 = vadd.f32 %v1907_v26, %v1906_v23  ;;  %v1971_v29 = vpop.f32.mrf.mxu1 }
  0xeb   :  { %v1972_v30 = vadd.f32 %v1971_v29, %v1970_v25  ;;  %v1909_v31 = vpop.f32.mrf.mxu0 }
  0xec   :  { %v1084_v32 = vadd.f32 %v1908_v28, %v2838_v18  ;;  %v1973_v33 = vpop.f32.mrf.mxu1 }
  0xed   :  { %v1910_v34 = vpop.f32.mrf.mxu0 }
  0xee   :  { %v2844_v35 = vadd.f32 %v1972_v30, %v1084_v32  ;;  %v1911_v36 = vadd.f32 %v1910_v34, %v1909_v31  ;;  %v1974_v37 = vpop.f32.mrf.mxu1 }
  0xef   :  { %v1975_v38 = vadd.f32 %v1974_v37, %v1973_v33  ;;  %v1912_v39 = vpop.f32.mrf.mxu0 }
  0xf0   :  { %v1089_v40 = vadd.f32 %v1911_v36, %v2838_v18  ;;  %v1976_v41 = vpop.f32.mrf.mxu1 }
  0xf1   :  { %v1913_v42 = vpop.f32.mrf.mxu0 }
  0xf2   :  { %v2847_v43 = vadd.f32 %v1975_v38, %v1089_v40  ;;  %v1914_v44 = vadd.f32 %v1913_v42, %v1912_v39  ;;  %v1977_v45 = vpop.f32.mrf.mxu1 }
  0xf3   :  { %v1978_v46 = vadd.f32 %v1977_v45, %v1976_v41  ;;  %v1915_v47 = vpop.f32.mrf.mxu0 }
  0xf4   :  { %v1092_v48 = vadd.f32 %v1914_v44, %v2838_v18  ;;  %v1979_v49 = vpop.f32.mrf.mxu1 }
  0xf5   :  { %v1916_v50 = vpop.f32.mrf.mxu0 }
  0xf6   :  { %v2850_v51 = vadd.f32 %v1978_v46, %v1092_v48  ;;  %v1917_v52 = vadd.f32 %v1916_v50, %v1915_v47  ;;  %v1980_v53 = vpop.f32.mrf.mxu1 }
  0xf7   :  { %v1981_v54 = vadd.f32 %v1980_v53, %v1979_v49  ;;  %v1918_v55 = vpop.f32.mrf.mxu0 }
  0xf8   :  { %v1097_v56 = vadd.f32 %v1917_v52, %v2838_v18  ;;  %v1982_v57 = vpop.f32.mrf.mxu1 }
  0xf9   :  { %v1919_v58 = vpop.f32.mrf.mxu0 }
  0xfa   :  { %v2853_v59 = vadd.f32 %v1981_v54, %v1097_v56  ;;  %v1920_v60 = vadd.f32 %v1919_v58, %v1918_v55  ;;  %v1983_v61 = vpop.f32.mrf.mxu1 }
  0xfb   :  { %v1984_v62 = vadd.f32 %v1983_v61, %v1982_v57  ;;  %v1921_v63 = vpop.f32.mrf.mxu0 }
  0xfc   :  { %v1100_v0 = vadd.f32 %v1920_v60, %v2838_v18  ;;  %v1985_v1 = vpop.f32.mrf.mxu1 }
  0xfd   :  { %v1922_v2 = vpop.f32.mrf.mxu0 }
  0xfe   :  { %v2856_v3 = vadd.f32 %v1984_v62, %v1100_v0  ;;  %v1923_v4 = vadd.f32 %v1922_v2, %v1921_v63  ;;  %v1986_v5 = vpop.f32.mrf.mxu1 }
  0xff   :  { %v1987_v6 = vadd.f32 %v1986_v5, %v1985_v1  ;;  %v1924_v7 = vpop.f32.mrf.mxu0 }
 0x100   :  { %v1105_v8 = vadd.f32 %v1923_v4, %v2838_v18  ;;  %v1988_v9 = vpop.f32.mrf.mxu1 }
 0x101   :  { %v1925_v10 = vpop.f32.mrf.mxu0 }
 0x102   :  { %v2859_v11 = vadd.f32 %v1987_v6, %v1105_v8  ;;  %v1926_v12 = vadd.f32 %v1925_v10, %v1924_v7  ;;  %v1989_v13 = vpop.f32.mrf.mxu1 }
 0x103   :  { %v1990_v14 = vadd.f32 %v1989_v13, %v1988_v9  ;;  %v1927_v15 = vpop.f32.mrf.mxu0 }
 0x104   :  { %v1108_v16 = vadd.f32 %v1926_v12, %v2838_v18  ;;  %v1991_v17 = vpop.f32.mrf.mxu1 }
 0x105   :  { %v1928_v19 = vpop.f32.mrf.mxu0 }
 0x106   :  { %v2862_v20 = vadd.f32 %v1990_v14, %v1108_v16  ;;  %v1929_v21 = vadd.f32 %v1928_v19, %v1927_v15  ;;  %v1992_v22 = vpop.f32.mrf.mxu1 }
 0x107   :  { %v1993_v23 = vadd.f32 %v1992_v22, %v1991_v17  ;;  %v1930_v24 = vpop.f32.mrf.mxu0 }
 0x108   :  { %v1113_v25 = vadd.f32 %v1929_v21, %v2838_v18  ;;  %v1994_v26 = vpop.f32.mrf.mxu1 }
 0x109   :  { %v1931_v28 = vpop.f32.mrf.mxu0 }
 0x10a   :  { %v2865_v29 = vadd.f32 %v1993_v23, %v1113_v25  ;;  %v1932_v30 = vadd.f32 %v1931_v28, %v1930_v24  ;;  %v1995_v31 = vpop.f32.mrf.mxu1 }
 0x10b   :  { %v1996_v32 = vadd.f32 %v1995_v31, %v1994_v26  ;;  %v1933_v33 = vpop.f32.mrf.mxu0 }
 0x10c   :  { %v1116_v34 = vadd.f32 %v1932_v30, %v2838_v18  ;;  %v1997_v36 = vpop.f32.mrf.mxu1 }
 0x10d   :  { %v1934_v37 = vpop.f32.mrf.mxu0 }
 0x10e   :  { %v2868_v38 = vadd.f32 %v1996_v32, %v1116_v34  ;;  %v1935_v39 = vadd.f32 %v1934_v37, %v1933_v33  ;;  %v1998_v40 = vpop.f32.mrf.mxu1 }
 0x10f   :  { %v1999_v41 = vadd.f32 %v1998_v40, %v1997_v36  ;;  %v1936_v42 = vpop.f32.mrf.mxu0 }
 0x110   :  { %2982 = vst [vmem:[#allocation2_spill] sm:$0xff] %v2868_v38  ;;  %v1121_v44 = vadd.f32 %v1935_v39, %v2838_v18  ;;  %v2000_v45 = vpop.f32.mrf.mxu1 }
 0x111   :  { %v1937_v46 = vpop.f32.mrf.mxu0 }
 0x112   :  { %v2871_v47 = vadd.f32 %v1999_v41, %v1121_v44  ;;  %v1938_v48 = vadd.f32 %v1937_v46, %v1936_v42  ;;  %v2001_v49 = vpop.f32.mrf.mxu1 }
 0x113   :  { %v2002_v50 = vadd.f32 %v2001_v49, %v2000_v45  ;;  %v1939_v52 = vpop.f32.mrf.mxu0 }
 0x114   :  { %2983 = vst [vmem:[#allocation3_spill] sm:$0xff] %v2871_v47  ;;  %v1124_v53 = vadd.f32 %v1938_v48, %v2838_v18  ;;  %v2003_v54 = vpop.f32.mrf.mxu1 }
 0x115   :  { %v1940_v55 = vpop.f32.mrf.mxu0 }
 0x116   :  { %v2874_v56 = vadd.f32 %v2002_v50, %v1124_v53  ;;  %v1941_v57 = vadd.f32 %v1940_v55, %v1939_v52  ;;  %v2004_v58 = vpop.f32.mrf.mxu1 }
 0x117   :  { %v2005_v60 = vadd.f32 %v2004_v58, %v2003_v54  ;;  %v1942_v61 = vpop.f32.mrf.mxu0 }
 0x118   :  { %2984 = vst [vmem:[#allocation4_spill] sm:$0xff] %v2874_v56  ;;  %v1129_v62 = vadd.f32 %v1941_v57, %v2838_v18  ;;  %v2006_v63 = vpop.f32.mrf.mxu1 }
 0x119   :  { %v1943_v0 = vpop.f32.mrf.mxu0 }
 0x11a   :  { %v2877_v1 = vadd.f32 %v2005_v60, %v1129_v62  ;;  %v1944_v2 = vadd.f32 %v1943_v0, %v1942_v61  ;;  %v2007_v4 = vpop.f32.mrf.mxu1 }
 0x11b   :  { %v2008_v5 = vadd.f32 %v2007_v4, %v2006_v63  ;;  %v1945_v6 = vpop.f32.mrf.mxu0 }
 0x11c   :  { %2985 = vst [vmem:[#allocation5_spill] sm:$0xff] %v2877_v1  ;;  %v1132_v7 = vadd.f32 %v1944_v2, %v2838_v18  ;;  %v2009_v8 = vpop.f32.mrf.mxu1 }
 0x11d   :  { %v1946_v9 = vpop.f32.mrf.mxu0 }
 0x11e   :  { %v2880_v10 = vadd.f32 %v2008_v5, %v1132_v7  ;;  %v1947_v12 = vadd.f32 %v1946_v9, %v1945_v6  ;;  %v2010_v13 = vpop.f32.mrf.mxu1 }
 0x11f   :  { %v2011_v14 = vadd.f32 %v2010_v13, %v2009_v8  ;;  %v1948_v15 = vpop.f32.mrf.mxu0 }
 0x120   :  { %2986 = vst [vmem:[#allocation6_spill] sm:$0xff] %v2880_v10  ;;  %v1137_v16 = vadd.f32 %v1947_v12, %v2838_v18  ;;  %v2012_v17 = vpop.f32.mrf.mxu1 }
 0x121   :  { %v1949_v19 = vpop.f32.mrf.mxu0 }
 0x122   :  { %v2883_v21 = vadd.f32 %v2011_v14, %v1137_v16  ;;  %v1950_v22 = vadd.f32 %v1949_v19, %v1948_v15  ;;  %v2013_v23 = vpop.f32.mrf.mxu1 }
 0x123   :  { %v2014_v24 = vadd.f32 %v2013_v23, %v2012_v17  ;;  %v2031_v25 = vpop.f32.mrf.mxu0 }
 0x124   :  { %2987 = vst [vmem:[#allocation7_spill] sm:$0xff] %v2883_v21  ;;  %v1140_v26 = vadd.f32 %v1950_v22, %v2838_v18  ;;  %v2095_v28 = vpop.f32.mrf.mxu1 }
 0x125   :  { %v2032_v30 = vpop.f32.mrf.mxu0 }
 0x126   :  { %v2886_v31 = vadd.f32 %v2014_v24, %v1140_v26  ;;  %v2033_v32 = vadd.f32 %v2032_v30, %v2031_v25  ;;  %v2096_v33 = vpop.f32.mrf.mxu1 }
 0x127   :  { %v2034_v34 = vpop.f32.mrf.mxu0  ;;  %v2097_v37 = vadd.f32 %v2096_v33, %v2095_v28 }
 0x128   :  { %2988 = vst [vmem:[#allocation8_spill] sm:$0xff] %v2886_v31  ;;  %v1275_v36 = vadd.f32 %v2033_v32, %v2841_v27  ;;  %v2098_v39 = vpop.f32.mrf.mxu1 }
 0x129   :  { %v2035_v40 = vpop.f32.mrf.mxu0 }
 0x12a   :  { %v2099_v41 = vpop.f32.mrf.mxu1  ;;  %v2889_v42 = vadd.f32 %v2097_v37, %v1275_v36  ;;  %v2036_v36 = vadd.f32 %v2035_v40, %v2034_v34 }
 0x12b   :  { %v2037_v44 = vpop.f32.mrf.mxu0  ;;  %v2100_v1 = vadd.f32 %v2099_v41, %v2098_v39 }
 0x12c   :  { %2989 = vst [vmem:[#allocation9_spill] sm:$0xff] %v2889_v42  ;;  %v2101_v45 = vpop.f32.mrf.mxu1 }
 0x12d   :  { %v2038_v46 = vpop.f32.mrf.mxu0 }
 0x12e   :  { %v2102_v48 = vpop.f32.mrf.mxu1  ;;  %v2039_v37 = vadd.f32 %v2038_v46, %v2037_v44 }
 0x12f   :  { %v2040_v18 = vpop.f32.mrf.mxu0 }
 0x130   :  { %v2104_v49 = vpop.f32.mrf.mxu1  ;;  %v1283_v56 = vadd.f32 %v2039_v37, %v2847_v43 }
 0x131   :  { %v2041_v50 = vpop.f32.mrf.mxu0 }
 0x132   :  { %v2105_v52 = vpop.f32.mrf.mxu1  ;;  %v2042_v31 = vadd.f32 %v2041_v50, %v2040_v18 }
 0x133   :  { %v2043_v53 = vpop.f32.mrf.mxu0  ;;  %v2106_v47 = vadd.f32 %v2105_v52, %v2104_v49 }
 0x134   :  { %v2107_v54 = vpop.f32.mrf.mxu1  ;;  %v1286_v38 = vadd.f32 %v2042_v31, %v2850_v51 }
 0x135   :  { %v2044_v55 = vpop.f32.mrf.mxu0 }
 0x136   :  { %v2108_v57 = vpop.f32.mrf.mxu1  ;;  %v2045_v10 = vadd.f32 %v2044_v55, %v2043_v53 }
 0x137   :  { %v2046_v58 = vpop.f32.mrf.mxu0 }
 0x138   :  { %v2891_v27 = vpop.f32.mrf.mxu1  ;;  %v1291_v34 = vadd.f32 %v2045_v10, %v2853_v59 }
 0x139   :  { %v2047_v60 = vpop.f32.mrf.mxu0 }
 0x13a   :  { %v2111_v61 = vpop.f32.mrf.mxu1  ;;  %v2048_v46 = vadd.f32 %v2047_v60, %v2046_v58  ;;  %v2999_v60 = vld [vmem:[#allocation2_spill] sm:$0xff] }
 0x13b   :  { %v2049_v62 = vpop.f32.mrf.mxu0  ;;  %v2913_v59 = vadd.f32 %v2111_v61, %v2891_v27 }
 0x13c   :  { %v2113_v63 = vpop.f32.mrf.mxu1 }
 0x13d   :  { %v2050_v0 = vpop.f32.mrf.mxu0 }
 0x13e   :  { %v2114_v2 = vpop.f32.mrf.mxu1 }
 0x13f   :  { %v2052_v4 = vpop.f32.mrf.mxu0 }
 0x140   :  { %v2893_v5 = vpop.f32.mrf.mxu1 }
 0x141   :  { %2990 = vst [vmem:[#allocation10_spill] sm:$0xff] %v2893_v5  ;;  %v2053_v6 = vpop.f32.mrf.mxu0  ;;  %v2103_v5 = vadd.f32 %v2102_v48, %v2101_v45  ;;  %v1383_v45 = vadd.f32 %v2106_v47, %v1286_v38 }
 0x142   :  { %v2895_v7 = vpop.f32.mrf.mxu1  ;;  %v2054_v40 = vadd.f32 %v2053_v6, %v2052_v4 }
 0x143   :  { %2991 = vst [vmem:[#allocation11_spill] sm:$0xff] %v2895_v7  ;;  %v2055_v8 = vpop.f32.mrf.mxu0  ;;  %v1380_v31 = vadd.f32 %v2103_v5, %v1283_v56 }
 0x144   :  { %v2897_v9 = vpop.f32.mrf.mxu1  ;;  %v1302_v10 = vadd.f32 %v2054_v40, %v2862_v20  ;;  %v3000_v20 = vld [vmem:[#allocation4_spill] sm:$0xff] }
 0x145   :  { %2992 = vst [vmem:[#allocation12_spill] sm:$0xff] %v2897_v9  ;;  %v2056_v12 = vpop.f32.mrf.mxu0 }
 0x146   :  { %v2899_v13 = vpop.f32.mrf.mxu1  ;;  %v2057_v50 = vadd.f32 %v2056_v12, %v2055_v8 }
 0x147   :  { %2993 = vst [vmem:[#allocation13_spill] sm:$0xff] %v2899_v13  ;;  %v2058_v14 = vpop.f32.mrf.mxu0 }
 0x148   :  { %v2901_v15 = vpop.f32.mrf.mxu1  ;;  %v2997_v47 = vld [vmem:[#allocation10_spill] sm:$0xff] }
 0x149   :  { %2994 = vst [vmem:[#allocation14_spill] sm:$0xff] %v2901_v15  ;;  %v2059_v16 = vpop.f32.mrf.mxu0  ;;  %v2051_v15 = vadd.f32 %v2050_v0, %v2049_v62  ;;  %v2109_v62 = vadd.f32 %v2108_v57, %v2107_v54  ;;  %v2115_v0 = vadd.f32 %v2114_v2, %v2113_v63  ;;  %v2919_v54 = vadd.f32 %v2048_v46, %v2856_v3  ;;  %v2996_v57 = vld [vmem:[#allocation3_spill] sm:$0xff]  ;;  %v3001_v2 = vld [vmem:[#allocation5_spill] sm:$0xff] }
 0x14a   :  { %v2903_v17 = vpop.f32.mrf.mxu1 }
 0x14b   :  { %2995 = vst [vmem:[#allocation15_spill] sm:$0xff] %v2903_v17  ;;  %v2061_v19 = vpop.f32.mrf.mxu0  ;;  %v1278_v17 = vadd.f32 %v2036_v36, %v2844_v35  ;;  %v1299_v18 = vadd.f32 %v2051_v15, %v2859_v11  ;;  %v2060_v35 = vadd.f32 %v2059_v16, %v2058_v14  ;;  %v2916_v52 = vadd.f32 %v2109_v62, %v1291_v34  ;;  %v3004_v14 = vld [vmem:[#allocation7_spill] sm:$0xff] }
 0x14c   :  { %v2125_v22 = vpop.f32.mrf.mxu1  ;;  %v3002_v6 = vld [vmem:[#allocation12_spill] sm:$0xff] }
 0x14d   :  { %v2062_v23 = vpop.f32.mrf.mxu0  ;;  %v2910_v48 = vadd.f32 %v2100_v1, %v1278_v17  ;;  %v2923_v38 = vadd.f32 %v2115_v0, %v1299_v18  ;;  %v2998_v1 = vld [vmem:[#allocation11_spill] sm:$0xff]  ;;  %v1310_v61 = vadd.f32 %v2060_v35, %v2999_v60  ;;  %v3009_v0 = vld [vmem:[#allocation8_spill] sm:$0xff] }
 0x14e   :  { %v2126_v24 = vpop.f32.mrf.mxu1  ;;  %v2063_v53 = vadd.f32 %v2062_v23, %v2061_v19  ;;  %v2118_v27 = vadd.f32 %v2998_v1, %v2997_v47  ;;  %v3003_v3 = vld [vmem:[#allocation13_spill] sm:$0xff] }
 0x14f   :  { %v2064_v25 = vpop.f32.mrf.mxu0  ;;  %v2121_v8 = vadd.f32 %v3003_v3, %v3002_v6  ;;  %v2127_v12 = vadd.f32 %v2126_v24, %v2125_v22  ;;  %v3007_v24 = vld [vmem:[#allocation6_spill] sm:$0xff] }
 0x150   :  { %v2128_v26 = vpop.f32.mrf.mxu1  ;;  %v1315_v58 = vadd.f32 %v2063_v53, %v2996_v57  ;;  %v3005_v17 = vld [vmem:[#allocation14_spill] sm:$0xff]  ;;  %v2935_v36 = vadd.f32 %v2118_v27, %v1302_v10 }
 0x151   :  { %v2065_v28 = vpop.f32.mrf.mxu0 }
 0x152   :  { %v2129_v30 = vpop.f32.mrf.mxu1  ;;  %v2066_v39 = vadd.f32 %v2065_v28, %v2064_v25  ;;  %v3006_v19 = vld [vmem:[#allocation15_spill] sm:$0xff]  ;;  %v1412_v46 = vadd.f32 %v2127_v12, %v1315_v58 }
 0x153   :  { %v2067_v32 = vpop.f32.mrf.mxu0  ;;  %v2124_v23 = vadd.f32 %v3006_v19, %v3005_v17  ;;  %v2130_v25 = vadd.f32 %v2129_v30, %v2128_v26 }
 0x154   :  { %v2131_v33 = vpop.f32.mrf.mxu1  ;;  %v1318_v63 = vadd.f32 %v2066_v39, %v3000_v20  ;;  %v3008_v39 = vld [vmem:[#allocation9_spill] sm:$0xff] }
 0x155   :  { %v2068_v42 = vpop.f32.mrf.mxu0 }
 0x156   :  { %v2132_v21 = vpop.f32.mrf.mxu1  ;;  %v2069_v41 = vadd.f32 %v2068_v42, %v2067_v32  ;;  %v1307_v42 = vadd.f32 %v2057_v50, %v2865_v29  ;;  %v1415_v22 = vadd.f32 %v2130_v25, %v1318_v63 }
 0x157   :  { %v2070_v13 = vpop.f32.mrf.mxu0  ;;  %v2133_v28 = vadd.f32 %v2132_v21, %v2131_v33 }
 0x158   :  { %v2134_v9 = vpop.f32.mrf.mxu1  ;;  %v1323_v4 = vadd.f32 %v2069_v41, %v3001_v2  ;;  %v1404_v18 = vadd.f32 %v2121_v8, %v1307_v42 }
 0x159   :  { %v2071_v7 = vpop.f32.mrf.mxu0 }
 0x15a   :  { %v2135_v44 = vpop.f32.mrf.mxu1  ;;  %v2072_v29 = vadd.f32 %v2071_v7, %v2070_v13  ;;  %v1407_v7 = vadd.f32 %v2124_v23, %v1310_v61  ;;  %v1420_v13 = vadd.f32 %v2133_v28, %v1323_v4 }
 0x15b   :  { %v2073_v55 = vpop.f32.mrf.mxu0  ;;  %v2940_v62 = vadd.f32 %v2135_v44, %v2134_v9 }
 0x15c   :  { %v2137_v43 = vpop.f32.mrf.mxu1 }
 0x15d   :  { %v2074_v51 = vpop.f32.mrf.mxu0 }
 0x15e   :  { %v2075_v11 = vadd.f32 %v2074_v51, %v2073_v55  ;;  %v2138_v49 = vpop.f32.mrf.mxu1  ;;  %v2938_v55 = vadd.f32 %v2072_v29, %v3007_v24 }
 0x15f   :  { %v2076_v56 = vpop.f32.mrf.mxu0  ;;  %v2139_v37 = vadd.f32 %v2138_v49, %v2137_v43 }
 0x160   :  { %v2140_v5 = vpop.f32.mrf.mxu1  ;;  %v1331_v15 = vadd.f32 %v2075_v11, %v3004_v14 }
 0x161   :  { %v2077_v16 = vpop.f32.mrf.mxu0 }
 0x162   :  { %v2141_v32 = vpop.f32.mrf.mxu1  ;;  %v2078_v34 = vadd.f32 %v2077_v16, %v2076_v56  ;;  %v1428_v30 = vadd.f32 %v2139_v37, %v1331_v15 }
 0x163   :  { %v2177_v40 = vpop.f32.mrf.mxu0  ;;  %v2142_v33 = vadd.f32 %v2141_v32, %v2140_v5 }
 0x164   :  { %v1477_v50 = vadd.f32 %v2177_v40, %v1380_v31  ;;  %v2185_v53 = vpop.f32.mrf.mxu1  ;;  %v1334_v51 = vadd.f32 %v2078_v34, %v3009_v0 }
 0x165   :  { %v1509_v26 = vadd.f32 %v2185_v53, %v1412_v46  ;;  %v1468_v21 = vpop.f32.mrf.mxu0  ;;  %v1423_v53 = vadd.f32 %v2940_v62, %v2938_v55 }
 0x166   :  { %vm1533_vm0 = vcmp.gt.f32.partialorder %v1477_v50, 0.0  ;;  %v1549_v35 = vmul.f32 0.1, %v1477_v50  ;;  %v1469_v41 = vadd.f32 %v1468_v21, %v3008_v39  ;;  %v1500_v43 = vpop.f32.mrf.mxu1 }
 0x167   :  { %vm1541_vm1 = vcmp.gt.f32.partialorder %v1509_v26, 0.0  ;;  %v1557_v31 = vmul.f32 0.1, %v1509_v26  ;;  %v1501_v10 = vadd.f32 %v1500_v43, %v1404_v18  ;;  %v2178_v11 = vpop.f32.mrf.mxu0  ;;  %v1431_v18 = vadd.f32 %v2142_v33, %v1334_v51 }
 0x168   :  { %v1565_v49 = vsel %vm1533_vm0, %v1477_v50, %v1549_v35  ;;  %vm1531_vm2 = vcmp.gt.f32.partialorder %v1469_v41, 0.0  ;;  %v1547_v42 = vmul.f32 0.1, %v1469_v41  ;;  %v1480_v9 = vadd.f32 %v2178_v11, %v1383_v45  ;;  %v2186_v44 = vpop.f32.mrf.mxu1 }
 0x169   :  { %v1573_v57 = vsel %vm1541_vm1, %v1509_v26, %v1557_v31  ;;  %vm1539_vm3 = vcmp.gt.f32.partialorder %v1501_v10, 0.0  ;;  %v1555_v58 = vmul.f32 0.1, %v1501_v10  ;;  %v1512_v56 = vadd.f32 %v2186_v44, %v1415_v22  ;;  %v1471_v47 = vpop.f32.mrf.mxu0 }
 0x16a   :  { %v1563_v1 = vsel %vm1531_vm2, %v1469_v41, %v1547_v42  ;;  %vm1534_vm4 = vcmp.gt.f32.partialorder %v1480_v9, 0.0  ;;  %v1550_v27 = vmul.f32 0.1, %v1480_v9  ;;  %v1472_v60 = vadd.f32 %v1471_v47, %v2910_v48  ;;  %v1503_v61 = vpop.f32.mrf.mxu1 }
 0x16b   :  { %v1571_v20 = vsel %vm1539_vm3, %v1501_v10, %v1555_v58  ;;  %vm1542_vm5 = vcmp.gt.f32.partialorder %v1512_v56, 0.0  ;;  %v1558_v63 = vmul.f32 0.1, %v1512_v56  ;;  %v1504_v2 = vadd.f32 %v1503_v61, %v1407_v7  ;;  %v2181_v4 = vpop.f32.mrf.mxu0 }
 0x16c   :  { %v1566_v5 = vsel %vm1534_vm4, %v1480_v9, %v1550_v27  ;;  %vm1532_vm6 = vcmp.gt.f32.partialorder %v1472_v60, 0.0  ;;  %v1548_v45 = vmul.f32 0.1, %v1472_v60  ;;  %v1493_v6 = vadd.f32 %v2181_v4, %v2923_v38  ;;  %v2189_v3 = vpop.f32.mrf.mxu1 }
 0x16d   :  { %v1848_v8 = vpack.c.bf16 %v1566_v5, %v1565_v49  ;;  %v1574_v12 = vsel %vm1542_vm5, %v1512_v56, %v1558_v63  ;;  %vm1540_vm7 = vcmp.gt.f32.partialorder %v1504_v2, 0.0  ;;  %v1556_v29 = vmul.f32 0.1, %v1504_v2  ;;  %v1484_v14 = vpop.f32.mrf.mxu0 }
 0x16e   :  { %v1868_v15 = vpack.c.bf16 %v1574_v12, %v1573_v57  ;;  %v1564_v16 = vsel %vm1532_vm6, %v1472_v60, %v1548_v45  ;;  %vm1537_vm8 = vcmp.gt.f32.partialorder %v1493_v6, 0.0  ;;  %v1553_v48 = vmul.f32 0.1, %v1493_v6  ;;  %v1516_v17 = vpop.f32.mrf.mxu1 }
 0x16f   :  { %1880 = vst [vmem:[%s2981_s3 + $0x8] sm:$0xff] %v1848_v8   ;;  %v1843_v19 = vpack.c.bf16 %v1564_v16, %v1563_v1  ;;  %v1572_v23 = vsel %vm1540_vm7, %v1504_v2, %v1556_v29  ;;  %v1525_v25 = vadd.f32 %v2189_v3, %v1428_v30  ;;  %v1485_v38 = vadd.f32 %v1484_v14, %v2916_v52  ;;  %v2182_v28 = vpop.f32.mrf.mxu0 }
 0x170   :  { %1884 = vst [vmem:[%s2981_s3 + $0x28] sm:$0xff] %v1868_v15   ;;  %v1863_v32 = vpack.c.bf16 %v1572_v23, %v1571_v20  ;;  %v1517_v37 = vadd.f32 %v1516_v17, %v1420_v13  ;;  %v1496_v34 = vadd.f32 %v2182_v28, %v2935_v36  ;;  %v2190_v40 = vpop.f32.mrf.mxu1  ;;  %v1569_v46 = vsel %vm1537_vm8, %v1493_v6, %v1553_v48 }
 0x171   :  { %1844 = vst [vmem:[%s2981_s3] sm:$0xff] %v1843_v19   ;;  %v1391_v50 = vadd.f32 %v2913_v59, %v2919_v54  ;;  %v1487_v52 = vpop.f32.mrf.mxu0  ;;  %vm1545_vm9 = vcmp.gt.f32.partialorder %v1525_v25, 0.0  ;;  %v1561_v36 = vmul.f32 0.1, %v1525_v25  ;;  %vm1535_vm11 = vcmp.gt.f32.partialorder %v1485_v38, 0.0 }
 0x172   :  { %1883 = vst [vmem:[%s2981_s3 + $0x20] sm:$0xff] %v1863_v32   ;;  %vm1538_vm10 = vcmp.gt.f32.partialorder %v1496_v34, 0.0  ;;  %v1554_v22 = vmul.f32 0.1, %v1496_v34  ;;  %v1519_v7 = vpop.f32.mrf.mxu1  ;;  %v1551_v13 = vmul.f32 0.1, %v1485_v38  ;;  %v1528_v24 = vadd.f32 %v2190_v40, %v1431_v18 }
 0x173   :  { %v1488_v26 = vadd.f32 %v1487_v52, %v1391_v50  ;;  %vm1543_vm12 = vcmp.gt.f32.partialorder %v1517_v37, 0.0  ;;  %v1559_v21 = vmul.f32 0.1, %v1517_v37  ;;  %v1520_v54 = vadd.f32 %v1519_v7, %v1423_v53 }
 0x174   :  { %v1570_v59 = vsel %vm1538_vm10, %v1496_v34, %v1554_v22  ;;  %vm1546_vm13 = vcmp.gt.f32.partialorder %v1528_v24, 0.0  ;;  %v1562_v55 = vmul.f32 0.1, %v1528_v24  ;;  %v1577_v35 = vsel %vm1545_vm9, %v1525_v25, %v1561_v36 }
 0x175   :  { %v1858_v30 = vpack.c.bf16 %v1570_v59, %v1569_v46  ;;  %vm1536_vm14 = vcmp.gt.f32.partialorder %v1488_v26, 0.0  ;;  %v1552_v62 = vmul.f32 0.1, %v1488_v26  ;;  %vm1544_vm15 = vcmp.gt.f32.partialorder %v1520_v54, 0.0 }
 0x176   :  { %v1560_v33 = vmul.f32 0.1, %v1520_v54  ;;  %v1567_v39 = vsel %vm1535_vm11, %v1485_v38, %v1551_v13  ;;  %v1578_v41 = vsel %vm1546_vm13, %v1528_v24, %v1562_v55  ;;  %v1575_v43 = vsel %vm1543_vm12, %v1517_v37, %v1559_v21 }
 0x177   :  { %1882 = vst [vmem:[%s2981_s3 + $0x18] sm:$0xff] %v1858_v30   ;;  %v1878_v0 = vpack.c.bf16 %v1578_v41, %v1577_v35  ;;  %v1568_v51 = vsel %vm1536_vm14, %v1488_v26, %v1552_v62 }
 0x178   :  { %v1576_v31 = vsel %vm1544_vm15, %v1520_v54, %v1560_v33  ;;  %v1853_v10 = vpack.c.bf16 %v1568_v51, %v1567_v39 }
 0x179   :  { %v1873_v11 = vpack.c.bf16 %v1576_v31, %v1575_v43  ;;  %1886 = vst [vmem:[%s2981_s3 + $0x38] sm:$0xff] %v1878_v0  }
 0x17a   :  { %1881 = vst [vmem:[%s2981_s3 + $0x10] sm:$0xff] %v1853_v10  }
 0x17b   :  { %1885 = vst [vmem:[%s2981_s3 + $0x30] sm:$0xff] %v1873_v11  }

// kernel: _forward.11
= control target key start
LH: loop header
LB: loop body
LE: loop exit
PB: predicated region body
PF: predicated region fallthrough
CT: control target
= control target key end

     0   :  { %s275_s1 = inlined_call_operand.vmem [shape: bf16[128,128], index: 1, kind: input, shape index: {}]   ;;  %s276_s0 = inlined_call_operand.vmem [shape: bf16[32,128], index: 0, kind: input, shape index: {}]   ;;  %s277_s2 = inlined_call_operand.vmem [shape: f32[1,128], index: 2, kind: input, shape index: {}]   ;;  %s278_s3 = inlined_call_operand.vmem [shape: f32[32,128], index: 3, kind: output, shape index: {}]  }
   0x1   :  { %v200_v0 = vld [vmem:[%s275_s1 + $0x38] sm:$0xff]   ;;  %v201_v1 = vld [vmem:[%s275_s1 + $0x30] sm:$0xff]   ;;  %v202_v2 = vld [vmem:[%s275_s1 + $0x28] sm:$0xff]  }
   0x2   :  { %180 = vmatprep.subr.bf16.mxu0 %v200_v0  ;;  %v203_v3 = vld [vmem:[%s275_s1 + $0x20] sm:$0xff]   ;;  %v204_v5 = vld [vmem:[%s275_s1 + $0x18] sm:$0xff]   ;;  %v205_v6 = vld [vmem:[%s275_s1 + $0x10] sm:$0xff]  }
   0x3   :  { %181 = vmatpush3.bf16.msra.mxu0 %v200_v0  ;;  %v208_v4 = vld [vmem:[%s276_s0] sm:$0xff]   ;;  %v206_v7 = vld [vmem:[%s275_s1 + $0x8] sm:$0xff]  }
   0x4   :  { %182 = vmatprep.subr.bf16.mxu0 %v201_v1  ;;  %196 = vmatprep.mubr.bf16.mxu0 %v208_v4  ;;  %v207_v8 = vld [vmem:[%s275_s1] sm:$0xff]   ;;  %v209_v9 = vld [vmem:[%s276_s0 + $0x8] sm:$0xff]  }
   0x5   :  { %v159_v10 = vld [vmem:[%s277_s2] ss:$0 sm:$0xff] }
   0x7   :  { %183 = vmatpush3.bf16.msra.mxu0 %v201_v1 }
   0x8   :  { %184 = vmatprep.subr.bf16.mxu0 %v202_v2 }
   0xb   :  { %185 = vmatpush3.bf16.msra.mxu0 %v202_v2 }
   0xc   :  { %186 = vmatprep.subr.bf16.mxu0 %v203_v3 }
   0xf   :  { %187 = vmatpush3.bf16.msra.mxu0 %v203_v3 }
  0x10   :  { %188 = vmatprep.subr.bf16.mxu0 %v204_v5 }
  0x13   :  { %189 = vmatpush3.bf16.msra.mxu0 %v204_v5 }
  0x14   :  { %190 = vmatprep.subr.bf16.mxu0 %v205_v6 }
  0x17   :  { %191 = vmatpush3.bf16.msra.mxu0 %v205_v6 }
  0x18   :  { %192 = vmatprep.subr.bf16.mxu0 %v206_v7 }
  0x1b   :  { %193 = vmatpush3.bf16.msra.mxu0 %v206_v7 }
  0x1c   :  { %194 = vmatprep.subr.bf16.mxu0 %v207_v8 }
  0x1f   :  { %195 = vmatpush3.bf16.msra.mxu0 %v207_v8 }
  0x22   :  { %197 = vmatmul.mubr.bf16.vlgmr.msra.gmra.mxu0 %v209_v9 }
  0xe2   :  { %v198_v11 = vpop.f32.mrf.mxu0 }
  0xe3   :  { %v145_v12 = vadd.f32 %v198_v11, %v159_v10 }
  0xe4   :  { %v136_v13 = vpop.f32.mrf.mxu0 }
  0xe5   :  { %153 = vst [vmem:[%s278_s3 + $0x10] sm:$0xff] %v145_v12  ;;  %v137_v14 = vadd.f32 %v159_v10, %v136_v13 }
  0xe6   :  { %v199_v15 = vpop.f32.mrf.mxu0 }
  0xe7   :  { %151 = vst [vmem:[%s278_s3] sm:$0xff] %v137_v14  ;;  %v148_v16 = vadd.f32 %v199_v15, %v159_v10 }
  0xe8   :  { %v139_v17 = vpop.f32.mrf.mxu0 }
  0xe9   :  { %154 = vst [vmem:[%s278_s3 + $0x18] sm:$0xff] %v148_v16  ;;  %v140_v18 = vadd.f32 %v159_v10, %v139_v17 }
  0xeb   :  { %152 = vst [vmem:[%s278_s3 + $0x8] sm:$0xff] %v140_v18 }

// kernel: _forward.7
= control target key start
LH: loop header
LB: loop body
LE: loop exit
PB: predicated region body
PF: predicated region fallthrough
CT: control target
= control target key end

     0   :  { %s7097_s12 = smov 0   ;;  %s7099_s13 = smov 0   ;;  %s9786_s0 = inlined_call_operand.vmem [shape: bf16[2,18,18,128], index: 0, kind: input, shape index: {}]   ;;  %s9787_s1 = inlined_call_operand.vmem [shape: bf16[9,128,128], index: 1, kind: input, shape index: {}]   ;;  %s9788_s2 = inlined_call_operand.vmem [shape: f32[1,128], index: 2, kind: input, shape index: {}]   ;;  %s9789_s3 = inlined_call_operand.vmem [shape: bf16[2,16,16,128], index: 3, kind: output, shape index: {}]  }
   0x1   :  { %s7101_s14 = smov 0  }
   0x2 LB: > { %s32_s15 = sadd.s32 1, %s7071_s13  ;;  %p5484_p0 = scmp.ge.s32.totalorder %s7075_s14, 1  ;;  %s7075_s14 = sphi %s7101_s14, %s13_s14   ;;  %s7071_s13 = sphi %s7099_s13, %s9984_s13   ;;  %s7067_s12 = sphi %s7097_s12, %s9983_s12  }
   0x3   : > { %p34_p1 = scmp.ge.s32.totalorder %s32_s15, 2  ;;  %p187_p2 = scmp.lt.s32.totalorder %s7075_s14, 3 }
   0x5   : > { %s9986_s15 = smov (%p34_p1, %s32_s15), 0  ;;  %p188_p3 = pnand %p5484_p0, %p187_p2 }
   0x7   : > { %191 = sbr.rel (%p188_p3) target bundleno = 560 (0x230), region = 32 }
   0xc   : > { %v6924_v0 = vld [vmem:[%s9787_s1 + $0x78] sm:$0xff]   ;;  %p228_p4 = scmp.lt.s32.totalorder %s7067_s12, 1  ;;  %v6925_v1 = vld [vmem:[%s9787_s1 + $0x70] sm:$0xff]   ;;  %v6926_v2 = vld [vmem:[%s9787_s1 + $0x68] sm:$0xff]   ;;  %vm321_vm0 = vsmask.f32 3328 }
   0xd   : > { %6451 = vmatprep.subr.bf16.mxu0 %v6924_v0  ;;  %6883 = vmatprep.subr.bf16.mxu1 %v6924_v0  ;;  %v6927_v3 = vld [vmem:[%s9787_s1 + $0x60] sm:$0xff]   ;;  %vm322_vm1 = vsmask.f32 7440  ;;  %v6928_v17 = vld [vmem:[%s9787_s1 + $0x58] sm:$0xff]   ;;  %v6929_v33 = vld [vmem:[%s9787_s1 + $0x50] sm:$0xff]   ;;  %vm1351_vm3 = vcmask 1042432  }
   0xe   : > { %s9988_s12 = smov (!%p228_p4, %s7067_s12), 1  ;;  %6452 = vmatpush3.bf16.msra.mxu0 %v6924_v0  ;;  %6891 = vmatpush3.bf16.msra.mxu1 %v6924_v0  ;;  %vm7161_vm2 = vmor %vm321_vm0, %vm322_vm1  ;;  %v6930_v58 = vld [vmem:[%s9787_s1 + $0x48] sm:$0xff]   ;;  %vm1352_vm4 = vcmask 1046532  }
   0xf   : > { %6453 = vmatprep.subr.bf16.mxu0 %v6925_v1  ;;  %6884 = vmatprep.subr.bf16.mxu1 %v6925_v1  ;;  %s6899_s22 = smul.u32 216, %s9988_s12  ;;  %vm7472_vm5 = vmor %vm1351_vm3, %vm1352_vm4  ;;  %s6107_s6 = sshll.u32 %s9988_s12, 7 }
  0x10   : > { %s9681_s8 = scalar_lea.vmem %s9789_s3, %s6107_s6 }
  0x11   : > { %s7130_s25 = scalar_lea.vmem %s9786_s0, %s6899_s22 }
  0x12   : > { %6454 = vmatpush3.bf16.msra.mxu0 %v6925_v1  ;;  %6892 = vmatpush3.bf16.msra.mxu1 %v6925_v1  ;;  %v7136_v4 = vld [vmem:[%s7130_s25] sm:$0xf]  ;;  %v7139_v5 = vld [vmem:[%s7130_s25 + $0x4] sm:$0xf]  ;;  %v7142_v6 = vld [vmem:[%s7130_s25 + $0x8] sm:$0x1] }
  0x13   : > { %6455 = vmatprep.subr.bf16.mxu0 %v6926_v2  ;;  %6885 = vmatprep.subr.bf16.mxu1 %v6926_v2  ;;  %v325_v7 = vshrl.u32 %v7136_v4, 16  ;;  %v328_v8 = vshll.u32 %v7136_v4, 16  ;;  %v334_v9 = vshll.u32 %v7139_v5, 16  ;;  %v338_v10 = vshrl.u32 %v7139_v5, 16  ;;  %v273_v12 = vld [vmem:[%s7130_s25 + $0x60] sm:$0xf] }
  0x14   : > { %v344_v11 = vshll.u32 %v7142_v6, 16  ;;  %v274_v15 = vld [vmem:[%s7130_s25 + $0x64] sm:$0xf]  ;;  %v313_v16 = vld [vmem:[%s7130_s25 + $0x68] sm:$0x1]  ;;  %v517_v21 = vshrl.u32 %v273_v12, 16 }
  0x15   : > { %v327_v13 = vrot.slane %v325_v7, 4  ;;  %v330_v14 = vrot.slane %v328_v8, 5  ;;  %v336_v18 = vrot.slane %v334_v9, 5  ;;  %v340_v19 = vrot.slane %v338_v10, 4  ;;  %v7157_v26 = vld [vmem:[%s7130_s25 + $0xc] sm:$0xf] }
  0x16   : > { %6456 = vmatpush3.bf16.msra.mxu0 %v6926_v2  ;;  %6893 = vmatpush3.bf16.msra.mxu1 %v6926_v2  ;;  %v520_v23 = vshll.u32 %v273_v12, 16  ;;  %v526_v24 = vshll.u32 %v274_v15, 16  ;;  %v530_v25 = vshrl.u32 %v274_v15, 16  ;;  %v346_v29 = vrot.slane %v344_v11, 5  ;;  %v7166_v32 = vld [vmem:[%s7130_s25 + $0x10] sm:$0xf] }
  0x17   : > { %6457 = vmatprep.subr.bf16.mxu0 %v6927_v3  ;;  %6886 = vmatprep.subr.bf16.mxu1 %v6927_v3  ;;  %v331_v22 = vor.u32 %v330_v14, %v327_v13  ;;  %v341_v28 = vor.u32 %v340_v19, %v336_v18  ;;  %v519_v30 = vrot.slane %v517_v21, 4  ;;  %v536_v31 = vshll.u32 %v313_v16, 16  ;;  %v7172_v40 = vld [vmem:[%s7130_s25 + $0x14] sm:$0x1]  ;;  %v275_v47 = vld [vmem:[%s7130_s25 + $0x6c] sm:$0xf] }
  0x18   : > { %v522_v35 = vrot.slane %v520_v23, 5  ;;  %v528_v36 = vrot.slane %v526_v24, 5  ;;  %v532_v37 = vrot.slane %v530_v25, 4  ;;  %v349_v41 = vshrl.u32 %v7157_v26, 16  ;;  %v276_v52 = vld [vmem:[%s7130_s25 + $0x70] sm:$0xf] }
  0x19   : > { %v332_v34 = vrot.slane %v331_v22, 4  ;;  %v342_v38 = vrot.slane %v341_v28, 4  ;;  %v538_v39 = vrot.slane %v536_v31, 5  ;;  %v352_v42 = vshll.u32 %v7157_v26, 16  ;;  %v314_v57 = vld [vmem:[%s7130_s25 + $0x74] sm:$0x1] }
  0x1a   : > { %6458 = vmatpush3.bf16.msra.mxu0 %v6927_v3  ;;  %6894 = vmatpush3.bf16.msra.mxu1 %v6927_v3  ;;  %v523_v44 = vor.u32 %v522_v35, %v519_v30  ;;  %v533_v45 = vor.u32 %v532_v37, %v528_v36  ;;  %v358_v46 = vshll.u32 %v7166_v32, 16  ;;  %v351_v49 = vrot.slane %v349_v41, 4  ;;  %v7195_v14 = vld [vmem:[%s7130_s25 + $0x18] sm:$0xf]  ;;  %v6931_v15 = vld [vmem:[%s9787_s1 + $0x40] sm:$0xff]  }
  0x1b   : > { %6459 = vmatprep.subr.bf16.mxu0 %v6928_v17  ;;  %6887 = vmatprep.subr.bf16.mxu1 %v6928_v17  ;;  %v337_v43 = vsel %vm7161_vm2, %v332_v34, %v336_v18  ;;  %v347_v48 = vsel %vm7161_vm2, %v342_v38, %v346_v29  ;;  %v354_v50 = vrot.slane %v352_v42, 5  ;;  %v362_v51 = vshrl.u32 %v7166_v32, 16  ;;  %v7203_v19 = vld [vmem:[%s7130_s25 + $0x1c] sm:$0xf]  ;;  %v7208_v25 = vld [vmem:[%s7130_s25 + $0x20] sm:$0x1] }
  0x1c   : > { %v5504_v53 = vcombine.low %v337_v43, %v347_v48  ;;  %v524_v54 = vrot.slane %v523_v44, 4  ;;  %v534_v55 = vrot.slane %v533_v45, 4  ;;  %v360_v56 = vrot.slane %v358_v46, 5  ;;  %v277_v34 = vld [vmem:[%s7130_s25 + $0x78] sm:$0xf] }
  0x1d   : > { %v355_v59 = vor.u32 %v354_v50, %v351_v49  ;;  %v364_v60 = vrot.slane %v362_v51, 4  ;;  %v368_v61 = vshll.u32 %v7172_v40, 16  ;;  %v541_v1 = vshrl.u32 %v275_v47, 16  ;;  %v6932_v41 = vld [vmem:[%s9787_s1 + $0x38] sm:$0xff]   ;;  %v315_v49 = vld [vmem:[%s7130_s25 + $0x80] sm:$0x1] }
  0x1e   : > { %6460 = vmatpush3.bf16.msra.mxu0 %v6928_v17  ;;  %6895 = vmatpush3.bf16.msra.mxu1 %v6928_v17  ;;  %v529_v63 = vsel %vm7161_vm2, %v524_v54, %v528_v36  ;;  %v539_v0 = vsel %vm7161_vm2, %v534_v55, %v538_v39  ;;  %v544_v2 = vshll.u32 %v275_v47, 16  ;;  %v550_v12 = vshll.u32 %v276_v52, 16  ;;  %v7217_v39 = vld [vmem:[%s7130_s25 + $0x7c] sm:$0xf] }
  0x1f   : > { %6461 = vmatprep.subr.bf16.mxu0 %v6929_v33  ;;  %6888 = vmatprep.subr.bf16.mxu1 %v6929_v33  ;;  %v5512_v3 = vcombine.low %v529_v63, %v539_v0  ;;  %v356_v7 = vrot.slane %v355_v59, 4  ;;  %v365_v8 = vor.u32 %v364_v60, %v360_v56  ;;  %v370_v9 = vrot.slane %v368_v61, 5  ;;  %v6933_v42 = vld [vmem:[%s9787_s1 + $0xb8] sm:$0xff]   ;;  %v6935_v59 = vld [vmem:[%s9787_s1 + $0xb0] sm:$0xff]   ;;  %v7244_v0 = vld [vmem:[%s7130_s25 + $0x28] sm:$0xf] }
  0x20   : > { %6467 = vmatprep.mubr.bf16.mxu0 %v5504_v53  ;;  %v543_v10 = vrot.slane %v541_v1, 4  ;;  %v546_v11 = vrot.slane %v544_v2, 5  ;;  %v554_v13 = vshrl.u32 %v276_v52, 16  ;;  %v560_v18 = vshll.u32 %v314_v57, 16  ;;  %v6934_v52 = vld [vmem:[%s9787_s1 + $0x30] sm:$0xff]  }
  0x21   : > { %v361_v16 = vsel %vm7161_vm2, %v356_v7, %v360_v56  ;;  %v366_v17 = vrot.slane %v365_v8, 4  ;;  %6483 = vmatprep.mubr.bf16.mxu1 %v5512_v3  ;;  %v552_v23 = vrot.slane %v550_v12, 5  ;;  %v373_v28 = vshrl.u32 %v7195_v14, 16  ;;  %v7235_v57 = vld [vmem:[%s7130_s25 + $0x24] sm:$0xf] }
  0x22   : > { %6462 = vmatpush3.bf16.msra.mxu0 %v6929_v33  ;;  %6896 = vmatpush3.bf16.msra.mxu1 %v6929_v33  ;;  %v547_v22 = vor.u32 %v546_v11, %v543_v10  ;;  %v556_v24 = vrot.slane %v554_v13, 4  ;;  %v562_v30 = vrot.slane %v560_v18, 5  ;;  %v376_v31 = vshll.u32 %v7195_v14, 16  ;;  %v7247_v8 = vld [vmem:[%s7130_s25 + $0x2c] sm:$0x1] }
  0x23   : > { %6463 = vmatprep.subr.bf16.mxu0 %v6930_v58  ;;  %6889 = vmatprep.subr.bf16.mxu1 %v6930_v58  ;;  %v371_v29 = vsel %vm7161_vm2, %v366_v17, %v370_v9  ;;  %v382_v33 = vshll.u32 %v7203_v19, 16  ;;  %v375_v38 = vrot.slane %v373_v28, 4  ;;  %v386_v45 = vshrl.u32 %v7203_v19, 16  ;;  %v7251_v13 = vld [vmem:[%s7130_s25 + $0x84] sm:$0xf] }
  0x24   : > { %v5505_v35 = vcombine.low %v361_v16, %v371_v29  ;;  %v548_v36 = vrot.slane %v547_v22, 4  ;;  %v557_v37 = vor.u32 %v556_v24, %v552_v23  ;;  %v378_v43 = vrot.slane %v376_v31, 5  ;;  %v7258_v22 = vld [vmem:[%s7130_s25 + $0x88] sm:$0xf] }
  0x25   : > { %v384_v44 = vrot.slane %v382_v33, 5  ;;  %v392_v46 = vshll.u32 %v7208_v25, 16  ;;  %v565_v50 = vshrl.u32 %v277_v34, 16  ;;  %v568_v51 = vshll.u32 %v277_v34, 16 }
  0x26   : > { %6464 = vmatpush3.bf16.msra.mxu0 %v6930_v58  ;;  %6897 = vmatpush3.bf16.msra.mxu1 %v6930_v58  ;;  %v553_v47 = vsel %vm7161_vm2, %v548_v36, %v552_v23  ;;  %v558_v48 = vrot.slane %v557_v37, 4  ;;  %v379_v53 = vor.u32 %v378_v43, %v375_v38  ;;  %v388_v54 = vrot.slane %v386_v45, 4  ;;  %v7267_v36 = vld [vmem:[%s7130_s25 + $0x8c] sm:$0x1] }
  0x27   : > { %6465 = vmatprep.subr.bf16.mxu0 %v6931_v15  ;;  %6890 = vmatprep.subr.bf16.mxu1 %v6931_v15  ;;  %v394_v55 = vrot.slane %v392_v46, 5  ;;  %v574_v56 = vshll.u32 %v7217_v39, 16  ;;  %v567_v60 = vrot.slane %v565_v50, 4  ;;  %v570_v61 = vrot.slane %v568_v51, 5  ;;  %v6937_v37 = vld [vmem:[%s9787_s1 + $0xa8] sm:$0xff]  }
  0x28   : > { %v563_v58 = vsel %vm7161_vm2, %v558_v48, %v562_v30  ;;  %v578_v63 = vshrl.u32 %v7217_v39, 16  ;;  %v380_v2 = vrot.slane %v379_v53, 4  ;;  %v389_v3 = vor.u32 %v388_v54, %v384_v44  ;;  %v6936_v30 = vld [vmem:[%s9787_s1 + $0x28] sm:$0xff]   ;;  %v7282_v53 = vld [vmem:[%s7130_s25 + $0x30] sm:$0xf] }
  0x29   : > { %v5513_v1 = vcombine.low %v553_v47, %v563_v58  ;;  %v576_v7 = vrot.slane %v574_v56, 5  ;;  %v571_v9 = vor.u32 %v570_v61, %v567_v60  ;;  %v584_v11 = vshll.u32 %v315_v49, 16  ;;  %v7291_v60 = vld [vmem:[%s7130_s25 + $0x34] sm:$0xf] }
  0x2a   : > { %6466 = vmatpush3.bf16.msra.mxu0 %v6931_v15  ;;  %6898 = vmatpush3.bf16.msra.mxu1 %v6931_v15  ;;  %v580_v10 = vrot.slane %v578_v63, 4  ;;  %v397_v12 = vshrl.u32 %v7235_v57, 16  ;;  %v385_v15 = vsel %vm7161_vm2, %v380_v2, %v384_v44  ;;  %v390_v16 = vrot.slane %v389_v3, 4 }
  0x2b   : > { %6499 = vmatprep.subr.bf16.mxu1 %v6932_v41  ;;  %6547 = vmatprep.subr.bf16.mxu0 %v6933_v42  ;;  %v400_v17 = vshll.u32 %v7235_v57, 16  ;;  %v406_v18 = vshll.u32 %v7244_v0, 16  ;;  %v572_v23 = vrot.slane %v571_v9, 4  ;;  %v586_v28 = vrot.slane %v584_v11, 5 }
  0x2c   : > { %v581_v24 = vor.u32 %v580_v10, %v576_v7  ;;  %v399_v29 = vrot.slane %v397_v12, 4  ;;  %v395_v31 = vsel %vm7161_vm2, %v390_v16, %v394_v55  ;;  %v416_v43 = vshll.u32 %v7247_v8, 16  ;;  %v7299_v16 = vld [vmem:[%s7130_s25 + $0x38] sm:$0x1] }
  0x2d   : > { %6468 = vmatmul.mubr.bf16.vlgmr.msra.gmra.mxu0 %v5505_v35  ;;  %6484 = vmatmul.mubr.bf16.vlgmr.msra.gmra.mxu1 %v5513_v1  ;;  %v402_v33 = vrot.slane %v400_v17, 5  ;;  %v408_v34 = vrot.slane %v406_v18, 5  ;;  %v410_v35 = vshrl.u32 %v7244_v0, 16  ;;  %v5506_v38 = vcombine.low %v385_v15, %v395_v31  ;;  %v7303_v18 = vld [vmem:[%s7130_s25 + $0x90] sm:$0xf] }
  0x2e   : > { %6500 = vmatpush3.bf16.msra.mxu1 %v6932_v41  ;;  %6548 = vmatpush3.bf16.msra.mxu0 %v6933_v42  ;;  %v577_v41 = vsel %vm7161_vm2, %v572_v23, %v576_v7  ;;  %v582_v42 = vrot.slane %v581_v24, 4  ;;  %v589_v46 = vshrl.u32 %v7251_v13, 16  ;;  %v592_v47 = vshll.u32 %v7251_v13, 16  ;;  %v7309_v31 = vld [vmem:[%s7130_s25 + $0x94] sm:$0xf] }
  0x2f   : > { %6501 = vmatprep.subr.bf16.mxu1 %v6934_v52  ;;  %6549 = vmatprep.subr.bf16.mxu0 %v6935_v59  ;;  %v403_v44 = vor.u32 %v402_v33, %v399_v29  ;;  %v412_v45 = vrot.slane %v410_v35, 4  ;;  %v418_v49 = vrot.slane %v416_v43, 5  ;;  %v598_v50 = vshll.u32 %v7258_v22, 16 }
  0x30   : > { %v587_v48 = vsel %vm7161_vm2, %v582_v42, %v586_v28  ;;  %v602_v51 = vshrl.u32 %v7258_v22, 16  ;;  %6471 = vmatprep.mubr.bf16.mxu0 %v5506_v38  ;;  %v591_v58 = vrot.slane %v589_v46, 4  ;;  %v594_v61 = vrot.slane %v592_v47, 5  ;;  %v6941_v38 = vld [vmem:[%s9787_s1 + $0x98] sm:$0xff]   ;;  %v6942_v46 = vld [vmem:[%s9787_s1 + $0x10] sm:$0xff]  }
  0x31   : > { %v5514_v54 = vcombine.low %v577_v41, %v587_v48  ;;  %v404_v55 = vrot.slane %v403_v44, 4  ;;  %v413_v56 = vor.u32 %v412_v45, %v408_v34  ;;  %v600_v63 = vrot.slane %v598_v50, 5  ;;  %v7319_v44 = vld [vmem:[%s7130_s25 + $0x98] sm:$0x1] }
  0x32   : > { %6502 = vmatpush3.bf16.msra.mxu1 %v6934_v52  ;;  %6550 = vmatpush3.bf16.msra.mxu0 %v6935_v59  ;;  %v6938_v52 = vld [vmem:[%s9787_s1 + $0x20] sm:$0xff]   ;;  %v604_v1 = vrot.slane %v602_v51, 4  ;;  %v608_v2 = vshll.u32 %v7267_v36, 16  ;;  %v421_v9 = vshrl.u32 %v7282_v53, 16  ;;  %v424_v10 = vshll.u32 %v7282_v53, 16 }
  0x33   : > { %6503 = vmatprep.subr.bf16.mxu1 %v6936_v30  ;;  %v6939_v59 = vld [vmem:[%s9787_s1 + $0xa0] sm:$0xff]   ;;  %6551 = vmatprep.subr.bf16.mxu0 %v6937_v37  ;;  %v409_v3 = vsel %vm7161_vm2, %v404_v55, %v408_v34  ;;  %v414_v7 = vrot.slane %v413_v56, 4  ;;  %v595_v11 = vor.u32 %v594_v61, %v591_v58  ;;  %v430_v17 = vshll.u32 %v7291_v60, 16  ;;  %v7332_v51 = vld [vmem:[%s7130_s25 + $0x3c] sm:$0xf]  ;;  %v6943_v55 = vld [vmem:[%s9787_s1 + $0x90] sm:$0xff]  }
  0x34   : > { %6487 = vmatprep.mubr.bf16.mxu1 %v5514_v54  ;;  %v605_v12 = vor.u32 %v604_v1, %v600_v63  ;;  %v610_v15 = vrot.slane %v608_v2, 5  ;;  %v423_v24 = vrot.slane %v421_v9, 4  ;;  %v426_v28 = vrot.slane %v424_v10, 5  ;;  %v7335_v54 = vld [vmem:[%s7130_s25 + $0x40] sm:$0xf] }
  0x35   : > { %v419_v23 = vsel %vm7161_vm2, %v414_v7, %v418_v49  ;;  %v434_v29 = vshrl.u32 %v7291_v60, 16  ;;  %v596_v34 = vrot.slane %v595_v11, 4  ;;  %v440_v43 = vshll.u32 %v7299_v16, 16  ;;  %v7342_v7 = vld [vmem:[%s7130_s25 + $0x44] sm:$0x1] }
  0x36   : > { %6504 = vmatpush3.bf16.msra.mxu1 %v6936_v30  ;;  %6552 = vmatpush3.bf16.msra.mxu0 %v6937_v37  ;;  %v6940_v30 = vld [vmem:[%s9787_s1 + $0x18] sm:$0xff]   ;;  %v5507_v33 = vcombine.low %v409_v3, %v419_v23  ;;  %v606_v35 = vrot.slane %v605_v12, 4  ;;  %v432_v37 = vrot.slane %v430_v17, 5  ;;  %v427_v41 = vor.u32 %v426_v28, %v423_v24  ;;  %v7354_v28 = vld [vmem:[%s7130_s25 + $0xa0] sm:$0xf] }
  0x37   : > { %6505 = vmatprep.subr.bf16.mxu1 %v6938_v52  ;;  %6553 = vmatprep.subr.bf16.mxu0 %v6939_v59  ;;  %v436_v42 = vrot.slane %v434_v29, 4  ;;  %v613_v45 = vshrl.u32 %v7303_v18, 16  ;;  %v601_v47 = vsel %vm7161_vm2, %v596_v34, %v600_v63  ;;  %v616_v49 = vshll.u32 %v7303_v18, 16  ;;  %v7345_v9 = vld [vmem:[%s7130_s25 + $0x9c] sm:$0xf]  ;;  %v6944_v29 = vld [vmem:[%s9787_s1 + $0x8] sm:$0xff]  }
  0x38   : > { %6472 = vmatmul.mubr.bf16.gmra.mxu0 %v5507_v33  ;;  %v611_v48 = vsel %vm7161_vm2, %v606_v35, %v610_v15  ;;  %v622_v50 = vshll.u32 %v7309_v31, 16  ;;  %v428_v58 = vrot.slane %v427_v41, 4  ;;  %v442_v63 = vrot.slane %v440_v43, 5  ;;  %v6945_v41 = vld [vmem:[%s9787_s1 + $0x88] sm:$0xff]  }
  0x39   : > { %v5515_v56 = vcombine.low %v601_v47, %v611_v48  ;;  %v437_v61 = vor.u32 %v436_v42, %v432_v37  ;;  %v618_v1 = vrot.slane %v616_v49, 5  ;;  %v626_v3 = vshrl.u32 %v7309_v31, 16 }
  0x3a   : > { %6506 = vmatpush3.bf16.msra.mxu1 %v6938_v52  ;;  %6554 = vmatpush3.bf16.msra.mxu0 %v6939_v59  ;;  %v615_v52 = vrot.slane %v613_v45, 4  ;;  %v624_v2 = vrot.slane %v622_v50, 5  ;;  %v433_v10 = vsel %vm7161_vm2, %v428_v58, %v432_v37  ;;  %v632_v11 = vshll.u32 %v7319_v44, 16 }
  0x3b   : > { %6507 = vmatprep.subr.bf16.mxu1 %v6940_v30  ;;  %6555 = vmatprep.subr.bf16.mxu0 %v6941_v38  ;;  %v438_v59 = vrot.slane %v437_v61, 4  ;;  %v445_v12 = vshrl.u32 %v7332_v51, 16  ;;  %v628_v17 = vrot.slane %v626_v3, 4  ;;  %v448_v23 = vshll.u32 %v7332_v51, 16  ;;  %v7370_v61 = vld [vmem:[%s7130_s25 + $0xa4] sm:$0x1] }
  0x3c   : > { %6488 = vmatmul.mubr.bf16.gmra.mxu1 %v5515_v56  ;;  %v619_v15 = vor.u32 %v618_v1, %v615_v52  ;;  %v454_v24 = vshll.u32 %v7335_v54, 16  ;;  %v634_v34 = vrot.slane %v632_v11, 5  ;;  %v458_v37 = vshrl.u32 %v7335_v54, 16 }
  0x3d   : > { %v443_v33 = vsel %vm7161_vm2, %v438_v59, %v442_v63  ;;  %v447_v35 = vrot.slane %v445_v12, 4  ;;  %v629_v43 = vor.u32 %v628_v17, %v624_v2  ;;  %v450_v45 = vrot.slane %v448_v23, 5  ;;  %v7375_v59 = vld [vmem:[%s7130_s25 + $0x48] sm:$0xf]  ;;  %v7384_v17 = vld [vmem:[%s7130_s25 + $0x4c] sm:$0xf] }
  0x3e   : > { %6508 = vmatpush3.bf16.msra.mxu1 %v6940_v30  ;;  %6556 = vmatpush3.bf16.msra.mxu0 %v6941_v38  ;;  %v5508_v42 = vcombine.low %v433_v10, %v443_v33  ;;  %v620_v30 = vrot.slane %v619_v15, 4  ;;  %v456_v47 = vrot.slane %v454_v24, 5  ;;  %v460_v48 = vrot.slane %v458_v37, 4 }
  0x3f   : > { %6509 = vmatprep.subr.bf16.mxu1 %v6942_v46  ;;  %6557 = vmatprep.subr.bf16.mxu0 %v6943_v55  ;;  %v464_v49 = vshll.u32 %v7342_v7, 16  ;;  %v637_v50 = vshrl.u32 %v7345_v9, 16  ;;  %v630_v56 = vrot.slane %v629_v43, 4  ;;  %v451_v58 = vor.u32 %v450_v45, %v447_v35 }
  0x40   : > { %6475 = vmatprep.mubr.bf16.mxu0 %v5508_v42  ;;  %v625_v38 = vsel %vm7161_vm2, %v620_v30, %v624_v2  ;;  %v640_v63 = vshll.u32 %v7345_v9, 16  ;;  %v461_v52 = vor.u32 %v460_v48, %v456_v47  ;;  %v646_v10 = vshll.u32 %v7354_v28, 16  ;;  %v6946_v2 = vld [vmem:[%s9787_s1] sm:$0xff]   ;;  %v7393_v30 = vld [vmem:[%s7130_s25 + $0x50] sm:$0x1] }
  0x41   : > { %v466_v1 = vrot.slane %v464_v49, 5  ;;  %v639_v3 = vrot.slane %v637_v50, 4  ;;  %v635_v11 = vsel %vm7161_vm2, %v630_v56, %v634_v34  ;;  %v452_v12 = vrot.slane %v451_v58, 4 }
  0x42   : > { %6510 = vmatpush3.bf16.msra.mxu1 %v6942_v46  ;;  %6558 = vmatpush3.bf16.msra.mxu0 %v6943_v55  ;;  %v642_v15 = vrot.slane %v640_v63, 5  ;;  %v650_v46 = vshrl.u32 %v7354_v28, 16  ;;  %v6947_v55 = vld [vmem:[%s9787_s1 + $0x80] sm:$0xff]   ;;  %v5516_v23 = vcombine.low %v625_v38, %v635_v11  ;;  %v462_v24 = vrot.slane %v461_v52, 4  ;;  %v7401_v38 = vld [vmem:[%s7130_s25 + $0xa8] sm:$0xf] }
  0x43   : > { %6511 = vmatprep.subr.bf16.mxu1 %v6944_v29  ;;  %6559 = vmatprep.subr.bf16.mxu0 %v6945_v41  ;;  %v648_v33 = vrot.slane %v646_v10, 5  ;;  %v656_v35 = vshll.u32 %v7370_v61, 16  ;;  %v457_v34 = vsel %vm7161_vm2, %v452_v12, %v456_v47  ;;  %v469_v43 = vshrl.u32 %v7375_v59, 16  ;;  %9816 = vst [vmem:[#allocation2_spill] sm:$0xff] %v7401_v38  ;;  %v7406_v47 = vld [vmem:[%s9787_s1 + $0xf8] sm:$0xff]  }
  0x44   : > { %v643_v37 = vor.u32 %v642_v15, %v639_v3  ;;  %v652_v42 = vrot.slane %v650_v46, 4  ;;  %6491 = vmatprep.mubr.bf16.mxu1 %v5516_v23  ;;  %v467_v45 = vsel %vm7161_vm2, %v462_v24, %v466_v1  ;;  %v472_v49 = vshll.u32 %v7375_v59, 16  ;;  %v7409_v52 = vld [vmem:[%s7130_s25 + $0xac] sm:$0xf]  ;;  %v7414_v1 = vld [vmem:[%s9787_s1 + $0x138] sm:$0xff]  }
  0x45   : > { %v658_v48 = vrot.slane %v656_v35, 5  ;;  %v478_v50 = vshll.u32 %v7384_v17, 16  ;;  %v471_v63 = vrot.slane %v469_v43, 4  ;;  %v482_v10 = vshrl.u32 %v7384_v17, 16  ;;  %v7419_v12 = vld [vmem:[%s7130_s25 + $0xb0] sm:$0x1] }
  0x46   : > { %6512 = vmatpush3.bf16.msra.mxu1 %v6944_v29  ;;  %6560 = vmatpush3.bf16.msra.mxu0 %v6945_v41  ;;  %v5509_v29 = vcombine.low %v457_v34, %v467_v45  ;;  %v644_v56 = vrot.slane %v643_v37, 4  ;;  %v653_v58 = vor.u32 %v652_v42, %v648_v33  ;;  %v474_v41 = vrot.slane %v472_v49, 5  ;;  %9817 = vst [vmem:[#allocation3_spill] sm:$0xff] %v7419_v12  ;;  %v7422_v15 = vld [vmem:[%s7130_s25 + $0x54] sm:$0xf] }
  0x47   : > { %6513 = vmatprep.subr.bf16.mxu1 %v6946_v2  ;;  %6561 = vmatprep.subr.bf16.mxu0 %v6947_v55  ;;  %v480_v3 = vrot.slane %v478_v50, 5  ;;  %v488_v11 = vshll.u32 %v7393_v30, 16  ;;  %v661_v24 = vshrl.u32 %v7401_v38, 16  ;;  %v664_v35 = vshll.u32 %v7401_v38, 16  ;;  %v7429_v34 = vld [vmem:[%s7130_s25 + $0x58] sm:$0xf] }
  0x48   : > { %6476 = vmatmul.mubr.bf16.gmra.mxu0 %v5509_v29  ;;  %v649_v46 = vsel %vm7161_vm2, %v644_v56, %v648_v33  ;;  %v654_v23 = vrot.slane %v653_v58, 4  ;;  %v475_v37 = vor.u32 %v474_v41, %v471_v63  ;;  %v484_v42 = vrot.slane %v482_v10, 4 }
  0x49   : > { %v490_v43 = vrot.slane %v488_v11, 5  ;;  %v670_v45 = vshll.u32 %v7409_v52, 16  ;;  %v663_v49 = vrot.slane %v661_v24, 4  ;;  %v666_v50 = vrot.slane %v664_v35, 5 }
  0x4a   : > { %6514 = vmatpush3.bf16.msra.mxu1 %v6946_v2  ;;  %6562 = vmatpush3.bf16.msra.mxu0 %v6947_v55  ;;  %v659_v33 = vsel %vm7161_vm2, %v654_v23, %v658_v48  ;;  %v674_v29 = vshrl.u32 %v7409_v52, 16  ;;  %v476_v56 = vrot.slane %v475_v37, 4  ;;  %v485_v58 = vor.u32 %v484_v42, %v480_v3  ;;  %v7438_v55 = vld [vmem:[%s7130_s25 + $0x5c] sm:$0x1]  ;;  %v7443_v48 = vld [vmem:[%s7130_s25 + $0xb4] sm:$0xf] }
  0x4b   : > { %6595 = vmatprep.subr.bf16.mxu1 %v7406_v47  ;;  %6643 = vmatprep.subr.bf16.mxu0 %v7414_v1  ;;  %v5517_v2 = vcombine.low %v649_v46, %v659_v33  ;;  %v672_v63 = vrot.slane %v670_v45, 5  ;;  %v667_v41 = vor.u32 %v666_v50, %v663_v49  ;;  %v680_v11 = vshll.u32 %v7419_v12, 16  ;;  %9818 = vst [vmem:[#allocation4_spill] sm:$0xff] %v7443_v48  ;;  %v7450_v37 = vld [vmem:[%s7130_s25 + $0xb8] sm:$0xf] }
  0x4c   : > { %v676_v10 = vrot.slane %v674_v29, 4  ;;  %v493_v21 = vshrl.u32 %v7422_v15, 16  ;;  %v481_v23 = vsel %vm7161_vm2, %v476_v56, %v480_v3  ;;  %v486_v24 = vrot.slane %v485_v58, 4  ;;  %9819 = vst [vmem:[#allocation5_spill] sm:$0xff] %v7450_v37  ;;  %v7456_v3 = vld [vmem:[%s7130_s25 + $0xbc] sm:$0x1] }
  0x4d   : > { %6492 = vmatmul.mubr.bf16.gmra.mxu1 %v5517_v2  ;;  %v496_v46 = vshll.u32 %v7422_v15, 16  ;;  %v502_v35 = vshll.u32 %v7429_v34, 16  ;;  %v668_v42 = vrot.slane %v667_v41, 4  ;;  %v682_v33 = vrot.slane %v680_v11, 5  ;;  %9820 = vst [vmem:[#allocation6_spill] sm:$0xff] %v7456_v3 }
  0x4e   : > { %v677_v45 = vor.u32 %v676_v10, %v672_v63  ;;  %v495_v49 = vrot.slane %v493_v21, 4  ;;  %v491_v50 = vsel %vm7161_vm2, %v486_v24, %v490_v43  ;;  %v506_v62 = vshrl.u32 %v7429_v34, 16  ;;  %v1303_v10 = vld [vmem:[%s7130_s25] sm:$0xe] }
  0x4f   : > { %v498_v29 = vrot.slane %v496_v46, 5  ;;  %v504_v2 = vrot.slane %v502_v35, 5  ;;  %v5510_v56 = vcombine.low %v481_v23, %v491_v50  ;;  %v673_v58 = vsel %vm7161_vm2, %v668_v42, %v672_v63 }
  0x50   : > { %v678_v20 = vrot.slane %v677_v45, 4  ;;  %v512_v41 = vshll.u32 %v7438_v55, 16  ;;  %v508_v21 = vrot.slane %v506_v62, 4  ;;  %v685_v12 = vshrl.u32 %v7443_v48, 16 }
  0x51   : > { %v499_v11 = vor.u32 %v498_v29, %v495_v49  ;;  %v688_v43 = vshll.u32 %v7443_v48, 16  ;;  %6479 = vmatprep.mubr.bf16.mxu0 %v5510_v56  ;;  %v694_v46 = vshll.u32 %v7450_v37, 16  ;;  %v698_v63 = vshrl.u32 %v7450_v37, 16  ;;  %v1304_v49 = vld [vmem:[%s7130_s25 + $0xc] sm:$0xe] }
  0x52   : > { %v683_v24 = vsel %vm7161_vm2, %v678_v20, %v682_v33  ;;  %v514_v23 = vrot.slane %v512_v41, 5  ;;  %v509_v45 = vor.u32 %v508_v21, %v504_v2  ;;  %v687_v50 = vrot.slane %v685_v12, 4  ;;  %v1305_v20 = vld [vmem:[%s7130_s25 + $0x18] sm:$0xe] }
  0x53   : > { %v5518_v35 = vcombine.low %v673_v58, %v683_v24  ;;  %v500_v42 = vrot.slane %v499_v11, 4  ;;  %v690_v62 = vrot.slane %v688_v43, 5  ;;  %v696_v29 = vrot.slane %v694_v46, 5 }
  0x54   : > { %v700_v38 = vrot.slane %v698_v63, 4  ;;  %v704_v48 = vshll.u32 %v7456_v3, 16  ;;  %v510_v58 = vrot.slane %v509_v45, 4  ;;  %v5552_v41 = vrot.slane %v1303_v10, 9 }
  0x55   : > { %6495 = vmatprep.mubr.bf16.mxu1 %v5518_v35  ;;  %v505_v33 = vsel %vm7161_vm2, %v500_v42, %v504_v2  ;;  %v1356_v12 = vrot.slane %v7139_v5, 5  ;;  %v691_v11 = vor.u32 %v690_v62, %v687_v50  ;;  %v5553_v24 = vrot.slane %v1304_v49, 9 }
  0x56   : > { %v701_v21 = vor.u32 %v700_v38, %v696_v29  ;;  %v706_v43 = vrot.slane %v704_v48, 5  ;;  %v515_v46 = vsel %vm7161_vm2, %v510_v58, %v514_v23  ;;  %v1363_v35 = vrot.slane %v7166_v32, 5 }
  0x57   : > { %v1357_v63 = vsel %vm7472_vm5, %v5552_v41, %v1356_v12  ;;  %v1358_v3 = vrot.slane %v1356_v12, 4  ;;  %v5511_v37 = vcombine.low %v505_v33, %v515_v46  ;;  %v692_v2 = vrot.slane %v691_v11, 4  ;;  %v1307_v12 = vld [vmem:[%s7130_s25 + $0x30] sm:$0xe]  ;;  %v1309_v46 = vld [vmem:[%s7130_s25 + $0x48] sm:$0xe] }
  0x58   : > { %v702_v42 = vrot.slane %v701_v21, 4  ;;  %v5528_v10 = vcombine.low %v7136_v4, %v7139_v5  ;;  %v9823_v38 = vrot.slane %v7142_v6, 5  ;;  %v1365_v45 = vrot.slane %v1363_v35, 4 }
  0x59   : > { %v5554_v23 = vrot.slane %v1305_v20, 9  ;;  %6480 = vmatmul.mubr.bf16.gmra.mxu0 %v5511_v37  ;;  %v697_v50 = vsel %vm7161_vm2, %v692_v2, %v696_v29  ;;  %v1370_v33 = vrot.slane %v7203_v19, 5  ;;  %v1364_v4 = vsel %vm7472_vm5, %v5553_v24, %v1363_v35  ;;  %v1308_v24 = vld [vmem:[%s7130_s25 + $0x3c] sm:$0xe] }
  0x5a   : > { %v1360_v48 = vsel %vm7472_vm5, %v1358_v3, %v9823_v38  ;;  %v707_v49 = vsel %vm7161_vm2, %v702_v42, %v706_v43  ;;  %v9824_v5 = vrot.slane %v7172_v40, 5  ;;  %v1373_v37 = vrot.slane %v7208_v25, 5  ;;  %v1306_v3 = vld [vmem:[%s7130_s25 + $0x24] sm:$0xe]  ;;  %v6955_v25 = vld [vmem:[%s9787_s1 + $0x130] sm:$0xff]  }
  0x5b   : > { %v5584_v62 = vcombine.low %v1357_v63, %v1360_v48  ;;  %v5519_v58 = vcombine.low %v697_v50, %v707_v49  ;;  %v1371_v29 = vsel %vm7472_vm5, %v5554_v23, %v1370_v33  ;;  %v1372_v20 = vrot.slane %v1370_v33, 4  ;;  %v6954_v23 = vld [vmem:[%s9787_s1 + $0xf0] sm:$0xff]  }
  0x5c   : > { %v1367_v6 = vsel %vm7472_vm5, %v1365_v45, %v9824_v5  ;;  %v1377_v41 = vrot.slane %v7244_v0, 5  ;;  %v5555_v21 = vrot.slane %v1306_v3, 9  ;;  %v1384_v43 = vrot.slane %v7291_v60, 5  ;;  %v7547_v3 = vld [vmem:[%s7130_s25 + $0x68] sm:$0x1] }
  0x5d   : > { %6563 = vmatprep.mubr.bf16.mxu0 %v5584_v62  ;;  %6496 = vmatmul.mubr.bf16.gmra.mxu1 %v5519_v58  ;;  %v5585_v11 = vcombine.low %v1364_v4, %v1367_v6  ;;  %v1374_v40 = vsel %vm7472_vm5, %v1372_v20, %v1373_v37  ;;  %v1380_v2 = vrot.slane %v7247_v8, 5  ;;  %v5556_v42 = vrot.slane %v1307_v12, 9  ;;  %v1310_v37 = vld [vmem:[%s7130_s25 + $0x54] sm:$0xe]  ;;  %v7571_v12 = vld [vmem:[%s7130_s25 + $0x60] sm:$0xe] }
  0x5e   : > { %6515 = vmatprep.mubr.bf16.mxu1 %v5528_v10  ;;  %v5586_v63 = vcombine.low %v1371_v29, %v1374_v40  ;;  %v1379_v35 = vrot.slane %v1377_v41, 4  ;;  %v1386_v38 = vrot.slane %v1384_v43, 4  ;;  %v1387_v10 = vrot.slane %v7299_v16, 5 }
  0x5f   : > { %v1391_v48 = vrot.slane %v7335_v54, 5  ;;  %v5530_v45 = vcombine.low %v7195_v14, %v7203_v19  ;;  %v1398_v50 = vrot.slane %v7384_v17, 5  ;;  %v5557_v49 = vrot.slane %v1308_v24, 9  ;;  %v6963_v24 = vld [vmem:[%s9787_s1 + $0x120] sm:$0xff]  }
  0x60   : > { %v1394_v8 = vrot.slane %v7342_v7, 5  ;;  %v5558_v33 = vrot.slane %v1309_v46, 9  ;;  %v1378_v14 = vsel %vm7472_vm5, %v5555_v21, %v1377_v41  ;;  %v1381_v19 = vsel %vm7472_vm5, %v1379_v35, %v1380_v2  ;;  %v7583_v46 = vld [vmem:[%s7130_s25 + $0x78] sm:$0xe]  ;;  %v6962_v2 = vld [vmem:[%s9787_s1 + $0xe0] sm:$0xff]  }
  0x61   : > { %6564 = vmatmul.mubr.bf16.vlgmr.msra.gmra.mxu0 %v5585_v11  ;;  %v1393_v62 = vrot.slane %v1391_v48, 4  ;;  %v1400_v16 = vrot.slane %v1398_v50, 4  ;;  %v1401_v58 = vrot.slane %v7393_v30, 5  ;;  %v1385_v4 = vsel %vm7472_vm5, %v5556_v42, %v1384_v43  ;;  %v7574_v11 = vld [vmem:[%s7130_s25 + $0x6c] sm:$0xe] }
  0x62   : > { %6644 = vmatpush3.bf16.msra.mxu0 %v7414_v1  ;;  %6567 = vmatprep.mubr.bf16.mxu0 %v5586_v63  ;;  %v1388_v7 = vsel %vm7472_vm5, %v1386_v38, %v1387_v10  ;;  %v6959_v1 = vld [vmem:[%s9787_s1 + $0x128] sm:$0xff]   ;;  %v1405_v5 = vrot.slane %v7429_v34, 5  ;;  %v9825_v6 = vcombine.low %v7157_v26, %v7166_v32  ;;  %v5531_v30 = vcombine.low %v7235_v57, %v7244_v0  ;;  %v1314_v63 = vld [vmem:[%s7130_s25 + $0x84] sm:$0xe]  ;;  %v1315_v42 = vld [vmem:[%s7130_s25 + $0x90] sm:$0xe] }
  0x63   : > { %6645 = vmatprep.subr.bf16.mxu0 %v6955_v25  ;;  %v1415_v29 = vrot.slane %v7547_v3, 5  ;;  %v5587_v20 = vcombine.low %v1378_v14, %v1381_v19  ;;  %v7553_v41 = vsel %vm7472_vm5, %v5557_v49, %v1391_v48  ;;  %v7557_v26 = vsel %vm7472_vm5, %v1393_v62, %v1394_v8  ;;  %v6958_v32 = vld [vmem:[%s9787_s1 + $0xe8] sm:$0xff]   ;;  %v7602_v48 = vld [vmem:[%s7130_s25 + $0x64] sm:$0xf]  ;;  %v1316_v49 = vld [vmem:[%s7130_s25 + $0x9c] sm:$0xe] }
  0x64   : > { %v5588_v57 = vcombine.low %v1385_v4, %v1388_v7  ;;  %v7564_v0 = vsel %vm7472_vm5, %v5558_v33, %v1398_v50  ;;  %v5532_v40 = vcombine.low %v7282_v53, %v7291_v60  ;;  %v5559_v21 = vrot.slane %v1310_v37, 9  ;;  %v7624_v4 = vld [vmem:[%s7130_s25 + $0x74] sm:$0x1] }
  0x65   : > { %6516 = vmatmul.mubr.bf16.vlgmr.msra.gmra.mxu1 %v9825_v6  ;;  %v1408_v43 = vrot.slane %v7438_v55, 5  ;;  %v5533_v35 = vcombine.low %v7332_v51, %v7335_v54  ;;  %v5589_v53 = vcombine.low %v7553_v41, %v7557_v26  ;;  %v5534_v60 = vcombine.low %v7375_v59, %v7384_v17  ;;  %v7048_v54 = vld [vmem:[%s7130_s25 + $0x80] sm:$0x1] }
  0x66   : > { %6596 = vmatpush3.bf16.msra.mxu1 %v7406_v47  ;;  %6519 = vmatprep.mubr.bf16.mxu1 %v5530_v45  ;;  %v7568_v47 = vsel %vm7472_vm5, %v1400_v16, %v1401_v58  ;;  %v5535_v55 = vcombine.low %v7422_v15, %v7429_v34  ;;  %v5560_v10 = vrot.slane %v7571_v12, 9  ;;  %v1412_v45 = vrot.slane %v7602_v48, 5  ;;  %v7620_v16 = vld [vmem:[%s7130_s25 + $0x70] sm:$0xf]  ;;  %v7049_v17 = vld [vmem:[%s7130_s25 + $0x60] sm:$0xf] }
  0x67   : > { %6597 = vmatprep.subr.bf16.mxu1 %v6954_v23  ;;  %6646 = vmatpush3.bf16.msra.mxu0 %v6955_v25  ;;  %v1407_v25 = vrot.slane %v1405_v5, 4  ;;  %v5590_v38 = vcombine.low %v7564_v0, %v7568_v47  ;;  %v5561_v62 = vrot.slane %v7574_v11, 9  ;;  %v1433_v8 = vrot.slane %v7258_v22, 5  ;;  %v1317_v0 = vld [vmem:[%s7130_s25 + $0xa8] sm:$0xe]  ;;  %v7804_v15 = vld [vmem:[%s9787_s1 + $0x1b8] sm:$0xff]  }
  0x68   : > { %6647 = vmatprep.subr.bf16.mxu0 %v6959_v1  ;;  %v1436_v33 = vrot.slane %v7267_v36, 5  ;;  %v7613_v14 = vsel %vm7472_vm5, %v5559_v21, %v1405_v5  ;;  %v1419_v58 = vrot.slane %v7620_v16, 5  ;;  %v1422_v7 = vrot.slane %v7624_v4, 5  ;;  %v6966_v36 = vld [vmem:[%s9787_s1 + $0xd8] sm:$0xff]  }
  0x69   : > { %6568 = vmatmul.mubr.bf16.gmra.mxu0 %v5587_v20  ;;  %v7617_v19 = vsel %vm7472_vm5, %v1407_v25, %v1408_v43  ;;  %v5562_v5 = vrot.slane %v7583_v46, 9  ;;  %v1435_v37 = vrot.slane %v1433_v8, 4  ;;  %v5564_v41 = vrot.slane %v1315_v42, 9  ;;  %v5680_v42 = vld [vmem:[%s7130_s25 + $0xc] sm:$0xf] }
  0x6a   : > { %6598 = vmatpush3.bf16.msra.mxu1 %v6954_v23  ;;  %6571 = vmatprep.mubr.bf16.mxu0 %v5588_v57  ;;  %v5563_v23 = vrot.slane %v1314_v63, 9  ;;  %v1440_v26 = vrot.slane %v7309_v31, 5  ;;  %v1443_v57 = vrot.slane %v7319_v44, 5  ;;  %v1426_v47 = vrot.slane %v7217_v39, 5 }
  0x6b   : > { %6599 = vmatprep.subr.bf16.mxu1 %v6958_v32  ;;  %6648 = vmatpush3.bf16.msra.mxu0 %v6959_v1  ;;  %v6967_v1 = vld [vmem:[%s9787_s1 + $0x118] sm:$0xff]   ;;  %v7648_v21 = vsel %vm7472_vm5, %v1435_v37, %v1436_v33  ;;  %v1447_v63 = vrot.slane %v7354_v28, 5  ;;  %v5566_v33 = vrot.slane %v1317_v0, 9  ;;  %v1454_v37 = vrot.slane %v7409_v52, 5  ;;  %v6970_v0 = vld [vmem:[%s9787_s1 + $0xd0] sm:$0xff]  }
  0x6c   : > { %6649 = vmatprep.subr.bf16.mxu0 %v6963_v24  ;;  %v7636_v6 = vsel %vm7472_vm5, %v5563_v23, %v1433_v8  ;;  %v7656_v44 = vsel %vm7472_vm5, %v5564_v41, %v1440_v26  ;;  %v1442_v43 = vrot.slane %v1440_v26, 4  ;;  %v6971_v23 = vld [vmem:[%s9787_s1 + $0x110] sm:$0xff]   ;;  %v1450_v8 = vrot.slane %v7370_v61, 5  ;;  %v9827_v61 = vld [vmem:[#allocation3_spill] sm:$0xff] }
  0x6d   : > { %6520 = vmatmul.mubr.bf16.gmra.mxu1 %v5531_v30  ;;  %v1414_v30 = vrot.slane %v1412_v45, 4  ;;  %v1449_v20 = vrot.slane %v1447_v63, 4  ;;  %v1457_v50 = vrot.slane %v9827_v61, 5  ;;  %v1413_v61 = vsel %vm7472_vm5, %v5560_v10, %v1412_v45  ;;  %v5683_v45 = vld [vmem:[%s7130_s25 + $0x18] sm:$0xf] }
  0x6e   : > { %6523 = vmatprep.mubr.bf16.mxu1 %v5532_v40  ;;  %6600 = vmatpush3.bf16.msra.mxu1 %v6958_v32  ;;  %v5565_v40 = vrot.slane %v1316_v49, 9  ;;  %v7668_v32 = vld [vmem:[%s7130_s25 + $0x10] sm:$0xf]  ;;  %v7672_v41 = vsel %vm7472_vm5, %v1442_v43, %v1443_v57  ;;  %v1456_v57 = vrot.slane %v1454_v37, 4  ;;  %v2224_v12 = vshrl.u32 %v5680_v42, 16 }
  0x6f   : > { %6601 = vmatprep.subr.bf16.mxu1 %v6962_v2  ;;  %6650 = vmatpush3.bf16.msra.mxu0 %v6963_v24  ;;  %v9826_v24 = vld [vmem:[#allocation2_spill] sm:$0xff]  ;;  %v9829_v43 = vld [vmem:[#allocation4_spill] sm:$0xff]  ;;  %v2227_v10 = vshll.u32 %v5680_v42, 16  ;;  %v1421_v51 = vrot.slane %v1419_v58, 4  ;;  %v2233_v59 = vshll.u32 %v7668_v32, 16  ;;  %v1427_v4 = vsel %vm7472_vm5, %v5562_v5, %v1426_v47 }
  0x70   : > { %6651 = vmatprep.subr.bf16.mxu0 %v6967_v1  ;;  %v7676_v26 = vsel %vm7472_vm5, %v5565_v40, %v1447_v63  ;;  %v9828_v40 = vld [vmem:[#allocation5_spill] sm:$0xff]  ;;  %v7742_v42 = vld [vmem:[%s7130_s25 + $0x14] sm:$0x1]  ;;  %v2226_v63 = vrot.slane %v2224_v12, 4  ;;  %v9831_v5 = vld [vmem:[#allocation6_spill] sm:$0xff] }
  0x71   : > { %6572 = vmatmul.mubr.bf16.gmra.mxu0 %v5589_v53  ;;  %v2229_v49 = vrot.slane %v2227_v10, 5  ;;  %v5686_v53 = vld [vmem:[%s7130_s25 + $0x24] sm:$0xf]  ;;  %v1423_v11 = vsel %vm7472_vm5, %v1421_v51, %v1422_v7 }
  0x72   : > { %6602 = vmatpush3.bf16.msra.mxu1 %v6962_v2  ;;  %6575 = vmatprep.mubr.bf16.mxu0 %v5590_v38  ;;  %v7686_v2 = vsel %vm7472_vm5, %v5566_v33, %v1454_v37  ;;  %v5591_v38 = vcombine.low %v7613_v14, %v7617_v19  ;;  %v1416_v33 = vsel %vm7472_vm5, %v1414_v30, %v1415_v29  ;;  %v6975_v14 = vld [vmem:[%s9787_s1 + $0x108] sm:$0xff]   ;;  %v6979_v30 = vld [vmem:[%s9787_s1 + $0x100] sm:$0xff]   ;;  %v7761_v19 = vrot.slane %v2233_v59, 5 }
  0x73   : > { %6603 = vmatprep.subr.bf16.mxu1 %v6966_v36  ;;  %6652 = vmatpush3.bf16.msra.mxu0 %v6967_v1  ;;  %v7704_v37 = vsel %vm7472_vm5, %v1449_v20, %v1450_v8  ;;  %v7716_v29 = vsel %vm7472_vm5, %v1456_v57, %v1457_v50  ;;  %v6974_v50 = vld [vmem:[%s9787_s1 + $0xc8] sm:$0xff]   ;;  %v7731_v1 = vld [vmem:[%s7130_s25 + $0xb4] sm:$0xe]  ;;  %v5592_v20 = vcombine.low %v1413_v61, %v1416_v33  ;;  %v2237_v8 = vshrl.u32 %v7668_v32, 16  ;;  %v7759_v61 = vld [vmem:[%s7130_s25 + $0x1c] sm:$0xf] }
  0x74   : > { %6653 = vmatprep.subr.bf16.mxu0 %v6971_v23  ;;  %v7746_v57 = vld [vmem:[%s7130_s25 + $0x6c] sm:$0xf]  ;;  %v2248_v33 = vshrl.u32 %v5683_v45, 16  ;;  %v2257_v51 = vshll.u32 %v7759_v61, 16  ;;  %v2261_v39 = vshrl.u32 %v7759_v61, 16  ;;  %v2272_v59 = vshrl.u32 %v5686_v53, 16 }
  0x75   : > { %6524 = vmatmul.mubr.bf16.gmra.mxu1 %v5533_v35  ;;  %v1429_v35 = vrot.slane %v7048_v54, 5  ;;  %v5537_v54 = vcombine.low %v7746_v57, %v7620_v16  ;;  %v2239_v3 = vrot.slane %v2237_v8, 4  ;;  %v2275_v46 = vshll.u32 %v5686_v53, 16  ;;  %v7052_v8 = vld [vmem:[%s7130_s25 + $0x7c] sm:$0xf] }
  0x76   : > { %6527 = vmatprep.mubr.bf16.mxu1 %v5534_v60  ;;  %6604 = vmatpush3.bf16.msra.mxu1 %v6966_v36  ;;  %v5536_v60 = vcombine.low %v7049_v17, %v7602_v48  ;;  %v1428_v36 = vrot.slane %v1426_v47, 4  ;;  %v7756_v48 = vsel %vm7472_vm5, %v5561_v62, %v1419_v58  ;;  %v2251_v17 = vshll.u32 %v5683_v45, 16  ;;  %v6978_v58 = vld [vmem:[%s9787_s1 + $0xc0] sm:$0xff]   ;;  %v7786_v45 = vld [vmem:[%s7130_s25 + $0x28] sm:$0xf] }
  0x77   : > { %6605 = vmatprep.subr.bf16.mxu1 %v6970_v0  ;;  %6654 = vmatpush3.bf16.msra.mxu0 %v6971_v23  ;;  %v9799_v62 = vrot.slane %v9828_v40, 5  ;;  %v7773_v23 = vld [vmem:[%s7130_s25 + $0x20] sm:$0x1]  ;;  %v2250_v12 = vrot.slane %v2248_v33, 4  ;;  %9830 = vst [vmem:[#allocation2_spill] sm:$0xff] %v7786_v45  ;;  %v5593_v34 = vcombine.low %v7756_v48, %v1423_v11  ;;  %v2281_v53 = vshll.u32 %v7786_v45, 16 }
  0x78   : > { %6655 = vmatprep.subr.bf16.mxu0 %v6975_v14  ;;  %v2253_v10 = vrot.slane %v2251_v17, 5  ;;  %v1430_v7 = vsel %vm7472_vm5, %v1428_v36, %v1429_v35  ;;  %v2230_v35 = vor.u32 %v2229_v49, %v2226_v63  ;;  %v7799_v36 = vld [vmem:[%s9787_s1 + $0x178] sm:$0xff]   ;;  %v5689_v63 = vld [vmem:[%s7130_s25 + $0x30] sm:$0xf]  ;;  %v7820_v48 = vld [vmem:[%s7130_s25 + $0x34] sm:$0xf] }
  0x79   : > { %6576 = vmatmul.mubr.bf16.gmra.mxu0 %v5591_v38  ;;  %v2243_v38 = vshll.u32 %v7742_v42, 16  ;;  %v5594_v17 = vcombine.low %v1427_v4, %v1430_v7  ;;  %9833 = vst [vmem:[#allocation5_spill] sm:$0xff] %v7820_v48  ;;  %v7822_v11 = vrot.slane %v2257_v51, 5  ;;  %v2277_v47 = vrot.slane %v2275_v46, 5  ;;  %v7841_v46 = vld [vmem:[%s7130_s25 + $0x40] sm:$0xf] }
  0x7a   : > { %6606 = vmatpush3.bf16.msra.mxu1 %v6970_v0  ;;  %6579 = vmatprep.mubr.bf16.mxu0 %v5592_v20  ;;  %v2240_v20 = vor.u32 %v2239_v3, %v7761_v19  ;;  %v2254_v49 = vor.u32 %v2253_v10, %v2250_v12  ;;  %v7051_v3 = vld [vmem:[%s7130_s25 + $0x78] sm:$0xf]  ;;  %v2263_v12 = vrot.slane %v2261_v39, 4  ;;  %v2274_v10 = vrot.slane %v2272_v59, 4  ;;  %9834 = vst [vmem:[#allocation4_spill] sm:$0xff] %v7841_v46 }
  0x7b   : > { %6607 = vmatprep.subr.bf16.mxu1 %v6974_v50  ;;  %6656 = vmatpush3.bf16.msra.mxu0 %v6975_v14  ;;  %v2267_v14 = vshll.u32 %v7773_v23, 16  ;;  %v5538_v33 = vcombine.low %v7051_v3, %v7052_v8  ;;  %v7813_v25 = vrot.slane %v2243_v38, 5  ;;  %v7825_v0 = vld [vmem:[%s7130_s25 + $0x38] sm:$0x1]  ;;  %v7827_v4 = vrot.slane %v2230_v35, 4 }
  0x7c   : > { %6657 = vmatprep.subr.bf16.mxu0 %v6979_v30  ;;  %v7829_v7 = vrot.slane %v2240_v20, 4  ;;  %v2296_v3 = vshrl.u32 %v5689_v63, 16  ;;  %v5692_v8 = vld [vmem:[%s7130_s25 + $0x3c] sm:$0xf]  ;;  %v7837_v51 = vrot.slane %v2281_v53, 5  ;;  %v2299_v39 = vshll.u32 %v5689_v63, 16 }
  0x7d   : > { %6528 = vmatmul.mubr.bf16.gmra.mxu1 %v5535_v55  ;;  %v1463_v55 = vrot.slane %v9799_v62, 4  ;;  %v7831_v38 = vrot.slane %v2267_v14, 5  ;;  %v2305_v59 = vshll.u32 %v7820_v48, 16  ;;  %v2309_v20 = vshrl.u32 %v7820_v48, 16 }
  0x7e   : > { %6531 = vmatprep.mubr.bf16.mxu1 %v5536_v60  ;;  %6608 = vmatpush3.bf16.msra.mxu1 %v6974_v50  ;;  %v7816_v60 = vld [vmem:[%s7130_s25 + $0x2c] sm:$0x1]  ;;  %v2285_v50 = vshrl.u32 %v7786_v45, 16  ;;  %v2264_v14 = vor.u32 %v2263_v12, %v7822_v11  ;;  %v2298_v53 = vrot.slane %v2296_v3, 4  ;;  %v2301_v63 = vrot.slane %v2299_v39, 5 }
  0x7f   : > { %6609 = vmatprep.subr.bf16.mxu1 %v6978_v58  ;;  %9832 = vst [vmem:[#allocation3_spill] sm:$0xff] %v7816_v60  ;;  %6658 = vmatpush3.bf16.msra.mxu0 %v6979_v30  ;;  %v7835_v30 = vrot.slane %v2254_v49, 4  ;;  %v2320_v49 = vshrl.u32 %v5692_v8, 16  ;;  %v2323_v62 = vshll.u32 %v5692_v8, 16  ;;  %v2311_v48 = vrot.slane %v2309_v20, 4 }
  0x80   : > { %6739 = vmatprep.subr.bf16.mxu0 %v7804_v15  ;;  %v2287_v35 = vrot.slane %v2285_v50, 4  ;;  %v7851_v50 = vrot.slane %v2305_v59, 5  ;;  %v7854_v45 = vld [vmem:[%s7130_s25 + $0x44] sm:$0x1]  ;;  %v2333_v12 = vshrl.u32 %v7841_v46, 16  ;;  %v9835_v16 = vrot.slane %v9828_v40, 5 }
  0x81   : > { %6580 = vmatmul.mubr.bf16.gmra.mxu0 %v5593_v34  ;;  %v2291_v34 = vshll.u32 %v7816_v60, 16  ;;  %v9836_v57 = vrot.slane %v7731_v1, 9  ;;  %v7875_v39 = vld [vmem:[%s7130_s25 + $0x4c] sm:$0xf]  ;;  %v2322_v59 = vrot.slane %v2320_v49, 4  ;;  %v2325_v20 = vrot.slane %v2323_v62, 5 }
  0x82   : > { %6610 = vmatpush3.bf16.msra.mxu1 %v6978_v58  ;;  %6583 = vmatprep.mubr.bf16.mxu0 %v5594_v17  ;;  %v2278_v58 = vor.u32 %v2277_v47, %v2274_v10  ;;  %v2315_v17 = vshll.u32 %v7825_v0, 16  ;;  %v2329_v47 = vshll.u32 %v7841_v46, 16  ;;  %v5695_v10 = vld [vmem:[%s7130_s25 + $0x48] sm:$0xf]  ;;  %v2288_v8 = vor.u32 %v2287_v35, %v7837_v51 }
  0x83   : > { %6691 = vmatprep.subr.bf16.mxu1 %v7799_v36  ;;  %v2335_v1 = vrot.slane %v2333_v12, 4  ;;  %v7879_v46 = vrot.slane %v2264_v14, 4  ;;  %v2236_v62 = vsel %vm7161_vm2, %v7827_v4, %v7761_v19  ;;  %v2246_v35 = vsel %vm7161_vm2, %v7829_v7, %v7813_v25  ;;  %v5698_v4 = vld [vmem:[%s7130_s25 + $0x54] sm:$0xf] }
  0x84   : > { %v7877_v60 = vrot.slane %v2329_v47, 5  ;;  %v2347_v14 = vshll.u32 %v5695_v10, 16  ;;  %v2339_v49 = vshll.u32 %v7854_v45, 16  ;;  %v2357_v19 = vshrl.u32 %v7875_v39, 16 }
  0x85   : > { %6532 = vmatmul.mubr.bf16.gmra.mxu1 %v5537_v54  ;;  %v7865_v54 = vsel %vm7472_vm5, %v9836_v57, %v9835_v16  ;;  %v7881_v16 = vrot.slane %v2278_v58, 4  ;;  %v7883_v57 = vrot.slane %v2291_v34, 5  ;;  %v2353_v58 = vshll.u32 %v7875_v39, 16 }
  0x86   : > { %6535 = vmatprep.mubr.bf16.mxu1 %v5538_v33  ;;  %v9837_v33 = vrot.slane %v9831_v5, 5  ;;  %v2344_v5 = vshrl.u32 %v5695_v10, 16  ;;  %v9839_v34 = vcombine.low %v7656_v44, %v7672_v41  ;;  %v7904_v47 = vrot.slane %v2288_v8, 4  ;;  %v7910_v10 = vld [vmem:[%s7130_s25 + $0x58] sm:$0xf] }
  0x87   : > { %v7906_v12 = vrot.slane %v2315_v17, 5  ;;  %v2326_v25 = vor.u32 %v2325_v20, %v2322_v59  ;;  %v2336_v7 = vor.u32 %v2335_v1, %v7877_v60  ;;  %v9840_v44 = vcombine.low %v7251_v13, %v7258_v22  ;;  %v7916_v41 = vld [vmem:[%s7130_s25 + $0x50] sm:$0x1] }
  0x88   : > { %v7871_v3 = vsel %vm7472_vm5, %v1463_v55, %v9837_v33  ;;  %v9838_v55 = vcombine.low %v7636_v6, %v7648_v21  ;;  %v2302_v6 = vor.u32 %v2301_v63, %v2298_v53  ;;  %v2312_v21 = vor.u32 %v2311_v48, %v7851_v50 }
  0x89   : > { %v2346_v48 = vrot.slane %v2344_v5, 4  ;;  %v2349_v53 = vrot.slane %v2347_v14, 5  ;;  %v7918_v63 = vrot.slane %v2353_v58, 5  ;;  %v2359_v17 = vrot.slane %v2357_v19, 4  ;;  %v5701_v5 = vld [vmem:[%s7130_s25 + $0x60] sm:$0xf] }
  0x8a   : > { %6584 = vmatmul.mubr.bf16.gmra.mxu0 %v9838_v55  ;;  %v9841_v33 = vcombine.low %v7303_v18, %v7309_v31  ;;  %v2368_v8 = vshrl.u32 %v5698_v4, 16  ;;  %v2371_v59 = vshll.u32 %v5698_v4, 16  ;;  %v7923_v20 = vrot.slane %v2302_v6, 4  ;;  %v7940_v31 = vld [vmem:[%s7130_s25 + $0x64] sm:$0xf] }
  0x8b   : > { %6587 = vmatprep.mubr.bf16.mxu0 %v9839_v34  ;;  %v7925_v1 = vrot.slane %v2312_v21, 4  ;;  %v7927_v13 = vrot.slane %v2339_v49, 5  ;;  %v2377_v22 = vshll.u32 %v7910_v10, 16  ;;  %v5599_v55 = vcombine.low %v7865_v54, %v7871_v3  ;;  %v7936_v34 = vld [vmem:[%s7130_s25 + $0x5c] sm:$0x1] }
  0x8c   : > { %v5744_v14 = vcombine.low %v2236_v62, %v2246_v35  ;;  %v7933_v58 = vrot.slane %v2326_v25, 4  ;;  %v2381_v18 = vshrl.u32 %v7910_v10, 16  ;;  %v7942_v6 = vrot.slane %v2336_v7, 4 }
  0x8d   : > { %6536 = vmatmul.mubr.bf16.gmra.mxu1 %v9840_v44  ;;  %v2363_v21 = vshll.u32 %v7916_v41, 16  ;;  %v2392_v49 = vshrl.u32 %v5701_v5, 16  ;;  %v2395_v19 = vshll.u32 %v5701_v5, 16  ;;  %v9842_v4 = vcombine.low %v7676_v26, %v7704_v37 }
  0x8e   : > { %6539 = vmatprep.mubr.bf16.mxu1 %v9841_v33  ;;  %v2350_v54 = vor.u32 %v2349_v53, %v2346_v48  ;;  %v2360_v3 = vor.u32 %v2359_v17, %v7918_v63  ;;  %v2370_v62 = vrot.slane %v2368_v8, 4  ;;  %v2373_v35 = vrot.slane %v2371_v59, 5  ;;  %v7980_v8 = vld [vmem:[%s7130_s25 + $0x70] sm:$0xf] }
  0x8f   : > { %v9843_v25 = vcombine.low %v7686_v2, %v7716_v29  ;;  %v7952_v7 = vrot.slane %v2377_v22, 5  ;;  %v2383_v44 = vrot.slane %v2381_v18, 4  ;;  %v2387_v33 = vshll.u32 %v7936_v34, 16 }
  0x90   : > { %v2401_v26 = vshll.u32 %v7940_v31, 16  ;;  %v2260_v37 = vsel %vm7161_vm2, %v7835_v30, %v7822_v11  ;;  %v2270_v2 = vsel %vm7161_vm2, %v7879_v46, %v7831_v38  ;;  %v2394_v29 = vrot.slane %v2392_v49, 4  ;;  %v5704_v46 = vld [vmem:[%s7130_s25 + $0x6c] sm:$0xf] }
  0x91   : > { %v2397_v48 = vrot.slane %v2395_v19, 5  ;;  %v9844_v53 = vcombine.low %v7345_v9, %v7354_v28  ;;  %v2284_v17 = vsel %vm7161_vm2, %v7881_v16, %v7837_v51  ;;  %v2294_v11 = vsel %vm7161_vm2, %v7904_v47, %v7883_v57  ;;  %v7988_v16 = vld [vmem:[%s7130_s25 + $0x68] sm:$0x1] }
  0x92   : > { %6588 = vmatmul.mubr.bf16.gmra.mxu0 %v9842_v4  ;;  %v7975_v30 = vrot.slane %v2363_v21, 5  ;;  %v2405_v38 = vshrl.u32 %v7940_v31, 16  ;;  %v9845_v9 = vcombine.low %v9826_v24, %v7409_v52  ;;  %v7985_v28 = vrot.slane %v2350_v54, 4  ;;  %v6980_v52 = vld [vmem:[%s7130_s25 + $0xc] sm:$0xff]  }
  0x93   : > { %6591 = vmatprep.mubr.bf16.mxu0 %v9843_v25  ;;  %v2374_v51 = vor.u32 %v2373_v35, %v2370_v62  ;;  %v2416_v59 = vshrl.u32 %v5704_v46, 16  ;;  %v2419_v57 = vshll.u32 %v5704_v46, 16  ;;  %v7990_v47 = vrot.slane %v2360_v3, 4  ;;  %v8001_v62 = vld [vmem:[%s7130_s25 + $0x74] sm:$0x1] }
  0x94   : > { %v2384_v22 = vor.u32 %v2383_v44, %v7952_v7  ;;  %v7993_v5 = vrot.slane %v2387_v33, 5  ;;  %v2425_v18 = vshll.u32 %v7980_v8, 16  ;;  %v2398_v24 = vor.u32 %v2397_v48, %v2394_v29  ;;  %v5707_v25 = vld [vmem:[%s7130_s25 + $0x78] sm:$0xf]  ;;  %v8005_v44 = vld [vmem:[%s7130_s25 + $0x7c] sm:$0xf] }
  0x95   : > { %6540 = vmatmul.mubr.bf16.gmra.mxu1 %v9844_v53  ;;  %v7997_v21 = vrot.slane %v2401_v26, 5  ;;  %v2407_v49 = vrot.slane %v2405_v38, 4  ;;  %v2429_v19 = vshrl.u32 %v7980_v8, 16  ;;  %v5745_v4 = vcombine.low %v2260_v37, %v2270_v2  ;;  %v8012_v26 = vld [vmem:[%s7130_s25 + $0x80] sm:$0x1] }
  0x96   : > { %6543 = vmatprep.mubr.bf16.mxu1 %v9845_v9  ;;  %v5746_v54 = vcombine.low %v2284_v17, %v2294_v11  ;;  %v2418_v3 = vrot.slane %v2416_v59, 4  ;;  %v2421_v35 = vrot.slane %v2419_v57, 5  ;;  %v8007_v33 = vrot.slane %v2374_v51, 4 }
  0x97   : > { %v8009_v53 = vrot.slane %v2425_v18, 5  ;;  %v2431_v29 = vrot.slane %v2429_v19, 4  ;;  %v2440_v48 = vshrl.u32 %v5707_v25, 16  ;;  %v2411_v37 = vshll.u32 %v7988_v16, 16  ;;  %v5710_v19 = vld [vmem:[%s7130_s25 + $0x84] sm:$0xf] }
  0x98   : > { %v2443_v2 = vshll.u32 %v5707_v25, 16  ;;  %v2449_v17 = vshll.u32 %v8005_v44, 16  ;;  %v2453_v11 = vshrl.u32 %v8005_v44, 16  ;;  %v8017_v38 = vrot.slane %v2384_v22, 4  ;;  %v6984_v25 = vld [vmem:[%s7130_s25 + $0x24] sm:$0xff]  }
  0x99   : > { %v8019_v46 = vrot.slane %v2398_v24, 4  ;;  %v2442_v9 = vrot.slane %v2440_v48, 4  ;;  %v9846_v51 = vcombine.low %v9829_v43, %v9828_v40  ;;  %v2308_v22 = vsel %vm7161_vm2, %v7923_v20, %v7851_v50 }
  0x9a   : > { %6592 = vmatmul.mubr.bf16.gmra.mxu0 %v5599_v55  ;;  %v2408_v55 = vor.u32 %v2407_v49, %v7997_v21  ;;  %v2445_v59 = vrot.slane %v2443_v2, 5  ;;  %v8025_v57 = vrot.slane %v2449_v17, 5  ;;  %v2455_v18 = vrot.slane %v2453_v11, 4  ;;  %v8074_v17 = vld [vmem:[%s7130_s25 + $0x8c] sm:$0x1] }
  0x9b   : > { %6659 = vmatprep.mubr.bf16.mxu0 %v5744_v14  ;;  %v2422_v14 = vor.u32 %v2421_v35, %v2418_v3  ;;  %v2432_v24 = vor.u32 %v2431_v29, %v8009_v53  ;;  %v2435_v49 = vshll.u32 %v8001_v62, 16  ;;  %v2459_v40 = vshll.u32 %v8012_v26, 16  ;;  %v8048_v3 = vld [vmem:[%s7130_s25 + $0x88] sm:$0xf]  ;;  %v6981_v35 = vld [vmem:[%s7130_s25 + $0x18] sm:$0xff]  }
  0x9c   : > { %v2318_v43 = vsel %vm7161_vm2, %v7925_v1, %v7906_v12  ;;  %v2342_v50 = vsel %vm7161_vm2, %v7942_v6, %v7927_v13  ;;  %v2446_v20 = vor.u32 %v2445_v59, %v2442_v9  ;;  %v6987_v12 = vld [vmem:[%s9787_s1 + $0x1b0] sm:$0xff]   ;;  %v8055_v1 = vrot.slane %v2411_v37, 5  ;;  %v8079_v11 = vld [vmem:[%s9787_s1 + $0x1a8] sm:$0xff]  }
  0x9d   : > { %6544 = vmatmul.mubr.bf16.gmra.mxu1 %v9846_v51  ;;  %v2467_v29 = vshll.u32 %v5710_v19, 16  ;;  %v6986_v13 = vld [vmem:[%s9787_s1 + $0x170] sm:$0xff]   ;;  %v2356_v6 = vsel %vm7161_vm2, %v7985_v28, %v7918_v63  ;;  %v2366_v48 = vsel %vm7161_vm2, %v7990_v47, %v7975_v30  ;;  %v8069_v37 = vrot.slane %v2408_v55, 4 }
  0x9e   : > { %6611 = vmatprep.mubr.bf16.mxu1 %v6980_v52  ;;  %v2332_v52 = vsel %vm7161_vm2, %v7933_v58, %v7877_v60  ;;  %v2456_v60 = vor.u32 %v2455_v18, %v8025_v57  ;;  %v2464_v58 = vshrl.u32 %v5710_v19, 16  ;;  %v8071_v2 = vrot.slane %v2422_v14, 4  ;;  %v5713_v14 = vld [vmem:[%s7130_s25 + $0x90] sm:$0xf]  ;;  %v8102_v59 = vld [vmem:[%s7130_s25 + $0x94] sm:$0xf] }
  0x9f   : > { %v8081_v63 = vrot.slane %v2432_v24, 4  ;;  %v8083_v28 = vrot.slane %v2435_v49, 5  ;;  %v2473_v30 = vshll.u32 %v8048_v3, 16  ;;  %v2477_v47 = vshrl.u32 %v8048_v3, 16  ;;  %9847 = vst [vmem:[#allocation6_spill] sm:$0xff] %v8102_v59 }
  0xa0   : > { %v2390_v55 = vsel %vm7161_vm2, %v8017_v38, %v7993_v5  ;;  %v8096_v9 = vrot.slane %v2446_v20, 4  ;;  %v8098_v51 = vrot.slane %v2459_v40, 5  ;;  %v2469_v18 = vrot.slane %v2467_v29, 5  ;;  %v6990_v5 = vld [vmem:[%s9787_s1 + $0x168] sm:$0xff]  }
  0xa1   : > { %v2491_v38 = vshll.u32 %v5713_v14, 16  ;;  %v2497_v24 = vshll.u32 %v8102_v59, 16  ;;  %v2501_v49 = vshrl.u32 %v8102_v59, 16  ;;  %v5747_v40 = vcombine.low %v2308_v22, %v2318_v43 }
  0xa2   : > { %6660 = vmatmul.mubr.bf16.vlgmr.msra.gmra.mxu0 %v5745_v4  ;;  %v2380_v4 = vsel %vm7161_vm2, %v8007_v33, %v7952_v7  ;;  %v2483_v7 = vshll.u32 %v8074_v17, 16  ;;  %v2488_v33 = vshrl.u32 %v5713_v14, 16  ;;  %v5748_v20 = vcombine.low %v2332_v52, %v2342_v50 }
  0xa3   : > { %6740 = vmatpush3.bf16.msra.mxu0 %v7804_v15  ;;  %6663 = vmatprep.mubr.bf16.mxu0 %v5746_v54  ;;  %v8104_v15 = vrot.slane %v2456_v60, 4  ;;  %v2466_v54 = vrot.slane %v2464_v58, 4  ;;  %v8113_v19 = vrot.slane %v2473_v30, 5  ;;  %v6985_v60 = vld [vmem:[%s7130_s25 + $0x30] sm:$0xff]   ;;  %v6995_v58 = vld [vmem:[%s9787_s1 + $0x1a0] sm:$0xff]   ;;  %v2493_v14 = vrot.slane %v2491_v38, 5 }
  0xa4   : > { %6741 = vmatprep.subr.bf16.mxu0 %v6987_v12  ;;  %v2490_v29 = vrot.slane %v2488_v33, 4  ;;  %v2503_v22 = vrot.slane %v2501_v49, 4  ;;  %v8121_v43 = vcombine.low %v2356_v6, %v2366_v48  ;;  %v8124_v52 = vcombine.low %v2380_v4, %v2390_v55  ;;  %v5716_v30 = vld [vmem:[%s7130_s25 + $0x9c] sm:$0xf]  ;;  %v8146_v4 = vld [vmem:[%s7130_s25 + $0xa4] sm:$0x1] }
  0xa5   : > { %6612 = vmatmul.mubr.bf16.vlgmr.msra.gmra.mxu1 %v6981_v35  ;;  %v2479_v35 = vrot.slane %v2477_v47, 4  ;;  %v2470_v48 = vor.u32 %v2469_v18, %v2466_v54  ;;  %v8143_v47 = vld [vmem:[%s7130_s25 + $0xa0] sm:$0xf]  ;;  %9850 = vst [vmem:[#allocation9_spill] sm:$0xff] %v8146_v4  ;;  %v2512_v55 = vshrl.u32 %v5716_v30, 16  ;;  %v2515_v33 = vshll.u32 %v5716_v30, 16 }
  0xa6   : > { %6692 = vmatpush3.bf16.msra.mxu1 %v7799_v36  ;;  %6615 = vmatprep.mubr.bf16.mxu1 %v6984_v25  ;;  %v8119_v36 = vrot.slane %v2497_v24, 5  ;;  %v2414_v25 = vsel %vm7161_vm2, %v8069_v37, %v8055_v1  ;;  %9849 = vst [vmem:[#allocation8_spill] sm:$0xff] %v8143_v47  ;;  %v6988_v38 = vld [vmem:[%s7130_s25 + $0x3c] sm:$0xff]   ;;  %v2521_v37 = vshll.u32 %v8143_v47, 16  ;;  %v2525_v24 = vshrl.u32 %v8143_v47, 16 }
  0xa7   : > { %6693 = vmatprep.subr.bf16.mxu1 %v6986_v13  ;;  %6742 = vmatpush3.bf16.msra.mxu0 %v6987_v12  ;;  %v8135_v12 = vld [vmem:[%s7130_s25 + $0x98] sm:$0x1]  ;;  %v2480_v1 = vor.u32 %v2479_v35, %v8113_v19  ;;  %v6994_v54 = vld [vmem:[%s9787_s1 + $0x160] sm:$0xff]   ;;  %v2494_v18 = vor.u32 %v2493_v14, %v2490_v29  ;;  %v2514_v30 = vrot.slane %v2512_v55, 4  ;;  %v2517_v49 = vrot.slane %v2515_v33, 5 }
  0xa8   : > { %6743 = vmatprep.subr.bf16.mxu0 %v8079_v11  ;;  %9848 = vst [vmem:[#allocation7_spill] sm:$0xff] %v8135_v12  ;;  %v2507_v35 = vshll.u32 %v8135_v12, 16  ;;  %v2527_v6 = vrot.slane %v2525_v24, 4  ;;  %v2531_v50 = vshll.u32 %v8146_v4, 16  ;;  %v5719_v47 = vld [vmem:[%s7130_s25 + $0xa8] sm:$0xf] }
  0xa9   : > { %v6998_v29 = vld [vmem:[%s9787_s1 + $0x158] sm:$0xff]   ;;  %v8169_v14 = vrot.slane %v2470_v48, 4  ;;  %v2536_v55 = vshrl.u32 %v5719_v47, 16  ;;  %v2539_v33 = vshll.u32 %v5719_v47, 16  ;;  %v8182_v4 = vld [vmem:[%s7130_s25 + $0xb0] sm:$0x1] }
  0xaa   : > { %6664 = vmatmul.mubr.bf16.gmra.mxu0 %v5747_v40  ;;  %6694 = vmatpush3.bf16.msra.mxu1 %v6986_v13  ;;  %v6999_v13 = vld [vmem:[%s9787_s1 + $0x198] sm:$0xff]   ;;  %v2504_v40 = vor.u32 %v2503_v22, %v8119_v36  ;;  %v8171_v22 = vrot.slane %v2483_v7, 5  ;;  %v6989_v48 = vld [vmem:[%s7130_s25 + $0x48] sm:$0xff]   ;;  %v8185_v7 = vrot.slane %v2480_v1, 4  ;;  %v8187_v12 = vrot.slane %v2494_v18, 4 }
  0xab   : > { %6667 = vmatprep.mubr.bf16.mxu0 %v5748_v20  ;;  %6695 = vmatprep.subr.bf16.mxu1 %v6990_v5  ;;  %v8162_v20 = vrot.slane %v2521_v37, 5  ;;  %v2518_v37 = vor.u32 %v2517_v49, %v2514_v30  ;;  %v8189_v59 = vrot.slane %v2507_v35, 5  ;;  %v7002_v49 = vld [vmem:[%s9787_s1 + $0x150] sm:$0xff]   ;;  %v8206_v18 = vrot.slane %v2539_v33, 5 }
  0xac   : > { %6744 = vmatpush3.bf16.msra.mxu0 %v8079_v11  ;;  %v8174_v11 = vld [vmem:[%s7130_s25 + $0xac] sm:$0xf]  ;;  %v2555_v35 = vshll.u32 %v8182_v4, 16 }
  0xad   : > { %6616 = vmatmul.mubr.bf16.gmra.mxu1 %v6985_v60  ;;  %6745 = vmatprep.subr.bf16.mxu0 %v6995_v58  ;;  %9851 = vst [vmem:[#allocation10_spill] sm:$0xff] %v8174_v11  ;;  %v2438_v60 = vsel %vm7161_vm2, %v8081_v63, %v8083_v28  ;;  %v2528_v24 = vor.u32 %v2527_v6, %v8162_v20  ;;  %v2545_v47 = vshll.u32 %v8174_v11, 16  ;;  %v6992_v63 = vld [vmem:[%s7130_s25 + $0x54] sm:$0xff]   ;;  %v8196_v28 = vrot.slane %v2504_v40, 4 }
  0xae   : > { %6619 = vmatprep.mubr.bf16.mxu1 %v6988_v38  ;;  %6696 = vmatpush3.bf16.msra.mxu1 %v6990_v5  ;;  %v7003_v5 = vld [vmem:[%s9787_s1 + $0x190] sm:$0xff]   ;;  %v8198_v6 = vrot.slane %v2531_v50, 5  ;;  %v8200_v38 = vrot.slane %v2536_v55, 4  ;;  %v2549_v1 = vshrl.u32 %v8174_v11, 16  ;;  %v8215_v40 = vrot.slane %v2518_v37, 4 }
  0xaf   : > { %6697 = vmatprep.subr.bf16.mxu1 %v6994_v54  ;;  %v8217_v30 = vrot.slane %v2528_v24, 4  ;;  %v5722_v55 = vld [vmem:[%s7130_s25 + $0xb4] sm:$0xf]  ;;  %v8221_v11 = vld [vmem:[%s7130_s25 + $0xb8] sm:$0xf]  ;;  %v7006_v24 = vld [vmem:[%s9787_s1 + $0x148] sm:$0xff]  }
  0xb0   : > { %6746 = vmatpush3.bf16.msra.mxu0 %v6995_v58  ;;  %v9852_v58 = vsel %vm7161_vm2, %v8019_v46, %v7997_v21  ;;  %9853 = vst [vmem:[#allocation11_spill] sm:$0xff] %v8221_v11  ;;  %v2452_v21 = vsel %vm7161_vm2, %v8096_v9, %v8025_v57  ;;  %v8233_v46 = vrot.slane %v2545_v47, 5  ;;  %v5725_v37 = vld [vmem:[%s7130_s25 + $0xc0] sm:$0xf]  ;;  %v2462_v57 = vsel %vm7161_vm2, %v8104_v15, %v8098_v51  ;;  %v8260_v47 = vld [vmem:[%s7130_s25 + $0xc4] sm:$0xf] }
  0xb1   : > { %6747 = vmatprep.subr.bf16.mxu0 %v6999_v13  ;;  %v5751_v50 = vcombine.low %v9852_v58, %v2414_v25  ;;  %v2560_v25 = vshrl.u32 %v5722_v55, 16  ;;  %v2476_v9 = vsel %vm7161_vm2, %v8169_v14, %v8113_v19  ;;  %9856 = vst [vmem:[#allocation13_spill] sm:$0xff] %v8260_v47  ;;  %v8263_v51 = vld [vmem:[%s7130_s25 + $0xc8] sm:$0x1]  ;;  %v2593_v58 = vshll.u32 %v8260_v47, 16 }
  0xb2   : > { %6668 = vmatmul.mubr.bf16.gmra.mxu0 %v8121_v43  ;;  %6698 = vmatpush3.bf16.msra.mxu1 %v6994_v54  ;;  %v9854_v43 = vsel %vm7161_vm2, %v8071_v2, %v8009_v53  ;;  %v2551_v54 = vrot.slane %v2549_v1, 4  ;;  %v2563_v53 = vshll.u32 %v5722_v55, 16  ;;  %v2569_v2 = vshll.u32 %v8221_v11, 16 }
  0xb3   : > { %6671 = vmatprep.mubr.bf16.mxu0 %v8124_v52  ;;  %v5752_v33 = vcombine.low %v9854_v43, %v2438_v60  ;;  %6699 = vmatprep.subr.bf16.mxu1 %v6998_v29  ;;  %v7007_v52 = vld [vmem:[%s9787_s1 + $0x188] sm:$0xff]   ;;  %v2573_v60 = vshrl.u32 %v8221_v11, 16  ;;  %v2562_v15 = vrot.slane %v2560_v25, 4  ;;  %v9857_v55 = vrot.slane %v7668_v32, 5 }
  0xb4   : > { %6748 = vmatpush3.bf16.msra.mxu0 %v6999_v13  ;;  %v2486_v13 = vsel %vm7161_vm2, %v8185_v7, %v8171_v22  ;;  %v2565_v19 = vrot.slane %v2563_v53, 5  ;;  %v8265_v14 = vrot.slane %v2569_v2, 5  ;;  %v2584_v22 = vshrl.u32 %v5725_v37, 16  ;;  %v6993_v2 = vld [vmem:[%s7130_s25 + $0x60] sm:$0xff]  }
  0xb5   : > { %6620 = vmatmul.mubr.bf16.gmra.mxu1 %v6989_v48  ;;  %6749 = vmatprep.subr.bf16.mxu0 %v7003_v5  ;;  %v8257_v48 = vld [vmem:[%s7130_s25 + $0xbc] sm:$0x1]  ;;  %v2575_v1 = vrot.slane %v2573_v60, 4  ;;  %v2587_v7 = vshll.u32 %v5725_v37, 16  ;;  %v8270_v43 = vrot.slane %v9857_v55, 4  ;;  %v8275_v25 = vrot.slane %v2555_v35, 5 }
  0xb6   : > { %9855 = vst [vmem:[#allocation12_spill] sm:$0xff] %v8257_v48  ;;  %6623 = vmatprep.mubr.bf16.mxu1 %v6992_v63  ;;  %6700 = vmatpush3.bf16.msra.mxu1 %v6998_v29  ;;  %v2542_v63 = vor.u32 %v8206_v18, %v8200_v38  ;;  %v2552_v29 = vor.u32 %v2551_v54, %v8233_v46  ;;  %v2597_v53 = vshrl.u32 %v8260_v47, 16  ;;  %v2579_v60 = vshll.u32 %v8257_v48, 16  ;;  %v6996_v38 = vld [vmem:[%s7130_s25 + $0x6c] sm:$0xff]   ;;  %v8295_v48 = vld [vmem:[%s7130_s25 + $0x18] sm:$0xe] }
  0xb7   : > { %6701 = vmatprep.subr.bf16.mxu1 %v7002_v49  ;;  %v2586_v37 = vrot.slane %v2584_v22, 4  ;;  %v2589_v11 = vrot.slane %v2587_v7, 5  ;;  %v8280_v55 = vrot.slane %v2593_v58, 5  ;;  %v2566_v18 = vor.u32 %v2565_v19, %v2562_v15  ;;  %v7010_v22 = vld [vmem:[%s9787_s1 + $0x140] sm:$0xff]   ;;  %v8292_v58 = vld [vmem:[%s7130_s25 + $0xc] sm:$0xe] }
  0xb8   : > { %6750 = vmatpush3.bf16.msra.mxu0 %v7003_v5  ;;  %v7011_v5 = vld [vmem:[%s9787_s1 + $0x180] sm:$0xff]   ;;  %v2576_v35 = vor.u32 %v2575_v1, %v8265_v14  ;;  %v2599_v54 = vrot.slane %v2597_v53, 4  ;;  %v2603_v47 = vshll.u32 %v8263_v51, 16  ;;  %v5753_v15 = vcombine.low %v2452_v21, %v2462_v57 }
  0xb9   : > { %6751 = vmatprep.subr.bf16.mxu0 %v7007_v52  ;;  %v2590_v7 = vor.u32 %v2589_v11, %v2586_v37  ;;  %v5754_v19 = vcombine.low %v2476_v9, %v2486_v13  ;;  %v8303_v1 = vrot.slane %v2542_v63, 4  ;;  %v8305_v11 = vrot.slane %v2552_v29, 4  ;;  %v6997_v9 = vld [vmem:[%s7130_s25 + $0x78] sm:$0xff]   ;;  %v7000_v37 = vld [vmem:[%s7130_s25 + $0x84] sm:$0xff]  }
  0xba   : > { %6672 = vmatmul.mubr.bf16.gmra.mxu0 %v5751_v50  ;;  %6702 = vmatpush3.bf16.msra.mxu1 %v7002_v49  ;;  %v8300_v49 = vld [vmem:[%s9787_s1 + $0x238] sm:$0xff]   ;;  %v2600_v50 = vor.u32 %v2599_v54, %v8280_v55  ;;  %v8314_v53 = vrot.slane %v2576_v35, 4  ;;  %v8316_v21 = vrot.slane %v2579_v60, 5  ;;  %v8322_v63 = vrot.slane %v2603_v47, 5  ;;  %v5771_v60 = vld [vmem:[%s7130_s25 + $0x30] sm:$0xe] }
  0xbb   : > { %6675 = vmatprep.mubr.bf16.mxu0 %v5752_v33  ;;  %6703 = vmatprep.subr.bf16.mxu1 %v7006_v24  ;;  %v8310_v33 = vld [vmem:[%s9787_s1 + $0x1f8] sm:$0xff]   ;;  %v8320_v13 = vrot.slane %v2590_v7, 4  ;;  %v2998_v29 = vrot.slane %v7742_v42, 5  ;;  %v9858_v35 = vld [vmem:[#allocation2_spill] sm:$0xff]  ;;  %v5787_v47 = vrot.slane %v5771_v60, 9  ;;  %v9861_v60 = vld [vmem:[#allocation3_spill] sm:$0xff] }
  0xbc   : > { %6752 = vmatpush3.bf16.msra.mxu0 %v7007_v52  ;;  %v8312_v52 = vrot.slane %v2566_v18, 4  ;;  %v9859_v7 = vld [vmem:[#allocation5_spill] sm:$0xff]  ;;  %v3019_v18 = vrot.slane %v7825_v0, 5  ;;  %v2534_v0 = vsel %vm7161_vm2, %v8217_v30, %v8198_v6  ;;  %v3033_v30 = vrot.slane %v7916_v41, 5 }
  0xbd   : > { %6624 = vmatmul.mubr.bf16.gmra.mxu1 %v6993_v2  ;;  %6753 = vmatprep.subr.bf16.mxu0 %v7011_v5  ;;  %v3016_v57 = vrot.slane %v9859_v7, 5  ;;  %v9860_v2 = vld [vmem:[#allocation4_spill] sm:$0xff] }
  0xbe   : > { %6627 = vmatprep.mubr.bf16.mxu1 %v6996_v38  ;;  %6704 = vmatpush3.bf16.msra.mxu1 %v7006_v24  ;;  %v8327_v24 = vrot.slane %v2600_v50, 4  ;;  %v3002_v38 = vrot.slane %v7759_v61, 5  ;;  %v2500_v50 = vsel %vm7161_vm2, %v8187_v12, %v8119_v36  ;;  %v3023_v54 = vrot.slane %v9860_v2, 5  ;;  %v5772_v12 = vld [vmem:[%s7130_s25 + $0x3c] sm:$0xe] }
  0xbf   : > { %6705 = vmatprep.subr.bf16.mxu1 %v7010_v22  ;;  %v8349_v7 = vsel %vm7472_vm5, %v5787_v47, %v3016_v57  ;;  %v3018_v36 = vrot.slane %v3016_v57, 4  ;;  %v5788_v2 = vrot.slane %v5772_v12, 9  ;;  %v7001_v47 = vld [vmem:[%s7130_s25 + $0x90] sm:$0xff]   ;;  %v3040_v12 = vrot.slane %v7936_v34, 5 }
  0xc0   : > { %6754 = vmatpush3.bf16.msra.mxu0 %v7011_v5  ;;  %v2510_v5 = vsel %vm7161_vm2, %v8196_v28, %v8189_v59  ;;  %v2524_v59 = vsel %vm7161_vm2, %v8215_v40, %v8162_v20  ;;  %v3025_v28 = vrot.slane %v3023_v54, 4  ;;  %v3030_v20 = vrot.slane %v7875_v39, 5 }
  0xc1   : > { %6835 = vmatprep.subr.bf16.mxu0 %v8300_v49  ;;  %v8363_v57 = vsel %vm7472_vm5, %v3018_v36, %v3019_v18  ;;  %v5756_v18 = vcombine.low %v2524_v59, %v2534_v0  ;;  %v8378_v39 = vsel %vm7472_vm5, %v5788_v2, %v3023_v54  ;;  %v2548_v36 = vsel %vm7161_vm2, %v8303_v1, %v8233_v46  ;;  %v5774_v54 = vld [vmem:[%s7130_s25 + $0x54] sm:$0xe] }
  0xc2   : > { %6676 = vmatmul.mubr.bf16.gmra.mxu0 %v5753_v15  ;;  %6706 = vmatpush3.bf16.msra.mxu1 %v7010_v22  ;;  %v3012_v15 = vrot.slane %v9861_v60, 5  ;;  %v3026_v22 = vrot.slane %v7854_v45, 5  ;;  %v5819_v40 = vcombine.low %v8349_v7, %v8363_v57  ;;  %v5773_v45 = vld [vmem:[%s7130_s25 + $0x48] sm:$0xe]  ;;  %v2558_v46 = vsel %vm7161_vm2, %v8305_v11, %v8275_v25  ;;  %v7021_v7 = vld [vmem:[%s7130_s25 + $0x54] sm:$0xff]  }
  0xc3   : > { %6679 = vmatprep.mubr.bf16.mxu0 %v5754_v19  ;;  %6787 = vmatprep.subr.bf16.mxu1 %v8310_v33  ;;  %v5755_v19 = vcombine.low %v2500_v50, %v2510_v5  ;;  %v3032_v50 = vrot.slane %v3030_v20, 4  ;;  %v7004_v5 = vld [vmem:[%s7130_s25 + $0x9c] sm:$0xff]   ;;  %v3044_v2 = vrot.slane %v7940_v31, 5  ;;  %v2572_v34 = vsel %vm7161_vm2, %v8312_v52, %v8265_v14 }
  0xc4   : > { %v8370_v6 = vsel %vm7472_vm5, %v3025_v28, %v3026_v22  ;;  %v5790_v28 = vrot.slane %v5774_v54, 9  ;;  %v5775_v22 = vld [vmem:[%s7130_s25 + $0x60] sm:$0xe]  ;;  %v3047_v25 = vrot.slane %v7988_v16, 5  ;;  %v2582_v11 = vsel %vm7161_vm2, %v8314_v53, %v8316_v21 }
  0xc5   : > { %6628 = vmatmul.mubr.bf16.gmra.mxu1 %v6997_v9  ;;  %v3037_v9 = vrot.slane %v7910_v10, 5  ;;  %v5820_v41 = vcombine.low %v8378_v39, %v8370_v6  ;;  %v8393_v59 = vsel %vm7472_vm5, %v3032_v50, %v3033_v30  ;;  %v3051_v14 = vrot.slane %v7980_v8, 5  ;;  %v6001_v6 = vld [vmem:[%s7130_s25 + $0x24] sm:$0xe] }
  0xc6   : > { %6631 = vmatprep.mubr.bf16.mxu1 %v7000_v37  ;;  %v5789_v37 = vrot.slane %v5773_v45, 9  ;;  %v3046_v45 = vrot.slane %v3044_v2, 4  ;;  %v5757_v52 = vcombine.low %v2548_v36, %v2558_v46  ;;  %v3054_v8 = vrot.slane %v8001_v62, 5  ;;  %v5777_v36 = vld [vmem:[%s7130_s25 + $0x78] sm:$0xe] }
  0xc7   : > { %v3039_v0 = vrot.slane %v3037_v9, 4  ;;  %v8420_v31 = vsel %vm7472_vm5, %v5790_v28, %v3037_v9  ;;  %v3053_v9 = vrot.slane %v3051_v14, 4  ;;  %v3058_v54 = vrot.slane %v8005_v44, 5 }
  0xc8   : > { %v8389_v10 = vsel %vm7472_vm5, %v5789_v37, %v3030_v20  ;;  %v5791_v20 = vrot.slane %v5775_v22, 9  ;;  %v8432_v53 = vsel %vm7472_vm5, %v3046_v45, %v3047_v25  ;;  %v5758_v37 = vcombine.low %v2572_v34, %v2582_v11 }
  0xc9   : > { %v8448_v46 = vsel %vm7472_vm5, %v3053_v9, %v3054_v8  ;;  %v5793_v62 = vrot.slane %v5777_v36, 9  ;;  %v3065_v28 = vrot.slane %v8048_v3, 5  ;;  %v3060_v44 = vrot.slane %v3058_v54, 4  ;;  %v7012_v8 = vld [vmem:[%s7130_s25 + $0x18] sm:$0xff]   ;;  %v9866_v36 = vld [vmem:[#allocation8_spill] sm:$0xff] }
  0xca   : > { %6680 = vmatmul.mubr.bf16.gmra.mxu0 %v5755_v19  ;;  %v8411_v19 = vsel %vm7472_vm5, %v3039_v0, %v3040_v12  ;;  %v8427_v16 = vsel %vm7472_vm5, %v5791_v20, %v3044_v2  ;;  %v3061_v0 = vrot.slane %v8012_v26, 5  ;;  %v3068_v26 = vrot.slane %v8074_v17, 5  ;;  %v5778_v20 = vld [vmem:[%s7130_s25 + $0x84] sm:$0xe] }
  0xcb   : > { %6683 = vmatprep.mubr.bf16.mxu0 %v5756_v18  ;;  %v5776_v18 = vld [vmem:[%s7130_s25 + $0x6c] sm:$0xe]  ;;  %v2596_v2 = vsel %vm7161_vm2, %v8320_v13, %v8280_v55  ;;  %v8460_v34 = vsel %vm7472_vm5, %v5793_v62, %v3058_v54  ;;  %v2606_v3 = vsel %vm7161_vm2, %v8327_v24, %v8322_v63  ;;  %v5794_v25 = vrot.slane %v5778_v20, 9  ;;  %v9864_v63 = vld [vmem:[#allocation6_spill] sm:$0xff] }
  0xcc   : > { %v5792_v21 = vrot.slane %v5776_v18, 9  ;;  %v8469_v17 = vsel %vm7472_vm5, %v3060_v44, %v3061_v0  ;;  %v3067_v11 = vrot.slane %v3065_v28, 4  ;;  %v9862_v45 = vrot.slane %v7668_v32, 5  ;;  %v5779_v18 = vld [vmem:[%s7130_s25 + $0x90] sm:$0xe]  ;;  %v7024_v62 = vld [vmem:[%s7130_s25 + $0x60] sm:$0xff]  }
  0xcd   : > { %6632 = vmatmul.mubr.bf16.gmra.mxu1 %v7001_v47  ;;  %v7005_v47 = vld [vmem:[%s7130_s25 + $0xa8] sm:$0xff]   ;;  %v9863_v55 = vrot.slane %v8292_v58, 9  ;;  %v3072_v24 = vrot.slane %v9864_v63, 5  ;;  %v8486_v32 = vsel %vm7472_vm5, %v5794_v25, %v3065_v28  ;;  %v3079_v54 = vrot.slane %v9866_v36, 5 }
  0xce   : > { %6635 = vmatprep.mubr.bf16.mxu1 %v7004_v5  ;;  %v7008_v5 = vld [vmem:[%s7130_s25 + $0xb4] sm:$0xff]   ;;  %v8444_v12 = vsel %vm7472_vm5, %v5792_v21, %v3051_v14  ;;  %v5770_v14 = vld [vmem:[%s7130_s25 + $0x24] sm:$0xe]  ;;  %v9865_v21 = vld [vmem:[#allocation7_spill] sm:$0xff]  ;;  %v8490_v58 = vsel %vm7472_vm5, %v3067_v11, %v3068_v26  ;;  %v5759_v0 = vcombine.low %v2596_v2, %v2606_v3  ;;  %v2999_v28 = vsel %vm7472_vm5, %v8270_v43, %v2998_v29 }
  0xcf   : > { %v2996_v13 = vsel %vm7472_vm5, %v9863_v55, %v9862_v45  ;;  %v3075_v9 = vrot.slane %v9865_v21, 5  ;;  %v3074_v44 = vrot.slane %v3072_v24, 4  ;;  %v7009_v45 = vld [vmem:[%s7130_s25 + $0xc0] sm:$0xff]   ;;  %v3004_v26 = vrot.slane %v3002_v38, 4  ;;  %v5780_v2 = vld [vmem:[%s7130_s25 + $0x9c] sm:$0xe] }
  0xd0   : > { %v3081_v3 = vrot.slane %v3079_v54, 4  ;;  %v5796_v11 = vrot.slane %v5780_v2, 9  ;;  %v9868_v55 = vld [vmem:[#allocation10_spill] sm:$0xff]  ;;  %v5781_v63 = vld [vmem:[%s7130_s25 + $0xa8] sm:$0xe]  ;;  %v5816_v21 = vcombine.low %v2996_v13, %v2999_v28  ;;  %v9872_v28 = vrot.slane %v8295_v48, 9 }
  0xd1   : > { %v8511_v25 = vsel %vm7472_vm5, %v3074_v44, %v3075_v9  ;;  %v3086_v42 = vrot.slane %v9868_v55, 5  ;;  %v8634_v43 = vld [vmem:[%s7130_s25 + $0x34] sm:$0xf] }
  0xd2   : > { %6684 = vmatmul.mubr.bf16.gmra.mxu0 %v5757_v52  ;;  %v8524_v9 = vsel %vm7472_vm5, %v5796_v11, %v3079_v54  ;;  %v5782_v54 = vld [vmem:[%s7130_s25 + $0xb4] sm:$0xe]  ;;  %v3920_v39 = vshll.u32 %v8634_v43, 16 }
  0xd3   : > { %6687 = vmatprep.mubr.bf16.mxu0 %v5758_v37  ;;  %v5795_v37 = vrot.slane %v5779_v18, 9  ;;  %v5786_v18 = vrot.slane %v5770_v14, 9  ;;  %v3088_v36 = vrot.slane %v3086_v42, 4  ;;  %v9869_v14 = vrot.slane %v9858_v35, 5 }
  0xd4   : > { %v5798_v55 = vrot.slane %v5782_v54, 9 }
  0xd5   : > { %6636 = vmatmul.mubr.bf16.gmra.mxu1 %v7005_v47  ;;  %v9867_v47 = vld [vmem:[#allocation9_spill] sm:$0xff]  ;;  %v3011_v44 = vrot.slane %v9869_v14, 4  ;;  %v9874_v61 = vmov %v9869_v14  ;;  %v3103_v14 = vrot.slane %v8263_v51, 5  ;;  %v5918_v51 = vld [vmem:[%s7130_s25 + $0x30] sm:$0xf] }
  0xd6   : > { %6639 = vmatprep.mubr.bf16.mxu1 %v7008_v5  ;;  %v3082_v20 = vrot.slane %v9867_v47, 5  ;;  %v8506_v5 = vsel %vm7472_vm5, %v5795_v37, %v3072_v24  ;;  %v3089_v24 = vrot.slane %v8182_v4, 5  ;;  %v5797_v37 = vrot.slane %v5781_v63, 9 }
  0xd7   : > { %v9873_v63 = vrot.slane %v7773_v23, 5  ;;  %v3010_v48 = vsel %vm7472_vm5, %v5786_v18, %v9874_v61  ;;  %v3013_v23 = vsel %vm7472_vm5, %v3011_v44, %v3012_v15  ;;  %v8604_v61 = vld [vmem:[%s7130_s25 + $0x28] sm:$0xf] }
  0xd8   : > { %v8518_v29 = vsel %vm7472_vm5, %v3081_v3, %v3082_v20  ;;  %v9870_v20 = vld [vmem:[#allocation11_spill] sm:$0xff]  ;;  %v8533_v4 = vsel %vm7472_vm5, %v5797_v37, %v3086_v42  ;;  %v8537_v13 = vsel %vm7472_vm5, %v3088_v36, %v3089_v24  ;;  %v3003_v3 = vsel %vm7472_vm5, %v9872_v28, %v3002_v38  ;;  %v5783_v37 = vld [vmem:[%s7130_s25 + $0xc0] sm:$0xe]  ;;  %v9875_v38 = vld [vmem:[#allocation13_spill] sm:$0xff] }
  0xd9   : > { %v3093_v2 = vrot.slane %v9870_v20, 5  ;;  %v3006_v24 = vsel %vm7472_vm5, %v3004_v26, %v9873_v63  ;;  %v3100_v36 = vrot.slane %v9875_v38, 5  ;;  %v5799_v18 = vrot.slane %v5783_v37, 9  ;;  %v7019_v20 = vld [vmem:[%s9787_s1 + $0x230] sm:$0xff]   ;;  %v5915_v63 = vld [vmem:[%s7130_s25 + $0x24] sm:$0xf] }
  0xda   : > { %6688 = vmatmul.mubr.bf16.gmra.mxu0 %v5759_v0  ;;  %v5817_v15 = vcombine.low %v3003_v3, %v3006_v24  ;;  %v5818_v54 = vcombine.low %v3010_v48, %v3013_v23  ;;  %v7018_v28 = vld [vmem:[%s9787_s1 + $0x1f0] sm:$0xff]   ;;  %v7017_v48 = vld [vmem:[%s7130_s25 + $0x3c] sm:$0xff]   ;;  %v3887_v37 = vshrl.u32 %v5915_v63, 16  ;;  %v7020_v38 = vld [vmem:[%s7130_s25 + $0x48] sm:$0xff]   ;;  %v3896_v23 = vshll.u32 %v8604_v61, 16 }
  0xdb   : > { %6755 = vmatprep.mubr.bf16.mxu0 %v7012_v8  ;;  %v9871_v8 = vld [vmem:[#allocation12_spill] sm:$0xff]  ;;  %v3095_v42 = vrot.slane %v3093_v2, 4  ;;  %v8568_v26 = vsel %vm7472_vm5, %v5798_v55, %v3093_v2  ;;  %v3102_v60 = vrot.slane %v3100_v36, 4  ;;  %v8581_v44 = vsel %vm7472_vm5, %v5799_v18, %v3100_v36  ;;  %v5912_v2 = vld [vmem:[%s7130_s25 + $0x18] sm:$0xf]  ;;  %v7023_v55 = vld [vmem:[%s9787_s1 + $0x228] sm:$0xff]  }
  0xdc   : > { %v3096_v0 = vrot.slane %v9871_v8, 5  ;;  %v3866_v24 = vshll.u32 %v5912_v2, 16  ;;  %v7022_v36 = vld [vmem:[%s9787_s1 + $0x1e8] sm:$0xff]   ;;  %v5914_v18 = vld [vmem:[%s7130_s25 + $0x20] sm:$0x1]  ;;  %v3889_v11 = vrot.slane %v3887_v37, 4 }
  0xdd   : > { %6640 = vmatmul.mubr.bf16.gmra.mxu1 %v7009_v45  ;;  %v7013_v45 = vld [vmem:[%s7130_s25 + $0x24] sm:$0xff]   ;;  %v8586_v8 = vsel %vm7472_vm5, %v3102_v60, %v3103_v14  ;;  %v3890_v14 = vshll.u32 %v5915_v63, 16  ;;  %v8624_v63 = vld [vmem:[%s7130_s25 + $0x2c] sm:$0x1]  ;;  %v3911_v37 = vshrl.u32 %v5918_v51, 16 }
  0xde   : > { %6707 = vmatprep.mubr.bf16.mxu1 %v5816_v21  ;;  %v7016_v21 = vld [vmem:[%s7130_s25 + $0x30] sm:$0xff]   ;;  %v8572_v35 = vsel %vm7472_vm5, %v3095_v42, %v3096_v0  ;;  %v8589_v0 = vld [vmem:[%s7130_s25 + $0x1c] sm:$0xf]  ;;  %v3863_v42 = vshrl.u32 %v5912_v2, 16 }
  0xdf   : > { %v4634_v3 = vrot.slane %v8589_v0, 5  ;;  %v3892_v47 = vrot.slane %v3890_v14, 5 }
  0xe0   : > { %v3865_v60 = vrot.slane %v3863_v42, 4  ;;  %v7026_v42 = vld [vmem:[%s9787_s1 + $0x1e0] sm:$0xff]  }
  0xe2   : > { %6756 = vmatmul.mubr.bf16.vlgmr.msra.gmra.mxu0 %v7013_v45  ;;  %v3876_v45 = vshrl.u32 %v8589_v0, 16 }
  0xe3   : > { %6836 = vmatpush3.bf16.msra.mxu0 %v8300_v49  ;;  %6759 = vmatprep.mubr.bf16.mxu0 %v7016_v21  ;;  %v3872_v49 = vshll.u32 %v8589_v0, 16  ;;  %v3900_v21 = vshrl.u32 %v8604_v61, 16 }
  0xe4   : > { %6837 = vmatprep.subr.bf16.mxu0 %v7019_v20 }
  0xe5   : > { %6708 = vmatmul.mubr.bf16.vlgmr.msra.gmra.mxu1 %v5817_v15  ;;  %v6000_v15 = vld [vmem:[%s7130_s25 + $0x18] sm:$0xe]  ;;  %v8619_v2 = vrot.slane %v3872_v49, 5  ;;  %v3882_v49 = vshll.u32 %v5914_v18, 16  ;;  %v3902_v0 = vrot.slane %v3900_v21, 4 }
  0xe6   : > { %6788 = vmatpush3.bf16.msra.mxu1 %v8310_v33  ;;  %6711 = vmatprep.mubr.bf16.mxu1 %v5818_v54  ;;  %v7027_v33 = vld [vmem:[%s9787_s1 + $0x220] sm:$0xff]   ;;  %v3878_v54 = vrot.slane %v3876_v45, 4  ;;  %v8631_v45 = vrot.slane %v3896_v23, 5  ;;  %v7031_v23 = vld [vmem:[%s9787_s1 + $0x218] sm:$0xff]  }
  0xe7   : > { %6789 = vmatprep.subr.bf16.mxu1 %v7018_v28  ;;  %6838 = vmatpush3.bf16.msra.mxu0 %v7019_v20  ;;  %v3868_v20 = vrot.slane %v3866_v24, 5 }
  0xe8   : > { %6839 = vmatprep.subr.bf16.mxu0 %v7023_v55  ;;  %v3879_v21 = vor.u32 %v3878_v54, %v8619_v2  ;;  %v3903_v54 = vor.u32 %v3902_v0, %v8631_v45 }
  0xea   : > { %6760 = vmatmul.mubr.bf16.gmra.mxu0 %v7017_v48  ;;  %6790 = vmatpush3.bf16.msra.mxu1 %v7018_v28  ;;  %v6016_v48 = vrot.slane %v6000_v15, 9  ;;  %v4637_v28 = vrot.slane %v5914_v18, 5  ;;  %v4636_v18 = vrot.slane %v4634_v3, 4  ;;  %v3906_v15 = vshll.u32 %v8624_v63, 16 }
  0xeb   : > { %6763 = vmatprep.mubr.bf16.mxu0 %v7020_v38  ;;  %6791 = vmatprep.subr.bf16.mxu1 %v7022_v36  ;;  %v3914_v38 = vshll.u32 %v5918_v51, 16  ;;  %v4641_v51 = vrot.slane %v8604_v61, 5  ;;  %v3924_v61 = vshrl.u32 %v8634_v43, 16 }
  0xec   : > { %6840 = vmatpush3.bf16.msra.mxu0 %v7023_v55  ;;  %v3869_v55 = vor.u32 %v3868_v20, %v3865_v60  ;;  %v7030_v60 = vld [vmem:[%s9787_s1 + $0x1d8] sm:$0xff]   ;;  %v8657_v20 = vrot.slane %v3882_v49, 5  ;;  %v7035_v49 = vld [vmem:[%s9787_s1 + $0x210] sm:$0xff]  }
  0xed   : > { %v8629_v24 = vpop.f32.mrf.mxu0  ;;  %6712 = vmatmul.mubr.bf16.gmra.mxu1 %v5819_v40  ;;  %6841 = vmatprep.subr.bf16.mxu0 %v7027_v33  ;;  %v8639_v14 = vpop.f32.mrf.mxu1  ;;  %v3893_v40 = vor.u32 %v3892_v47, %v3889_v11  ;;  %v3913_v47 = vrot.slane %v3911_v37, 4  ;;  %v3916_v11 = vrot.slane %v3914_v38, 5  ;;  %v8684_v37 = vld [vmem:[%s7130_s25 + $0x40] sm:$0xf]  ;;  %v4643_v50 = vrot.slane %v4641_v51, 4 }
  0xee   : > { %9876 = vst [vmem:[#allocation2_spill] sm:$0xff] %v8639_v14  ;;  %6715 = vmatprep.mubr.bf16.mxu1 %v5820_v41  ;;  %6792 = vmatpush3.bf16.msra.mxu1 %v7022_v36  ;;  %v8664_v41 = vsel %vm7472_vm5, %v6016_v48, %v4634_v3  ;;  %v5921_v36 = vld [vmem:[%s7130_s25 + $0x3c] sm:$0xf]  ;;  %v8673_v0 = vrot.slane %v3869_v55, 4  ;;  %v8679_v3 = vsel %vm7472_vm5, %v4636_v18, %v4637_v28  ;;  %v8681_v48 = vrot.slane %v3906_v15, 5  ;;  %v7034_v55 = vld [vmem:[%s9787_s1 + $0x1d0] sm:$0xff]  }
  0xef   : > { %v8650_v57 = vpop.f32.mrf.mxu0  ;;  %6793 = vmatprep.subr.bf16.mxu1 %v7026_v42  ;;  %v8668_v52 = vpop.f32.mrf.mxu1  ;;  %v8691_v22 = vrot.slane %v3893_v40, 4  ;;  %v4644_v28 = vrot.slane %v8624_v63, 5  ;;  %v3904_v18 = vrot.slane %v3903_v54, 4  ;;  %v8695_v15 = vld [vmem:[%s7130_s25 + $0x38] sm:$0x1]  ;;  %v3938_v30 = vshll.u32 %v5921_v36, 16 }
  0xf0   : > { %6842 = vmatpush3.bf16.msra.mxu0 %v7027_v33  ;;  %9877 = vst [vmem:[#allocation5_spill] sm:$0xff] %v8668_v52  ;;  %v8675_v33 = vrot.slane %v3879_v21, 4  ;;  %v6017_v21 = vrot.slane %v6001_v6, 9  ;;  %v3917_v1 = vor.u32 %v3916_v11, %v3913_v47  ;;  %v8699_v52 = vrot.slane %v3924_v61, 4  ;;  %v6002_v40 = vld [vmem:[%s7130_s25 + $0x30] sm:$0xe] }
  0xf1   : > { %6843 = vmatprep.subr.bf16.mxu0 %v7031_v23  ;;  %v8686_v38 = vpop.f32.mrf.mxu0  ;;  %v3944_v6 = vshll.u32 %v8684_v37, 16  ;;  %v3948_v63 = vshrl.u32 %v8684_v37, 16  ;;  %v8707_v54 = vpop.f32.mrf.mxu1  ;;  %v9880_v11 = vcombine.low %v8420_v31, %v8411_v19  ;;  %v7025_v61 = vld [vmem:[%s7130_s25 + $0x6c] sm:$0xff]   ;;  %v8740_v19 = vsel %vm7472_vm5, %v4643_v50, %v4644_v28  ;;  %v8758_v28 = vld [vmem:[%s7130_s25 + $0x44] sm:$0x1] }
  0xf2   : > { %6764 = vmatmul.mubr.bf16.gmra.mxu0 %v7021_v7  ;;  %6794 = vmatpush3.bf16.msra.mxu1 %v7026_v42  ;;  %v8697_v7 = vrot.slane %v3920_v39, 5  ;;  %v3935_v42 = vshrl.u32 %v5921_v36, 16  ;;  %9879 = vst [vmem:[#allocation4_spill] sm:$0xff] %v8707_v54  ;;  %v3875_v39 = vsel %vm7161_vm2, %v8673_v0, %v8619_v2  ;;  %v3885_v47 = vsel %vm7161_vm2, %v8675_v33, %v8657_v20  ;;  %v7028_v36 = vld [vmem:[%s7130_s25 + $0x78] sm:$0xff]   ;;  %v8751_v33 = vld [vmem:[%s7130_s25 + $0x4c] sm:$0xf] }
  0xf3   : > { %6767 = vmatprep.mubr.bf16.mxu0 %v7024_v62  ;;  %6795 = vmatprep.subr.bf16.mxu1 %v7030_v60  ;;  %v9878_v62 = vcombine.low %v8389_v10, %v8393_v59  ;;  %v4648_v59 = vrot.slane %v8634_v43, 5  ;;  %v3899_v2 = vsel %vm7161_vm2, %v8691_v22, %v8631_v45  ;;  %v8736_v20 = vsel %vm7472_vm5, %v6017_v21, %v4641_v51  ;;  %v5924_v43 = vld [vmem:[%s7130_s25 + $0x48] sm:$0xf]  ;;  %v8762_v54 = vpop.f32.mrf.mxu1  ;;  %v6003_v14 = vld [vmem:[%s7130_s25 + $0x3c] sm:$0xe] }
  0xf4   : > { %6844 = vmatpush3.bf16.msra.mxu0 %v7031_v23  ;;  %v7039_v23 = vld [vmem:[%s9787_s1 + $0x208] sm:$0xff]   ;;  %v3930_v31 = vshll.u32 %v8695_v15, 16  ;;  %v3909_v22 = vsel %vm7161_vm2, %v3904_v18, %v8681_v48  ;;  %v6018_v45 = vrot.slane %v6002_v40, 9  ;;  %v3937_v0 = vrot.slane %v3935_v42, 4  ;;  %9882 = vst [vmem:[#allocation6_spill] sm:$0xff] %v8762_v54  ;;  %v7042_v42 = vld [vmem:[%s9787_s1 + $0x1c0] sm:$0xff]  }
  0xf5   : > { %6716 = vmatmul.mubr.bf16.gmra.mxu1 %v9878_v62  ;;  %6845 = vmatprep.subr.bf16.mxu0 %v7035_v49  ;;  %v8728_v62 = vpop.f32.mrf.mxu0  ;;  %v3940_v51 = vrot.slane %v3938_v30, 5  ;;  %v8753_v50 = vrot.slane %v3917_v1, 4  ;;  %v3927_v21 = vor.u32 %v8699_v52, %v8697_v7  ;;  %v3950_v10 = vrot.slane %v3948_v63, 4  ;;  %v7043_v30 = vld [vmem:[%s9787_s1 + $0x200] sm:$0xff]  }
  0xf6   : > { %6719 = vmatprep.mubr.bf16.mxu1 %v9880_v11  ;;  %6796 = vmatpush3.bf16.msra.mxu1 %v7030_v60  ;;  %9881 = vst [vmem:[#allocation3_spill] sm:$0xff] %v8728_v62  ;;  %v7038_v60 = vld [vmem:[%s9787_s1 + $0x1c8] sm:$0xff]   ;;  %v8760_v11 = vrot.slane %v3944_v6, 5  ;;  %v4650_v48 = vrot.slane %v4648_v59, 4  ;;  %v3959_v1 = vshrl.u32 %v5924_v43, 16  ;;  %v3962_v18 = vshll.u32 %v5924_v43, 16 }
  0xf7   : > { %6797 = vmatprep.subr.bf16.mxu1 %v7034_v55  ;;  %v8773_v40 = vcombine.low %v3875_v39, %v3885_v47  ;;  %v3972_v63 = vshrl.u32 %v8751_v33, 16  ;;  %v8781_v43 = vrot.slane %v3930_v31, 5  ;;  %v3954_v54 = vshll.u32 %v8758_v28, 16  ;;  %v5927_v39 = vld [vmem:[%s7130_s25 + $0x54] sm:$0xf]  ;;  %v7029_v6 = vld [vmem:[%s7130_s25 + $0x84] sm:$0xff]  }
  0xf8   : > { %6846 = vmatpush3.bf16.msra.mxu0 %v7035_v49  ;;  %v4651_v49 = vrot.slane %v8695_v15, 5  ;;  %v8768_v52 = vpop.f32.mrf.mxu0  ;;  %v3968_v15 = vshll.u32 %v8751_v33, 16  ;;  %v4655_v31 = vrot.slane %v8684_v37, 5  ;;  %v9886_v37 = vcombine.low %v8444_v12, %v8448_v46  ;;  %v7032_v47 = vld [vmem:[%s7130_s25 + $0x90] sm:$0xff]  }
  0xf9   : > { %6847 = vmatprep.subr.bf16.mxu0 %v7039_v23  ;;  %9883 = vst [vmem:[#allocation7_spill] sm:$0xff] %v8768_v52 }
  0xfa   : > { %6768 = vmatmul.mubr.bf16.gmra.mxu0 %v7025_v61  ;;  %6798 = vmatpush3.bf16.msra.mxu1 %v7034_v55  ;;  %v8779_v61 = vcombine.low %v3899_v2, %v3909_v22  ;;  %v3941_v55 = vor.u32 %v3940_v51, %v3937_v0  ;;  %v3951_v2 = vor.u32 %v3950_v10, %v8760_v11  ;;  %v8797_v22 = vld [vmem:[%s7130_s25 + $0x58] sm:$0xf]  ;;  %v8804_v51 = vrot.slane %v3927_v21, 4 }
  0xfb   : > { %6771 = vmatprep.mubr.bf16.mxu0 %v7028_v36  ;;  %6799 = vmatprep.subr.bf16.mxu1 %v7038_v60  ;;  %v8792_v36 = vsel %vm7472_vm5, %v6018_v45, %v4648_v59  ;;  %v9884_v0 = vcombine.low %v8427_v16, %v8432_v53  ;;  %v8808_v59 = vsel %vm7472_vm5, %v4650_v48, %v4651_v49  ;;  %v3961_v45 = vrot.slane %v3959_v1, 4  ;;  %v8815_v16 = vpop.f32.mrf.mxu0  ;;  %v5926_v1 = vld [vmem:[%s7130_s25 + $0x50] sm:$0x1] }
  0xfc   : > { %6848 = vmatpush3.bf16.msra.mxu0 %v7039_v23  ;;  %v8802_v23 = vpop.f32.mrf.mxu1  ;;  %v3964_v10 = vrot.slane %v3962_v18, 5  ;;  %9887 = vst [vmem:[#allocation9_spill] sm:$0xff] %v8815_v16  ;;  %v6019_v53 = vrot.slane %v6003_v14, 9  ;;  %v3974_v21 = vrot.slane %v3972_v63, 4  ;;  %v3942_v48 = vrot.slane %v3941_v55, 4 }
  0xfd   : > { %6720 = vmatmul.mubr.bf16.gmra.mxu1 %v9884_v0  ;;  %9885 = vst [vmem:[#allocation8_spill] sm:$0xff] %v8802_v23  ;;  %6849 = vmatprep.subr.bf16.mxu0 %v7043_v30  ;;  %v8817_v0 = vrot.slane %v3968_v15, 5  ;;  %v3983_v23 = vshrl.u32 %v5927_v39, 16  ;;  %v3956_v49 = vrot.slane %v3954_v54, 5  ;;  %v3986_v18 = vshll.u32 %v5927_v39, 16  ;;  %v8833_v39 = vpop.f32.mrf.mxu0 }
  0xfe   : > { %6723 = vmatprep.mubr.bf16.mxu1 %v9886_v37  ;;  %6800 = vmatpush3.bf16.msra.mxu1 %v7038_v60  ;;  %v3992_v52 = vshll.u32 %v8797_v22, 16  ;;  %v3952_v12 = vrot.slane %v3951_v2, 4  ;;  %v4657_v46 = vrot.slane %v4655_v31, 4  ;;  %v4658_v37 = vrot.slane %v8758_v28, 5  ;;  %v8823_v60 = vpop.f32.mrf.mxu1  ;;  %v5930_v55 = vld [vmem:[%s7130_s25 + $0x60] sm:$0xf] }
  0xff   : > { %6801 = vmatprep.subr.bf16.mxu1 %v7042_v42  ;;  %v3996_v14 = vshrl.u32 %v8797_v22, 16  ;;  %9888 = vst [vmem:[#allocation10_spill] sm:$0xff] %v8823_v60  ;;  %v3933_v15 = vsel %vm7161_vm2, %v8804_v51, %v8781_v43  ;;  %v3965_v63 = vor.u32 %v3964_v10, %v3961_v45  ;;  %v3975_v28 = vor.u32 %v3974_v21, %v8817_v0  ;;  %v6004_v60 = vld [vmem:[%s7130_s25 + $0x48] sm:$0xe] }
 0x100   : > { %6850 = vmatpush3.bf16.msra.mxu0 %v7043_v30  ;;  %v4662_v30 = vrot.slane %v8751_v33, 5  ;;  %v3978_v2 = vshll.u32 %v5926_v1, 16  ;;  %v3985_v16 = vrot.slane %v3983_v23, 4  ;;  %v3988_v62 = vrot.slane %v3986_v18, 5  ;;  %v8858_v10 = vpop.f32.mrf.mxu1 }
 0x101   : > { %v3947_v43 = vsel %vm7161_vm2, %v3942_v48, %v8760_v11  ;;  %v8842_v33 = vsel %vm7472_vm5, %v6019_v53, %v4655_v31  ;;  %v3957_v51 = vsel %vm7161_vm2, %v3952_v12, %v3956_v49  ;;  %v8850_v23 = vsel %vm7472_vm5, %v4657_v46, %v4658_v37  ;;  %9890 = vst [vmem:[#allocation11_spill] sm:$0xff] %v8858_v10  ;;  %v8861_v49 = vld [vmem:[%s7130_s25 + $0x64] sm:$0xf]  ;;  %v7033_v12 = vld [vmem:[%s7130_s25 + $0x9c] sm:$0xff]   ;;  %v8867_v46 = vpop.f32.mrf.mxu0 }
 0x102   : > { %6772 = vmatmul.mubr.bf16.gmra.mxu0 %v7029_v6  ;;  %6802 = vmatpush3.bf16.msra.mxu1 %v7042_v42  ;;  %v8844_v6 = vrot.slane %v3992_v52, 5  ;;  %v3998_v42 = vrot.slane %v3996_v14, 4  ;;  %v4007_v45 = vshrl.u32 %v5930_v55, 16  ;;  %v4010_v11 = vshll.u32 %v5930_v55, 16  ;;  %v7036_v55 = vld [vmem:[%s7130_s25 + $0xa8] sm:$0xff]  }
 0x103   : > { %6775 = vmatprep.mubr.bf16.mxu0 %v7032_v47  ;;  %v8853_v47 = vld [vmem:[%s7130_s25 + $0x5c] sm:$0x1]  ;;  %v9889_v31 = vcombine.low %v8460_v34, %v8469_v17  ;;  %v3966_v52 = vrot.slane %v3965_v63, 4  ;;  %v6020_v53 = vrot.slane %v6004_v60, 9  ;;  %v4664_v21 = vrot.slane %v4662_v30, 4 }
 0x104   : > { %v4665_v48 = vrot.slane %v5926_v1, 5  ;;  %v9891_v18 = vcombine.low %v8486_v32, %v8490_v58  ;;  %v3976_v37 = vrot.slane %v3975_v28, 4  ;;  %v3980_v14 = vrot.slane %v3978_v2, 5  ;;  %v6005_v63 = vld [vmem:[%s7130_s25 + $0x54] sm:$0xe]  ;;  %v8885_v28 = vpop.f32.mrf.mxu1 }
 0x105   : > { %6724 = vmatmul.mubr.bf16.gmra.mxu1 %v9889_v31  ;;  %v3989_v34 = vor.u32 %v3988_v62, %v3985_v16  ;;  %v4669_v17 = vrot.slane %v8797_v22, 5  ;;  %v3999_v60 = vor.u32 %v3998_v42, %v8844_v6  ;;  %v4002_v1 = vshll.u32 %v8853_v47, 16  ;;  %9893 = vst [vmem:[#allocation12_spill] sm:$0xff] %v8885_v28  ;;  %v6006_v62 = vld [vmem:[%s7130_s25 + $0x60] sm:$0xe] }
 0x106   : > { %6727 = vmatprep.mubr.bf16.mxu1 %v9891_v18  ;;  %v4009_v31 = vrot.slane %v4007_v45, 4  ;;  %v4012_v54 = vrot.slane %v4010_v11, 5  ;;  %v9892_v32 = vsel %vm7161_vm2, %v8753_v50, %v8697_v7  ;;  %v4016_v22 = vshll.u32 %v8861_v49, 16 }
 0x107   : > { %v8879_v58 = vcombine.low %v9892_v32, %v3933_v15  ;;  %v4020_v16 = vshrl.u32 %v8861_v49, 16  ;;  %v8887_v2 = vcombine.low %v3947_v43, %v3957_v51  ;;  %v3971_v42 = vsel %vm7161_vm2, %v3966_v52, %v8817_v0  ;;  %v5933_v15 = vld [vmem:[%s7130_s25 + $0x6c] sm:$0xf]  ;;  %v8905_v32 = vld [vmem:[%s7130_s25 + $0x70] sm:$0xf] }
 0x108   : > { %v8894_v7 = vsel %vm7472_vm5, %v6020_v53, %v4662_v30  ;;  %v8898_v50 = vsel %vm7472_vm5, %v4664_v21, %v4665_v48  ;;  %v8901_v45 = vpop.f32.mrf.mxu0  ;;  %v3990_v43 = vrot.slane %v3989_v34, 4  ;;  %v6021_v51 = vrot.slane %v6005_v63, 9  ;;  %v5932_v53 = vld [vmem:[%s7130_s25 + $0x68] sm:$0x1] }
 0x109   : > { %9894 = vst [vmem:[#allocation13_spill] sm:$0xff] %v8901_v45  ;;  %v4671_v11 = vrot.slane %v4669_v17, 4  ;;  %v4672_v18 = vrot.slane %v8853_v47, 5  ;;  %v3981_v0 = vsel %vm7161_vm2, %v3976_v37, %v3980_v14  ;;  %v4000_v30 = vrot.slane %v3999_v60, 4  ;;  %v6008_v45 = vld [vmem:[%s7130_s25 + $0x78] sm:$0xe] }
 0x10a   : > { %6776 = vmatmul.mubr.bf16.gmra.mxu0 %v7033_v12  ;;  %v4004_v52 = vrot.slane %v4002_v1, 5  ;;  %v4013_v21 = vor.u32 %v4012_v54, %v4009_v31  ;;  %v8910_v48 = vrot.slane %v4016_v22, 5  ;;  %v4022_v12 = vrot.slane %v4020_v16, 4  ;;  %v7037_v31 = vld [vmem:[%s7130_s25 + $0xb4] sm:$0xff]  }
 0x10b   : > { %6779 = vmatprep.mubr.bf16.mxu0 %v7036_v55  ;;  %v4031_v34 = vshrl.u32 %v5933_v15, 16  ;;  %v4034_v63 = vshll.u32 %v5933_v15, 16  ;;  %v9895_v47 = vcombine.low %v8506_v5, %v8511_v25  ;;  %v4676_v14 = vrot.slane %v8861_v49, 5  ;;  %v8927_v5 = vpop.f32.mrf.mxu0 }
 0x10c   : > { %v4040_v54 = vshll.u32 %v8905_v32, 16  ;;  %v4044_v60 = vshrl.u32 %v8905_v32, 16  ;;  %v9897_v1 = vcombine.low %v8524_v9, %v8518_v29  ;;  %9898 = vst [vmem:[#allocation15_spill] sm:$0xff] %v8927_v5  ;;  %v8929_v25 = vcombine.low %v3971_v42, %v3981_v0  ;;  %v5936_v29 = vld [vmem:[%s7130_s25 + $0x78] sm:$0xf]  ;;  %v7040_v9 = vld [vmem:[%s7130_s25 + $0xc0] sm:$0xff]  }
 0x10d   : > { %6728 = vmatmul.mubr.bf16.gmra.mxu1 %v9895_v47  ;;  %v8916_v55 = vpop.f32.mrf.mxu1  ;;  %v3995_v22 = vsel %vm7161_vm2, %v3990_v43, %v8844_v6  ;;  %v8936_v49 = vsel %vm7472_vm5, %v6021_v51, %v4669_v17  ;;  %v8940_v16 = vsel %vm7472_vm5, %v4671_v11, %v4672_v18  ;;  %v4005_v15 = vsel %vm7161_vm2, %v4000_v30, %v4004_v52  ;;  %v8953_v43 = vld [vmem:[%s7130_s25 + $0x74] sm:$0x1]  ;;  %v9010_v5 = vld [vmem:[%s7130_s25 + $0x8c] sm:$0x1] }
 0x10e   : > { %9896 = vst [vmem:[#allocation14_spill] sm:$0xff] %v8916_v55  ;;  %6731 = vmatprep.mubr.bf16.mxu1 %v9897_v1  ;;  %v8946_v47 = vrot.slane %v4013_v21, 4  ;;  %v4026_v42 = vshll.u32 %v5932_v53, 16  ;;  %v6022_v0 = vrot.slane %v6006_v62, 9  ;;  %v8949_v1 = vld [vmem:[%s7130_s25 + $0x7c] sm:$0xf]  ;;  %v4023_v6 = vor.u32 %v4022_v12, %v8910_v48  ;;  %v8959_v21 = vpop.f32.mrf.mxu0 }
 0x10f   : > { %v4679_v17 = vrot.slane %v5932_v53, 5  ;;  %v4033_v51 = vrot.slane %v4031_v34, 4  ;;  %v4036_v11 = vrot.slane %v4034_v63, 5  ;;  %v8955_v18 = vpop.f32.mrf.mxu1  ;;  %v4678_v37 = vrot.slane %v4676_v14, 4  ;;  %9900 = vst [vmem:[#allocation17_spill] sm:$0xff] %v8959_v21 }
 0x110   : > { %9899 = vst [vmem:[#allocation16_spill] sm:$0xff] %v8955_v18  ;;  %v8957_v55 = vrot.slane %v4040_v54, 5  ;;  %v4046_v30 = vrot.slane %v4044_v60, 4  ;;  %v4055_v52 = vshrl.u32 %v5936_v29, 16  ;;  %v6007_v53 = vld [vmem:[%s7130_s25 + $0x6c] sm:$0xe]  ;;  %v8966_v18 = vcombine.low %v3995_v22, %v4005_v15 }
 0x111   : > { %v4058_v12 = vshll.u32 %v5936_v29, 16  ;;  %v4064_v34 = vshll.u32 %v8949_v1, 16  ;;  %v4068_v63 = vshrl.u32 %v8949_v1, 16  ;;  %v8968_v54 = vrot.slane %v4026_v42, 5  ;;  %v5939_v62 = vld [vmem:[%s7130_s25 + $0x84] sm:$0xf]  ;;  %v8989_v42 = vpop.f32.mrf.mxu1 }
 0x112   : > { %6780 = vmatmul.mubr.bf16.gmra.mxu0 %v7037_v31  ;;  %9901 = vst [vmem:[#allocation18_spill] sm:$0xff] %v8966_v18  ;;  %v8972_v60 = vsel %vm7472_vm5, %v6022_v0, %v4676_v14  ;;  %v4050_v31 = vshll.u32 %v8953_v43, 16  ;;  %v8980_v28 = vrot.slane %v4023_v6, 4  ;;  %v4683_v22 = vrot.slane %v8905_v32, 5  ;;  %v8984_v15 = vld [vmem:[%s7130_s25 + $0x88] sm:$0xf] }
 0x113   : > { %6783 = vmatprep.mubr.bf16.mxu0 %v7040_v9  ;;  %v4037_v9 = vor.u32 %v4036_v11, %v4033_v51  ;;  %v9902_v14 = vcombine.low %v8533_v4, %v8537_v13  ;;  %9903 = vst [vmem:[#allocation19_spill] sm:$0xff] %v8989_v42  ;;  %v7041_v0 = vld [vmem:[%s7130_s25 + $0xcc] sm:$0xff]   ;;  %v8994_v10 = vsel %vm7472_vm5, %v4678_v37, %v4679_v17  ;;  %v6023_v6 = vrot.slane %v6007_v53, 9  ;;  %v8997_v11 = vpop.f32.mrf.mxu0  ;;  %v9003_v4 = vld [vmem:[%s7130_s25 + $0x80] sm:$0x1] }
 0x114   : > { %v4047_v29 = vor.u32 %v4046_v30, %v8957_v55  ;;  %v4057_v51 = vrot.slane %v4055_v52, 4  ;;  %9904 = vst [vmem:[#allocation20_spill] sm:$0xff] %v8997_v11  ;;  %v9905_v32 = vcombine.low %v8568_v26, %v8572_v35  ;;  %v4060_v13 = vrot.slane %v4058_v12, 5 }
 0x115   : > { %6732 = vmatmul.mubr.bf16.gmra.mxu1 %v9902_v14  ;;  %v9005_v14 = vrot.slane %v4064_v34, 5  ;;  %v4070_v42 = vrot.slane %v4068_v63, 4  ;;  %v4079_v21 = vshrl.u32 %v5939_v62, 16  ;;  %v4052_v37 = vrot.slane %v4050_v31, 5 }
 0x116   : > { %6735 = vmatprep.mubr.bf16.mxu1 %v9905_v32  ;;  %v4686_v17 = vrot.slane %v8953_v43, 5  ;;  %v4082_v30 = vshll.u32 %v5939_v62, 16  ;;  %v4088_v52 = vshll.u32 %v8984_v15, 16  ;;  %v4038_v53 = vrot.slane %v4037_v9, 4  ;;  %v9013_v32 = vpop.f32.mrf.mxu1 }
 0x117   : > { %v4685_v11 = vrot.slane %v4683_v22, 4  ;;  %v4081_v26 = vrot.slane %v4079_v21, 4  ;;  %v4092_v35 = vshrl.u32 %v8984_v15, 16  ;;  %v4048_v12 = vrot.slane %v4047_v29, 4 }
 0x118   : > { %v4074_v34 = vshll.u32 %v9003_v4, 16  ;;  %v4084_v63 = vrot.slane %v4082_v30, 5  ;;  %v9016_v31 = vrot.slane %v4088_v52, 5  ;;  %v4061_v62 = vor.u32 %v4060_v13, %v4057_v51  ;;  %v6009_v52 = vld [vmem:[%s7130_s25 + $0x84] sm:$0xe] }
 0x119   : > { %v9018_v43 = vpop.f32.mrf.mxu0  ;;  %v4071_v9 = vor.u32 %v4070_v42, %v9005_v14  ;;  %v4690_v21 = vrot.slane %v8949_v1, 5  ;;  %v4094_v18 = vrot.slane %v4092_v35, 4  ;;  %v9906_v29 = vcombine.low %v8664_v41, %v8679_v3 }
 0x11a   : > { %6784 = vmatmul.mubr.bf16.gmra.mxu0 %v7041_v0  ;;  %v4029_v30 = vsel %vm7161_vm2, %v8980_v28, %v8968_v54  ;;  %v9034_v51 = vsel %vm7472_vm5, %v6023_v6, %v4683_v22  ;;  %v4098_v42 = vshll.u32 %v9010_v5, 16  ;;  %v4043_v41 = vsel %vm7161_vm2, %v4038_v53, %v8957_v55  ;;  %v5942_v54 = vld [vmem:[%s7130_s25 + $0x90] sm:$0xf] }
 0x11b   : > { %6851 = vmatprep.mubr.bf16.mxu0 %v9906_v29  ;;  %v9037_v1 = vpop.f32.mrf.mxu0  ;;  %v4085_v3 = vor.u32 %v4084_v63, %v4081_v26  ;;  %v4095_v13 = vor.u32 %v4094_v18, %v9016_v31  ;;  %v4697_v28 = vrot.slane %v8984_v15, 5  ;;  %v9908_v22 = vcombine.low %v8581_v44, %v8586_v8 }
 0x11c   : > { %v4053_v6 = vsel %vm7161_vm2, %v4048_v12, %v4052_v37  ;;  %v9055_v55 = vsel %vm7472_vm5, %v4685_v11, %v4686_v17  ;;  %v4076_v53 = vrot.slane %v4074_v34, 5  ;;  %v6024_v18 = vrot.slane %v6008_v45, 9  ;;  %v9064_v12 = vld [vmem:[%s7130_s25 + $0x94] sm:$0xf] }
 0x11d   : > { %v9046_v35 = vpop.f32.mrf.mxu1  ;;  %6736 = vmatmul.mubr.bf16.gmra.mxu1 %v9908_v22  ;;  %v9057_v26 = vpop.f32.mrf.mxu0  ;;  %v4062_v15 = vrot.slane %v4061_v62, 4  ;;  %v4072_v63 = vrot.slane %v4071_v9, 4  ;;  %v4692_v29 = vrot.slane %v4690_v21, 4  ;;  %v4693_v0 = vrot.slane %v9003_v4, 5 }
 0x11e   : > { %9907 = vst [vmem:[#allocation21_spill] sm:$0xff] %v9046_v35  ;;  %6803 = vmatprep.mubr.bf16.mxu1 %v8773_v40  ;;  %v4100_v8 = vrot.slane %v4098_v42, 5  ;;  %v6025_v37 = vrot.slane %v6009_v52, 9  ;;  %v4103_v11 = vshrl.u32 %v5942_v54, 16  ;;  %v4106_v17 = vshll.u32 %v5942_v54, 16 }
 0x11f   : > { %v9061_v44 = vpop.f32.mrf.mxu1  ;;  %v9066_v34 = vpop.f32.mrf.mxu0  ;;  %v4086_v45 = vrot.slane %v4085_v3, 4  ;;  %v4096_v22 = vrot.slane %v4095_v13, 4  ;;  %v4699_v40 = vrot.slane %v4697_v28, 4  ;;  %v4700_v62 = vrot.slane %v9010_v5, 5  ;;  %v9087_v54 = vld [vmem:[%s7130_s25 + $0x98] sm:$0x1] }
 0x120   : > { %9909 = vst [vmem:[#allocation22_spill] sm:$0xff] %v9061_v44  ;;  %v9911_v4 = vsel %vm7161_vm2, %v8946_v47, %v8910_v48  ;;  %v9078_v52 = vcombine.low %v4043_v41, %v4053_v6  ;;  %v9084_v13 = vsel %vm7472_vm5, %v6024_v18, %v4690_v21  ;;  %v4067_v48 = vsel %vm7161_vm2, %v4062_v15, %v9005_v14  ;;  %v5945_v41 = vld [vmem:[%s7130_s25 + $0x9c] sm:$0xf]  ;;  %v9104_v6 = vld [vmem:[%s7130_s25 + $0xa0] sm:$0xf] }
 0x121   : > { %v9069_v9 = vpop.f32.mrf.mxu1  ;;  %v9076_v42 = vcombine.low %v9911_v4, %v4029_v30  ;;  %v6565_v5 = vpop.f32.mrf.mxu0  ;;  %v4077_v47 = vsel %vm7161_vm2, %v4072_v63, %v4076_v53  ;;  %v9099_v30 = vsel %vm7472_vm5, %v4692_v29, %v4693_v0  ;;  %v4112_v21 = vshll.u32 %v9064_v12, 16  ;;  %v9191_v35 = vld [vmem:[%s7130_s25 + $0xb0] sm:$0x1] }
 0x122   : > { %9910 = vst [vmem:[#allocation23_spill] sm:$0xff] %v9069_v9  ;;  %v9912_v9 = vcombine.low %v8736_v20, %v8740_v19  ;;  %v9914_v20 = vcombine.low %v8792_v36, %v8808_v59  ;;  %v9113_v19 = vsel %vm7472_vm5, %v6025_v37, %v4697_v28  ;;  %v4105_v14 = vrot.slane %v4103_v11, 4  ;;  %v9128_v37 = vld [vmem:[%s7130_s25 + $0x90] sm:$0xe] }
 0x123   : > { %v9106_v18 = vpop.f32.mrf.mxu1  ;;  %v4108_v53 = vrot.slane %v4106_v17, 5  ;;  %v4116_v0 = vshrl.u32 %v9064_v12, 16  ;;  %v1629_v15 = vpop.f32.mrf.mxu0  ;;  %v4091_v63 = vsel %vm7161_vm2, %v4086_v45, %v9016_v31  ;;  %v4101_v29 = vsel %vm7161_vm2, %v4096_v22, %v4100_v8 }
 0x124   : > { %6852 = vmatmul.mubr.bf16.vlgmr.msra.gmra.mxu0 %v9912_v9  ;;  %9913 = vst [vmem:[#allocation24_spill] sm:$0xff] %v9106_v18  ;;  %v9123_v36 = vsel %vm7472_vm5, %v4699_v40, %v4700_v62  ;;  %v4122_v59 = vshll.u32 %v9087_v54, 16  ;;  %v4127_v11 = vshrl.u32 %v5945_v41, 16  ;;  %v4130_v17 = vshll.u32 %v5945_v41, 16 }
 0x125   : > { %6855 = vmatprep.mubr.bf16.mxu0 %v9914_v20  ;;  %v6517_v28 = vpop.f32.mrf.mxu1  ;;  %6804 = vmatmul.mubr.bf16.vlgmr.msra.gmra.mxu1 %v8779_v61  ;;  %v4136_v9 = vshll.u32 %v9104_v6, 16  ;;  %v4140_v31 = vshrl.u32 %v9104_v6, 16  ;;  %v6566_v45 = vpop.f32.mrf.mxu0  ;;  %v9134_v22 = vcombine.low %v4067_v48, %v4077_v47  ;;  %v9138_v40 = vrot.slane %v4112_v21, 5  ;;  %v9152_v61 = vld [vmem:[%s7130_s25 + $0xa4] sm:$0x1] }
 0x126   : > { %v1185_v8 = vadd.f32 %v6517_v28, %v8629_v24  ;;  %6807 = vmatprep.mubr.bf16.mxu1 %v8879_v58  ;;  %v9140_v4 = vcombine.low %v4091_v63, %v4101_v29  ;;  %v4109_v20 = vor.u32 %v4108_v53, %v4105_v14  ;;  %v4118_v24 = vrot.slane %v4116_v0, 4  ;;  %v5948_v28 = vld [vmem:[%s7130_s25 + $0xa8] sm:$0xf]  ;;  %v9157_v14 = vld [vmem:[%s7130_s25 + $0xac] sm:$0xf] }
 0x127   : > { %v1176_v62 = vpop.f32.mrf.mxu1  ;;  %v1632_v48 = vpop.f32.mrf.mxu0  ;;  %v9148_v47 = vrot.slane %v4122_v59, 5  ;;  %v6026_v21 = vrot.slane %v9128_v37, 9  ;;  %v4129_v29 = vrot.slane %v4127_v11, 4  ;;  %v4132_v18 = vrot.slane %v4130_v17, 5 }
 0x128   : > { %v9145_v3 = vadd.f32 %v6565_v5, %v1185_v8  ;;  %v1177_v58 = vadd.f32 %v1176_v62, %v8650_v57  ;;  %v9154_v44 = vrot.slane %v4136_v9, 5  ;;  %v4142_v41 = vrot.slane %v4140_v31, 4  ;;  %v9920_v62 = vld [vmem:[#allocation3_spill] sm:$0xff] }
 0x129   : > { %v6518_v63 = vpop.f32.mrf.mxu1  ;;  %v6569_v5 = vpop.f32.mrf.mxu0  ;;  %v9917_v0 = vcombine.low %v8842_v33, %v8850_v23  ;;  %v4151_v59 = vshrl.u32 %v5948_v28, 16  ;;  %v4154_v37 = vshll.u32 %v5948_v28, 16  ;;  %v9918_v11 = vcombine.low %v8894_v7, %v8898_v50 }
 0x12a   : > { %9915 = vst [vmem:[#allocation25_spill] sm:$0xff] %v9145_v3  ;;  %v9159_v53 = vadd.f32 %v1629_v15, %v1177_v58  ;;  %v1188_v57 = vadd.f32 %v6518_v63, %v8686_v38  ;;  %v9168_v17 = vrot.slane %v4109_v20, 4  ;;  %v4119_v15 = vor.u32 %v4118_v24, %v9138_v40  ;;  %v6011_v58 = vld [vmem:[%s7130_s25 + $0x9c] sm:$0xe] }
 0x12b   : > { %v1179_v8 = vpop.f32.mrf.mxu1  ;;  %v4704_v9 = vrot.slane %v9064_v12, 5  ;;  %v4146_v38 = vshll.u32 %v9152_v61, 16  ;;  %v1645_v23 = vpop.f32.mrf.mxu0  ;;  %v4707_v28 = vrot.slane %v9087_v54, 5  ;;  %v4160_v63 = vshll.u32 %v9157_v14, 16 }
 0x12c   : > { %9916 = vst [vmem:[#allocation26_spill] sm:$0xff] %v9159_v53  ;;  %6856 = vmatmul.mubr.bf16.gmra.mxu0 %v9917_v0  ;;  %v9173_v31 = vadd.f32 %v6566_v45, %v1188_v57  ;;  %v1180_v33 = vadd.f32 %v1179_v8, %v9920_v62  ;;  %v4133_v50 = vor.u32 %v4132_v18, %v4129_v29  ;;  %v4711_v12 = vrot.slane %v9104_v6, 5  ;;  %v9921_v57 = vld [vmem:[#allocation7_spill] sm:$0xff]  ;;  %v9922_v6 = vld [vmem:[#allocation9_spill] sm:$0xff] }
 0x12d   : > { %6859 = vmatprep.mubr.bf16.mxu0 %v9918_v11  ;;  %v6521_v7 = vpop.f32.mrf.mxu1  ;;  %6808 = vmatmul.mubr.bf16.gmra.mxu1 %v8887_v2  ;;  %v4143_v20 = vor.u32 %v4142_v41, %v9154_v44  ;;  %v4164_v45 = vshrl.u32 %v9157_v14, 16  ;;  %v6570_v8 = vpop.f32.mrf.mxu0  ;;  %v4153_v54 = vrot.slane %v4151_v59, 4  ;;  %v4156_v11 = vrot.slane %v4154_v37, 5 }
 0x12e   : > { %9919 = vst [vmem:[#allocation27_spill] sm:$0xff] %v9173_v31  ;;  %v9183_v24 = vadd.f32 %v1632_v48, %v1180_v33  ;;  %v1201_v0 = vadd.f32 %v6521_v7, %v9921_v57  ;;  %6811 = vmatprep.mubr.bf16.mxu1 %v8929_v25  ;;  %v4120_v31 = vrot.slane %v4119_v15, 4  ;;  %v4706_v2 = vrot.slane %v4704_v9, 4 }
 0x12f   : > { %v1192_v62 = vpop.f32.mrf.mxu1  ;;  %v4148_v18 = vrot.slane %v4146_v38, 5  ;;  %v6027_v29 = vrot.slane %v6011_v58, 9  ;;  %v1648_v3 = vpop.f32.mrf.mxu0  ;;  %v9193_v48 = vrot.slane %v4160_v63, 5  ;;  %v4166_v33 = vrot.slane %v4164_v45, 4 }
 0x130   : > { %v9187_v41 = vadd.f32 %v6569_v5, %v1201_v0  ;;  %v1193_v53 = vadd.f32 %v1192_v62, %v9922_v6  ;;  %v4134_v57 = vrot.slane %v4133_v50, 4  ;;  %v4144_v25 = vrot.slane %v4143_v20, 4 }
 0x131   : > { %v6522_v7 = vpop.f32.mrf.mxu1  ;;  %v4713_v59 = vrot.slane %v4711_v12, 4  ;;  %v4714_v37 = vrot.slane %v9152_v61, 5  ;;  %v6573_v38 = vpop.f32.mrf.mxu0  ;;  %v9923_v58 = vcombine.low %v8936_v49, %v8940_v16  ;;  %v9204_v63 = vsel %vm7472_vm5, %v6026_v21, %v4704_v9  ;;  %v6012_v21 = vld [vmem:[%s7130_s25 + $0xa8] sm:$0xe] }
 0x132   : > { %v9196_v15 = vadd.f32 %v1645_v23, %v1193_v53  ;;  %v1204_v5 = vadd.f32 %v6522_v7, %v8833_v39  ;;  %v4157_v50 = vor.u32 %v4156_v11, %v4153_v54  ;;  %v9924_v20 = vcombine.low %v8972_v60, %v8994_v10 }
 0x133   : > { %v1195_v45 = vpop.f32.mrf.mxu1  ;;  %v4115_v39 = vsel %vm7161_vm2, %v9168_v17, %v9138_v40  ;;  %v4125_v49 = vsel %vm7161_vm2, %v4120_v31, %v9148_v47  ;;  %v9218_v16 = vsel %vm7472_vm5, %v4706_v2, %v4707_v28  ;;  %v4170_v61 = vshll.u32 %v9191_v35, 16  ;;  %v1661_v60 = vpop.f32.mrf.mxu0  ;;  %v5951_v17 = vld [vmem:[%s7130_s25 + $0xb4] sm:$0xf]  ;;  %v9925_v47 = vld [vmem:[#allocation18_spill] sm:$0xff]  ;;  %v9247_v2 = vld [vmem:[%s7130_s25 + $0xb8] sm:$0xf] }
 0x134   : > { %6860 = vmatmul.mubr.bf16.gmra.mxu0 %v9923_v58  ;;  %v9222_v53 = vadd.f32 %v6570_v8, %v1204_v5  ;;  %v1196_v10 = vadd.f32 %v1195_v45, %v8867_v46  ;;  %v4167_v9 = vor.u32 %v4166_v33, %v9193_v48  ;;  %v4718_v40 = vrot.slane %v9157_v14, 5  ;;  %v9926_v8 = vld [vmem:[#allocation13_spill] sm:$0xff] }
 0x135   : > { %6863 = vmatprep.mubr.bf16.mxu0 %v9924_v20  ;;  %v6525_v23 = vpop.f32.mrf.mxu1  ;;  %6812 = vmatmul.mubr.bf16.gmra.mxu1 %v9925_v47  ;;  %v4139_v31 = vsel %vm7161_vm2, %v4134_v57, %v9154_v44  ;;  %v4149_v28 = vsel %vm7161_vm2, %v4144_v25, %v4148_v18  ;;  %v9236_v46 = vsel %vm7472_vm5, %v6027_v29, %v4711_v12  ;;  %v6574_v11 = vpop.f32.mrf.mxu0  ;;  %v4158_v62 = vrot.slane %v4157_v50, 4  ;;  %v9927_v57 = vld [vmem:[#allocation15_spill] sm:$0xff]  ;;  %v9931_v47 = vld [vmem:[#allocation20_spill] sm:$0xff] }
 0x136   : > { %v9240_v0 = vsel %vm7472_vm5, %v4713_v59, %v4714_v37  ;;  %v9242_v14 = vadd.f32 %v1648_v3, %v1196_v10  ;;  %v1217_v54 = vadd.f32 %v6525_v23, %v9926_v8  ;;  %6815 = vmatprep.mubr.bf16.mxu1 %v9076_v42  ;;  %v6028_v44 = vrot.slane %v6012_v21, 9 }
 0x137   : > { %v1208_v18 = vpop.f32.mrf.mxu1  ;;  %v4172_v6 = vrot.slane %v4170_v61, 5  ;;  %v4721_v12 = vrot.slane %v9191_v35, 5  ;;  %v4175_v29 = vshrl.u32 %v5951_v17, 16  ;;  %v4178_v33 = vshll.u32 %v5951_v17, 16  ;;  %v1664_v25 = vpop.f32.mrf.mxu0 }
 0x138   : > { %v9250_v7 = vadd.f32 %v6573_v38, %v1217_v54  ;;  %v1209_v3 = vadd.f32 %v1208_v18, %v9927_v57  ;;  %v4168_v59 = vrot.slane %v4167_v9, 4  ;;  %v4720_v37 = vrot.slane %v4718_v40, 4  ;;  %v9928_v38 = vld [vmem:[#allocation17_spill] sm:$0xff] }
 0x139   : > { %v6526_v42 = vpop.f32.mrf.mxu1  ;;  %v9253_v5 = vcombine.low %v4115_v39, %v4125_v49  ;;  %v6058_v58 = vcombine.low %v9204_v63, %v9218_v16  ;;  %v9257_v50 = vcombine.low %v4139_v31, %v4149_v28  ;;  %v4184_v35 = vshll.u32 %v9247_v2, 16  ;;  %v6577_v61 = vpop.f32.mrf.mxu0  ;;  %v5954_v49 = vld [vmem:[%s7130_s25 + $0xc0] sm:$0xf]  ;;  %v9271_v16 = vld [vmem:[%s7130_s25 + $0xc4] sm:$0xf] }
 0x13a   : > { %v9260_v45 = vadd.f32 %v1661_v60, %v1209_v3  ;;  %v1220_v20 = vadd.f32 %v6526_v42, %v9928_v38  ;;  %v9929_v21 = vcombine.low %v9034_v51, %v9055_v55  ;;  %v6059_v39 = vcombine.low %v9236_v46, %v9240_v0  ;;  %v9936_v46 = vld [vmem:[#allocation6_spill] sm:$0xff] }
 0x13b   : > { %v4188_v63 = vshrl.u32 %v9247_v2, 16  ;;  %v1211_v10 = vpop.f32.mrf.mxu1  ;;  %v9930_v60 = vcombine.low %v9084_v13, %v9099_v30  ;;  %v4163_v51 = vsel %vm7161_vm2, %v4158_v62, %v9193_v48  ;;  %v9281_v55 = vsel %vm7472_vm5, %v6028_v44, %v4718_v40  ;;  %v1677_v28 = vpop.f32.mrf.mxu0  ;;  %v9293_v30 = vld [vmem:[%s7130_s25 + $0xbc] sm:$0x1]  ;;  %v6013_v48 = vld [vmem:[%s7130_s25 + $0xb4] sm:$0xe] }
 0x13c   : > { %6864 = vmatmul.mubr.bf16.gmra.mxu0 %v9929_v21  ;;  %v4177_v9 = vrot.slane %v4175_v29, 4  ;;  %v4180_v17 = vrot.slane %v4178_v33, 5  ;;  %v9283_v23 = vadd.f32 %v6574_v11, %v1220_v20  ;;  %v1212_v31 = vadd.f32 %v1211_v10, %v9931_v47  ;;  %v9315_v20 = vld [vmem:[%s7130_s25 + $0xc8] sm:$0x1] }
 0x13d   : > { %6867 = vmatprep.mubr.bf16.mxu0 %v9930_v60  ;;  %v4173_v8 = vsel %vm7161_vm2, %v4168_v59, %v4172_v6  ;;  %v9290_v13 = vsel %vm7472_vm5, %v4720_v37, %v4721_v12  ;;  %v6529_v54 = vpop.f32.mrf.mxu1  ;;  %6816 = vmatmul.mubr.bf16.gmra.mxu1 %v9078_v52  ;;  %v9297_v40 = vrot.slane %v4184_v35, 5  ;;  %v4199_v11 = vshrl.u32 %v5954_v49, 16  ;;  %v6578_v29 = vpop.f32.mrf.mxu0 }
 0x13e   : > { %v4202_v62 = vshll.u32 %v5954_v49, 16  ;;  %v4208_v44 = vshll.u32 %v9271_v16, 16  ;;  %v9300_v18 = vadd.f32 %v1664_v25, %v1212_v31  ;;  %v1233_v6 = vadd.f32 %v6529_v54, %v9018_v43  ;;  %6819 = vmatprep.mubr.bf16.mxu1 %v9134_v22 }
 0x13f   : > { %v4190_v12 = vrot.slane %v4188_v63, 4  ;;  %v4212_v33 = vshrl.u32 %v9271_v16, 16  ;;  %v1224_v57 = vpop.f32.mrf.mxu1  ;;  %v4181_v3 = vor.u32 %v4180_v17, %v4177_v9  ;;  %v4194_v52 = vshll.u32 %v9293_v30, 16  ;;  %v1680_v43 = vpop.f32.mrf.mxu0  ;;  %v5957_v9 = vld [vmem:[%s7130_s25 + $0xcc] sm:$0xf] }
 0x140   : > { %v6029_v59 = vrot.slane %v6013_v48, 9  ;;  %v4725_v37 = vrot.slane %v9247_v2, 5  ;;  %v9307_v42 = vadd.f32 %v6577_v61, %v1233_v6  ;;  %v1225_v25 = vadd.f32 %v1224_v57, %v9037_v1  ;;  %v6014_v48 = vld [vmem:[%s7130_s25 + $0xc0] sm:$0xe] }
 0x141   : > { %v9310_v35 = vcombine.low %v4163_v51, %v4173_v8  ;;  %v6060_v22 = vcombine.low %v9281_v55, %v9290_v13  ;;  %v6530_v38 = vpop.f32.mrf.mxu1  ;;  %v4201_v21 = vrot.slane %v4199_v11, 4  ;;  %v4204_v63 = vrot.slane %v4202_v62, 5  ;;  %v6581_v10 = vpop.f32.mrf.mxu0  ;;  %v9337_v8 = vld [vmem:[%s7130_s25 + $0xd0] sm:$0xf] }
 0x142   : > { %v9317_v49 = vrot.slane %v4208_v44, 5  ;;  %v4214_v2 = vrot.slane %v4212_v33, 4  ;;  %v9319_v61 = vadd.f32 %v1677_v28, %v1225_v25  ;;  %v1236_v1 = vadd.f32 %v6530_v38, %v9057_v26 }
 0x143   : > { %v9932_v60 = vcombine.low %v9113_v19, %v9123_v36  ;;  %v4191_v51 = vor.u32 %v4190_v12, %v9297_v40  ;;  %v4728_v55 = vrot.slane %v9293_v30, 5  ;;  %v1227_v17 = vpop.f32.mrf.mxu1  ;;  %v9328_v47 = vrot.slane %v4181_v3, 4  ;;  %v1693_v13 = vpop.f32.mrf.mxu0 }
 0x144   : > { %v9330_v31 = vrot.slane %v4194_v52, 5  ;;  %v9334_v26 = vsel %vm7472_vm5, %v6029_v59, %v4725_v37  ;;  %v4727_v28 = vrot.slane %v4725_v37, 4  ;;  %v9339_v19 = vadd.f32 %v6578_v29, %v1236_v1  ;;  %v9933_v29 = vld [vmem:[#allocation2_spill] sm:$0xff] }
 0x145   : > { %6868 = vmatmul.mubr.bf16.gmra.mxu0 %v9932_v60  ;;  %v1228_v36 = vadd.f32 %v1227_v17, %v9066_v34  ;;  %v4218_v30 = vshll.u32 %v9315_v20, 16  ;;  %v6533_v54 = vpop.f32.mrf.mxu1  ;;  %6820 = vmatmul.mubr.bf16.gmra.mxu1 %v9140_v4  ;;  %v4205_v11 = vor.u32 %v4204_v63, %v4201_v21  ;;  %v4215_v62 = vor.u32 %v4214_v2, %v9317_v49  ;;  %v6582_v57 = vpop.f32.mrf.mxu0 }
 0x146   : > { %6871 = vmatprep.mubr.bf16.mxu0 %v6058_v58  ;;  %v4732_v58 = vrot.slane %v9271_v16, 5  ;;  %v4223_v44 = vshrl.u32 %v5957_v9, 16  ;;  %v4226_v6 = vshll.u32 %v5957_v9, 16  ;;  %v1249_v33 = vadd.f32 %v6533_v54, %v9933_v29  ;;  %6823 = vmatprep.mubr.bf16.mxu1 %v9253_v5 }
 0x147   : > { %v9347_v12 = vadd.f32 %v1680_v43, %v1228_v36  ;;  %v4232_v34 = vshll.u32 %v9337_v8, 16  ;;  %v4236_v3 = vshrl.u32 %v9337_v8, 16  ;;  %v1240_v16 = vpop.f32.mrf.mxu1  ;;  %v4192_v52 = vrot.slane %v4191_v51, 4  ;;  %v9934_v43 = vld [vmem:[#allocation5_spill] sm:$0xff]  ;;  %v1696_v21 = vpop.f32.mrf.mxu0  ;;  %v9935_v36 = vld [vmem:[#allocation4_spill] sm:$0xff] }
 0x148   : > { %v4729_v4 = vsel %vm7472_vm5, %v4727_v28, %v4728_v55  ;;  %v6030_v59 = vrot.slane %v6014_v48, 9  ;;  %v4735_v37 = vrot.slane %v9315_v20, 5  ;;  %v9356_v25 = vadd.f32 %v6581_v10, %v1249_v33  ;;  %v5959_v20 = vld [vmem:[%s7130_s25 + $0xd4] sm:$0x1] }
 0x149   : > { %v1241_v38 = vadd.f32 %v1240_v16, %v9934_v43  ;;  %v4220_v63 = vrot.slane %v4218_v30, 5  ;;  %v4734_v5 = vrot.slane %v4732_v58, 4  ;;  %v6534_v2 = vpop.f32.mrf.mxu1  ;;  %v4206_v1 = vrot.slane %v4205_v11, 4 }
 0x14a   : > { %v4216_v60 = vrot.slane %v4215_v62, 4  ;;  %v4225_v9 = vrot.slane %v4223_v44, 4  ;;  %v4228_v17 = vrot.slane %v4226_v6, 5  ;;  %v1252_v55 = vadd.f32 %v6534_v2, %v9935_v36  ;;  %v6585_v28 = vpop.f32.mrf.mxu0  ;;  %v6015_v6 = vld [vmem:[%s7130_s25 + $0xcc] sm:$0xe] }
 0x14b   : > { %v9359_v51 = vadd.f32 %v1693_v13, %v1241_v38  ;;  %v9366_v10 = vrot.slane %v4232_v34, 5  ;;  %v4238_v30 = vrot.slane %v4236_v3, 4  ;;  %v1243_v48 = vpop.f32.mrf.mxu1  ;;  %v4187_v13 = vsel %vm7161_vm2, %v9328_v47, %v9297_v40 }
 0x14c   : > { %v4197_v54 = vsel %vm7161_vm2, %v4192_v52, %v9330_v31  ;;  %v4739_v11 = vrot.slane %v9337_v8, 5  ;;  %v9376_v62 = vadd.f32 %v6582_v57, %v1252_v55  ;;  %v1244_v0 = vadd.f32 %v1243_v48, %v9936_v46  ;;  %v9937_v57 = vld [vmem:[#allocation8_spill] sm:$0xff] }
 0x14d   : > { %6872 = vmatmul.mubr.bf16.gmra.mxu0 %v6059_v39  ;;  %v1709_v39 = vpop.f32.mrf.mxu0  ;;  %v4733_v44 = vsel %vm7472_vm5, %v6030_v59, %v4732_v58  ;;  %v6537_v29 = vpop.f32.mrf.mxu1  ;;  %6824 = vmatmul.mubr.bf16.gmra.mxu1 %v9257_v50  ;;  %v6061_v40 = vcombine.low %v9334_v26, %v4729_v4  ;;  %v4211_v47 = vsel %vm7161_vm2, %v4206_v1, %v9317_v49  ;;  %v4242_v8 = vshll.u32 %v5959_v20, 16  ;;  %v9940_v48 = vld [vmem:[#allocation12_spill] sm:$0xff] }
 0x14e   : > { %6875 = vmatprep.mubr.bf16.mxu0 %v6060_v22  ;;  %v4736_v22 = vsel %vm7472_vm5, %v4734_v5, %v4735_v37  ;;  %v4229_v31 = vor.u32 %v4228_v17, %v4225_v9  ;;  %v9389_v33 = vadd.f32 %v1696_v21, %v1244_v0  ;;  %v1265_v34 = vadd.f32 %v6537_v29, %v9937_v57  ;;  %v9938_v37 = vld [vmem:[#allocation10_spill] sm:$0xff]  ;;  %v9939_v9 = vld [vmem:[#allocation11_spill] sm:$0xff] }
 0x14f   : > { %v6586_v58 = vpop.f32.mrf.mxu0  ;;  %6827 = vmatprep.mubr.bf16.mxu1 %v9310_v35  ;;  %v4221_v3 = vsel %vm7161_vm2, %v4216_v60, %v4220_v63  ;;  %v4239_v50 = vor.u32 %v4238_v30, %v9366_v10  ;;  %v1256_v16 = vpop.f32.mrf.mxu1  ;;  %v6062_v26 = vcombine.low %v4733_v44, %v4736_v22  ;;  %v6031_v52 = vrot.slane %v6015_v6, 9  ;;  %v9941_v44 = vld [vmem:[#allocation14_spill] sm:$0xff] }
 0x150   : > { %v4741_v4 = vrot.slane %v4739_v11, 4  ;;  %v4742_v59 = vrot.slane %v5959_v20, 5  ;;  %v9396_v49 = vadd.f32 %v6585_v28, %v1265_v34  ;;  %v1257_v43 = vadd.f32 %v1256_v16, %v9938_v37  ;;  %v9944_v37 = vld [vmem:[#allocation21_spill] sm:$0xff] }
 0x151   : > { %v1712_v38 = vpop.f32.mrf.mxu0  ;;  %v6538_v21 = vpop.f32.mrf.mxu1  ;;  %v5989_v5 = vcombine.low %v4187_v13, %v4197_v54  ;;  %v5990_v2 = vcombine.low %v4211_v47, %v4221_v3  ;;  %v4230_v1 = vrot.slane %v4229_v31, 4  ;;  %v4240_v17 = vrot.slane %v4239_v50, 4  ;;  %v9942_v47 = vld [vmem:[#allocation16_spill] sm:$0xff] }
 0x152   : > { %v9399_v35 = vadd.f32 %v1709_v39, %v1257_v43  ;;  %v1268_v63 = vadd.f32 %v6538_v21, %v9939_v9  ;;  %v4244_v36 = vrot.slane %v4242_v8, 5  ;;  %v4740_v28 = vsel %vm7472_vm5, %v6031_v52, %v4739_v11 }
 0x153   : > { %v6589_v60 = vpop.f32.mrf.mxu0  ;;  %v1259_v55 = vpop.f32.mrf.mxu1  ;;  %v4743_v20 = vsel %vm7472_vm5, %v4741_v4, %v4742_v59  ;;  %v4235_v0 = vsel %vm7161_vm2, %v4230_v1, %v9366_v10  ;;  %v9943_v10 = vld [vmem:[#allocation19_spill] sm:$0xff] }
 0x154   : > { %v9406_v30 = vadd.f32 %v6586_v58, %v1268_v63  ;;  %v1260_v13 = vadd.f32 %v1259_v55, %v9940_v48  ;;  %v4245_v56 = vsel %vm7161_vm2, %v4240_v17, %v4244_v36  ;;  %v6063_v11 = vcombine.low %v4740_v28, %v4743_v20  ;;  %v9946_v17 = vld [vmem:[#allocation23_spill] sm:$0xff]  ;;  %v9947_v20 = vld [vmem:[#allocation24_spill] sm:$0xff] }
 0x155   : > { %6876 = vmatmul.mubr.bf16.gmra.mxu0 %v6061_v40  ;;  %v1725_v54 = vpop.f32.mrf.mxu0  ;;  %v6541_v46 = vpop.f32.mrf.mxu1  ;;  %6828 = vmatmul.mubr.bf16.gmra.mxu1 %v5989_v5  ;;  %v5991_v34 = vcombine.low %v4235_v0, %v4245_v56  ;;  %v9948_v0 = vld [vmem:[#allocation25_spill] sm:$0xff] }
 0x156   : > { %6879 = vmatprep.mubr.bf16.mxu0 %v6062_v26  ;;  %v9412_v39 = vadd.f32 %v1712_v38, %v1260_v13  ;;  %v1281_v22 = vadd.f32 %v6541_v46, %v9941_v44  ;;  %6831 = vmatprep.mubr.bf16.mxu1 %v5990_v2  ;;  %v9945_v2 = vld [vmem:[#allocation22_spill] sm:$0xff] }
 0x157   : > { %v6590_v6 = vpop.f32.mrf.mxu0  ;;  %v1272_v29 = vpop.f32.mrf.mxu1 }
 0x158   : > { %v9417_v40 = vadd.f32 %v6589_v60, %v1281_v22  ;;  %v1273_v31 = vadd.f32 %v1272_v29, %v9942_v47 }
 0x159   : > { %v1728_v8 = vpop.f32.mrf.mxu0  ;;  %v6542_v57 = vpop.f32.mrf.mxu1 }
 0x15a   : > { %v9420_v58 = vadd.f32 %v1725_v54, %v1273_v31  ;;  %v1284_v3 = vadd.f32 %v6542_v57, %v9943_v10  ;;  %v9950_v57 = vld [vmem:[#allocation27_spill] sm:$0xff] }
 0x15b   : > { %v6593_v50 = vpop.f32.mrf.mxu0  ;;  %v1275_v16 = vpop.f32.mrf.mxu1 }
 0x15c   : > { %v9423_v26 = vadd.f32 %v6590_v6, %v1284_v3  ;;  %v1276_v27 = vadd.f32 %v1275_v16, %v9013_v32 }
 0x15d   : > { %6880 = vmatmul.mubr.bf16.gmra.mxu0 %v6063_v11  ;;  %v1741_v52 = vpop.f32.mrf.mxu0  ;;  %v6545_v4 = vpop.f32.mrf.mxu1  ;;  %6832 = vmatmul.mubr.bf16.gmra.mxu1 %v5991_v34  ;;  %v9949_v11 = vld [vmem:[#allocation26_spill] sm:$0xff] }
 0x15e   : > { %v9426_v59 = vadd.f32 %v1728_v8, %v1276_v27  ;;  %v1297_v43 = vadd.f32 %v6545_v4, %v9944_v37 }
 0x15f   : > { %v6594_v38 = vpop.f32.mrf.mxu0  ;;  %v1288_v21 = vpop.f32.mrf.mxu1 }
 0x160   : > { %v9429_v5 = vadd.f32 %v6593_v50, %v1297_v43  ;;  %v1289_v1 = vadd.f32 %v1288_v21, %v9945_v2 }
 0x161   : > { %v1744_v9 = vpop.f32.mrf.mxu0  ;;  %v6546_v63 = vpop.f32.mrf.mxu1 }
 0x162   : > { %v9432_v60 = vadd.f32 %v1741_v52, %v1289_v1  ;;  %v1300_v36 = vadd.f32 %v6546_v63, %v9946_v17 }
 0x163   : > { %v6661_v32 = vpop.f32.mrf.mxu0  ;;  %v1291_v55 = vpop.f32.mrf.mxu1 }
 0x164   : > { %v9435_v28 = vadd.f32 %v6594_v38, %v1300_v36  ;;  %v1292_v48 = vadd.f32 %v1291_v55, %v9947_v20 }
 0x165   : > { %v2770_v13 = vpop.f32.mrf.mxu0  ;;  %v6613_v54 = vpop.f32.mrf.mxu1 }
 0x166   : > { %v9438_v46 = vadd.f32 %v1744_v9, %v1292_v48  ;;  %v2145_v44 = vadd.f32 %v6613_v54, %v9948_v0 }
 0x167   : > { %v6662_v22 = vpop.f32.mrf.mxu0  ;;  %v2016_v6 = vpop.f32.mrf.mxu1 }
 0x168   : > { %v9441_v56 = vadd.f32 %v6661_v32, %v2145_v44  ;;  %v2143_v29 = vadd.f32 %v2016_v6, %v9949_v11 }
 0x169   : > { %v2773_v47 = vpop.f32.mrf.mxu0  ;;  %v6614_v31 = vpop.f32.mrf.mxu1 }
 0x16a   : > { %v9444_v8 = vadd.f32 %v2770_v13, %v2143_v29  ;;  %v2146_v34 = vadd.f32 %v6614_v31, %v9950_v57 }
 0x16b   : > { %v6665_v10 = vpop.f32.mrf.mxu0  ;;  %v2019_v3 = vpop.f32.mrf.mxu1 }
 0x16c   : > { %v9447_v50 = vadd.f32 %v6662_v22, %v2146_v34  ;;  %v2144_v16 = vadd.f32 %v2019_v3, %v9183_v24 }
 0x16d   : > { %v2786_v27 = vpop.f32.mrf.mxu0  ;;  %v6617_v52 = vpop.f32.mrf.mxu1 }
 0x16e   : > { %v9450_v4 = vadd.f32 %v2773_v47, %v2144_v16  ;;  %v2149_v37 = vadd.f32 %v6617_v52, %v9187_v41 }
 0x16f   : > { %v6666_v43 = vpop.f32.mrf.mxu0  ;;  %v2032_v38 = vpop.f32.mrf.mxu1 }
 0x170   : > { %v9453_v21 = vadd.f32 %v6665_v10, %v2149_v37  ;;  %v2147_v2 = vadd.f32 %v2032_v38, %v9196_v15 }
 0x171   : > { %v2789_v1 = vpop.f32.mrf.mxu0  ;;  %v6618_v9 = vpop.f32.mrf.mxu1 }
 0x172   : > { %v9456_v63 = vadd.f32 %v2786_v27, %v2147_v2  ;;  %v2150_v17 = vadd.f32 %v6618_v9, %v9222_v53 }
 0x173   : > { %v6669_v36 = vpop.f32.mrf.mxu0  ;;  %v2035_v24 = vpop.f32.mrf.mxu1 }
 0x174   : > { %v9459_v32 = vadd.f32 %v6666_v43, %v2150_v17  ;;  %v2148_v55 = vadd.f32 %v2035_v24, %v9242_v14 }
 0x175   : > { %v2802_v20 = vpop.f32.mrf.mxu0  ;;  %v6621_v41 = vpop.f32.mrf.mxu1 }
 0x176   : > { %v9462_v48 = vadd.f32 %v2789_v1, %v2148_v55  ;;  %v2153_v13 = vadd.f32 %v6621_v41, %v9250_v7 }
 0x177   : > { %v6670_v54 = vpop.f32.mrf.mxu0  ;;  %v2048_v15 = vpop.f32.mrf.mxu1 }
 0x178   : > { %v9465_v0 = vadd.f32 %v6669_v36, %v2153_v13  ;;  %v2151_v44 = vadd.f32 %v2048_v15, %v9260_v45 }
 0x179   : > { %v2805_v22 = vpop.f32.mrf.mxu0  ;;  %v6622_v53 = vpop.f32.mrf.mxu1 }
 0x17a   : > { %v9468_v6 = vadd.f32 %v2802_v20, %v2151_v44  ;;  %v2154_v11 = vadd.f32 %v6622_v53, %v9283_v23 }
 0x17b   : > { %v6673_v29 = vpop.f32.mrf.mxu0  ;;  %v2051_v14 = vpop.f32.mrf.mxu1 }
 0x17c   : > { %v9471_v47 = vadd.f32 %v6670_v54, %v2154_v11  ;;  %v2152_v31 = vadd.f32 %v2051_v14, %v9300_v18 }
 0x17d   : > { %v2818_v57 = vpop.f32.mrf.mxu0  ;;  %v6625_v7 = vpop.f32.mrf.mxu1 }
 0x17e   : > { %v9474_v34 = vadd.f32 %v2805_v22, %v2152_v31  ;;  %v2157_v10 = vadd.f32 %v6625_v7, %v9307_v42 }
 0x17f   : > { %v6674_v3 = vpop.f32.mrf.mxu0  ;;  %v2064_v45 = vpop.f32.mrf.mxu1 }
 0x180   : > { %v9477_v16 = vadd.f32 %v6673_v29, %v2157_v10  ;;  %v2155_v27 = vadd.f32 %v2064_v45, %v9319_v61 }
 0x181   : > { %v2821_v52 = vpop.f32.mrf.mxu0  ;;  %v6626_v23 = vpop.f32.mrf.mxu1 }
 0x182   : > { %v9480_v37 = vadd.f32 %v2818_v57, %v2155_v27  ;;  %v2158_v43 = vadd.f32 %v6626_v23, %v9339_v19 }
 0x183   : > { %v6677_v38 = vpop.f32.mrf.mxu0  ;;  %v2067_v18 = vpop.f32.mrf.mxu1 }
 0x184   : > { %v9483_v2 = vadd.f32 %v6674_v3, %v2158_v43  ;;  %v2156_v1 = vadd.f32 %v2067_v18, %v9347_v12 }
 0x185   : > { %v2834_v9 = vpop.f32.mrf.mxu0  ;;  %v6629_v42 = vpop.f32.mrf.mxu1 }
 0x186   : > { %v9486_v17 = vadd.f32 %v2821_v52, %v2156_v1  ;;  %v2161_v36 = vadd.f32 %v6629_v42, %v9356_v25 }
 0x187   : > { %v6678_v24 = vpop.f32.mrf.mxu0  ;;  %v2080_v61 = vpop.f32.mrf.mxu1 }
 0x188   : > { %v9489_v55 = vadd.f32 %v6677_v38, %v2161_v36  ;;  %v2159_v20 = vadd.f32 %v2080_v61, %v9359_v51 }
 0x189   : > { %v2837_v41 = vpop.f32.mrf.mxu0  ;;  %v6630_v19 = vpop.f32.mrf.mxu1 }
 0x18a   : > { %v9492_v13 = vadd.f32 %v2834_v9, %v2159_v20  ;;  %v2162_v54 = vadd.f32 %v6630_v19, %v9376_v62 }
 0x18b   : > { %v6681_v15 = vpop.f32.mrf.mxu0  ;;  %v2083_v12 = vpop.f32.mrf.mxu1 }
 0x18c   : > { %v9495_v44 = vadd.f32 %v6678_v24, %v2162_v54  ;;  %v2160_v22 = vadd.f32 %v2083_v12, %v9389_v33 }
 0x18d   : > { %v2850_v53 = vpop.f32.mrf.mxu0  ;;  %v6633_v25 = vpop.f32.mrf.mxu1 }
 0x18e   : > { %v9498_v11 = vadd.f32 %v2837_v41, %v2160_v22  ;;  %v2165_v29 = vadd.f32 %v6633_v25, %v9396_v49 }
 0x18f   : > { %v6682_v14 = vpop.f32.mrf.mxu0  ;;  %v2096_v51 = vpop.f32.mrf.mxu1 }
 0x190   : > { %v9501_v31 = vadd.f32 %v6681_v15, %v2165_v29  ;;  %v2163_v57 = vadd.f32 %v2096_v51, %v9399_v35 }
 0x191   : > { %v2853_v7 = vpop.f32.mrf.mxu0  ;;  %v6634_v62 = vpop.f32.mrf.mxu1 }
 0x192   : > { %v9504_v10 = vadd.f32 %v2850_v53, %v2163_v57  ;;  %v2166_v3 = vadd.f32 %v6634_v62, %v9406_v30 }
 0x193   : > { %v6685_v45 = vpop.f32.mrf.mxu0  ;;  %v2099_v33 = vpop.f32.mrf.mxu1 }
 0x194   : > { %v9507_v27 = vadd.f32 %v6682_v14, %v2166_v3  ;;  %v2164_v52 = vadd.f32 %v2099_v33, %v9412_v39 }
 0x195   : > { %v2866_v23 = vpop.f32.mrf.mxu0  ;;  %v6637_v49 = vpop.f32.mrf.mxu1 }
 0x196   : > { %v9510_v43 = vadd.f32 %v2853_v7, %v2164_v52  ;;  %v2169_v38 = vadd.f32 %v6637_v49, %v9417_v40 }
 0x197   : > { %v6686_v18 = vpop.f32.mrf.mxu0  ;;  %v2112_v35 = vpop.f32.mrf.mxu1 }
 0x198   : > { %v9513_v1 = vadd.f32 %v6685_v45, %v2169_v38  ;;  %v2167_v9 = vadd.f32 %v2112_v35, %v9420_v58 }
 0x199   : > { %v2869_v42 = vpop.f32.mrf.mxu0  ;;  %v6638_v30 = vpop.f32.mrf.mxu1 }
 0x19a   : > { %v9516_v36 = vadd.f32 %v2866_v23, %v2167_v9  ;;  %v2170_v24 = vadd.f32 %v6638_v30, %v9423_v26 }
 0x19b   : > { %v6689_v61 = vpop.f32.mrf.mxu0  ;;  %v2115_v39 = vpop.f32.mrf.mxu1 }
 0x19c   : > { %v9519_v20 = vadd.f32 %v6686_v18, %v2170_v24  ;;  %v2168_v41 = vadd.f32 %v2115_v39, %v9426_v59 }
 0x19d   : > { %v2882_v19 = vpop.f32.mrf.mxu0  ;;  %v6641_v40 = vpop.f32.mrf.mxu1 }
 0x19e   : > { %9951 = vst [vmem:[#allocation3_spill] sm:$0xff] %v9519_v20  ;;  %v9522_v54 = vadd.f32 %v2869_v42, %v2168_v41  ;;  %v2173_v15 = vadd.f32 %v6641_v40, %v9429_v5 }
 0x19f   : > { %v6690_v12 = vpop.f32.mrf.mxu0  ;;  %v2128_v58 = vpop.f32.mrf.mxu1 }
 0x1a0   : > { %9952 = vst [vmem:[#allocation7_spill] sm:$0xff] %v9522_v54  ;;  %v9525_v22 = vadd.f32 %v6689_v61, %v2173_v15  ;;  %v2171_v53 = vadd.f32 %v2128_v58, %v9432_v60 }
 0x1a1   : > { %v2885_v25 = vpop.f32.mrf.mxu0  ;;  %v6642_v26 = vpop.f32.mrf.mxu1 }
 0x1a2   : > { %v9528_v29 = vadd.f32 %v2882_v19, %v2171_v53  ;;  %v2174_v14 = vadd.f32 %v6642_v26, %v9435_v28 }
 0x1a3   : > { %v6757_v51 = vpop.f32.mrf.mxu0  ;;  %v2131_v59 = vpop.f32.mrf.mxu1 }
 0x1a4   : > { %v9531_v57 = vadd.f32 %v6690_v12, %v2174_v14  ;;  %v2172_v7 = vadd.f32 %v2131_v59, %v9438_v46 }
 0x1a5   : > { %v3655_v62 = vpop.f32.mrf.mxu0  ;;  %v6709_v5 = vpop.f32.mrf.mxu1 }
 0x1a6   : > { %9953 = vst [vmem:[#allocation9_spill] sm:$0xff] %v9531_v57  ;;  %v9534_v3 = vadd.f32 %v2885_v25, %v2172_v7  ;;  %v3397_v45 = vadd.f32 %v6709_v5, %v9441_v56 }
 0x1a7   : > { %v9537_v33 = vpop.f32.mrf.mxu0  ;;  %v3268_v60 = vpop.f32.mrf.mxu1 }
 0x1a8   : > { %9954 = vst [vmem:[#allocation18_spill] sm:$0xff] %v9534_v3  ;;  %v9539_v52 = vadd.f32 %v6757_v51, %v3397_v45  ;;  %v3395_v23 = vadd.f32 %v3268_v60, %v9444_v8 }
 0x1a9   : > { %v9542_v28 = vpop.f32.mrf.mxu0  ;;  %v9544_v49 = vpop.f32.mrf.mxu1 }
 0x1aa   : > { %v9546_v38 = vadd.f32 %v3655_v62, %v3395_v23 }
 0x1ab   : > { %v6761_v46 = vpop.f32.mrf.mxu0  ;;  %v9548_v18 = vpop.f32.mrf.mxu1 }
 0x1ad   : > { %v3671_v35 = vpop.f32.mrf.mxu0  ;;  %v6713_v9 = vpop.f32.mrf.mxu1 }
 0x1ae   : > { %v3401_v56 = vadd.f32 %v6713_v9, %v9453_v21 }
 0x1af   : > { %v9551_v42 = vpop.f32.mrf.mxu0  ;;  %v3284_v30 = vpop.f32.mrf.mxu1 }
 0x1b0   : > { %v9553_v24 = vadd.f32 %v6761_v46, %v3401_v56  ;;  %v3399_v8 = vadd.f32 %v3284_v30, %v9456_v63 }
 0x1b1   : > { %v9556_v61 = vpop.f32.mrf.mxu0  ;;  %v9558_v39 = vpop.f32.mrf.mxu1 }
 0x1b2   : > { %v9560_v41 = vadd.f32 %v3671_v35, %v3399_v8 }
 0x1b3   : > { %v6765_v19 = vpop.f32.mrf.mxu0  ;;  %v9562_v40 = vpop.f32.mrf.mxu1 }
 0x1b5   : > { %v3687_v15 = vpop.f32.mrf.mxu0  ;;  %v6717_v12 = vpop.f32.mrf.mxu1 }
 0x1b6   : > { %v3405_v21 = vadd.f32 %v6717_v12, %v9465_v0 }
 0x1b7   : > { %v9565_v58 = vpop.f32.mrf.mxu0  ;;  %v3300_v53 = vpop.f32.mrf.mxu1 }
 0x1b8   : > { %v9567_v25 = vadd.f32 %v6765_v19, %v3405_v21  ;;  %v3403_v63 = vadd.f32 %v3300_v53, %v9468_v6 }
 0x1b9   : > { %v9570_v26 = vpop.f32.mrf.mxu0  ;;  %v9572_v14 = vpop.f32.mrf.mxu1 }
 0x1ba   : > { %v9574_v51 = vadd.f32 %v3687_v15, %v3403_v63 }
 0x1bb   : > { %v6769_v59 = vpop.f32.mrf.mxu0  ;;  %v9576_v7 = vpop.f32.mrf.mxu1 }
 0x1bd   : > { %v3703_v62 = vpop.f32.mrf.mxu0  ;;  %v6721_v5 = vpop.f32.mrf.mxu1 }
 0x1be   : > { %v3409_v0 = vadd.f32 %v6721_v5, %v9477_v16 }
 0x1bf   : > { %v9579_v45 = vpop.f32.mrf.mxu0  ;;  %v3316_v60 = vpop.f32.mrf.mxu1 }
 0x1c0   : > { %v9581_v23 = vadd.f32 %v6769_v59, %v3409_v0  ;;  %v3407_v6 = vadd.f32 %v3316_v60, %v9480_v37 }
 0x1c1   : > { %v9584_v46 = vpop.f32.mrf.mxu0  ;;  %v9586_v35 = vpop.f32.mrf.mxu1 }
 0x1c2   : > { %v9588_v9 = vadd.f32 %v3703_v62, %v3407_v6 }
 0x1c3   : > { %v6773_v56 = vpop.f32.mrf.mxu0  ;;  %v9590_v30 = vpop.f32.mrf.mxu1 }
 0x1c5   : > { %v3719_v8 = vpop.f32.mrf.mxu0  ;;  %v6725_v19 = vpop.f32.mrf.mxu1 }
 0x1c6   : > { %v3413_v16 = vadd.f32 %v6725_v19, %v9489_v55 }
 0x1c7   : > { %v9593_v15 = vpop.f32.mrf.mxu0  ;;  %v3332_v12 = vpop.f32.mrf.mxu1 }
 0x1c8   : > { %v9595_v21 = vadd.f32 %v6773_v56, %v3413_v16  ;;  %v3411_v37 = vadd.f32 %v3332_v12, %v9492_v13 }
 0x1c9   : > { %v9598_v53 = vpop.f32.mrf.mxu0  ;;  %v9600_v63 = vpop.f32.mrf.mxu1 }
 0x1ca   : > { %v9602_v59 = vadd.f32 %v3719_v8, %v3411_v37 }
 0x1cb   : > { %v6777_v62 = vpop.f32.mrf.mxu0  ;;  %v9604_v5 = vpop.f32.mrf.mxu1 }
 0x1cd   : > { %v3735_v0 = vpop.f32.mrf.mxu0  ;;  %v6729_v60 = vpop.f32.mrf.mxu1 }
 0x1ce   : > { %v3417_v55 = vadd.f32 %v6729_v60, %v9501_v31 }
 0x1cf   : > { %v9607_v6 = vpop.f32.mrf.mxu0  ;;  %v3348_v19 = vpop.f32.mrf.mxu1 }
 0x1d0   : > { %v9609_v56 = vadd.f32 %v6777_v62, %v3417_v55  ;;  %v3415_v13 = vadd.f32 %v3348_v19, %v9504_v10 }
 0x1d1   : > { %v9612_v16 = vpop.f32.mrf.mxu0  ;;  %v9614_v12 = vpop.f32.mrf.mxu1 }
 0x1d2   : > { %9955 = vst [vmem:[#allocation13_spill] sm:$0xff] %v9609_v56  ;;  %9956 = vst [vmem:[#allocation15_spill] sm:$0xff] %v9612_v16  ;;  %v9616_v8 = vadd.f32 %v3735_v0, %v3415_v13 }
 0x1d3   : > { %v6781_v37 = vpop.f32.mrf.mxu0  ;;  %v9618_v3 = vpop.f32.mrf.mxu1 }
 0x1d4   : > { %9957 = vst [vmem:[#allocation17_spill] sm:$0xff] %v9616_v8 }
 0x1d5   : > { %v3751_v57 = vpop.f32.mrf.mxu0  ;;  %v6733_v54 = vpop.f32.mrf.mxu1 }
 0x1d6   : > { %v3421_v31 = vadd.f32 %v6733_v54, %v9513_v1 }
 0x1d7   : > { %v9621_v60 = vpop.f32.mrf.mxu0  ;;  %v3364_v20 = vpop.f32.mrf.mxu1 }
 0x1d8   : > { %9958 = vst [vmem:[#allocation20_spill] sm:$0xff] %v9621_v60  ;;  %v9623_v62 = vadd.f32 %v6781_v37, %v3421_v31  ;;  %v3419_v10 = vadd.f32 %v3364_v20, %v9516_v36 }
 0x1d9   : > { %v9626_v55 = vpop.f32.mrf.mxu0  ;;  %v9628_v19 = vpop.f32.mrf.mxu1 }
 0x1da   : > { %9959 = vst [vmem:[#allocation2_spill] sm:$0xff] %v9623_v62  ;;  %v9630_v0 = vadd.f32 %v3751_v57, %v3419_v10  ;;  %v3398_v62 = vadd.f32 %v9544_v49, %v9447_v50 }
 0x1db   : > { %v6785_v13 = vpop.f32.mrf.mxu0  ;;  %v9632_v8 = vpop.f32.mrf.mxu1 }
 0x1dc   : > { %9960 = vst [vmem:[#allocation5_spill] sm:$0xff] %v9630_v0 }
 0x1dd   : > { %v3767_v56 = vpop.f32.mrf.mxu0  ;;  %v6737_v16 = vpop.f32.mrf.mxu1 }
 0x1de   : > { %v3425_v1 = vadd.f32 %v6737_v16, %v9525_v22 }
 0x1df   : > { %v9635_v54 = vpop.f32.mrf.mxu0  ;;  %v3380_v60 = vpop.f32.mrf.mxu1 }
 0x1e0   : > { %9961 = vst [vmem:[#allocation4_spill] sm:$0xff] %v9635_v54  ;;  %v9637_v37 = vadd.f32 %v6785_v13, %v3425_v1  ;;  %v3423_v36 = vadd.f32 %v3380_v60, %v9528_v29  ;;  %v3396_v29 = vadd.f32 %v9548_v18, %v9450_v4  ;;  %v9656_v60 = vld [vmem:[%s9788_s2] ss:$0 sm:$0xff]  ;;  %v3785_v1 = vadd.f32 %v9537_v33, %v3398_v62 }
 0x1e1   : > { %v9640_v20 = vpop.f32.mrf.mxu0  ;;  %v9642_v31 = vpop.f32.mrf.mxu1 }
 0x1e2   : > { %9962 = vst [vmem:[#allocation6_spill] sm:$0xff] %v9637_v37  ;;  %9963 = vst [vmem:[#allocation8_spill] sm:$0xff] %v9640_v20  ;;  %v9644_v57 = vadd.f32 %v3767_v56, %v3423_v36  ;;  %v3783_v37 = vadd.f32 %v9542_v28, %v3396_v29  ;;  %v3406_v28 = vadd.f32 %v9572_v14, %v9471_v47 }
 0x1e3   : > { %9964 = vst [vmem:[#allocation10_spill] sm:$0xff] %v9642_v31  ;;  %v9646_v0 = vpop.f32.mrf.mxu1 }
 0x1e4   : > { %9965 = vst [vmem:[#allocation11_spill] sm:$0xff] %v9644_v57  ;;  %v6853_v10 = vpop.f32.mrf.mxu0  ;;  %9966 = vst [vmem:[#allocation12_spill] sm:$0xff] %v9646_v0  ;;  %v3400_v0 = vadd.f32 %v9562_v40, %v9462_v48 }
 0x1e5   : > { %v6805_v16 = vpop.f32.mrf.mxu1 }
 0x1e6   : > { %v4907_v22 = vpop.f32.mrf.mxu0  ;;  %v4538_v54 = vadd.f32 %v6805_v16, %v9539_v52  ;;  %v3402_v52 = vadd.f32 %v9558_v39, %v9459_v32 }
 0x1e7   : > { %v4409_v56 = vpop.f32.mrf.mxu1 }
 0x1e8   : > { %v6854_v13 = vpop.f32.mrf.mxu0  ;;  %v5036_v36 = vadd.f32 %v6853_v10, %v4538_v54  ;;  %v4536_v57 = vadd.f32 %v4409_v56, %v9546_v38  ;;  %v3789_v32 = vadd.f32 %v9551_v42, %v3402_v52 }
 0x1e9   : > { %v6806_v49 = vpop.f32.mrf.mxu1 }
 0x1ea   : > { %v4910_v50 = vpop.f32.mrf.mxu0  ;;  %v5075_v16 = vadd.f32 %v9656_v60, %v5036_v36  ;;  %v5034_v20 = vadd.f32 %v4907_v22, %v4536_v57  ;;  %v4539_v4 = vadd.f32 %v6806_v49, %v3785_v1  ;;  %v3787_v22 = vadd.f32 %v9556_v61, %v3400_v0 }
 0x1eb   : > { %v4412_v33 = vpop.f32.mrf.mxu1 }
 0x1ec   : > { %v6857_v18 = vpop.f32.mrf.mxu0  ;;  %v5037_v62 = vadd.f32 %v6854_v13, %v4539_v4  ;;  %v5139_v38 = vmul.f32 0.1, %v5075_v16  ;;  %v5073_v10 = vadd.f32 %v9656_v60, %v5034_v20  ;;  %v4537_v56 = vadd.f32 %v4412_v33, %v3783_v37 }
 0x1ed   : > { %v6809_v31 = vpop.f32.mrf.mxu1  ;;  %vm5107_vm6 = vcmp.gt.f32.partialorder %v5075_v16, 0.0  ;;  %v3404_v37 = vadd.f32 %v9576_v7, %v9474_v34 }
 0x1ee   : > { %v4923_v54 = vpop.f32.mrf.mxu0  ;;  %v5076_v39 = vadd.f32 %v9656_v60, %v5037_v62  ;;  %v5035_v48 = vadd.f32 %v4910_v50, %v4537_v56  ;;  %v4542_v40 = vadd.f32 %v6809_v31, %v9553_v24  ;;  %v5171_v1 = vsel %vm5107_vm6, %v5075_v16, %v5139_v38 }
 0x1ef   : > { %v4425_v13 = vpop.f32.mrf.mxu1  ;;  %v5137_v36 = vmul.f32 0.1, %v5073_v10  ;;  %vm5105_vm8 = vcmp.gt.f32.partialorder %v5073_v10, 0.0  ;;  %v3791_v56 = vadd.f32 %v9570_v26, %v3404_v37 }
 0x1f0   : > { %v6858_v57 = vpop.f32.mrf.mxu0  ;;  %vm5108_vm7 = vcmp.gt.f32.partialorder %v5076_v39, 0.0  ;;  %v5140_v20 = vmul.f32 0.1, %v5076_v39  ;;  %v4540_v42 = vadd.f32 %v4425_v13, %v9560_v41  ;;  %v5074_v61 = vadd.f32 %v9656_v60, %v5035_v48 }
 0x1f1   : > { %v5040_v0 = vadd.f32 %v6857_v18, %v4542_v40  ;;  %v6810_v49 = vpop.f32.mrf.mxu1  ;;  %v3793_v18 = vadd.f32 %v9565_v58, %v3406_v28  ;;  %v5169_v33 = vsel %vm5105_vm8, %v5073_v10, %v5137_v36  ;;  %v3408_v28 = vadd.f32 %v9590_v30, %v9486_v17 }
 0x1f2   : > { %v4926_v29 = vpop.f32.mrf.mxu0  ;;  %v5172_v47 = vsel %vm5108_vm7, %v5076_v39, %v5140_v20  ;;  %v5038_v34 = vadd.f32 %v4923_v54, %v4540_v42  ;;  %v4543_v24 = vadd.f32 %v6810_v49, %v3789_v32  ;;  %vm5106_vm9 = vcmp.gt.f32.partialorder %v5074_v61, 0.0 }
 0x1f3   : > { %v6148_v7 = vpack.c.bf16 %v5172_v47, %v5171_v1  ;;  %v5138_v41 = vmul.f32 0.1, %v5074_v61  ;;  %v5079_v31 = vadd.f32 %v9656_v60, %v5040_v0  ;;  %v4428_v50 = vpop.f32.mrf.mxu1 }
 0x1f4   : > { %v6861_v14 = vpop.f32.mrf.mxu0  ;;  %v5041_v52 = vadd.f32 %v6858_v57, %v4543_v24  ;;  %v4541_v16 = vadd.f32 %v4428_v50, %v3787_v22  ;;  %v5077_v38 = vadd.f32 %v9656_v60, %v5038_v34  ;;  %v3410_v57 = vadd.f32 %v9586_v35, %v9483_v2 }
 0x1f5   : > { %6220 = vst [vmem:[%s9681_s8 + $0x8] sm:$0xff] %v6148_v7   ;;  %v5170_v62 = vsel %vm5106_vm9, %v5074_v61, %v5138_v41  ;;  %v6813_v54 = vpop.f32.mrf.mxu1  ;;  %v5143_v39 = vmul.f32 0.1, %v5079_v31  ;;  %vm5111_vm10 = vcmp.gt.f32.partialorder %v5079_v31, 0.0  ;;  %v3795_v50 = vadd.f32 %v9584_v46, %v3408_v28 }
 0x1f6   : > { %v4939_v4 = vpop.f32.mrf.mxu0  ;;  %v6143_v32 = vpack.c.bf16 %v5170_v62, %v5169_v33  ;;  %v5080_v48 = vadd.f32 %v9656_v60, %v5041_v52  ;;  %v5039_v22 = vadd.f32 %v4926_v29, %v4541_v16  ;;  %v4546_v58 = vadd.f32 %v6813_v54, %v9567_v25 }
 0x1f7   : > { %v4441_v10 = vpop.f32.mrf.mxu1  ;;  %vm5109_vm12 = vcmp.gt.f32.partialorder %v5077_v38, 0.0  ;;  %v5141_v20 = vmul.f32 0.1, %v5077_v38  ;;  %v5175_v35 = vsel %vm5111_vm10, %v5079_v31, %v5143_v39  ;;  %v3797_v24 = vadd.f32 %v9579_v45, %v3410_v57 }
 0x1f8   : > { %v6862_v40 = vpop.f32.mrf.mxu0  ;;  %6144 = vst [vmem:[%s9681_s8] sm:$0xff] %v6143_v32   ;;  %vm5112_vm11 = vcmp.gt.f32.partialorder %v5080_v48, 0.0  ;;  %v5144_v13 = vmul.f32 0.1, %v5080_v48  ;;  %v4544_v26 = vadd.f32 %v4441_v10, %v9574_v51  ;;  %v5078_v42 = vadd.f32 %v9656_v60, %v5039_v22 }
 0x1f9   : > { %v5044_v1 = vadd.f32 %v6861_v14, %v4546_v58  ;;  %v6814_v2 = vpop.f32.mrf.mxu1  ;;  %v5173_v14 = vsel %vm5109_vm12, %v5077_v38, %v5141_v20  ;;  %v3414_v33 = vadd.f32 %v9600_v63, %v9495_v44  ;;  %v3412_v54 = vadd.f32 %v9604_v5, %v9498_v11 }
 0x1fa   : > { %v4942_v37 = vpop.f32.mrf.mxu0  ;;  %v5176_v29 = vsel %vm5112_vm11, %v5080_v48, %v5144_v13  ;;  %v5042_v25 = vadd.f32 %v4939_v4, %v4544_v26  ;;  %v4547_v36 = vadd.f32 %v6814_v2, %v3793_v18  ;;  %vm5110_vm13 = vcmp.gt.f32.partialorder %v5078_v42, 0.0 }
 0x1fb   : > { %v6158_v0 = vpack.c.bf16 %v5176_v29, %v5175_v35  ;;  %v5142_v17 = vmul.f32 0.1, %v5078_v42  ;;  %v5083_v30 = vadd.f32 %v9656_v60, %v5044_v1  ;;  %v4444_v49 = vpop.f32.mrf.mxu1  ;;  %v3799_v35 = vadd.f32 %v9598_v53, %v3412_v54  ;;  %v9967_v54 = vld [vmem:[#allocation15_spill] sm:$0xff] }
 0x1fc   : > { %v6865_v61 = vpop.f32.mrf.mxu0  ;;  %v5045_v51 = vadd.f32 %v6862_v40, %v4547_v36  ;;  %v4545_v47 = vadd.f32 %v4444_v49, %v3791_v56  ;;  %v5081_v41 = vadd.f32 %v9656_v60, %v5042_v25  ;;  %v3416_v49 = vadd.f32 %v9618_v3, %v9510_v43 }
 0x1fd   : > { %6222 = vst [vmem:[%s9681_s8 + $0x18] sm:$0xff] %v6158_v0   ;;  %v5174_v7 = vsel %vm5110_vm13, %v5078_v42, %v5142_v17  ;;  %v6817_v31 = vpop.f32.mrf.mxu1  ;;  %v5147_v16 = vmul.f32 0.1, %v5083_v30  ;;  %vm5115_vm14 = vcmp.gt.f32.partialorder %v5083_v30, 0.0  ;;  %v3418_v0 = vadd.f32 %v9614_v12, %v9507_v27 }
 0x1fe   : > { %v4955_v34 = vpop.f32.mrf.mxu0  ;;  %v6153_v52 = vpack.c.bf16 %v5174_v7, %v5173_v14  ;;  %v5084_v4 = vadd.f32 %v9656_v60, %v5045_v51  ;;  %v5043_v45 = vadd.f32 %v4942_v37, %v4545_v47  ;;  %v4550_v62 = vadd.f32 %v6817_v31, %v9581_v23 }
 0x1ff   : > { %v4457_v38 = vpop.f32.mrf.mxu1  ;;  %vm5113_vm0 = vcmp.gt.f32.partialorder %v5081_v41, 0.0  ;;  %v5145_v39 = vmul.f32 0.1, %v5081_v41  ;;  %v5179_v63 = vsel %vm5115_vm14, %v5083_v30, %v5147_v16  ;;  %v3801_v37 = vadd.f32 %v9593_v15, %v3414_v33 }
 0x200   : > { %v6866_v18 = vpop.f32.mrf.mxu0  ;;  %6221 = vst [vmem:[%s9681_s8 + $0x10] sm:$0xff] %v6153_v52   ;;  %vm5116_vm15 = vcmp.gt.f32.partialorder %v5084_v4, 0.0  ;;  %v5148_v56 = vmul.f32 0.1, %v5084_v4  ;;  %v4548_v46 = vadd.f32 %v4457_v38, %v9588_v9  ;;  %v5082_v48 = vadd.f32 %v9656_v60, %v5043_v45 }
 0x201   : > { %v5048_v40 = vadd.f32 %v6865_v61, %v4550_v62  ;;  %v6818_v44 = vpop.f32.mrf.mxu1  ;;  %v5177_v20 = vsel %vm5113_vm0, %v5081_v41, %v5145_v39 }
 0x202   : > { %v4958_v32 = vpop.f32.mrf.mxu0  ;;  %v5180_v57 = vsel %vm5116_vm15, %v5084_v4, %v5148_v56  ;;  %v5046_v23 = vadd.f32 %v4955_v34, %v4548_v46  ;;  %v4551_v22 = vadd.f32 %v6818_v44, %v3797_v24  ;;  %vm5114_vm1 = vcmp.gt.f32.partialorder %v5082_v48, 0.0 }
 0x203   : > { %v6168_v10 = vpack.c.bf16 %v5180_v57, %v5179_v63  ;;  %v5146_v11 = vmul.f32 0.1, %v5082_v48  ;;  %v5087_v5 = vadd.f32 %v9656_v60, %v5048_v40  ;;  %v4460_v28 = vpop.f32.mrf.mxu1  ;;  %v3803_v56 = vadd.f32 %v9967_v54, %v3416_v49  ;;  %v9968_v40 = vld [vmem:[#allocation3_spill] sm:$0xff]  ;;  %v9969_v63 = vld [vmem:[#allocation13_spill] sm:$0xff] }
 0x204   : > { %v5049_v9 = vadd.f32 %v6866_v18, %v4551_v22  ;;  %v4549_v13 = vadd.f32 %v4460_v28, %v3795_v50  ;;  %v5085_v1 = vadd.f32 %v9656_v60, %v5046_v23  ;;  %v3805_v18 = vadd.f32 %v9607_v6, %v3418_v0  ;;  %v9970_v22 = vld [vmem:[#allocation7_spill] sm:$0xff] }
 0x205   : > { %v6869_v58 = vpop.f32.mrf.mxu0  ;;  %6224 = vst [vmem:[%s9681_s8 + $0x28] sm:$0xff] %v6168_v10   ;;  %v5178_v42 = vsel %vm5114_vm1, %v5082_v48, %v5146_v11  ;;  %v6821_v2 = vpop.f32.mrf.mxu1  ;;  %v5151_v25 = vmul.f32 0.1, %v5087_v5  ;;  %vm5119_vm2 = vcmp.gt.f32.partialorder %v5087_v5, 0.0  ;;  %v3422_v44 = vadd.f32 %v9628_v19, %v9968_v40  ;;  %v9971_v11 = vld [vmem:[#allocation17_spill] sm:$0xff]  ;;  %v9977_v40 = vld [vmem:[#allocation18_spill] sm:$0xff] }
 0x206   : > { %v6163_v29 = vpack.c.bf16 %v5178_v42, %v5177_v20  ;;  %v5088_v36 = vadd.f32 %v9656_v60, %v5049_v9  ;;  %v5047_v15 = vadd.f32 %v4958_v32, %v4549_v13  ;;  %v4554_v17 = vadd.f32 %v6821_v2, %v9595_v21 }
 0x207   : > { %v4971_v26 = vpop.f32.mrf.mxu0  ;;  %v4473_v30 = vpop.f32.mrf.mxu1  ;;  %vm5117_vm4 = vcmp.gt.f32.partialorder %v5085_v1, 0.0  ;;  %v5149_v34 = vmul.f32 0.1, %v5085_v1  ;;  %v5183_v12 = vsel %vm5119_vm2, %v5087_v5, %v5151_v25 }
 0x208   : > { %6223 = vst [vmem:[%s9681_s8 + $0x20] sm:$0xff] %v6163_v29   ;;  %vm5120_vm3 = vcmp.gt.f32.partialorder %v5088_v36, 0.0  ;;  %v5152_v51 = vmul.f32 0.1, %v5088_v36  ;;  %v4552_v53 = vadd.f32 %v4473_v30, %v9602_v59  ;;  %v5086_v24 = vadd.f32 %v9656_v60, %v5047_v15 }
 0x209   : > { %v6870_v61 = vpop.f32.mrf.mxu0  ;;  %v5052_v14 = vadd.f32 %v6869_v58, %v4554_v17  ;;  %v6822_v27 = vpop.f32.mrf.mxu1  ;;  %v5181_v33 = vsel %vm5117_vm4, %v5085_v1, %v5149_v34  ;;  %v3420_v58 = vadd.f32 %v9632_v8, %v9970_v22 }
 0x20a   : > { %v5184_v7 = vsel %vm5120_vm3, %v5088_v36, %v5152_v51  ;;  %v5050_v21 = vadd.f32 %v4971_v26, %v4552_v53  ;;  %v4555_v41 = vadd.f32 %v6822_v27, %v3801_v37  ;;  %vm5118_vm5 = vcmp.gt.f32.partialorder %v5086_v24, 0.0  ;;  %v9972_v51 = vld [vmem:[#allocation20_spill] sm:$0xff] }
 0x20b   : > { %v4974_v47 = vpop.f32.mrf.mxu0  ;;  %v6178_v50 = vpack.c.bf16 %v5184_v7, %v5183_v12  ;;  %v5150_v43 = vmul.f32 0.1, %v5086_v24  ;;  %v5091_v3 = vadd.f32 %v9656_v60, %v5052_v14  ;;  %v4476_v52 = vpop.f32.mrf.mxu1  ;;  %v3809_v53 = vadd.f32 %v9972_v51, %v3422_v44  ;;  %v9973_v7 = vld [vmem:[#allocation2_spill] sm:$0xff]  ;;  %v9978_v44 = vld [vmem:[#allocation12_spill] sm:$0xff] }
 0x20c   : > { %v5053_v59 = vadd.f32 %v6870_v61, %v4555_v41  ;;  %v4553_v16 = vadd.f32 %v4476_v52, %v3799_v35  ;;  %v5089_v62 = vadd.f32 %v9656_v60, %v5050_v21  ;;  %v3807_v27 = vadd.f32 %v9626_v55, %v3420_v58  ;;  %v9976_v52 = vld [vmem:[#allocation5_spill] sm:$0xff] }
 0x20d   : > { %v6873_v31 = vpop.f32.mrf.mxu0  ;;  %6226 = vst [vmem:[%s9681_s8 + $0x38] sm:$0xff] %v6178_v50   ;;  %v5182_v45 = vsel %vm5118_vm5, %v5086_v24, %v5150_v43  ;;  %v6825_v38 = vpop.f32.mrf.mxu1  ;;  %v5155_v32 = vmul.f32 0.1, %v5091_v3  ;;  %vm5123_vm6 = vcmp.gt.f32.partialorder %v5091_v3, 0.0  ;;  %v9975_v50 = vld [vmem:[#allocation10_spill] sm:$0xff] }
 0x20e   : > { %v6173_v46 = vpack.c.bf16 %v5182_v45, %v5181_v33  ;;  %v5092_v39 = vadd.f32 %v9656_v60, %v5053_v59  ;;  %v5051_v6 = vadd.f32 %v4974_v47, %v4553_v16  ;;  %v4558_v57 = vadd.f32 %v6825_v38, %v9969_v63 }
 0x20f   : > { %v4987_v4 = vpop.f32.mrf.mxu0  ;;  %v4489_v23 = vpop.f32.mrf.mxu1  ;;  %vm5121_vm8 = vcmp.gt.f32.partialorder %v5089_v62, 0.0  ;;  %v5153_v9 = vmul.f32 0.1, %v5089_v62  ;;  %v5187_v37 = vsel %vm5123_vm6, %v5091_v3, %v5155_v32 }
 0x210   : > { %6225 = vst [vmem:[%s9681_s8 + $0x30] sm:$0xff] %v6173_v46   ;;  %vm5124_vm7 = vcmp.gt.f32.partialorder %v5092_v39, 0.0  ;;  %v5156_v10 = vmul.f32 0.1, %v5092_v39  ;;  %v4556_v5 = vadd.f32 %v4489_v23, %v9971_v11  ;;  %v5090_v13 = vadd.f32 %v9656_v60, %v5051_v6 }
 0x211   : > { %v6874_v48 = vpop.f32.mrf.mxu0  ;;  %v5056_v26 = vadd.f32 %v6873_v31, %v4558_v57  ;;  %v6826_v19 = vpop.f32.mrf.mxu1  ;;  %v5185_v15 = vsel %vm5121_vm8, %v5089_v62, %v5153_v9  ;;  %v9974_v31 = vld [vmem:[#allocation9_spill] sm:$0xff]  ;;  %v3424_v6 = vadd.f32 %v9978_v44, %v9977_v40 }
 0x212   : > { %v5188_v20 = vsel %vm5124_vm7, %v5092_v39, %v5156_v10  ;;  %v5054_v42 = vadd.f32 %v4987_v4, %v4556_v5  ;;  %v4559_v1 = vadd.f32 %v6826_v19, %v3805_v18  ;;  %vm5122_vm9 = vcmp.gt.f32.partialorder %v5090_v13, 0.0 }
 0x213   : > { %v4990_v28 = vpop.f32.mrf.mxu0  ;;  %v6188_v35 = vpack.c.bf16 %v5188_v20, %v5187_v37  ;;  %v5154_v8 = vmul.f32 0.1, %v5090_v13  ;;  %v5095_v29 = vadd.f32 %v9656_v60, %v5056_v26  ;;  %v4492_v25 = vpop.f32.mrf.mxu1  ;;  %v3426_v43 = vadd.f32 %v9975_v50, %v9974_v31  ;;  %v9980_v37 = vld [vmem:[#allocation6_spill] sm:$0xff] }
 0x214   : > { %v5057_v36 = vadd.f32 %v6874_v48, %v4559_v1  ;;  %v4557_v61 = vadd.f32 %v4492_v25, %v3803_v56  ;;  %v5093_v30 = vadd.f32 %v9656_v60, %v5054_v42  ;;  %v9981_v1 = vld [vmem:[#allocation8_spill] sm:$0xff] }
 0x215   : > { %v6877_v2 = vpop.f32.mrf.mxu0  ;;  %6228 = vst [vmem:[%s9681_s8 + $0x48] sm:$0xff] %v6188_v35   ;;  %v5186_v17 = vsel %vm5122_vm9, %v5090_v13, %v5154_v8  ;;  %v6829_v49 = vpop.f32.mrf.mxu1  ;;  %v5159_v34 = vmul.f32 0.1, %v5095_v29  ;;  %vm5127_vm10 = vcmp.gt.f32.partialorder %v5095_v29, 0.0  ;;  %v9979_v13 = vld [vmem:[#allocation4_spill] sm:$0xff]  ;;  %v9982_v8 = vld [vmem:[#allocation11_spill] sm:$0xff] }
 0x216   : > { %v6183_v47 = vpack.c.bf16 %v5186_v17, %v5185_v15  ;;  %v5096_v24 = vadd.f32 %v9656_v60, %v5057_v36  ;;  %v5055_v12 = vadd.f32 %v4990_v28, %v4557_v61  ;;  %v4562_v21 = vadd.f32 %v6829_v49, %v9973_v7 }
 0x217   : > { %v5003_v0 = vpop.f32.mrf.mxu0  ;;  %v4505_v41 = vpop.f32.mrf.mxu1  ;;  %vm5125_vm12 = vcmp.gt.f32.partialorder %v5093_v30, 0.0  ;;  %v5157_v4 = vmul.f32 0.1, %v5093_v30  ;;  %v5191_v45 = vsel %vm5127_vm10, %v5095_v29, %v5159_v34  ;;  %v3813_v26 = vadd.f32 %v9979_v13, %v3426_v43 }
 0x218   : > { %6227 = vst [vmem:[%s9681_s8 + $0x40] sm:$0xff] %v6183_v47   ;;  %vm5128_vm11 = vcmp.gt.f32.partialorder %v5096_v24, 0.0  ;;  %v5160_v3 = vmul.f32 0.1, %v5096_v24  ;;  %v4560_v59 = vadd.f32 %v4505_v41, %v9976_v52  ;;  %v5094_v18 = vadd.f32 %v9656_v60, %v5055_v12 }
 0x219   : > { %v6878_v14 = vpop.f32.mrf.mxu0  ;;  %v5060_v33 = vadd.f32 %v6877_v2, %v4562_v21  ;;  %v6830_v55 = vpop.f32.mrf.mxu1  ;;  %v5189_v23 = vsel %vm5125_vm12, %v5093_v30, %v5157_v4  ;;  %v3811_v2 = vadd.f32 %v9981_v1, %v3424_v6 }
 0x21a   : > { %v5192_v62 = vsel %vm5128_vm11, %v5096_v24, %v5160_v3  ;;  %v5058_v38 = vadd.f32 %v5003_v0, %v4560_v59  ;;  %v4563_v54 = vadd.f32 %v6830_v55, %v3809_v53  ;;  %vm5126_vm13 = vcmp.gt.f32.partialorder %v5094_v18, 0.0 }
 0x21b   : > { %v5006_v16 = vpop.f32.mrf.mxu0  ;;  %v6198_v46 = vpack.c.bf16 %v5192_v62, %v5191_v45  ;;  %v5158_v32 = vmul.f32 0.1, %v5094_v18  ;;  %v5099_v39 = vadd.f32 %v9656_v60, %v5060_v33  ;;  %v4508_v48 = vpop.f32.mrf.mxu1 }
 0x21c   : > { %v5061_v63 = vadd.f32 %v6878_v14, %v4563_v54  ;;  %v4561_v57 = vadd.f32 %v4508_v48, %v3807_v27  ;;  %v5097_v58 = vadd.f32 %v9656_v60, %v5058_v38 }
 0x21d   : > { %v6881_v56 = vpop.f32.mrf.mxu0  ;;  %6230 = vst [vmem:[%s9681_s8 + $0x58] sm:$0xff] %v6198_v46   ;;  %v5190_v22 = vsel %vm5126_vm13, %v5094_v18, %v5158_v32  ;;  %v6833_v10 = vpop.f32.mrf.mxu1  ;;  %v5163_v5 = vmul.f32 0.1, %v5099_v39  ;;  %vm5131_vm14 = vcmp.gt.f32.partialorder %v5099_v39, 0.0 }
 0x21e   : > { %v6193_v11 = vpack.c.bf16 %v5190_v22, %v5189_v23  ;;  %v5100_v28 = vadd.f32 %v9656_v60, %v5061_v63  ;;  %v5059_v19 = vadd.f32 %v5006_v16, %v4561_v57  ;;  %v4566_v20 = vadd.f32 %v6833_v10, %v9980_v37 }
 0x21f   : > { %v5019_v9 = vpop.f32.mrf.mxu0  ;;  %v4521_v42 = vpop.f32.mrf.mxu1  ;;  %vm5129_vm0 = vcmp.gt.f32.partialorder %v5097_v58, 0.0  ;;  %v5161_v25 = vmul.f32 0.1, %v5097_v58  ;;  %v5195_v15 = vsel %vm5131_vm14, %v5099_v39, %v5163_v5 }
 0x220   : > { %6229 = vst [vmem:[%s9681_s8 + $0x50] sm:$0xff] %v6193_v11   ;;  %vm5132_vm15 = vcmp.gt.f32.partialorder %v5100_v28, 0.0  ;;  %v5164_v35 = vmul.f32 0.1, %v5100_v28  ;;  %v4564_v29 = vadd.f32 %v4521_v42, %v9982_v8  ;;  %v5098_v36 = vadd.f32 %v9656_v60, %v5059_v19 }
 0x221   : > { %v5064_v61 = vadd.f32 %v6881_v56, %v4566_v20  ;;  %v6834_v0 = vpop.f32.mrf.mxu1  ;;  %v6882_v51 = vpop.f32.mrf.mxu0  ;;  %v5193_v12 = vsel %vm5129_vm0, %v5097_v58, %v5161_v25 }
 0x222   : > { %v5196_v17 = vsel %vm5132_vm15, %v5100_v28, %v5164_v35  ;;  %v5062_v30 = vadd.f32 %v5019_v9, %v4564_v29  ;;  %v4567_v49 = vadd.f32 %v6834_v0, %v3813_v26  ;;  %vm5130_vm1 = vcmp.gt.f32.partialorder %v5098_v36, 0.0 }
 0x223   : > { %v6208_v53 = vpack.c.bf16 %v5196_v17, %v5195_v15  ;;  %v5162_v47 = vmul.f32 0.1, %v5098_v36  ;;  %v5103_v34 = vadd.f32 %v9656_v60, %v5064_v61  ;;  %v4524_v24 = vpop.f32.mrf.mxu1  ;;  %v5022_v43 = vpop.f32.mrf.mxu0 }
 0x224   : > { %v5065_v14 = vadd.f32 %v6882_v51, %v4567_v49  ;;  %v4565_v27 = vadd.f32 %v4524_v24, %v3811_v2  ;;  %v5101_v21 = vadd.f32 %v9656_v60, %v5062_v30 }
 0x225   : > { %6232 = vst [vmem:[%s9681_s8 + $0x68] sm:$0xff] %v6208_v53   ;;  %v5194_v7 = vsel %vm5130_vm1, %v5098_v36, %v5162_v47  ;;  %v5167_v31 = vmul.f32 0.1, %v5103_v34  ;;  %vm5135_vm2 = vcmp.gt.f32.partialorder %v5103_v34, 0.0 }
 0x226   : > { %v6203_v41 = vpack.c.bf16 %v5194_v7, %v5193_v12  ;;  %v5104_v50 = vadd.f32 %v9656_v60, %v5065_v14  ;;  %v5063_v3 = vadd.f32 %v5022_v43, %v4565_v27  ;;  %v5165_v59 = vmul.f32 0.1, %v5101_v21 }
 0x227   : > { %v5199_v4 = vsel %vm5135_vm2, %v5103_v34, %v5167_v31  ;;  %vm5133_vm4 = vcmp.gt.f32.partialorder %v5101_v21, 0.0 }
 0x228   : > { %6231 = vst [vmem:[%s9681_s8 + $0x60] sm:$0xff] %v6203_v41   ;;  %vm5136_vm3 = vcmp.gt.f32.partialorder %v5104_v50, 0.0  ;;  %v5168_v52 = vmul.f32 0.1, %v5104_v50  ;;  %v5102_v16 = vadd.f32 %v9656_v60, %v5063_v3  ;;  %v5197_v45 = vsel %vm5133_vm4, %v5101_v21, %v5165_v59 }
 0x22a   : > { %v5200_v18 = vsel %vm5136_vm3, %v5104_v50, %v5168_v52  ;;  %vm5134_vm5 = vcmp.gt.f32.partialorder %v5102_v16, 0.0  ;;  %v5166_v55 = vmul.f32 0.1, %v5102_v16 }
 0x22b   : > { %v6218_v33 = vpack.c.bf16 %v5200_v18, %v5199_v4 }
 0x22c   : > { %v5198_v62 = vsel %vm5134_vm5, %v5102_v16, %v5166_v55 }
 0x22d   : > { %6234 = vst [vmem:[%s9681_s8 + $0x78] sm:$0xff] %v6218_v33   ;;  %v6213_v38 = vpack.c.bf16 %v5198_v62, %v5197_v45 }
 0x22f   : > { %6233 = vst [vmem:[%s9681_s8 + $0x70] sm:$0xff] %v6213_v38  }
 0x230 PF: > { %s13_s14 = sadd.s32 1, %s7075_s14   ;;  %s9983_s12 = smov %s7071_s13 }
 0x231   : > { %p10_p5 = scmp.ge.s32.totalorder %s13_s14, 4   ;;  %s9984_s13 = smov %s9986_s15 }
 0x233   :  { %12 = sbr.rel (!%p10_p5) target bundleno = 2 (0x2), region = 78 }

// kernel: _forward.10
= control target key start
LH: loop header
LB: loop body
LE: loop exit
PB: predicated region body
PF: predicated region fallthrough
CT: control target
= control target key end

     0   :  { %s1640_s1 = inlined_call_operand.vmem [shape: bf16[1152,128], index: 1, kind: input, shape index: {}]   ;;  %s1641_s0 = inlined_call_operand.vmem [shape: bf16[32,1152], index: 0, kind: input, shape index: {}]   ;;  %s1642_s2 = inlined_call_operand.vmem [shape: f32[1,128], index: 2, kind: input, shape index: {}]   ;;  %s1643_s3 = inlined_call_operand.vmem [shape: bf16[32,128], index: 3, kind: output, shape index: {}]  }
   0x1   :  { %v1243_v0 = vld [vmem:[%s1640_s1 + $0x78] sm:$0xff]   ;;  %v1247_v4 = vld [vmem:[%s1640_s1 + $0x70] sm:$0xff]   ;;  %v1251_v8 = vld [vmem:[%s1640_s1 + $0x68] sm:$0xff]  }
   0x2   :  { %v1244_v1 = vld [vmem:[%s1640_s1 + $0x38] sm:$0xff]   ;;  %1101 = vmatprep.subr.bf16.mxu0 %v1243_v0  ;;  %v1248_v5 = vld [vmem:[%s1640_s1 + $0x30] sm:$0xff]   ;;  %v1252_v9 = vld [vmem:[%s1640_s1 + $0x28] sm:$0xff]  }
   0x3   :  { %v1245_v2 = vld [vmem:[%s1640_s1 + $0xf8] sm:$0xff]   ;;  %1102 = vmatpush3.bf16.msra.mxu0 %v1244_v1  ;;  %v1249_v6 = vld [vmem:[%s1640_s1 + $0xf0] sm:$0xff]   ;;  %v1253_v10 = vld [vmem:[%s1640_s1 + $0xe8] sm:$0xff]  }
   0x4   :  { %v1246_v3 = vld [vmem:[%s1640_s1 + $0xb8] sm:$0xff]   ;;  %1129 = vmatprep.subr.bf16.mxu1 %v1245_v2  ;;  %1103 = vmatprep.subr.bf16.mxu0 %v1247_v4  ;;  %v1250_v7 = vld [vmem:[%s1640_s1 + $0xb0] sm:$0xff]   ;;  %v1254_v11 = vld [vmem:[%s1640_s1 + $0xa8] sm:$0xff]  }
   0x5   :  { %1130 = vmatpush3.bf16.msra.mxu1 %v1246_v3  ;;  %v1255_v12 = vld [vmem:[%s1640_s1 + $0x60] sm:$0xff]   ;;  %v1259_v16 = vld [vmem:[%s1640_s1 + $0x58] sm:$0xff]   ;;  %v1263_v20 = vld [vmem:[%s1640_s1 + $0x50] sm:$0xff]  }
   0x6   :  { %1131 = vmatprep.subr.bf16.mxu1 %v1249_v6  ;;  %v1256_v13 = vld [vmem:[%s1640_s1 + $0x20] sm:$0xff]   ;;  %v1260_v17 = vld [vmem:[%s1640_s1 + $0x18] sm:$0xff]   ;;  %v1264_v21 = vld [vmem:[%s1640_s1 + $0x10] sm:$0xff]  }
   0x7   :  { %1104 = vmatpush3.bf16.msra.mxu0 %v1248_v5  ;;  %v1257_v14 = vld [vmem:[%s1640_s1 + $0xe0] sm:$0xff]   ;;  %v1261_v18 = vld [vmem:[%s1640_s1 + $0xd8] sm:$0xff]   ;;  %v1265_v22 = vld [vmem:[%s1640_s1 + $0xd0] sm:$0xff]  }
   0x8   :  { %1105 = vmatprep.subr.bf16.mxu0 %v1251_v8  ;;  %v1258_v15 = vld [vmem:[%s1640_s1 + $0xa0] sm:$0xff]   ;;  %v1262_v19 = vld [vmem:[%s1640_s1 + $0x98] sm:$0xff]   ;;  %v1266_v23 = vld [vmem:[%s1640_s1 + $0x90] sm:$0xff]  }
   0x9   :  { %1132 = vmatpush3.bf16.msra.mxu1 %v1250_v7  ;;  %v1267_v24 = vld [vmem:[%s1640_s1 + $0x48] sm:$0xff]   ;;  %v1271_v28 = vld [vmem:[%s1640_s1 + $0x40] sm:$0xff]   ;;  %v1278_v34 = vld [vmem:[%s1640_s1 + $0x178] sm:$0xff]  }
   0xa   :  { %1133 = vmatprep.subr.bf16.mxu1 %v1253_v10  ;;  %v1268_v25 = vld [vmem:[%s1640_s1 + $0x8] sm:$0xff]   ;;  %v1272_v29 = vld [vmem:[%s1640_s1] sm:$0xff]   ;;  %v1282_v37 = vld [vmem:[%s1640_s1 + $0x138] sm:$0xff]  }
   0xb   :  { %1106 = vmatpush3.bf16.msra.mxu0 %v1252_v9  ;;  %v1269_v26 = vld [vmem:[%s1640_s1 + $0xc8] sm:$0xff]   ;;  %v1273_v30 = vld [vmem:[%s1640_s1 + $0xc0] sm:$0xff]   ;;  %v1283_v38 = vld [vmem:[%s1640_s1 + $0x1f8] sm:$0xff]  }
   0xc   :  { %1107 = vmatprep.subr.bf16.mxu0 %v1255_v12  ;;  %v1270_v27 = vld [vmem:[%s1640_s1 + $0x88] sm:$0xff]   ;;  %v1274_v31 = vld [vmem:[%s1641_s0] ss:$36 sps:$4 sm:$0xff]   ;;  %v1284_v39 = vld [vmem:[%s1640_s1 + $0x1b8] sm:$0xff]  }
   0xd   :  { %1134 = vmatpush3.bf16.msra.mxu1 %v1254_v11  ;;  %v1276_v32 = vld [vmem:[%s1641_s0 + $0x4] ss:$36 sps:$4 sm:$0xff]   ;;  %v1281_v36 = vld [vmem:[%s1641_s0 + $0xc] ss:$36 sps:$4 sm:$0xff]   ;;  %v1297_v52 = vld [vmem:[%s1640_s1 + $0x158] sm:$0xff]  }
   0xe   :  { %1135 = vmatprep.subr.bf16.mxu1 %v1257_v14  ;;  %v1277_v33 = vld [vmem:[%s1640_s1 + $0x80] sm:$0xff]   ;;  %742 = vmatprep.mubr.bf16.mxu0 %v1276_v32  ;;  %v1279_v35 = vld [vmem:[%s1641_s0 + $0x8] ss:$36 sps:$4 sm:$0xff]   ;;  %v1285_v40 = vld [vmem:[%s1640_s1 + $0x170] sm:$0xff]  }
   0xf   :  { %1108 = vmatpush3.bf16.msra.mxu0 %v1256_v13  ;;  %791 = vmatprep.mubr.bf16.mxu1 %v1281_v36  ;;  %v1286_v41 = vld [vmem:[%s1640_s1 + $0x130] sm:$0xff]   ;;  %v1289_v44 = vld [vmem:[%s1640_s1 + $0x168] sm:$0xff]   ;;  %v1293_v48 = vld [vmem:[%s1640_s1 + $0x160] sm:$0xff]  }
  0x10   :  { %1109 = vmatprep.subr.bf16.mxu0 %v1259_v16  ;;  %v1287_v42 = vld [vmem:[%s1640_s1 + $0x1f0] sm:$0xff]   ;;  %v1290_v45 = vld [vmem:[%s1640_s1 + $0x128] sm:$0xff]   ;;  %v1294_v49 = vld [vmem:[%s1640_s1 + $0x120] sm:$0xff]  }
  0x11   :  { %1136 = vmatpush3.bf16.msra.mxu1 %v1258_v15  ;;  %v1288_v43 = vld [vmem:[%s1640_s1 + $0x1b0] sm:$0xff]   ;;  %v1291_v46 = vld [vmem:[%s1640_s1 + $0x1e8] sm:$0xff]   ;;  %v1295_v50 = vld [vmem:[%s1640_s1 + $0x1e0] sm:$0xff]  }
  0x12   :  { %1137 = vmatprep.subr.bf16.mxu1 %v1261_v18  ;;  %v1292_v47 = vld [vmem:[%s1640_s1 + $0x1a8] sm:$0xff]   ;;  %v1296_v51 = vld [vmem:[%s1640_s1 + $0x1a0] sm:$0xff]   ;;  %v1298_v53 = vld [vmem:[%s1640_s1 + $0x118] sm:$0xff]  }
  0x13   :  { %1110 = vmatpush3.bf16.msra.mxu0 %v1260_v17  ;;  %v1299_v54 = vld [vmem:[%s1641_s0 + $0x4c] ss:$36 sps:$4 sm:$0xff]   ;;  %v1301_v55 = vld [vmem:[%s1640_s1 + $0x1d8] sm:$0xff]   ;;  %v1315_v4 = vld [vmem:[%s1640_s1 + $0x140] sm:$0xff]  }
  0x14   :  { %1111 = vmatprep.subr.bf16.mxu0 %v1263_v20  ;;  %v1302_v56 = vld [vmem:[%s1641_s0 + $0x48] ss:$36 sps:$4 sm:$0xff]   ;;  %v1303_v57 = vld [vmem:[%s1640_s1 + $0x198] sm:$0xff]   ;;  %v1306_v59 = vld [vmem:[%s1640_s1 + $0x150] sm:$0xff]  }
  0x15   :  { %1138 = vmatpush3.bf16.msra.mxu1 %v1262_v19  ;;  %v1304_v58 = vld [vmem:[%s1641_s0 + $0x54] ss:$36 sps:$4 sm:$0xff]   ;;  %v1311_v0 = vld [vmem:[%s1640_s1 + $0x148] sm:$0xff]   ;;  %v1316_v5 = vld [vmem:[%s1640_s1 + $0x100] sm:$0xff]  }
  0x16   :  { %1139 = vmatprep.subr.bf16.mxu1 %v1265_v22  ;;  %v1307_v60 = vld [vmem:[%s1641_s0 + $0x50] ss:$36 sps:$4 sm:$0xff]   ;;  %v1312_v1 = vld [vmem:[%s1640_s1 + $0x108] sm:$0xff]   ;;  %v1317_v6 = vld [vmem:[%s1640_s1 + $0x1c0] sm:$0xff]  }
  0x17   :  { %1112 = vmatpush3.bf16.msra.mxu0 %v1264_v21  ;;  %v1308_v61 = vld [vmem:[%s1640_s1 + $0x110] sm:$0xff]   ;;  %v1313_v2 = vld [vmem:[%s1640_s1 + $0x1c8] sm:$0xff]   ;;  %v1321_v9 = vld [vmem:[%s1640_s1 + $0x180] sm:$0xff]  }
  0x18   :  { %1113 = vmatprep.subr.bf16.mxu0 %v1267_v24  ;;  %v1309_v62 = vld [vmem:[%s1640_s1 + $0x1d0] sm:$0xff]   ;;  %v1314_v3 = vld [vmem:[%s1640_s1 + $0x188] sm:$0xff]   ;;  %v1322_v10 = vld [vmem:[%s1640_s1 + $0x238] sm:$0xff]  }
  0x19   :  { %1140 = vmatpush3.bf16.msra.mxu1 %v1266_v23  ;;  %v1310_v63 = vld [vmem:[%s1640_s1 + $0x190] sm:$0xff]   ;;  %v1323_v11 = vld [vmem:[%s1641_s0 + $0x18] ss:$36 sps:$4 sm:$0xff]   ;;  %v1330_v16 = vld [vmem:[%s1640_s1 + $0x228] sm:$0xff]  }
  0x1a   :  { %1141 = vmatprep.subr.bf16.mxu1 %v1269_v26  ;;  %v1318_v7 = vld [vmem:[%s1641_s0 + $0x10] ss:$36 sps:$4 sm:$0xff]   ;;  %v1325_v12 = vld [vmem:[%s1641_s0 + $0x1c] ss:$36 sps:$4 sm:$0xff]   ;;  %v1331_v17 = vld [vmem:[%s1641_s0 + $0x64] ss:$36 sps:$4 sm:$0xff]  }
  0x1b   :  { %1114 = vmatpush3.bf16.msra.mxu0 %v1268_v25  ;;  %v1320_v8 = vld [vmem:[%s1641_s0 + $0x14] ss:$36 sps:$4 sm:$0xff]   ;;  %v1327_v14 = vld [vmem:[%s1641_s0 + $0x5c] ss:$36 sps:$4 sm:$0xff]   ;;  %v1337_v23 = vld [vmem:[%s1640_s1 + $0x208] sm:$0xff]  }
  0x1c   :  { %1115 = vmatprep.subr.bf16.mxu0 %v1271_v28  ;;  %v1326_v13 = vld [vmem:[%s1640_s1 + $0x230] sm:$0xff]   ;;  %v1329_v15 = vld [vmem:[%s1641_s0 + $0x58] ss:$36 sps:$4 sm:$0xff]   ;;  %v1333_v18 = vld [vmem:[%s1641_s0 + $0x60] ss:$36 sps:$4 sm:$0xff]  }
  0x1d   :  { %1142 = vmatpush3.bf16.msra.mxu1 %v1270_v27  ;;  %v1334_v19 = vld [vmem:[%s1640_s1 + $0x220] sm:$0xff]   ;;  %v1335_v20 = vld [vmem:[%s1640_s1 + $0x218] sm:$0xff]   ;;  %v1336_v22 = vld [vmem:[%s1640_s1 + $0x210] sm:$0xff]  }
  0x1e   :  { %1143 = vmatprep.subr.bf16.mxu1 %v1273_v30  ;;  %v1339_v21 = vld [vmem:[%s1641_s0 + $0x20] ss:$36 sps:$4 sm:$0xff]   ;;  %v1340_v25 = vld [vmem:[%s1641_s0 + $0x68] ss:$36 sps:$4 sm:$0xff]  }
  0x1f   :  { %1116 = vmatpush3.bf16.msra.mxu0 %v1272_v29  ;;  %v1338_v24 = vld [vmem:[%s1640_s1 + $0x200] sm:$0xff]  }
  0x20   :  { %1157 = vmatprep.subr.bf16.mxu0 %v1278_v34 }
  0x21   :  { %1144 = vmatpush3.bf16.msra.mxu1 %v1277_v33 }
  0x22   :  { %743 = vmatmul.mubr.bf16.vlgmr.msra.gmra.mxu0 %v1274_v31  ;;  %1185 = vmatprep.subr.bf16.mxu1 %v1283_v38 }
  0x23   :  { %1158 = vmatpush3.bf16.msra.mxu0 %v1282_v37  ;;  %750 = vmatprep.mubr.bf16.mxu0 %v1299_v54 }
  0x24   :  { %792 = vmatmul.mubr.bf16.vlgmr.msra.gmra.mxu1 %v1279_v35  ;;  %1159 = vmatprep.subr.bf16.mxu0 %v1285_v40 }
  0x25   :  { %1186 = vmatpush3.bf16.msra.mxu1 %v1284_v39  ;;  %799 = vmatprep.mubr.bf16.mxu1 %v1304_v58 }
  0x26   :  { %1187 = vmatprep.subr.bf16.mxu1 %v1287_v42 }
  0x27   :  { %1160 = vmatpush3.bf16.msra.mxu0 %v1286_v41 }
  0x28   :  { %1161 = vmatprep.subr.bf16.mxu0 %v1289_v44 }
  0x29   :  { %1188 = vmatpush3.bf16.msra.mxu1 %v1288_v43 }
  0x2a   :  { %1189 = vmatprep.subr.bf16.mxu1 %v1291_v46  ;;  %751 = vmatmul.mubr.bf16.gmra.mxu0 %v1302_v56 }
  0x2b   :  { %1162 = vmatpush3.bf16.msra.mxu0 %v1290_v45  ;;  %840 = vmatprep.mubr.bf16.mxu0 %v1320_v8 }
  0x2c   :  { %1163 = vmatprep.subr.bf16.mxu0 %v1293_v48  ;;  %800 = vmatmul.mubr.bf16.gmra.mxu1 %v1307_v60 }
  0x2d   :  { %1190 = vmatpush3.bf16.msra.mxu1 %v1292_v47  ;;  %889 = vmatprep.mubr.bf16.mxu1 %v1325_v12 }
  0x2e   :  { %1191 = vmatprep.subr.bf16.mxu1 %v1295_v50 }
  0x2f   :  { %1164 = vmatpush3.bf16.msra.mxu0 %v1294_v49 }
  0x30   :  { %1165 = vmatprep.subr.bf16.mxu0 %v1297_v52 }
  0x31   :  { %1192 = vmatpush3.bf16.msra.mxu1 %v1296_v51 }
  0x32   :  { %1193 = vmatprep.subr.bf16.mxu1 %v1301_v55  ;;  %v991_v55 = vld [vmem:[%s1642_s2] ss:$0 sm:$0xff] }
  0x33   :  { %1166 = vmatpush3.bf16.msra.mxu0 %v1298_v53 }
  0x34   :  { %1167 = vmatprep.subr.bf16.mxu0 %v1306_v59 }
  0x35   :  { %1194 = vmatpush3.bf16.msra.mxu1 %v1303_v57 }
  0x36   :  { %1195 = vmatprep.subr.bf16.mxu1 %v1309_v62 }
  0x37   :  { %1168 = vmatpush3.bf16.msra.mxu0 %v1308_v61 }
  0x38   :  { %1169 = vmatprep.subr.bf16.mxu0 %v1311_v0 }
  0x39   :  { %1196 = vmatpush3.bf16.msra.mxu1 %v1310_v63 }
  0x3a   :  { %1197 = vmatprep.subr.bf16.mxu1 %v1313_v2 }
  0x3b   :  { %1170 = vmatpush3.bf16.msra.mxu0 %v1312_v1 }
  0x3c   :  { %1171 = vmatprep.subr.bf16.mxu0 %v1315_v4 }
  0x3d   :  { %1198 = vmatpush3.bf16.msra.mxu1 %v1314_v3 }
  0x3e   :  { %1199 = vmatprep.subr.bf16.mxu1 %v1317_v6 }
  0x3f   :  { %1172 = vmatpush3.bf16.msra.mxu0 %v1316_v5 }
  0x40   :  { %1223 = vmatprep.subr.bf16.mxu0 %v1322_v10 }
  0x41   :  { %1200 = vmatpush3.bf16.msra.mxu1 %v1321_v9 }
  0x42   :  { %841 = vmatmul.mubr.bf16.vlgmr.msra.gmra.mxu0 %v1318_v7 }
  0x43   :  { %1224 = vmatpush3.bf16.msra.mxu0 %v1322_v10  ;;  %848 = vmatprep.mubr.bf16.mxu0 %v1327_v14 }
  0x44   :  { %890 = vmatmul.mubr.bf16.vlgmr.msra.gmra.mxu1 %v1323_v11  ;;  %1225 = vmatprep.subr.bf16.mxu0 %v1326_v13 }
  0x45   :  { %897 = vmatprep.mubr.bf16.mxu1 %v1331_v17 }
  0x47   :  { %1226 = vmatpush3.bf16.msra.mxu0 %v1326_v13 }
  0x48   :  { %1227 = vmatprep.subr.bf16.mxu0 %v1330_v16 }
  0x4a   :  { %849 = vmatmul.mubr.bf16.gmra.mxu0 %v1329_v15 }
  0x4b   :  { %1228 = vmatpush3.bf16.msra.mxu0 %v1330_v16  ;;  %1239 = vmatprep.mubr.bf16.mxu0 %v1339_v21 }
  0x4c   :  { %898 = vmatmul.mubr.bf16.gmra.mxu1 %v1333_v18  ;;  %1229 = vmatprep.subr.bf16.mxu0 %v1334_v19 }
  0x4f   :  { %1230 = vmatpush3.bf16.msra.mxu0 %v1334_v19 }
  0x50   :  { %1231 = vmatprep.subr.bf16.mxu0 %v1335_v20 }
  0x53   :  { %1232 = vmatpush3.bf16.msra.mxu0 %v1335_v20 }
  0x54   :  { %1233 = vmatprep.subr.bf16.mxu0 %v1336_v22 }
  0x57   :  { %1234 = vmatpush3.bf16.msra.mxu0 %v1336_v22 }
  0x58   :  { %1235 = vmatprep.subr.bf16.mxu0 %v1337_v23 }
  0x5b   :  { %1236 = vmatpush3.bf16.msra.mxu0 %v1337_v23 }
  0x5c   :  { %1237 = vmatprep.subr.bf16.mxu0 %v1338_v24 }
  0x5f   :  { %1238 = vmatpush3.bf16.msra.mxu0 %v1338_v24 }
  0x62   :  { %1240 = vmatmul.mubr.bf16.vlgmr.msra.gmra.mxu0 %v1340_v25 }
  0xe2   :  { %v1117_v26 = vpop.f32.mrf.mxu0 }
  0xe4   :  { %v1145_v27 = vpop.f32.mrf.mxu1  ;;  %v1118_v28 = vpop.f32.mrf.mxu0 }
  0xe5   :  { %v1119_v54 = vadd.f32 %v1118_v28, %v1117_v26 }
  0xe6   :  { %v1146_v29 = vpop.f32.mrf.mxu1  ;;  %v1120_v30 = vpop.f32.mrf.mxu0 }
  0xe7   :  { %v745_v61 = vadd.f32 %v1119_v54, %v991_v55  ;;  %v1147_v62 = vadd.f32 %v1146_v29, %v1145_v27 }
  0xe8   :  { %v1148_v31 = vpop.f32.mrf.mxu1  ;;  %v1121_v32 = vpop.f32.mrf.mxu0 }
  0xe9   :  { %v1122_v63 = vadd.f32 %v1121_v32, %v1120_v30  ;;  %v794_v7 = vadd.f32 %v1147_v62, %v745_v61 }
  0xea   :  { %v1123_v33 = vpop.f32.mrf.mxu0  ;;  %v1149_v34 = vpop.f32.mrf.mxu1 }
  0xeb   :  { %v748_v8 = vadd.f32 %v1122_v63, %v991_v55  ;;  %v1150_v9 = vadd.f32 %v1149_v34, %v1148_v31 }
  0xec   :  { %v1151_v35 = vpop.f32.mrf.mxu1  ;;  %v1124_v36 = vpop.f32.mrf.mxu0 }
  0xed   :  { %v1125_v53 = vadd.f32 %v1124_v36, %v1123_v33  ;;  %v797_v18 = vadd.f32 %v1150_v9, %v748_v8 }
  0xee   :  { %v1152_v37 = vpop.f32.mrf.mxu1  ;;  %v1126_v38 = vpop.f32.mrf.mxu0 }
  0xef   :  { %v753_v58 = vadd.f32 %v1125_v53, %v991_v55  ;;  %v1153_v59 = vadd.f32 %v1152_v37, %v1151_v35 }
  0xf0   :  { %v1154_v39 = vpop.f32.mrf.mxu1  ;;  %v1127_v40 = vpop.f32.mrf.mxu0 }
  0xf1   :  { %v1128_v60 = vadd.f32 %v1127_v40, %v1126_v38  ;;  %v802_v3 = vadd.f32 %v1153_v59, %v753_v58 }
  0xf2   :  { %v1155_v42 = vpop.f32.mrf.mxu1 }
  0xf3   :  { %v756_v4 = vadd.f32 %v1128_v60, %v991_v55  ;;  %v1156_v5 = vadd.f32 %v1155_v42, %v1154_v39 }
  0xf5   :  { %v805_v14 = vadd.f32 %v1156_v5, %v756_v4 }
 0x102   :  { %v1173_v41 = vpop.f32.mrf.mxu0 }
 0x104   :  { %v1174_v43 = vpop.f32.mrf.mxu0  ;;  %v1201_v44 = vpop.f32.mrf.mxu1 }
 0x105   :  { %v1175_v6 = vadd.f32 %v1174_v43, %v1173_v41 }
 0x106   :  { %v1176_v45 = vpop.f32.mrf.mxu0  ;;  %v1202_v46 = vpop.f32.mrf.mxu1 }
 0x107   :  { %v843_v15 = vadd.f32 %v1175_v6, %v794_v7  ;;  %v1203_v16 = vadd.f32 %v1202_v46, %v1201_v44 }
 0x108   :  { %v1177_v47 = vpop.f32.mrf.mxu0  ;;  %v1204_v48 = vpop.f32.mrf.mxu1 }
 0x109   :  { %v1178_v17 = vadd.f32 %v1177_v47, %v1176_v45  ;;  %v892_v26 = vadd.f32 %v1203_v16, %v843_v15 }
 0x10a   :  { %v1179_v49 = vpop.f32.mrf.mxu0  ;;  %v1205_v50 = vpop.f32.mrf.mxu1 }
 0x10b   :  { %v846_v23 = vadd.f32 %v1178_v17, %v797_v18  ;;  %v1206_v24 = vadd.f32 %v1205_v50, %v1204_v48 }
 0x10c   :  { %v1180_v51 = vpop.f32.mrf.mxu0  ;;  %v1207_v52 = vpop.f32.mrf.mxu1 }
 0x10d   :  { %v1181_v0 = vadd.f32 %v1180_v51, %v1179_v49  ;;  %v895_v33 = vadd.f32 %v1206_v24, %v846_v23 }
 0x10e   :  { %v1182_v56 = vpop.f32.mrf.mxu0  ;;  %v1208_v57 = vpop.f32.mrf.mxu1 }
 0x10f   :  { %v851_v10 = vadd.f32 %v1181_v0, %v802_v3  ;;  %v1209_v11 = vadd.f32 %v1208_v57, %v1207_v52 }
 0x110   :  { %v1183_v1 = vpop.f32.mrf.mxu0  ;;  %v1210_v2 = vpop.f32.mrf.mxu1 }
 0x111   :  { %v1184_v12 = vadd.f32 %v1183_v1, %v1182_v56  ;;  %v900_v21 = vadd.f32 %v1209_v11, %v851_v10 }
 0x112   :  { %v1211_v13 = vpop.f32.mrf.mxu1 }
 0x113   :  { %v854_v19 = vadd.f32 %v1184_v12, %v805_v14  ;;  %v1212_v20 = vadd.f32 %v1211_v13, %v1210_v2 }
 0x115   :  { %v903_v29 = vadd.f32 %v1212_v20, %v854_v19 }
 0x122   :  { %v1241_v22 = vpop.f32.mrf.mxu0 }
 0x123   :  { %v949_v25 = vadd.f32 %v1241_v22, %v900_v21 }
 0x124   :  { %v940_v27 = vpop.f32.mrf.mxu0 }
 0x125   :  { %v941_v28 = vadd.f32 %v940_v27, %v892_v26  ;;  %v961_v31 = vmul.f32 0.1, %v949_v25  ;;  %vm957_vm0 = vcmp.gt.f32.partialorder %v949_v25, 0.0 }
 0x126   :  { %v1242_v30 = vpop.f32.mrf.mxu0 }
 0x127   :  { %v952_v32 = vadd.f32 %v1242_v30, %v903_v29  ;;  %v959_v35 = vmul.f32 0.1, %v941_v28  ;;  %vm955_vm2 = vcmp.gt.f32.partialorder %v941_v28, 0.0  ;;  %v965_v38 = vsel %vm957_vm0, %v949_v25, %v961_v31 }
 0x128   :  { %v943_v34 = vpop.f32.mrf.mxu0 }
 0x129   :  { %vm958_vm1 = vcmp.gt.f32.partialorder %v952_v32, 0.0  ;;  %v962_v36 = vmul.f32 0.1, %v952_v32  ;;  %v944_v37 = vadd.f32 %v943_v34, %v895_v33  ;;  %v963_v42 = vsel %vm955_vm2, %v941_v28, %v959_v35 }
 0x12b   :  { %v966_v39 = vsel %vm958_vm1, %v952_v32, %v962_v36  ;;  %vm956_vm3 = vcmp.gt.f32.partialorder %v944_v37, 0.0  ;;  %v960_v40 = vmul.f32 0.1, %v944_v37 }
 0x12c   :  { %v1098_v41 = vpack.c.bf16 %v966_v39, %v965_v38 }
 0x12d   :  { %v964_v43 = vsel %vm956_vm3, %v944_v37, %v960_v40 }
 0x12e   :  { %1100 = vst [vmem:[%s1643_s3 + $0x8] sm:$0xff] %v1098_v41   ;;  %v1093_v44 = vpack.c.bf16 %v964_v43, %v963_v42 }
 0x130   :  { %1094 = vst [vmem:[%s1643_s3] sm:$0xff] %v1093_v44  }

// kernel: _forward.12
= control target key start
LH: loop header
LB: loop body
LE: loop exit
PB: predicated region body
PF: predicated region fallthrough
CT: control target
= control target key end

     0   :  { %s316_s1 = inlined_call_operand.vmem [shape: bf16[128,128], index: 1, kind: input, shape index: {}]   ;;  %s317_s0 = inlined_call_operand.vmem [shape: bf16[32,128], index: 0, kind: input, shape index: {}]   ;;  %s318_s2 = inlined_call_operand.vmem [shape: f32[1,128], index: 2, kind: input, shape index: {}]   ;;  %s319_s3 = inlined_call_operand.vmem [shape: bf16[32,128], index: 3, kind: output, shape index: {}]  }
   0x1   :  { %v247_v0 = vld [vmem:[%s316_s1 + $0x38] sm:$0xff]   ;;  %v248_v1 = vld [vmem:[%s316_s1 + $0x30] sm:$0xff]   ;;  %v249_v2 = vld [vmem:[%s316_s1 + $0x28] sm:$0xff]  }
   0x2   :  { %227 = vmatprep.subr.bf16.mxu0 %v247_v0  ;;  %v250_v3 = vld [vmem:[%s316_s1 + $0x20] sm:$0xff]   ;;  %v251_v5 = vld [vmem:[%s316_s1 + $0x18] sm:$0xff]   ;;  %v252_v6 = vld [vmem:[%s316_s1 + $0x10] sm:$0xff]  }
   0x3   :  { %228 = vmatpush3.bf16.msra.mxu0 %v247_v0  ;;  %v255_v4 = vld [vmem:[%s317_s0] sm:$0xff]   ;;  %v253_v7 = vld [vmem:[%s316_s1 + $0x8] sm:$0xff]  }
   0x4   :  { %229 = vmatprep.subr.bf16.mxu0 %v248_v1  ;;  %243 = vmatprep.mubr.bf16.mxu0 %v255_v4  ;;  %v254_v8 = vld [vmem:[%s316_s1] sm:$0xff]   ;;  %v256_v9 = vld [vmem:[%s317_s0 + $0x8] sm:$0xff]  }
   0x5   :  { %v187_v10 = vld [vmem:[%s318_s2] ss:$0 sm:$0xff] }
   0x7   :  { %230 = vmatpush3.bf16.msra.mxu0 %v248_v1 }
   0x8   :  { %231 = vmatprep.subr.bf16.mxu0 %v249_v2 }
   0xb   :  { %232 = vmatpush3.bf16.msra.mxu0 %v249_v2 }
   0xc   :  { %233 = vmatprep.subr.bf16.mxu0 %v250_v3 }
   0xf   :  { %234 = vmatpush3.bf16.msra.mxu0 %v250_v3 }
  0x10   :  { %235 = vmatprep.subr.bf16.mxu0 %v251_v5 }
  0x13   :  { %236 = vmatpush3.bf16.msra.mxu0 %v251_v5 }
  0x14   :  { %237 = vmatprep.subr.bf16.mxu0 %v252_v6 }
  0x17   :  { %238 = vmatpush3.bf16.msra.mxu0 %v252_v6 }
  0x18   :  { %239 = vmatprep.subr.bf16.mxu0 %v253_v7 }
  0x1b   :  { %240 = vmatpush3.bf16.msra.mxu0 %v253_v7 }
  0x1c   :  { %241 = vmatprep.subr.bf16.mxu0 %v254_v8 }
  0x1f   :  { %242 = vmatpush3.bf16.msra.mxu0 %v254_v8 }
  0x22   :  { %244 = vmatmul.mubr.bf16.vlgmr.msra.gmra.mxu0 %v256_v9 }
  0xe2   :  { %v245_v11 = vpop.f32.mrf.mxu0 }
  0xe3   :  { %v145_v12 = vadd.f32 %v245_v11, %v187_v10 }
  0xe4   :  { %v136_v13 = vpop.f32.mrf.mxu0 }
  0xe5   :  { %v137_v14 = vadd.f32 %v187_v10, %v136_v13  ;;  %v157_v16 = vmul.f32 0.1, %v145_v12  ;;  %vm153_vm0 = vcmp.gt.f32.partialorder %v145_v12, 0.0 }
  0xe6   :  { %v246_v15 = vpop.f32.mrf.mxu0 }
  0xe7   :  { %v148_v17 = vadd.f32 %v246_v15, %v187_v10  ;;  %v155_v19 = vmul.f32 0.1, %v137_v14  ;;  %vm151_vm2 = vcmp.gt.f32.partialorder %v137_v14, 0.0  ;;  %v161_v22 = vsel %vm153_vm0, %v145_v12, %v157_v16 }
  0xe8   :  { %v139_v18 = vpop.f32.mrf.mxu0 }
  0xe9   :  { %vm154_vm1 = vcmp.gt.f32.partialorder %v148_v17, 0.0  ;;  %v158_v20 = vmul.f32 0.1, %v148_v17  ;;  %v140_v21 = vadd.f32 %v187_v10, %v139_v18  ;;  %v159_v26 = vsel %vm151_vm2, %v137_v14, %v155_v19 }
  0xeb   :  { %v162_v23 = vsel %vm154_vm1, %v148_v17, %v158_v20  ;;  %vm152_vm3 = vcmp.gt.f32.partialorder %v140_v21, 0.0  ;;  %v156_v24 = vmul.f32 0.1, %v140_v21 }
  0xec   :  { %v214_v25 = vpack.c.bf16 %v162_v23, %v161_v22 }
  0xed   :  { %v160_v27 = vsel %vm152_vm3, %v140_v21, %v156_v24 }
  0xee   :  { %216 = vst [vmem:[%s319_s3 + $0x8] sm:$0xff] %v214_v25   ;;  %v209_v28 = vpack.c.bf16 %v160_v27, %v159_v26 }
  0xf0   :  { %210 = vst [vmem:[%s319_s3] sm:$0xff] %v209_v28  }

// kernel: _forward.13
= control target key start
LH: loop header
LB: loop body
LE: loop exit
PB: predicated region body
PF: predicated region fallthrough
CT: control target
= control target key end

     0   :  { %s483_s1 = inlined_call_operand.vmem [shape: bf16[128,128], index: 1, kind: input, shape index: {}]   ;;  %s484_s0 = inlined_call_operand.vmem [shape: bf16[128,128], index: 0, kind: input, shape index: {}]   ;;  %s485_s2 = inlined_call_operand.vmem [shape: f32[1,128], index: 2, kind: input, shape index: {}]   ;;  %s486_s3 = inlined_call_operand.vmem [shape: f32[128,128], index: 3, kind: output, shape index: {}]  }
   0x1   :  { %v348_v0 = vld [vmem:[%s483_s1 + $0x38] sm:$0xff]   ;;  %v349_v1 = vld [vmem:[%s483_s1 + $0x30] sm:$0xff]   ;;  %v350_v2 = vld [vmem:[%s483_s1 + $0x28] sm:$0xff]  }
   0x2   :  { %300 = vmatprep.subr.bf16.mxu0 %v348_v0  ;;  %332 = vmatprep.subr.bf16.mxu1 %v348_v0  ;;  %v351_v3 = vld [vmem:[%s483_s1 + $0x20] sm:$0xff]   ;;  %v352_v6 = vld [vmem:[%s483_s1 + $0x18] sm:$0xff]   ;;  %v353_v7 = vld [vmem:[%s483_s1 + $0x10] sm:$0xff]  }
   0x3   :  { %301 = vmatpush3.bf16.msra.mxu0 %v348_v0  ;;  %340 = vmatpush3.bf16.msra.mxu1 %v348_v0  ;;  %v356_v4 = vld [vmem:[%s484_s0] sm:$0xff]   ;;  %v354_v8 = vld [vmem:[%s483_s1 + $0x8] sm:$0xff]   ;;  %v360_v12 = vld [vmem:[%s484_s0 + $0x10] sm:$0xff]  }
   0x4   :  { %302 = vmatprep.subr.bf16.mxu0 %v349_v1  ;;  %333 = vmatprep.subr.bf16.mxu1 %v349_v1  ;;  %v357_v5 = vld [vmem:[%s484_s0 + $0x20] sm:$0xff]   ;;  %v358_v10 = vld [vmem:[%s484_s0 + $0x8] sm:$0xff]   ;;  %v361_v13 = vld [vmem:[%s484_s0 + $0x30] sm:$0xff]  }
   0x5   :  { %316 = vmatprep.mubr.bf16.mxu0 %v356_v4  ;;  %324 = vmatprep.mubr.bf16.mxu1 %v357_v5  ;;  %v355_v9 = vld [vmem:[%s483_s1] sm:$0xff]   ;;  %v359_v11 = vld [vmem:[%s484_s0 + $0x28] sm:$0xff]   ;;  %v362_v14 = vld [vmem:[%s484_s0 + $0x18] sm:$0xff]  }
   0x6   :  { %v363_v15 = vld [vmem:[%s484_s0 + $0x38] sm:$0xff]   ;;  %v267_v16 = vld [vmem:[%s485_s2] ss:$0 sm:$0xff] }
   0x7   :  { %303 = vmatpush3.bf16.msra.mxu0 %v349_v1  ;;  %341 = vmatpush3.bf16.msra.mxu1 %v349_v1 }
   0x8   :  { %304 = vmatprep.subr.bf16.mxu0 %v350_v2  ;;  %334 = vmatprep.subr.bf16.mxu1 %v350_v2 }
   0xb   :  { %305 = vmatpush3.bf16.msra.mxu0 %v350_v2  ;;  %342 = vmatpush3.bf16.msra.mxu1 %v350_v2 }
   0xc   :  { %306 = vmatprep.subr.bf16.mxu0 %v351_v3  ;;  %335 = vmatprep.subr.bf16.mxu1 %v351_v3 }
   0xf   :  { %307 = vmatpush3.bf16.msra.mxu0 %v351_v3  ;;  %343 = vmatpush3.bf16.msra.mxu1 %v351_v3 }
  0x10   :  { %308 = vmatprep.subr.bf16.mxu0 %v352_v6  ;;  %336 = vmatprep.subr.bf16.mxu1 %v352_v6 }
  0x13   :  { %309 = vmatpush3.bf16.msra.mxu0 %v352_v6  ;;  %344 = vmatpush3.bf16.msra.mxu1 %v352_v6 }
  0x14   :  { %310 = vmatprep.subr.bf16.mxu0 %v353_v7  ;;  %337 = vmatprep.subr.bf16.mxu1 %v353_v7 }
  0x17   :  { %311 = vmatpush3.bf16.msra.mxu0 %v353_v7  ;;  %345 = vmatpush3.bf16.msra.mxu1 %v353_v7 }
  0x18   :  { %312 = vmatprep.subr.bf16.mxu0 %v354_v8  ;;  %338 = vmatprep.subr.bf16.mxu1 %v354_v8 }
  0x1b   :  { %313 = vmatpush3.bf16.msra.mxu0 %v354_v8  ;;  %346 = vmatpush3.bf16.msra.mxu1 %v354_v8 }
  0x1c   :  { %314 = vmatprep.subr.bf16.mxu0 %v355_v9  ;;  %339 = vmatprep.subr.bf16.mxu1 %v355_v9 }
  0x1f   :  { %315 = vmatpush3.bf16.msra.mxu0 %v355_v9  ;;  %347 = vmatpush3.bf16.msra.mxu1 %v355_v9 }
  0x22   :  { %317 = vmatmul.mubr.bf16.vlgmr.msra.gmra.mxu0 %v358_v10  ;;  %325 = vmatmul.mubr.bf16.vlgmr.msra.gmra.mxu1 %v359_v11 }
  0x23   :  { %320 = vmatprep.mubr.bf16.mxu0 %v360_v12  ;;  %328 = vmatprep.mubr.bf16.mxu1 %v361_v13 }
  0x2a   :  { %321 = vmatmul.mubr.bf16.gmra.mxu0 %v362_v14  ;;  %329 = vmatmul.mubr.bf16.gmra.mxu1 %v363_v15 }
  0xe2   :  { %v318_v17 = vpop.f32.mrf.mxu0  ;;  %v326_v18 = vpop.f32.mrf.mxu1 }
  0xe3   :  { %v193_v19 = vadd.f32 %v318_v17, %v267_v16  ;;  %v225_v20 = vadd.f32 %v326_v18, %v267_v16 }
  0xe4   :  { %v184_v21 = vpop.f32.mrf.mxu0  ;;  %v216_v22 = vpop.f32.mrf.mxu1 }
  0xe5   :  { %249 = vst [vmem:[%s486_s3 + $0x10] sm:$0xff] %v193_v19  ;;  %257 = vst [vmem:[%s486_s3 + $0x50] sm:$0xff] %v225_v20  ;;  %v185_v23 = vadd.f32 %v267_v16, %v184_v21  ;;  %v217_v24 = vadd.f32 %v267_v16, %v216_v22 }
  0xe6   :  { %v319_v25 = vpop.f32.mrf.mxu0  ;;  %v327_v26 = vpop.f32.mrf.mxu1 }
  0xe7   :  { %247 = vst [vmem:[%s486_s3] sm:$0xff] %v185_v23  ;;  %255 = vst [vmem:[%s486_s3 + $0x40] sm:$0xff] %v217_v24  ;;  %v196_v27 = vadd.f32 %v319_v25, %v267_v16  ;;  %v228_v28 = vadd.f32 %v327_v26, %v267_v16 }
  0xe8   :  { %v187_v29 = vpop.f32.mrf.mxu0  ;;  %v219_v30 = vpop.f32.mrf.mxu1 }
  0xe9   :  { %250 = vst [vmem:[%s486_s3 + $0x18] sm:$0xff] %v196_v27  ;;  %258 = vst [vmem:[%s486_s3 + $0x58] sm:$0xff] %v228_v28  ;;  %v188_v31 = vadd.f32 %v267_v16, %v187_v29  ;;  %v220_v32 = vadd.f32 %v267_v16, %v219_v30 }
  0xea   :  { %v322_v33 = vpop.f32.mrf.mxu0  ;;  %v330_v34 = vpop.f32.mrf.mxu1 }
  0xeb   :  { %248 = vst [vmem:[%s486_s3 + $0x8] sm:$0xff] %v188_v31  ;;  %256 = vst [vmem:[%s486_s3 + $0x48] sm:$0xff] %v220_v32  ;;  %v209_v35 = vadd.f32 %v322_v33, %v267_v16  ;;  %v241_v36 = vadd.f32 %v330_v34, %v267_v16 }
  0xec   :  { %v200_v37 = vpop.f32.mrf.mxu0  ;;  %v232_v38 = vpop.f32.mrf.mxu1 }
  0xed   :  { %253 = vst [vmem:[%s486_s3 + $0x30] sm:$0xff] %v209_v35  ;;  %261 = vst [vmem:[%s486_s3 + $0x70] sm:$0xff] %v241_v36  ;;  %v201_v39 = vadd.f32 %v267_v16, %v200_v37  ;;  %v233_v40 = vadd.f32 %v267_v16, %v232_v38 }
  0xee   :  { %v323_v41 = vpop.f32.mrf.mxu0  ;;  %v331_v42 = vpop.f32.mrf.mxu1 }
  0xef   :  { %251 = vst [vmem:[%s486_s3 + $0x20] sm:$0xff] %v201_v39  ;;  %259 = vst [vmem:[%s486_s3 + $0x60] sm:$0xff] %v233_v40  ;;  %v212_v43 = vadd.f32 %v323_v41, %v267_v16  ;;  %v244_v44 = vadd.f32 %v331_v42, %v267_v16 }
  0xf0   :  { %v203_v45 = vpop.f32.mrf.mxu0  ;;  %v235_v46 = vpop.f32.mrf.mxu1 }
  0xf1   :  { %254 = vst [vmem:[%s486_s3 + $0x38] sm:$0xff] %v212_v43  ;;  %262 = vst [vmem:[%s486_s3 + $0x78] sm:$0xff] %v244_v44  ;;  %v204_v47 = vadd.f32 %v267_v16, %v203_v45  ;;  %v236_v48 = vadd.f32 %v267_v16, %v235_v46 }
  0xf3   :  { %252 = vst [vmem:[%s486_s3 + $0x28] sm:$0xff] %v204_v47  ;;  %260 = vst [vmem:[%s486_s3 + $0x68] sm:$0xff] %v236_v48 }

</bundles_post_ra>
